<compile_context>
chip_gen: v6e
topology: v6e:2x2x1
jax: 0.10.0
libtpu: 0.0.40
codegen_flags: <defaults>
</compile_context>

<pallas_src>
import jax
import jax.numpy as jnp
from jax.experimental import pallas as pl
from jax.experimental.pallas import tpu as pltpu


# ----------------------------------------------------------------------------
# Per-generation VMEM sizing
# ----------------------------------------------------------------------------
def _tpu_vmem_capacity_bytes():
    """Physical VMEM per TensorCore (64 MiB on v7x, 128 MiB on v5e/v6e)."""
    try:
        cap = getattr(pltpu.get_tpu_info(), "vmem_capacity_bytes", None)
        if cap:
            return int(cap)
    except Exception:  # no TPU visible at trace time / API drift
        pass
    return 64 * 1024 * 1024  # assume the smallest (v7x) budget


_VMEM_CAP = _tpu_vmem_capacity_bytes()
_VMEM_LIMIT = (_VMEM_CAP * 3) // 4        # scoped-VMEM limit handed to Mosaic
_BLOCK_BUDGET = (_VMEM_CAP * 2) // 5      # what one batch block may occupy


def _choose_batch_block(n, t, e, h):
    """Largest batch block that fits the VMEM budget, keeps >= 2 grid steps
    (v7x has 2 TensorCores) and wastes < 25% of the batch on padding."""
    # Resident f32 bytes per batch row: double-buffered x & mask input blocks,
    # fwd/bwd trans + projection scratches, one output row.
    bytes_per_row = 4 * (2 * t * (e + 1) + 8 * t * h + h)
    cap = max(8, _BLOCK_BUDGET // max(bytes_per_row, 1))
    n8 = ((n + 7) // 8) * 8
    for bn in (256, 128, 64, 32, 16):
        if bn > cap or n8 < 2 * bn:
            continue
        n_pad = ((n8 + bn - 1) // bn) * bn
        if 4 * n_pad <= 5 * n8:          # <= 25% padding waste
            return bn
    return 8


# ----------------------------------------------------------------------------
# Kernel
# ----------------------------------------------------------------------------
def _gru_cell(xp, h, whh, bhh, h_dim):
    """One PyTorch-convention GRU cell step (bf16 matmul inputs, f32 accumulate).

    r = sig(xp_r + hp_r); z = sig(xp_z + hp_z); n = tanh(xp_n + r*hp_n)
    h' = (1 - z) * n + z * h          (gate order r | z | n, matching nn.GRU)
    """
    hp = jnp.dot(h.astype(jnp.bfloat16), whh,
                 preferred_element_type=jnp.float32) + bhh
    r = jax.nn.sigmoid(xp[:, :h_dim] + hp[:, :h_dim])
    z = jax.nn.sigmoid(xp[:, h_dim:2 * h_dim] + hp[:, h_dim:2 * h_dim])
    n = jnp.tanh(xp[:, 2 * h_dim:] + r * hp[:, 2 * h_dim:])
    return (1.0 - z) * n + z * h


def _make_cgate_kernel(num_layers, t_len, bn, e_dim, h_dim):
    h3 = 3 * h_dim
    f32 = jnp.float32
    bf16 = jnp.bfloat16

    def kernel(*refs):
        # refs = x, mask, [8 weight refs per layer], 7 head refs, out, 4 scratch
        x_ref, mask_ref = refs[0], refs[1]
        pos = 2
        layers = []
        for _ in range(num_layers):
            layers.append(refs[pos:pos + 8])
            pos += 8
        (wconv_f_ref, wconv_b_ref, bconv_ref,
         wx_ref, wg_f_ref, wg_b_ref, bfc_ref) = refs[pos:pos + 7]
        pos += 7
        out_ref = refs[pos]
        trans_f, trans_b, xp_f, xp_b = refs[pos + 1:pos + 5]

        mask = mask_ref[...]                                     # [T, bn, 1] f32

        # ===================== stacked bidirectional GRU =====================
        for li, (wih_f, wih_b, bih_f, bih_b,
                 whh_f, whh_b, bhh_f, bhh_b) in enumerate(layers):
            # ---- hoisted input projections: one MXU matmul per direction for
            #      ALL timesteps & gates (no serial dependence). ---------------
            if li == 0:
                xin = x_ref[...].astype(bf16).reshape(t_len * bn, e_dim)
                pf = jnp.dot(xin, wih_f[...], preferred_element_type=f32)
                pb = jnp.dot(xin, wih_b[...], preferred_element_type=f32)
            else:
                tf2d = trans_f[...].astype(bf16).reshape(t_len * bn, h_dim)
                tb2d = trans_b[...].astype(bf16).reshape(t_len * bn, h_dim)
                wf = wih_f[...]   # [2H,3H]; rows [:H] act on the fwd half,
                wb = wih_b[...]   # rows [H:] on the bwd half (torch concat order)
                pf = (jnp.dot(tf2d, wf[:h_dim], preferred_element_type=f32)
                      + jnp.dot(tb2d, wf[h_dim:], preferred_element_type=f32))
                pb = (jnp.dot(tf2d, wb[:h_dim], preferred_element_type=f32)
                      + jnp.dot(tb2d, wb[h_dim:], preferred_element_type=f32))
            xp_f[...] = (pf + bih_f[...]).reshape(t_len, bn, h3)
            xp_b[...] = (pb + bih_b[...]).reshape(t_len, bn, h3)

            whh_f_m, bhh_f_v = whh_f[...], bhh_f[...]
            whh_b_m, bhh_b_v = whh_b[...], bhh_b[...]

            # ---- interleaved fwd/bwd recurrences, fully unrolled (static T):
            #      the two directions are independent, so each step's small
            #      matmul overlaps the other direction's sigmoid/tanh math. ----
            hf = jnp.zeros((bn, h_dim), f32)
            hb = jnp.zeros((bn, h_dim), f32)
            for i in range(t_len):
                tb = t_len - 1 - i
                hf = _gru_cell(xp_f[i], hf, whh_f_m, bhh_f_v, h_dim)
                # bwd h must stay zero until t == len-1 -> per-step mask.
                hb = _gru_cell(xp_b[tb], hb, whh_b_m, bhh_b_v, h_dim) * mask[tb]
                trans_f[i] = hf
                trans_b[tb] = hb
            # fwd padded steps only ever FOLLOW valid ones, so zeroing them with
            # one vectorized multiply after the loop reproduces packed-sequence
            # semantics while keeping the mask off the serial critical path.
            trans_f[...] = trans_f[...] * mask

        # ============== conv gate + fc + max over time (fused) ===============
        tf = trans_f[...]                                         # [T, bn, H]
        tb_ = trans_b[...]
        tf_bf = tf.astype(bf16).reshape(t_len * bn, h_dim)
        tb_bf = tb_.astype(bf16).reshape(t_len * bn, h_dim)

        # Conv1d(k=3, pad=1, Cout=1) channel contraction on the MXU:
        # column c of wconv holds the tap that multiplies trans[t-1+c].
        sproj = (jnp.dot(tf_bf, wconv_f_ref[...], preferred_element_type=f32)
                 + jnp.dot(tb_bf, wconv_b_ref[...], preferred_element_type=f32))
        sproj = sproj.reshape(t_len, bn, 3)
        zrow = jnp.zeros((1, bn, 1), f32)
        center = sproj[:, :, 1:2]
        prev = jnp.concatenate([zrow, sproj[:-1, :, 0:1]], axis=0)   # left zero pad
        nxt = jnp.concatenate([sproj[1:, :, 2:3], zrow], axis=0)     # right zero pad
        gate = jax.nn.sigmoid(center + prev + nxt + bconv_ref[...])  # [T, bn, 1]

        gxf = (jnp.tanh(tf) * gate).astype(bf16).reshape(t_len * bn, h_dim)
        gxb = (jnp.tanh(tb_) * gate).astype(bf16).reshape(t_len * bn, h_dim)
        xin = x_ref[...].astype(bf16).reshape(t_len * bn, e_dim)
        pre = (jnp.dot(xin, wx_ref[...], preferred_element_type=f32)
               + jnp.dot(gxf, wg_f_ref[...], preferred_element_type=f32)
               + jnp.dot(gxb, wg_b_ref[...], preferred_element_type=f32)
               + bfc_ref[...])
        rep = jnp.tanh(pre).reshape(t_len, bn, h_dim)
        # max over ALL timesteps (incl. padded rows), exactly as the reference.
        out_ref[...] = jnp.max(rep, axis=0)

    return kernel


# ----------------------------------------------------------------------------
# Wrapper
# ----------------------------------------------------------------------------
def _full_spec(shape):
    nd = len(shape)
    return pl.BlockSpec(shape, lambda i, _n=nd: (0,) * _n)


_LAYER_KEYS = ("wih_f", "wih_b", "bih_f", "bih_b",
               "whh_f", "whh_b", "bhh_f", "bhh_b")
_HEAD_KEYS = ("wconv_f", "wconv_b", "bconv", "wx_t", "wg_f", "wg_b", "bfc")


def _cost_estimate(num_layers, t_len, n_rows, e_dim, h_dim):
    flops = 0
    trans = 0
    e_in = e_dim
    for _ in range(num_layers):
        flops += 2 * (2 * t_len * n_rows * e_in * 3 * h_dim)    # input projections
        flops += 2 * (2 * t_len * n_rows * h_dim * 3 * h_dim)   # recurrent matmuls
        trans += 2 * t_len * n_rows * 3 * h_dim                 # sigmoid/tanh gates
        e_in = 2 * h_dim
    flops += 2 * t_len * n_rows * 2 * h_dim * 3                 # conv contraction
    flops += 2 * t_len * n_rows * (e_dim + 2 * h_dim) * h_dim   # fc
    trans += t_len * n_rows * (3 * h_dim + 1)                   # gate_x/rep tanh, sigmoid
    bytes_accessed = 4 * (t_len * n_rows * (e_dim + 1) + n_rows * h_dim)
    return pl.CostEstimate(flops=int(flops), transcendentals=int(trans),
                           bytes_accessed=int(bytes_accessed))


def c_gate_forward(utterance, utterance_mask, params):
    """utterance: [N, T, E] f32; utterance_mask: [N, T] (1/0). Returns [N, H]."""
    n, t_len, e_dim = utterance.shape
    h_dim = params["hidden_dim"]
    num_layers = len(params["gru_layers"])

    # lens = argmin over the mask with an appended zero column (matches torch).
    mask_ext = jnp.concatenate(
        [utterance_mask, jnp.zeros((n, 1), utterance_mask.dtype)], axis=1)
    lens = jnp.argmin(mask_ext, axis=1).astype(jnp.int32)                  # [N]

    bn = _choose_batch_block(n, t_len, e_dim, h_dim)
    n_pad = ((n + bn - 1) // bn) * bn

    # Single transpose to time-major; the whole fused kernel consumes this layout.
    x_tm = jnp.transpose(utterance, (1, 0, 2)).astype(jnp.float32)         # [T, N, E]
    if n_pad != n:
        x_tm = jnp.pad(x_tm, ((0, 0), (0, n_pad - n), (0, 0)))
        lens = jnp.pad(lens, (0, n_pad - n))                               # len-0 rows
    valid = (jnp.arange(t_len)[:, None] < lens[None, :]).astype(jnp.float32)
    valid = valid[:, :, None]                                              # [T, Np, 1]

    def bmap(i):
        return (0, i, 0)

    inputs = [x_tm, valid]
    in_specs = [pl.BlockSpec((t_len, bn, e_dim), bmap),
                pl.BlockSpec((t_len, bn, 1), bmap)]
    for layer in params["gru_layers"]:
        for name in _LAYER_KEYS:
            inputs.append(layer[name])
            in_specs.append(_full_spec(layer[name].shape))
    for name in _HEAD_KEYS:
        inputs.append(params[name])
        in_specs.append(_full_spec(params[name].shape))

    kernel = _make_cgate_kernel(num_layers, t_len, bn, e_dim, h_dim)
    rep = pl.pallas_call(
        kernel,
        out_shape=jax.ShapeDtypeStruct((n_pad, h_dim), jnp.float32),
        grid=(n_pad // bn,),
        in_specs=in_specs,
        out_specs=pl.BlockSpec((bn, h_dim), lambda i: (i, 0)),
        scratch_shapes=[
            pltpu.VMEM((t_len, bn, h_dim), jnp.float32),       # fwd trans
            pltpu.VMEM((t_len, bn, h_dim), jnp.float32),       # bwd trans
            pltpu.VMEM((t_len, bn, 3 * h_dim), jnp.float32),   # fwd input projections
            pltpu.VMEM((t_len, bn, 3 * h_dim), jnp.float32),   # bwd input projections
        ],
        compiler_params=pltpu.CompilerParams(
            dimension_semantics=("parallel",),
            vmem_limit_bytes=_VMEM_LIMIT),
        cost_estimate=_cost_estimate(num_layers, t_len, n_pad, e_dim, h_dim),
    )(*inputs)
    # dropout_in is identity in eval mode; drop the batch padding.
    return rep[:n]


# ----------------------------------------------------------------------------
# Deterministic parameter init (shapes follow C_GATE.__init__, pre-transposed /
# pre-split per GRU direction so the kernel never concatenates along lanes).
#
# Mapping from PyTorch:
#   wih_f = weight_ih_l{k}.T            wih_b = weight_ih_l{k}_reverse.T
#   whh_f = weight_hh_l{k}.T            whh_b = weight_hh_l{k}_reverse.T
#   bih_* / bhh_* = matching biases     (gate column order r | z | n)
#   wconv_f / wconv_b = cnn.weight[0, :H].T-less split (columns = taps t-1, t, t+1)
#   wx_t = fc.weight[:, :E].T,  wg_f = fc.weight[:, E:E+H].T,  wg_b = fc.weight[:, E+H:].T
# ----------------------------------------------------------------------------
def init_params(key, embedding_dim, hidden_dim, num_layers):
    scale = hidden_dim ** -0.5
    keys = iter(jax.random.split(key, 8 * num_layers + 7))

    def u(shape, dtype=jnp.float32):
        w = jax.random.uniform(next(keys), shape, jnp.float32, -scale, scale)
        return w.astype(dtype)

    bf16 = jnp.bfloat16
    gru_layers = []
    e_in = embedding_dim
    for _ in range(num_layers):
        gru_layers.append({
            "wih_f": u((e_in, 3 * hidden_dim), bf16),
            "wih_b": u((e_in, 3 * hidden_dim), bf16),
            "bih_f": u((1, 3 * hidden_dim)),
            "bih_b": u((1, 3 * hidden_dim)),
            "whh_f": u((hidden_dim, 3 * hidden_dim), bf16),
            "whh_b": u((hidden_dim, 3 * hidden_dim), bf16),
            "bhh_f": u((1, 3 * hidden_dim)),
            "bhh_b": u((1, 3 * hidden_dim)),
        })
        e_in = 2 * hidden_dim
    return {
        "hidden_dim": hidden_dim,
        "gru_layers": gru_layers,
        "wconv_f": u((hidden_dim, 3), bf16),
        "wconv_b": u((hidden_dim, 3), bf16),
        "bconv": u((1, 1)),
        "wx_t": u((embedding_dim, hidden_dim), bf16),
        "wg_f": u((hidden_dim, hidden_dim), bf16),
        "wg_b": u((hidden_dim, hidden_dim), bf16),
        "bfc": u((1, hidden_dim)),
    }


if __name__ == "__main__":
    # Small smoke-test shapes (batch=2 utterances, seq=8, embed=32, hidden=32,
    # 2 stacked bi-GRU layers to exercise the multi-layer path).
    N, T, E, H, NUM_LAYERS = 2, 8, 32, 32, 2

    key = jax.random.PRNGKey(0)
    k_x, k_p = jax.random.split(key)
    utterance = jax.random.normal(k_x, (N, T, E), jnp.float32)
    lens = jnp.array([8, 5], jnp.int32)            # second sequence is padded
    utterance_mask = (jnp.arange(T)[None, :] < lens[:, None]).astype(jnp.float32)

    params = init_params(k_p, E, H, NUM_LAYERS)

    out = c_gate_forward(utterance, utterance_mask, params)
    out = jax.block_until_ready(out)
    assert out.shape == (N, H), out.shape
    assert bool(jnp.all(jnp.isfinite(out)))
    print("KERNEL_OK")
</pallas_src>

<mosaic_0001>
module attributes {stable_mosaic.version = 11 : i64} {
  func.func @kernel(%arg0: i32, %arg1: memref<8x8x32xf32, #tpu.memory_space<vmem>>, %arg2: memref<8x8x1xf32, #tpu.memory_space<vmem>>, %arg3: memref<32x96xbf16, #tpu.memory_space<vmem>>, %arg4: memref<32x96xbf16, #tpu.memory_space<vmem>>, %arg5: memref<1x96xf32, #tpu.memory_space<vmem>>, %arg6: memref<1x96xf32, #tpu.memory_space<vmem>>, %arg7: memref<32x96xbf16, #tpu.memory_space<vmem>>, %arg8: memref<32x96xbf16, #tpu.memory_space<vmem>>, %arg9: memref<1x96xf32, #tpu.memory_space<vmem>>, %arg10: memref<1x96xf32, #tpu.memory_space<vmem>>, %arg11: memref<64x96xbf16, #tpu.memory_space<vmem>>, %arg12: memref<64x96xbf16, #tpu.memory_space<vmem>>, %arg13: memref<1x96xf32, #tpu.memory_space<vmem>>, %arg14: memref<1x96xf32, #tpu.memory_space<vmem>>, %arg15: memref<32x96xbf16, #tpu.memory_space<vmem>>, %arg16: memref<32x96xbf16, #tpu.memory_space<vmem>>, %arg17: memref<1x96xf32, #tpu.memory_space<vmem>>, %arg18: memref<1x96xf32, #tpu.memory_space<vmem>>, %arg19: memref<32x3xbf16, #tpu.memory_space<vmem>>, %arg20: memref<32x3xbf16, #tpu.memory_space<vmem>>, %arg21: memref<1x1xf32, #tpu.memory_space<vmem>>, %arg22: memref<32x32xbf16, #tpu.memory_space<vmem>>, %arg23: memref<32x32xbf16, #tpu.memory_space<vmem>>, %arg24: memref<32x32xbf16, #tpu.memory_space<vmem>>, %arg25: memref<1x32xf32, #tpu.memory_space<vmem>>, %arg26: memref<8x32xf32, #tpu.memory_space<vmem>>, %arg27: memref<8x8x32xf32, #tpu.memory_space<vmem>>, %arg28: memref<8x8x32xf32, #tpu.memory_space<vmem>>, %arg29: memref<8x8x96xf32, #tpu.memory_space<vmem>>, %arg30: memref<8x8x96xf32, #tpu.memory_space<vmem>>) attributes {dimension_semantics = [#tpu.dimension_semantics<parallel>], iteration_bounds = array<i64: 1>, scalar_prefetch = 0 : i64, scratch_operands = 4 : i64, tpu.core_type = #tpu.core_type<tc>, window_params = [{transform_indices = @transform_0, window_bounds = array<i64: 8, 8, 32>}, {transform_indices = @transform_1, window_bounds = array<i64: 8, 8, 1>}, {pipeline_mode = #tpu.pipeline_mode<synchronous>, transform_indices = @transform_2, window_bounds = array<i64: 32, 96>}, {pipeline_mode = #tpu.pipeline_mode<synchronous>, transform_indices = @transform_3, window_bounds = array<i64: 32, 96>}, {pipeline_mode = #tpu.pipeline_mode<synchronous>, transform_indices = @transform_4, window_bounds = array<i64: 1, 96>}, {pipeline_mode = #tpu.pipeline_mode<synchronous>, transform_indices = @transform_5, window_bounds = array<i64: 1, 96>}, {pipeline_mode = #tpu.pipeline_mode<synchronous>, transform_indices = @transform_6, window_bounds = array<i64: 32, 96>}, {pipeline_mode = #tpu.pipeline_mode<synchronous>, transform_indices = @transform_7, window_bounds = array<i64: 32, 96>}, {pipeline_mode = #tpu.pipeline_mode<synchronous>, transform_indices = @transform_8, window_bounds = array<i64: 1, 96>}, {pipeline_mode = #tpu.pipeline_mode<synchronous>, transform_indices = @transform_9, window_bounds = array<i64: 1, 96>}, {pipeline_mode = #tpu.pipeline_mode<synchronous>, transform_indices = @transform_10, window_bounds = array<i64: 64, 96>}, {pipeline_mode = #tpu.pipeline_mode<synchronous>, transform_indices = @transform_11, window_bounds = array<i64: 64, 96>}, {pipeline_mode = #tpu.pipeline_mode<synchronous>, transform_indices = @transform_12, window_bounds = array<i64: 1, 96>}, {pipeline_mode = #tpu.pipeline_mode<synchronous>, transform_indices = @transform_13, window_bounds = array<i64: 1, 96>}, {pipeline_mode = #tpu.pipeline_mode<synchronous>, transform_indices = @transform_14, window_bounds = array<i64: 32, 96>}, {pipeline_mode = #tpu.pipeline_mode<synchronous>, transform_indices = @transform_15, window_bounds = array<i64: 32, 96>}, {pipeline_mode = #tpu.pipeline_mode<synchronous>, transform_indices = @transform_16, window_bounds = array<i64: 1, 96>}, {pipeline_mode = #tpu.pipeline_mode<synchronous>, transform_indices = @transform_17, window_bounds = array<i64: 1, 96>}, {pipeline_mode = #tpu.pipeline_mode<synchronous>, transform_indices = @transform_18, window_bounds = array<i64: 32, 3>}, {pipeline_mode = #tpu.pipeline_mode<synchronous>, transform_indices = @transform_19, window_bounds = array<i64: 32, 3>}, {pipeline_mode = #tpu.pipeline_mode<synchronous>, transform_indices = @transform_20, window_bounds = array<i64: 1, 1>}, {pipeline_mode = #tpu.pipeline_mode<synchronous>, transform_indices = @transform_21, window_bounds = array<i64: 32, 32>}, {pipeline_mode = #tpu.pipeline_mode<synchronous>, transform_indices = @transform_22, window_bounds = array<i64: 32, 32>}, {pipeline_mode = #tpu.pipeline_mode<synchronous>, transform_indices = @transform_23, window_bounds = array<i64: 32, 32>}, {pipeline_mode = #tpu.pipeline_mode<synchronous>, transform_indices = @transform_24, window_bounds = array<i64: 1, 32>}, {transform_indices = @transform_25, window_bounds = array<i64: 8, 32>}]} {
    %c0 = arith.constant 0 : index
    %c0_0 = arith.constant 0 : index
    %c0_1 = arith.constant 0 : index
    %0 = vector.load %arg2[%c0, %c0_0, %c0_1] : memref<8x8x1xf32, #tpu.memory_space<vmem>>, vector<8x8x1xf32>
    %c0_2 = arith.constant 0 : index
    %c0_3 = arith.constant 0 : index
    %c0_4 = arith.constant 0 : index
    %1 = vector.load %arg1[%c0_2, %c0_3, %c0_4] : memref<8x8x32xf32, #tpu.memory_space<vmem>>, vector<8x8x32xf32>
    %2 = arith.truncf %1 : vector<8x8x32xf32> to vector<8x8x32xbf16>
    %3 = vector.shape_cast %2 : vector<8x8x32xbf16> to vector<64x32xbf16>
    %c0_5 = arith.constant 0 : index
    %c0_6 = arith.constant 0 : index
    %4 = vector.load %arg3[%c0_5, %c0_6] : memref<32x96xbf16, #tpu.memory_space<vmem>>, vector<32x96xbf16>
    %cst = arith.constant dense<0.000000e+00> : vector<64x96xf32>
    %5 = tpu.matmul %3, %4, %cst {dimension_numbers = #tpu.dot_dimension_numbers<[1], [0], [0], [1], [0, 0, 1, 1], [], []>} : vector<64x32xbf16>, vector<32x96xbf16>, vector<64x96xf32> -> vector<64x96xf32>
    %c0_7 = arith.constant 0 : index
    %c0_8 = arith.constant 0 : index
    %6 = vector.load %arg4[%c0_7, %c0_8] : memref<32x96xbf16, #tpu.memory_space<vmem>>, vector<32x96xbf16>
    %cst_9 = arith.constant dense<0.000000e+00> : vector<64x96xf32>
    %7 = tpu.matmul %3, %6, %cst_9 {dimension_numbers = #tpu.dot_dimension_numbers<[1], [0], [0], [1], [0, 0, 1, 1], [], []>} : vector<64x32xbf16>, vector<32x96xbf16>, vector<64x96xf32> -> vector<64x96xf32>
    %c0_10 = arith.constant 0 : index
    %c0_11 = arith.constant 0 : index
    %8 = vector.load %arg5[%c0_10, %c0_11] : memref<1x96xf32, #tpu.memory_space<vmem>>, vector<1x96xf32>
    %9 = vector.broadcast %8 : vector<1x96xf32> to vector<64x96xf32>
    %10 = arith.addf %5, %9 : vector<64x96xf32>
    %11 = vector.shape_cast %10 : vector<64x96xf32> to vector<8x8x96xf32>
    %c0_12 = arith.constant 0 : index
    %c0_13 = arith.constant 0 : index
    %c0_14 = arith.constant 0 : index
    %12 = vector.load %arg29[%c0_12, %c0_13, %c0_14] : memref<8x8x96xf32, #tpu.memory_space<vmem>>, vector<8x8x96xf32>
    tpu.vector_store %arg29[%c0_12, %c0_13, %c0_14], %11 {strides = array<i32>} : memref<8x8x96xf32, #tpu.memory_space<vmem>>, vector<8x8x96xf32>,
    %c0_15 = arith.constant 0 : index
    %c0_16 = arith.constant 0 : index
    %13 = vector.load %arg6[%c0_15, %c0_16] : memref<1x96xf32, #tpu.memory_space<vmem>>, vector<1x96xf32>
    %14 = vector.broadcast %13 : vector<1x96xf32> to vector<64x96xf32>
    %15 = arith.addf %7, %14 : vector<64x96xf32>
    %16 = vector.shape_cast %15 : vector<64x96xf32> to vector<8x8x96xf32>
    %c0_17 = arith.constant 0 : index
    %c0_18 = arith.constant 0 : index
    %c0_19 = arith.constant 0 : index
    %17 = vector.load %arg30[%c0_17, %c0_18, %c0_19] : memref<8x8x96xf32, #tpu.memory_space<vmem>>, vector<8x8x96xf32>
    tpu.vector_store %arg30[%c0_17, %c0_18, %c0_19], %16 {strides = array<i32>} : memref<8x8x96xf32, #tpu.memory_space<vmem>>, vector<8x8x96xf32>,
    %c0_20 = arith.constant 0 : index
    %c0_21 = arith.constant 0 : index
    %18 = vector.load %arg7[%c0_20, %c0_21] : memref<32x96xbf16, #tpu.memory_space<vmem>>, vector<32x96xbf16>
    %c0_22 = arith.constant 0 : index
    %c0_23 = arith.constant 0 : index
    %19 = vector.load %arg9[%c0_22, %c0_23] : memref<1x96xf32, #tpu.memory_space<vmem>>, vector<1x96xf32>
    %c0_24 = arith.constant 0 : index
    %c0_25 = arith.constant 0 : index
    %20 = vector.load %arg8[%c0_24, %c0_25] : memref<32x96xbf16, #tpu.memory_space<vmem>>, vector<32x96xbf16>
    %c0_26 = arith.constant 0 : index
    %c0_27 = arith.constant 0 : index
    %21 = vector.load %arg10[%c0_26, %c0_27] : memref<1x96xf32, #tpu.memory_space<vmem>>, vector<1x96xf32>
    %cst_28 = arith.constant 0.000000e+00 : f32
    %22 = vector.broadcast %cst_28 : f32 to vector<8x32xf32>
    %cst_29 = arith.constant 0.000000e+00 : f32
    %23 = vector.broadcast %cst_29 : f32 to vector<8x32xf32>
    %c0_30 = arith.constant 0 : index
    %c0_31 = arith.constant 0 : index
    %c0_32 = arith.constant 0 : index
    %24 = vector.load %arg29[%c0_30, %c0_31, %c0_32] : memref<8x8x96xf32, #tpu.memory_space<vmem>>, vector<1x8x96xf32>
    %25 = vector.shape_cast %24 : vector<1x8x96xf32> to vector<8x96xf32>
    %26 = arith.truncf %22 : vector<8x32xf32> to vector<8x32xbf16>
    %cst_33 = arith.constant dense<0.000000e+00> : vector<8x96xf32>
    %27 = tpu.matmul %26, %18, %cst_33 {dimension_numbers = #tpu.dot_dimension_numbers<[1], [0], [0], [1], [0, 0, 1, 1], [], []>} : vector<8x32xbf16>, vector<32x96xbf16>, vector<8x96xf32> -> vector<8x96xf32>
    %28 = vector.broadcast %19 : vector<1x96xf32> to vector<8x96xf32>
    %29 = arith.addf %27, %28 : vector<8x96xf32>
    %30 = vector.extract_strided_slice %25 {offsets = [0, 0], sizes = [8, 32], strides = [1, 1]} : vector<8x96xf32> to vector<8x32xf32>
    %31 = vector.extract_strided_slice %29 {offsets = [0, 0], sizes = [8, 32], strides = [1, 1]} : vector<8x96xf32> to vector<8x32xf32>
    %32 = arith.addf %30, %31 : vector<8x32xf32>
    %33 = arith.negf %32 : vector<8x32xf32>
    %34 = math.exp %33 : vector<8x32xf32>
    %cst_34 = arith.constant 1.000000e+00 : f32
    %35 = vector.broadcast %cst_34 : f32 to vector<8x32xf32>
    %36 = arith.addf %35, %34 : vector<8x32xf32>
    %37 = arith.divf %35, %36 : vector<8x32xf32>
    %38 = vector.extract_strided_slice %25 {offsets = [0, 32], sizes = [8, 32], strides = [1, 1]} : vector<8x96xf32> to vector<8x32xf32>
    %39 = vector.extract_strided_slice %29 {offsets = [0, 32], sizes = [8, 32], strides = [1, 1]} : vector<8x96xf32> to vector<8x32xf32>
    %40 = arith.addf %38, %39 : vector<8x32xf32>
    %41 = arith.negf %40 : vector<8x32xf32>
    %42 = math.exp %41 : vector<8x32xf32>
    %cst_35 = arith.constant 1.000000e+00 : f32
    %43 = vector.broadcast %cst_35 : f32 to vector<8x32xf32>
    %44 = arith.addf %43, %42 : vector<8x32xf32>
    %45 = arith.divf %43, %44 : vector<8x32xf32>
    %46 = vector.extract_strided_slice %25 {offsets = [0, 64], sizes = [8, 32], strides = [1, 1]} : vector<8x96xf32> to vector<8x32xf32>
    %47 = vector.extract_strided_slice %29 {offsets = [0, 64], sizes = [8, 32], strides = [1, 1]} : vector<8x96xf32> to vector<8x32xf32>
    %48 = arith.mulf %37, %47 : vector<8x32xf32>
    %49 = arith.addf %46, %48 : vector<8x32xf32>
    %50 = math.tanh %49 : vector<8x32xf32>
    %cst_36 = arith.constant 1.000000e+00 : f32
    %51 = vector.broadcast %cst_36 : f32 to vector<8x32xf32>
    %52 = arith.subf %51, %45 : vector<8x32xf32>
    %53 = arith.mulf %52, %50 : vector<8x32xf32>
    %54 = arith.mulf %45, %22 : vector<8x32xf32>
    %55 = arith.addf %53, %54 : vector<8x32xf32>
    %c7 = arith.constant 7 : index
    %c0_37 = arith.constant 0 : index
    %c0_38 = arith.constant 0 : index
    %56 = vector.load %arg30[%c7, %c0_37, %c0_38] : memref<8x8x96xf32, #tpu.memory_space<vmem>>, vector<1x8x96xf32>
    %57 = vector.shape_cast %56 : vector<1x8x96xf32> to vector<8x96xf32>
    %58 = arith.truncf %23 : vector<8x32xf32> to vector<8x32xbf16>
    %cst_39 = arith.constant dense<0.000000e+00> : vector<8x96xf32>
    %59 = tpu.matmul %58, %20, %cst_39 {dimension_numbers = #tpu.dot_dimension_numbers<[1], [0], [0], [1], [0, 0, 1, 1], [], []>} : vector<8x32xbf16>, vector<32x96xbf16>, vector<8x96xf32> -> vector<8x96xf32>
    %60 = vector.broadcast %21 : vector<1x96xf32> to vector<8x96xf32>
    %61 = arith.addf %59, %60 : vector<8x96xf32>
    %62 = vector.extract_strided_slice %57 {offsets = [0, 0], sizes = [8, 32], strides = [1, 1]} : vector<8x96xf32> to vector<8x32xf32>
    %63 = vector.extract_strided_slice %61 {offsets = [0, 0], sizes = [8, 32], strides = [1, 1]} : vector<8x96xf32> to vector<8x32xf32>
    %64 = arith.addf %62, %63 : vector<8x32xf32>
    %65 = arith.negf %64 : vector<8x32xf32>
    %66 = math.exp %65 : vector<8x32xf32>
    %cst_40 = arith.constant 1.000000e+00 : f32
    %67 = vector.broadcast %cst_40 : f32 to vector<8x32xf32>
    %68 = arith.addf %67, %66 : vector<8x32xf32>
    %69 = arith.divf %67, %68 : vector<8x32xf32>
    %70 = vector.extract_strided_slice %57 {offsets = [0, 32], sizes = [8, 32], strides = [1, 1]} : vector<8x96xf32> to vector<8x32xf32>
    %71 = vector.extract_strided_slice %61 {offsets = [0, 32], sizes = [8, 32], strides = [1, 1]} : vector<8x96xf32> to vector<8x32xf32>
    %72 = arith.addf %70, %71 : vector<8x32xf32>
    %73 = arith.negf %72 : vector<8x32xf32>
    %74 = math.exp %73 : vector<8x32xf32>
    %cst_41 = arith.constant 1.000000e+00 : f32
    %75 = vector.broadcast %cst_41 : f32 to vector<8x32xf32>
    %76 = arith.addf %75, %74 : vector<8x32xf32>
    %77 = arith.divf %75, %76 : vector<8x32xf32>
    %78 = vector.extract_strided_slice %57 {offsets = [0, 64], sizes = [8, 32], strides = [1, 1]} : vector<8x96xf32> to vector<8x32xf32>
    %79 = vector.extract_strided_slice %61 {offsets = [0, 64], sizes = [8, 32], strides = [1, 1]} : vector<8x96xf32> to vector<8x32xf32>
    %80 = arith.mulf %69, %79 : vector<8x32xf32>
    %81 = arith.addf %78, %80 : vector<8x32xf32>
    %82 = math.tanh %81 : vector<8x32xf32>
    %cst_42 = arith.constant 1.000000e+00 : f32
    %83 = vector.broadcast %cst_42 : f32 to vector<8x32xf32>
    %84 = arith.subf %83, %77 : vector<8x32xf32>
    %85 = arith.mulf %84, %82 : vector<8x32xf32>
    %86 = arith.mulf %77, %23 : vector<8x32xf32>
    %87 = arith.addf %85, %86 : vector<8x32xf32>
    %88 = vector.extract_strided_slice %0 {offsets = [7, 0, 0], sizes = [1, 8, 1], strides = [1, 1, 1]} : vector<8x8x1xf32> to vector<1x8x1xf32>
    %89 = vector.shape_cast %88 : vector<1x8x1xf32> to vector<8x1xf32>
    %90 = vector.broadcast %89 : vector<8x1xf32> to vector<8x32xf32>
    %91 = arith.mulf %87, %90 : vector<8x32xf32>
    %c0_43 = arith.constant 0 : index
    %c0_44 = arith.constant 0 : index
    %c0_45 = arith.constant 0 : index
    %92 = vector.load %arg27[%c0_43, %c0_44, %c0_45] : memref<8x8x32xf32, #tpu.memory_space<vmem>>, vector<1x8x32xf32>
    %93 = vector.shape_cast %92 : vector<1x8x32xf32> to vector<8x32xf32>
    %94 = vector.shape_cast %55 : vector<8x32xf32> to vector<1x8x32xf32>
    tpu.vector_store %arg27[%c0_43, %c0_44, %c0_45], %94 {strides = array<i32>} : memref<8x8x32xf32, #tpu.memory_space<vmem>>, vector<1x8x32xf32>,
    %c7_46 = arith.constant 7 : index
    %c0_47 = arith.constant 0 : index
    %c0_48 = arith.constant 0 : index
    %95 = vector.load %arg28[%c7_46, %c0_47, %c0_48] : memref<8x8x32xf32, #tpu.memory_space<vmem>>, vector<1x8x32xf32>
    %96 = vector.shape_cast %95 : vector<1x8x32xf32> to vector<8x32xf32>
    %97 = vector.shape_cast %91 : vector<8x32xf32> to vector<1x8x32xf32>
    tpu.vector_store %arg28[%c7_46, %c0_47, %c0_48], %97 {strides = array<i32>} : memref<8x8x32xf32, #tpu.memory_space<vmem>>, vector<1x8x32xf32>,
    %c1 = arith.constant 1 : index
    %c0_49 = arith.constant 0 : index
    %c0_50 = arith.constant 0 : index
    %98 = vector.load %arg29[%c1, %c0_49, %c0_50] : memref<8x8x96xf32, #tpu.memory_space<vmem>>, vector<1x8x96xf32>
    %99 = vector.shape_cast %98 : vector<1x8x96xf32> to vector<8x96xf32>
    %100 = arith.truncf %55 : vector<8x32xf32> to vector<8x32xbf16>
    %cst_51 = arith.constant dense<0.000000e+00> : vector<8x96xf32>
    %101 = tpu.matmul %100, %18, %cst_51 {dimension_numbers = #tpu.dot_dimension_numbers<[1], [0], [0], [1], [0, 0, 1, 1], [], []>} : vector<8x32xbf16>, vector<32x96xbf16>, vector<8x96xf32> -> vector<8x96xf32>
    %102 = vector.broadcast %19 : vector<1x96xf32> to vector<8x96xf32>
    %103 = arith.addf %101, %102 : vector<8x96xf32>
    %104 = vector.extract_strided_slice %99 {offsets = [0, 0], sizes = [8, 32], strides = [1, 1]} : vector<8x96xf32> to vector<8x32xf32>
    %105 = vector.extract_strided_slice %103 {offsets = [0, 0], sizes = [8, 32], strides = [1, 1]} : vector<8x96xf32> to vector<8x32xf32>
    %106 = arith.addf %104, %105 : vector<8x32xf32>
    %107 = arith.negf %106 : vector<8x32xf32>
    %108 = math.exp %107 : vector<8x32xf32>
    %cst_52 = arith.constant 1.000000e+00 : f32
    %109 = vector.broadcast %cst_52 : f32 to vector<8x32xf32>
    %110 = arith.addf %109, %108 : vector<8x32xf32>
    %111 = arith.divf %109, %110 : vector<8x32xf32>
    %112 = vector.extract_strided_slice %99 {offsets = [0, 32], sizes = [8, 32], strides = [1, 1]} : vector<8x96xf32> to vector<8x32xf32>
    %113 = vector.extract_strided_slice %103 {offsets = [0, 32], sizes = [8, 32], strides = [1, 1]} : vector<8x96xf32> to vector<8x32xf32>
    %114 = arith.addf %112, %113 : vector<8x32xf32>
    %115 = arith.negf %114 : vector<8x32xf32>
    %116 = math.exp %115 : vector<8x32xf32>
    %cst_53 = arith.constant 1.000000e+00 : f32
    %117 = vector.broadcast %cst_53 : f32 to vector<8x32xf32>
    %118 = arith.addf %117, %116 : vector<8x32xf32>
    %119 = arith.divf %117, %118 : vector<8x32xf32>
    %120 = vector.extract_strided_slice %99 {offsets = [0, 64], sizes = [8, 32], strides = [1, 1]} : vector<8x96xf32> to vector<8x32xf32>
    %121 = vector.extract_strided_slice %103 {offsets = [0, 64], sizes = [8, 32], strides = [1, 1]} : vector<8x96xf32> to vector<8x32xf32>
    %122 = arith.mulf %111, %121 : vector<8x32xf32>
    %123 = arith.addf %120, %122 : vector<8x32xf32>
    %124 = math.tanh %123 : vector<8x32xf32>
    %cst_54 = arith.constant 1.000000e+00 : f32
    %125 = vector.broadcast %cst_54 : f32 to vector<8x32xf32>
    %126 = arith.subf %125, %119 : vector<8x32xf32>
    %127 = arith.mulf %126, %124 : vector<8x32xf32>
    %128 = arith.mulf %119, %55 : vector<8x32xf32>
    %129 = arith.addf %127, %128 : vector<8x32xf32>
    %c6 = arith.constant 6 : index
    %c0_55 = arith.constant 0 : index
    %c0_56 = arith.constant 0 : index
    %130 = vector.load %arg30[%c6, %c0_55, %c0_56] : memref<8x8x96xf32, #tpu.memory_space<vmem>>, vector<1x8x96xf32>
    %131 = vector.shape_cast %130 : vector<1x8x96xf32> to vector<8x96xf32>
    %132 = arith.truncf %91 : vector<8x32xf32> to vector<8x32xbf16>
    %cst_57 = arith.constant dense<0.000000e+00> : vector<8x96xf32>
    %133 = tpu.matmul %132, %20, %cst_57 {dimension_numbers = #tpu.dot_dimension_numbers<[1], [0], [0], [1], [0, 0, 1, 1], [], []>} : vector<8x32xbf16>, vector<32x96xbf16>, vector<8x96xf32> -> vector<8x96xf32>
    %134 = vector.broadcast %21 : vector<1x96xf32> to vector<8x96xf32>
    %135 = arith.addf %133, %134 : vector<8x96xf32>
    %136 = vector.extract_strided_slice %131 {offsets = [0, 0], sizes = [8, 32], strides = [1, 1]} : vector<8x96xf32> to vector<8x32xf32>
    %137 = vector.extract_strided_slice %135 {offsets = [0, 0], sizes = [8, 32], strides = [1, 1]} : vector<8x96xf32> to vector<8x32xf32>
    %138 = arith.addf %136, %137 : vector<8x32xf32>
    %139 = arith.negf %138 : vector<8x32xf32>
    %140 = math.exp %139 : vector<8x32xf32>
    %cst_58 = arith.constant 1.000000e+00 : f32
    %141 = vector.broadcast %cst_58 : f32 to vector<8x32xf32>
    %142 = arith.addf %141, %140 : vector<8x32xf32>
    %143 = arith.divf %141, %142 : vector<8x32xf32>
    %144 = vector.extract_strided_slice %131 {offsets = [0, 32], sizes = [8, 32], strides = [1, 1]} : vector<8x96xf32> to vector<8x32xf32>
    %145 = vector.extract_strided_slice %135 {offsets = [0, 32], sizes = [8, 32], strides = [1, 1]} : vector<8x96xf32> to vector<8x32xf32>
    %146 = arith.addf %144, %145 : vector<8x32xf32>
    %147 = arith.negf %146 : vector<8x32xf32>
    %148 = math.exp %147 : vector<8x32xf32>
    %cst_59 = arith.constant 1.000000e+00 : f32
    %149 = vector.broadcast %cst_59 : f32 to vector<8x32xf32>
    %150 = arith.addf %149, %148 : vector<8x32xf32>
    %151 = arith.divf %149, %150 : vector<8x32xf32>
    %152 = vector.extract_strided_slice %131 {offsets = [0, 64], sizes = [8, 32], strides = [1, 1]} : vector<8x96xf32> to vector<8x32xf32>
    %153 = vector.extract_strided_slice %135 {offsets = [0, 64], sizes = [8, 32], strides = [1, 1]} : vector<8x96xf32> to vector<8x32xf32>
    %154 = arith.mulf %143, %153 : vector<8x32xf32>
    %155 = arith.addf %152, %154 : vector<8x32xf32>
    %156 = math.tanh %155 : vector<8x32xf32>
    %cst_60 = arith.constant 1.000000e+00 : f32
    %157 = vector.broadcast %cst_60 : f32 to vector<8x32xf32>
    %158 = arith.subf %157, %151 : vector<8x32xf32>
    %159 = arith.mulf %158, %156 : vector<8x32xf32>
    %160 = arith.mulf %151, %91 : vector<8x32xf32>
    %161 = arith.addf %159, %160 : vector<8x32xf32>
    %162 = vector.extract_strided_slice %0 {offsets = [6, 0, 0], sizes = [1, 8, 1], strides = [1, 1, 1]} : vector<8x8x1xf32> to vector<1x8x1xf32>
    %163 = vector.shape_cast %162 : vector<1x8x1xf32> to vector<8x1xf32>
    %164 = vector.broadcast %163 : vector<8x1xf32> to vector<8x32xf32>
    %165 = arith.mulf %161, %164 : vector<8x32xf32>
    %c1_61 = arith.constant 1 : index
    %c0_62 = arith.constant 0 : index
    %c0_63 = arith.constant 0 : index
    %166 = vector.load %arg27[%c1_61, %c0_62, %c0_63] : memref<8x8x32xf32, #tpu.memory_space<vmem>>, vector<1x8x32xf32>
    %167 = vector.shape_cast %166 : vector<1x8x32xf32> to vector<8x32xf32>
    %168 = vector.shape_cast %129 : vector<8x32xf32> to vector<1x8x32xf32>
    tpu.vector_store %arg27[%c1_61, %c0_62, %c0_63], %168 {strides = array<i32>} : memref<8x8x32xf32, #tpu.memory_space<vmem>>, vector<1x8x32xf32>,
    %c6_64 = arith.constant 6 : index
    %c0_65 = arith.constant 0 : index
    %c0_66 = arith.constant 0 : index
    %169 = vector.load %arg28[%c6_64, %c0_65, %c0_66] : memref<8x8x32xf32, #tpu.memory_space<vmem>>, vector<1x8x32xf32>
    %170 = vector.shape_cast %169 : vector<1x8x32xf32> to vector<8x32xf32>
    %171 = vector.shape_cast %165 : vector<8x32xf32> to vector<1x8x32xf32>
    tpu.vector_store %arg28[%c6_64, %c0_65, %c0_66], %171 {strides = array<i32>} : memref<8x8x32xf32, #tpu.memory_space<vmem>>, vector<1x8x32xf32>,
    %c2 = arith.constant 2 : index
    %c0_67 = arith.constant 0 : index
    %c0_68 = arith.constant 0 : index
    %172 = vector.load %arg29[%c2, %c0_67, %c0_68] : memref<8x8x96xf32, #tpu.memory_space<vmem>>, vector<1x8x96xf32>
    %173 = vector.shape_cast %172 : vector<1x8x96xf32> to vector<8x96xf32>
    %174 = arith.truncf %129 : vector<8x32xf32> to vector<8x32xbf16>
    %cst_69 = arith.constant dense<0.000000e+00> : vector<8x96xf32>
    %175 = tpu.matmul %174, %18, %cst_69 {dimension_numbers = #tpu.dot_dimension_numbers<[1], [0], [0], [1], [0, 0, 1, 1], [], []>} : vector<8x32xbf16>, vector<32x96xbf16>, vector<8x96xf32> -> vector<8x96xf32>
    %176 = vector.broadcast %19 : vector<1x96xf32> to vector<8x96xf32>
    %177 = arith.addf %175, %176 : vector<8x96xf32>
    %178 = vector.extract_strided_slice %173 {offsets = [0, 0], sizes = [8, 32], strides = [1, 1]} : vector<8x96xf32> to vector<8x32xf32>
    %179 = vector.extract_strided_slice %177 {offsets = [0, 0], sizes = [8, 32], strides = [1, 1]} : vector<8x96xf32> to vector<8x32xf32>
    %180 = arith.addf %178, %179 : vector<8x32xf32>
    %181 = arith.negf %180 : vector<8x32xf32>
    %182 = math.exp %181 : vector<8x32xf32>
    %cst_70 = arith.constant 1.000000e+00 : f32
    %183 = vector.broadcast %cst_70 : f32 to vector<8x32xf32>
    %184 = arith.addf %183, %182 : vector<8x32xf32>
    %185 = arith.divf %183, %184 : vector<8x32xf32>
    %186 = vector.extract_strided_slice %173 {offsets = [0, 32], sizes = [8, 32], strides = [1, 1]} : vector<8x96xf32> to vector<8x32xf32>
    %187 = vector.extract_strided_slice %177 {offsets = [0, 32], sizes = [8, 32], strides = [1, 1]} : vector<8x96xf32> to vector<8x32xf32>
    %188 = arith.addf %186, %187 : vector<8x32xf32>
    %189 = arith.negf %188 : vector<8x32xf32>
    %190 = math.exp %189 : vector<8x32xf32>
    %cst_71 = arith.constant 1.000000e+00 : f32
    %191 = vector.broadcast %cst_71 : f32 to vector<8x32xf32>
    %192 = arith.addf %191, %190 : vector<8x32xf32>
    %193 = arith.divf %191, %192 : vector<8x32xf32>
    %194 = vector.extract_strided_slice %173 {offsets = [0, 64], sizes = [8, 32], strides = [1, 1]} : vector<8x96xf32> to vector<8x32xf32>
    %195 = vector.extract_strided_slice %177 {offsets = [0, 64], sizes = [8, 32], strides = [1, 1]} : vector<8x96xf32> to vector<8x32xf32>
    %196 = arith.mulf %185, %195 : vector<8x32xf32>
    %197 = arith.addf %194, %196 : vector<8x32xf32>
    %198 = math.tanh %197 : vector<8x32xf32>
    %cst_72 = arith.constant 1.000000e+00 : f32
    %199 = vector.broadcast %cst_72 : f32 to vector<8x32xf32>
    %200 = arith.subf %199, %193 : vector<8x32xf32>
    %201 = arith.mulf %200, %198 : vector<8x32xf32>
    %202 = arith.mulf %193, %129 : vector<8x32xf32>
    %203 = arith.addf %201, %202 : vector<8x32xf32>
    %c5 = arith.constant 5 : index
    %c0_73 = arith.constant 0 : index
    %c0_74 = arith.constant 0 : index
    %204 = vector.load %arg30[%c5, %c0_73, %c0_74] : memref<8x8x96xf32, #tpu.memory_space<vmem>>, vector<1x8x96xf32>
    %205 = vector.shape_cast %204 : vector<1x8x96xf32> to vector<8x96xf32>
    %206 = arith.truncf %165 : vector<8x32xf32> to vector<8x32xbf16>
    %cst_75 = arith.constant dense<0.000000e+00> : vector<8x96xf32>
    %207 = tpu.matmul %206, %20, %cst_75 {dimension_numbers = #tpu.dot_dimension_numbers<[1], [0], [0], [1], [0, 0, 1, 1], [], []>} : vector<8x32xbf16>, vector<32x96xbf16>, vector<8x96xf32> -> vector<8x96xf32>
    %208 = vector.broadcast %21 : vector<1x96xf32> to vector<8x96xf32>
    %209 = arith.addf %207, %208 : vector<8x96xf32>
    %210 = vector.extract_strided_slice %205 {offsets = [0, 0], sizes = [8, 32], strides = [1, 1]} : vector<8x96xf32> to vector<8x32xf32>
    %211 = vector.extract_strided_slice %209 {offsets = [0, 0], sizes = [8, 32], strides = [1, 1]} : vector<8x96xf32> to vector<8x32xf32>
    %212 = arith.addf %210, %211 : vector<8x32xf32>
    %213 = arith.negf %212 : vector<8x32xf32>
    %214 = math.exp %213 : vector<8x32xf32>
    %cst_76 = arith.constant 1.000000e+00 : f32
    %215 = vector.broadcast %cst_76 : f32 to vector<8x32xf32>
    %216 = arith.addf %215, %214 : vector<8x32xf32>
    %217 = arith.divf %215, %216 : vector<8x32xf32>
    %218 = vector.extract_strided_slice %205 {offsets = [0, 32], sizes = [8, 32], strides = [1, 1]} : vector<8x96xf32> to vector<8x32xf32>
    %219 = vector.extract_strided_slice %209 {offsets = [0, 32], sizes = [8, 32], strides = [1, 1]} : vector<8x96xf32> to vector<8x32xf32>
    %220 = arith.addf %218, %219 : vector<8x32xf32>
    %221 = arith.negf %220 : vector<8x32xf32>
    %222 = math.exp %221 : vector<8x32xf32>
    %cst_77 = arith.constant 1.000000e+00 : f32
    %223 = vector.broadcast %cst_77 : f32 to vector<8x32xf32>
    %224 = arith.addf %223, %222 : vector<8x32xf32>
    %225 = arith.divf %223, %224 : vector<8x32xf32>
    %226 = vector.extract_strided_slice %205 {offsets = [0, 64], sizes = [8, 32], strides = [1, 1]} : vector<8x96xf32> to vector<8x32xf32>
    %227 = vector.extract_strided_slice %209 {offsets = [0, 64], sizes = [8, 32], strides = [1, 1]} : vector<8x96xf32> to vector<8x32xf32>
    %228 = arith.mulf %217, %227 : vector<8x32xf32>
    %229 = arith.addf %226, %228 : vector<8x32xf32>
    %230 = math.tanh %229 : vector<8x32xf32>
    %cst_78 = arith.constant 1.000000e+00 : f32
    %231 = vector.broadcast %cst_78 : f32 to vector<8x32xf32>
    %232 = arith.subf %231, %225 : vector<8x32xf32>
    %233 = arith.mulf %232, %230 : vector<8x32xf32>
    %234 = arith.mulf %225, %165 : vector<8x32xf32>
    %235 = arith.addf %233, %234 : vector<8x32xf32>
    %236 = vector.extract_strided_slice %0 {offsets = [5, 0, 0], sizes = [1, 8, 1], strides = [1, 1, 1]} : vector<8x8x1xf32> to vector<1x8x1xf32>
    %237 = vector.shape_cast %236 : vector<1x8x1xf32> to vector<8x1xf32>
    %238 = vector.broadcast %237 : vector<8x1xf32> to vector<8x32xf32>
    %239 = arith.mulf %235, %238 : vector<8x32xf32>
    %c2_79 = arith.constant 2 : index
    %c0_80 = arith.constant 0 : index
    %c0_81 = arith.constant 0 : index
    %240 = vector.load %arg27[%c2_79, %c0_80, %c0_81] : memref<8x8x32xf32, #tpu.memory_space<vmem>>, vector<1x8x32xf32>
    %241 = vector.shape_cast %240 : vector<1x8x32xf32> to vector<8x32xf32>
    %242 = vector.shape_cast %203 : vector<8x32xf32> to vector<1x8x32xf32>
    tpu.vector_store %arg27[%c2_79, %c0_80, %c0_81], %242 {strides = array<i32>} : memref<8x8x32xf32, #tpu.memory_space<vmem>>, vector<1x8x32xf32>,
    %c5_82 = arith.constant 5 : index
    %c0_83 = arith.constant 0 : index
    %c0_84 = arith.constant 0 : index
    %243 = vector.load %arg28[%c5_82, %c0_83, %c0_84] : memref<8x8x32xf32, #tpu.memory_space<vmem>>, vector<1x8x32xf32>
    %244 = vector.shape_cast %243 : vector<1x8x32xf32> to vector<8x32xf32>
    %245 = vector.shape_cast %239 : vector<8x32xf32> to vector<1x8x32xf32>
    tpu.vector_store %arg28[%c5_82, %c0_83, %c0_84], %245 {strides = array<i32>} : memref<8x8x32xf32, #tpu.memory_space<vmem>>, vector<1x8x32xf32>,
    %c3 = arith.constant 3 : index
    %c0_85 = arith.constant 0 : index
    %c0_86 = arith.constant 0 : index
    %246 = vector.load %arg29[%c3, %c0_85, %c0_86] : memref<8x8x96xf32, #tpu.memory_space<vmem>>, vector<1x8x96xf32>
    %247 = vector.shape_cast %246 : vector<1x8x96xf32> to vector<8x96xf32>
    %248 = arith.truncf %203 : vector<8x32xf32> to vector<8x32xbf16>
    %cst_87 = arith.constant dense<0.000000e+00> : vector<8x96xf32>
    %249 = tpu.matmul %248, %18, %cst_87 {dimension_numbers = #tpu.dot_dimension_numbers<[1], [0], [0], [1], [0, 0, 1, 1], [], []>} : vector<8x32xbf16>, vector<32x96xbf16>, vector<8x96xf32> -> vector<8x96xf32>
    %250 = vector.broadcast %19 : vector<1x96xf32> to vector<8x96xf32>
    %251 = arith.addf %249, %250 : vector<8x96xf32>
    %252 = vector.extract_strided_slice %247 {offsets = [0, 0], sizes = [8, 32], strides = [1, 1]} : vector<8x96xf32> to vector<8x32xf32>
    %253 = vector.extract_strided_slice %251 {offsets = [0, 0], sizes = [8, 32], strides = [1, 1]} : vector<8x96xf32> to vector<8x32xf32>
    %254 = arith.addf %252, %253 : vector<8x32xf32>
    %255 = arith.negf %254 : vector<8x32xf32>
    %256 = math.exp %255 : vector<8x32xf32>
    %cst_88 = arith.constant 1.000000e+00 : f32
    %257 = vector.broadcast %cst_88 : f32 to vector<8x32xf32>
    %258 = arith.addf %257, %256 : vector<8x32xf32>
    %259 = arith.divf %257, %258 : vector<8x32xf32>
    %260 = vector.extract_strided_slice %247 {offsets = [0, 32], sizes = [8, 32], strides = [1, 1]} : vector<8x96xf32> to vector<8x32xf32>
    %261 = vector.extract_strided_slice %251 {offsets = [0, 32], sizes = [8, 32], strides = [1, 1]} : vector<8x96xf32> to vector<8x32xf32>
    %262 = arith.addf %260, %261 : vector<8x32xf32>
    %263 = arith.negf %262 : vector<8x32xf32>
    %264 = math.exp %263 : vector<8x32xf32>
    %cst_89 = arith.constant 1.000000e+00 : f32
    %265 = vector.broadcast %cst_89 : f32 to vector<8x32xf32>
    %266 = arith.addf %265, %264 : vector<8x32xf32>
    %267 = arith.divf %265, %266 : vector<8x32xf32>
    %268 = vector.extract_strided_slice %247 {offsets = [0, 64], sizes = [8, 32], strides = [1, 1]} : vector<8x96xf32> to vector<8x32xf32>
    %269 = vector.extract_strided_slice %251 {offsets = [0, 64], sizes = [8, 32], strides = [1, 1]} : vector<8x96xf32> to vector<8x32xf32>
    %270 = arith.mulf %259, %269 : vector<8x32xf32>
    %271 = arith.addf %268, %270 : vector<8x32xf32>
    %272 = math.tanh %271 : vector<8x32xf32>
    %cst_90 = arith.constant 1.000000e+00 : f32
    %273 = vector.broadcast %cst_90 : f32 to vector<8x32xf32>
    %274 = arith.subf %273, %267 : vector<8x32xf32>
    %275 = arith.mulf %274, %272 : vector<8x32xf32>
    %276 = arith.mulf %267, %203 : vector<8x32xf32>
    %277 = arith.addf %275, %276 : vector<8x32xf32>
    %c4 = arith.constant 4 : index
    %c0_91 = arith.constant 0 : index
    %c0_92 = arith.constant 0 : index
    %278 = vector.load %arg30[%c4, %c0_91, %c0_92] : memref<8x8x96xf32, #tpu.memory_space<vmem>>, vector<1x8x96xf32>
    %279 = vector.shape_cast %278 : vector<1x8x96xf32> to vector<8x96xf32>
    %280 = arith.truncf %239 : vector<8x32xf32> to vector<8x32xbf16>
    %cst_93 = arith.constant dense<0.000000e+00> : vector<8x96xf32>
    %281 = tpu.matmul %280, %20, %cst_93 {dimension_numbers = #tpu.dot_dimension_numbers<[1], [0], [0], [1], [0, 0, 1, 1], [], []>} : vector<8x32xbf16>, vector<32x96xbf16>, vector<8x96xf32> -> vector<8x96xf32>
    %282 = vector.broadcast %21 : vector<1x96xf32> to vector<8x96xf32>
    %283 = arith.addf %281, %282 : vector<8x96xf32>
    %284 = vector.extract_strided_slice %279 {offsets = [0, 0], sizes = [8, 32], strides = [1, 1]} : vector<8x96xf32> to vector<8x32xf32>
    %285 = vector.extract_strided_slice %283 {offsets = [0, 0], sizes = [8, 32], strides = [1, 1]} : vector<8x96xf32> to vector<8x32xf32>
    %286 = arith.addf %284, %285 : vector<8x32xf32>
    %287 = arith.negf %286 : vector<8x32xf32>
    %288 = math.exp %287 : vector<8x32xf32>
    %cst_94 = arith.constant 1.000000e+00 : f32
    %289 = vector.broadcast %cst_94 : f32 to vector<8x32xf32>
    %290 = arith.addf %289, %288 : vector<8x32xf32>
    %291 = arith.divf %289, %290 : vector<8x32xf32>
    %292 = vector.extract_strided_slice %279 {offsets = [0, 32], sizes = [8, 32], strides = [1, 1]} : vector<8x96xf32> to vector<8x32xf32>
    %293 = vector.extract_strided_slice %283 {offsets = [0, 32], sizes = [8, 32], strides = [1, 1]} : vector<8x96xf32> to vector<8x32xf32>
    %294 = arith.addf %292, %293 : vector<8x32xf32>
    %295 = arith.negf %294 : vector<8x32xf32>
    %296 = math.exp %295 : vector<8x32xf32>
    %cst_95 = arith.constant 1.000000e+00 : f32
    %297 = vector.broadcast %cst_95 : f32 to vector<8x32xf32>
    %298 = arith.addf %297, %296 : vector<8x32xf32>
    %299 = arith.divf %297, %298 : vector<8x32xf32>
    %300 = vector.extract_strided_slice %279 {offsets = [0, 64], sizes = [8, 32], strides = [1, 1]} : vector<8x96xf32> to vector<8x32xf32>
    %301 = vector.extract_strided_slice %283 {offsets = [0, 64], sizes = [8, 32], strides = [1, 1]} : vector<8x96xf32> to vector<8x32xf32>
    %302 = arith.mulf %291, %301 : vector<8x32xf32>
    %303 = arith.addf %300, %302 : vector<8x32xf32>
    %304 = math.tanh %303 : vector<8x32xf32>
    %cst_96 = arith.constant 1.000000e+00 : f32
    %305 = vector.broadcast %cst_96 : f32 to vector<8x32xf32>
    %306 = arith.subf %305, %299 : vector<8x32xf32>
    %307 = arith.mulf %306, %304 : vector<8x32xf32>
    %308 = arith.mulf %299, %239 : vector<8x32xf32>
    %309 = arith.addf %307, %308 : vector<8x32xf32>
    %310 = vector.extract_strided_slice %0 {offsets = [4, 0, 0], sizes = [1, 8, 1], strides = [1, 1, 1]} : vector<8x8x1xf32> to vector<1x8x1xf32>
    %311 = vector.shape_cast %310 : vector<1x8x1xf32> to vector<8x1xf32>
    %312 = vector.broadcast %311 : vector<8x1xf32> to vector<8x32xf32>
    %313 = arith.mulf %309, %312 : vector<8x32xf32>
    %c3_97 = arith.constant 3 : index
    %c0_98 = arith.constant 0 : index
    %c0_99 = arith.constant 0 : index
    %314 = vector.load %arg27[%c3_97, %c0_98, %c0_99] : memref<8x8x32xf32, #tpu.memory_space<vmem>>, vector<1x8x32xf32>
    %315 = vector.shape_cast %314 : vector<1x8x32xf32> to vector<8x32xf32>
    %316 = vector.shape_cast %277 : vector<8x32xf32> to vector<1x8x32xf32>
    tpu.vector_store %arg27[%c3_97, %c0_98, %c0_99], %316 {strides = array<i32>} : memref<8x8x32xf32, #tpu.memory_space<vmem>>, vector<1x8x32xf32>,
    %c4_100 = arith.constant 4 : index
    %c0_101 = arith.constant 0 : index
    %c0_102 = arith.constant 0 : index
    %317 = vector.load %arg28[%c4_100, %c0_101, %c0_102] : memref<8x8x32xf32, #tpu.memory_space<vmem>>, vector<1x8x32xf32>
    %318 = vector.shape_cast %317 : vector<1x8x32xf32> to vector<8x32xf32>
    %319 = vector.shape_cast %313 : vector<8x32xf32> to vector<1x8x32xf32>
    tpu.vector_store %arg28[%c4_100, %c0_101, %c0_102], %319 {strides = array<i32>} : memref<8x8x32xf32, #tpu.memory_space<vmem>>, vector<1x8x32xf32>,
    %c4_103 = arith.constant 4 : index
    %c0_104 = arith.constant 0 : index
    %c0_105 = arith.constant 0 : index
    %320 = vector.load %arg29[%c4_103, %c0_104, %c0_105] : memref<8x8x96xf32, #tpu.memory_space<vmem>>, vector<1x8x96xf32>
    %321 = vector.shape_cast %320 : vector<1x8x96xf32> to vector<8x96xf32>
    %322 = arith.truncf %277 : vector<8x32xf32> to vector<8x32xbf16>
    %cst_106 = arith.constant dense<0.000000e+00> : vector<8x96xf32>
    %323 = tpu.matmul %322, %18, %cst_106 {dimension_numbers = #tpu.dot_dimension_numbers<[1], [0], [0], [1], [0, 0, 1, 1], [], []>} : vector<8x32xbf16>, vector<32x96xbf16>, vector<8x96xf32> -> vector<8x96xf32>
    %324 = vector.broadcast %19 : vector<1x96xf32> to vector<8x96xf32>
    %325 = arith.addf %323, %324 : vector<8x96xf32>
    %326 = vector.extract_strided_slice %321 {offsets = [0, 0], sizes = [8, 32], strides = [1, 1]} : vector<8x96xf32> to vector<8x32xf32>
    %327 = vector.extract_strided_slice %325 {offsets = [0, 0], sizes = [8, 32], strides = [1, 1]} : vector<8x96xf32> to vector<8x32xf32>
    %328 = arith.addf %326, %327 : vector<8x32xf32>
    %329 = arith.negf %328 : vector<8x32xf32>
    %330 = math.exp %329 : vector<8x32xf32>
    %cst_107 = arith.constant 1.000000e+00 : f32
    %331 = vector.broadcast %cst_107 : f32 to vector<8x32xf32>
    %332 = arith.addf %331, %330 : vector<8x32xf32>
    %333 = arith.divf %331, %332 : vector<8x32xf32>
    %334 = vector.extract_strided_slice %321 {offsets = [0, 32], sizes = [8, 32], strides = [1, 1]} : vector<8x96xf32> to vector<8x32xf32>
    %335 = vector.extract_strided_slice %325 {offsets = [0, 32], sizes = [8, 32], strides = [1, 1]} : vector<8x96xf32> to vector<8x32xf32>
    %336 = arith.addf %334, %335 : vector<8x32xf32>
    %337 = arith.negf %336 : vector<8x32xf32>
    %338 = math.exp %337 : vector<8x32xf32>
    %cst_108 = arith.constant 1.000000e+00 : f32
    %339 = vector.broadcast %cst_108 : f32 to vector<8x32xf32>
    %340 = arith.addf %339, %338 : vector<8x32xf32>
    %341 = arith.divf %339, %340 : vector<8x32xf32>
    %342 = vector.extract_strided_slice %321 {offsets = [0, 64], sizes = [8, 32], strides = [1, 1]} : vector<8x96xf32> to vector<8x32xf32>
    %343 = vector.extract_strided_slice %325 {offsets = [0, 64], sizes = [8, 32], strides = [1, 1]} : vector<8x96xf32> to vector<8x32xf32>
    %344 = arith.mulf %333, %343 : vector<8x32xf32>
    %345 = arith.addf %342, %344 : vector<8x32xf32>
    %346 = math.tanh %345 : vector<8x32xf32>
    %cst_109 = arith.constant 1.000000e+00 : f32
    %347 = vector.broadcast %cst_109 : f32 to vector<8x32xf32>
    %348 = arith.subf %347, %341 : vector<8x32xf32>
    %349 = arith.mulf %348, %346 : vector<8x32xf32>
    %350 = arith.mulf %341, %277 : vector<8x32xf32>
    %351 = arith.addf %349, %350 : vector<8x32xf32>
    %c3_110 = arith.constant 3 : index
    %c0_111 = arith.constant 0 : index
    %c0_112 = arith.constant 0 : index
    %352 = vector.load %arg30[%c3_110, %c0_111, %c0_112] : memref<8x8x96xf32, #tpu.memory_space<vmem>>, vector<1x8x96xf32>
    %353 = vector.shape_cast %352 : vector<1x8x96xf32> to vector<8x96xf32>
    %354 = arith.truncf %313 : vector<8x32xf32> to vector<8x32xbf16>
    %cst_113 = arith.constant dense<0.000000e+00> : vector<8x96xf32>
    %355 = tpu.matmul %354, %20, %cst_113 {dimension_numbers = #tpu.dot_dimension_numbers<[1], [0], [0], [1], [0, 0, 1, 1], [], []>} : vector<8x32xbf16>, vector<32x96xbf16>, vector<8x96xf32> -> vector<8x96xf32>
    %356 = vector.broadcast %21 : vector<1x96xf32> to vector<8x96xf32>
    %357 = arith.addf %355, %356 : vector<8x96xf32>
    %358 = vector.extract_strided_slice %353 {offsets = [0, 0], sizes = [8, 32], strides = [1, 1]} : vector<8x96xf32> to vector<8x32xf32>
    %359 = vector.extract_strided_slice %357 {offsets = [0, 0], sizes = [8, 32], strides = [1, 1]} : vector<8x96xf32> to vector<8x32xf32>
    %360 = arith.addf %358, %359 : vector<8x32xf32>
    %361 = arith.negf %360 : vector<8x32xf32>
    %362 = math.exp %361 : vector<8x32xf32>
    %cst_114 = arith.constant 1.000000e+00 : f32
    %363 = vector.broadcast %cst_114 : f32 to vector<8x32xf32>
    %364 = arith.addf %363, %362 : vector<8x32xf32>
    %365 = arith.divf %363, %364 : vector<8x32xf32>
    %366 = vector.extract_strided_slice %353 {offsets = [0, 32], sizes = [8, 32], strides = [1, 1]} : vector<8x96xf32> to vector<8x32xf32>
    %367 = vector.extract_strided_slice %357 {offsets = [0, 32], sizes = [8, 32], strides = [1, 1]} : vector<8x96xf32> to vector<8x32xf32>
    %368 = arith.addf %366, %367 : vector<8x32xf32>
    %369 = arith.negf %368 : vector<8x32xf32>
    %370 = math.exp %369 : vector<8x32xf32>
    %cst_115 = arith.constant 1.000000e+00 : f32
    %371 = vector.broadcast %cst_115 : f32 to vector<8x32xf32>
    %372 = arith.addf %371, %370 : vector<8x32xf32>
    %373 = arith.divf %371, %372 : vector<8x32xf32>
    %374 = vector.extract_strided_slice %353 {offsets = [0, 64], sizes = [8, 32], strides = [1, 1]} : vector<8x96xf32> to vector<8x32xf32>
    %375 = vector.extract_strided_slice %357 {offsets = [0, 64], sizes = [8, 32], strides = [1, 1]} : vector<8x96xf32> to vector<8x32xf32>
    %376 = arith.mulf %365, %375 : vector<8x32xf32>
    %377 = arith.addf %374, %376 : vector<8x32xf32>
    %378 = math.tanh %377 : vector<8x32xf32>
    %cst_116 = arith.constant 1.000000e+00 : f32
    %379 = vector.broadcast %cst_116 : f32 to vector<8x32xf32>
    %380 = arith.subf %379, %373 : vector<8x32xf32>
    %381 = arith.mulf %380, %378 : vector<8x32xf32>
    %382 = arith.mulf %373, %313 : vector<8x32xf32>
    %383 = arith.addf %381, %382 : vector<8x32xf32>
    %384 = vector.extract_strided_slice %0 {offsets = [3, 0, 0], sizes = [1, 8, 1], strides = [1, 1, 1]} : vector<8x8x1xf32> to vector<1x8x1xf32>
    %385 = vector.shape_cast %384 : vector<1x8x1xf32> to vector<8x1xf32>
    %386 = vector.broadcast %385 : vector<8x1xf32> to vector<8x32xf32>
    %387 = arith.mulf %383, %386 : vector<8x32xf32>
    %c4_117 = arith.constant 4 : index
    %c0_118 = arith.constant 0 : index
    %c0_119 = arith.constant 0 : index
    %388 = vector.load %arg27[%c4_117, %c0_118, %c0_119] : memref<8x8x32xf32, #tpu.memory_space<vmem>>, vector<1x8x32xf32>
    %389 = vector.shape_cast %388 : vector<1x8x32xf32> to vector<8x32xf32>
    %390 = vector.shape_cast %351 : vector<8x32xf32> to vector<1x8x32xf32>
    tpu.vector_store %arg27[%c4_117, %c0_118, %c0_119], %390 {strides = array<i32>} : memref<8x8x32xf32, #tpu.memory_space<vmem>>, vector<1x8x32xf32>,
    %c3_120 = arith.constant 3 : index
    %c0_121 = arith.constant 0 : index
    %c0_122 = arith.constant 0 : index
    %391 = vector.load %arg28[%c3_120, %c0_121, %c0_122] : memref<8x8x32xf32, #tpu.memory_space<vmem>>, vector<1x8x32xf32>
    %392 = vector.shape_cast %391 : vector<1x8x32xf32> to vector<8x32xf32>
    %393 = vector.shape_cast %387 : vector<8x32xf32> to vector<1x8x32xf32>
    tpu.vector_store %arg28[%c3_120, %c0_121, %c0_122], %393 {strides = array<i32>} : memref<8x8x32xf32, #tpu.memory_space<vmem>>, vector<1x8x32xf32>,
    %c5_123 = arith.constant 5 : index
    %c0_124 = arith.constant 0 : index
    %c0_125 = arith.constant 0 : index
    %394 = vector.load %arg29[%c5_123, %c0_124, %c0_125] : memref<8x8x96xf32, #tpu.memory_space<vmem>>, vector<1x8x96xf32>
    %395 = vector.shape_cast %394 : vector<1x8x96xf32> to vector<8x96xf32>
    %396 = arith.truncf %351 : vector<8x32xf32> to vector<8x32xbf16>
    %cst_126 = arith.constant dense<0.000000e+00> : vector<8x96xf32>
    %397 = tpu.matmul %396, %18, %cst_126 {dimension_numbers = #tpu.dot_dimension_numbers<[1], [0], [0], [1], [0, 0, 1, 1], [], []>} : vector<8x32xbf16>, vector<32x96xbf16>, vector<8x96xf32> -> vector<8x96xf32>
    %398 = vector.broadcast %19 : vector<1x96xf32> to vector<8x96xf32>
    %399 = arith.addf %397, %398 : vector<8x96xf32>
    %400 = vector.extract_strided_slice %395 {offsets = [0, 0], sizes = [8, 32], strides = [1, 1]} : vector<8x96xf32> to vector<8x32xf32>
    %401 = vector.extract_strided_slice %399 {offsets = [0, 0], sizes = [8, 32], strides = [1, 1]} : vector<8x96xf32> to vector<8x32xf32>
    %402 = arith.addf %400, %401 : vector<8x32xf32>
    %403 = arith.negf %402 : vector<8x32xf32>
    %404 = math.exp %403 : vector<8x32xf32>
    %cst_127 = arith.constant 1.000000e+00 : f32
    %405 = vector.broadcast %cst_127 : f32 to vector<8x32xf32>
    %406 = arith.addf %405, %404 : vector<8x32xf32>
    %407 = arith.divf %405, %406 : vector<8x32xf32>
    %408 = vector.extract_strided_slice %395 {offsets = [0, 32], sizes = [8, 32], strides = [1, 1]} : vector<8x96xf32> to vector<8x32xf32>
    %409 = vector.extract_strided_slice %399 {offsets = [0, 32], sizes = [8, 32], strides = [1, 1]} : vector<8x96xf32> to vector<8x32xf32>
    %410 = arith.addf %408, %409 : vector<8x32xf32>
    %411 = arith.negf %410 : vector<8x32xf32>
    %412 = math.exp %411 : vector<8x32xf32>
    %cst_128 = arith.constant 1.000000e+00 : f32
    %413 = vector.broadcast %cst_128 : f32 to vector<8x32xf32>
    %414 = arith.addf %413, %412 : vector<8x32xf32>
    %415 = arith.divf %413, %414 : vector<8x32xf32>
    %416 = vector.extract_strided_slice %395 {offsets = [0, 64], sizes = [8, 32], strides = [1, 1]} : vector<8x96xf32> to vector<8x32xf32>
    %417 = vector.extract_strided_slice %399 {offsets = [0, 64], sizes = [8, 32], strides = [1, 1]} : vector<8x96xf32> to vector<8x32xf32>
    %418 = arith.mulf %407, %417 : vector<8x32xf32>
    %419 = arith.addf %416, %418 : vector<8x32xf32>
    %420 = math.tanh %419 : vector<8x32xf32>
    %cst_129 = arith.constant 1.000000e+00 : f32
    %421 = vector.broadcast %cst_129 : f32 to vector<8x32xf32>
    %422 = arith.subf %421, %415 : vector<8x32xf32>
    %423 = arith.mulf %422, %420 : vector<8x32xf32>
    %424 = arith.mulf %415, %351 : vector<8x32xf32>
    %425 = arith.addf %423, %424 : vector<8x32xf32>
    %c2_130 = arith.constant 2 : index
    %c0_131 = arith.constant 0 : index
    %c0_132 = arith.constant 0 : index
    %426 = vector.load %arg30[%c2_130, %c0_131, %c0_132] : memref<8x8x96xf32, #tpu.memory_space<vmem>>, vector<1x8x96xf32>
    %427 = vector.shape_cast %426 : vector<1x8x96xf32> to vector<8x96xf32>
    %428 = arith.truncf %387 : vector<8x32xf32> to vector<8x32xbf16>
    %cst_133 = arith.constant dense<0.000000e+00> : vector<8x96xf32>
    %429 = tpu.matmul %428, %20, %cst_133 {dimension_numbers = #tpu.dot_dimension_numbers<[1], [0], [0], [1], [0, 0, 1, 1], [], []>} : vector<8x32xbf16>, vector<32x96xbf16>, vector<8x96xf32> -> vector<8x96xf32>
    %430 = vector.broadcast %21 : vector<1x96xf32> to vector<8x96xf32>
    %431 = arith.addf %429, %430 : vector<8x96xf32>
    %432 = vector.extract_strided_slice %427 {offsets = [0, 0], sizes = [8, 32], strides = [1, 1]} : vector<8x96xf32> to vector<8x32xf32>
    %433 = vector.extract_strided_slice %431 {offsets = [0, 0], sizes = [8, 32], strides = [1, 1]} : vector<8x96xf32> to vector<8x32xf32>
    %434 = arith.addf %432, %433 : vector<8x32xf32>
    %435 = arith.negf %434 : vector<8x32xf32>
    %436 = math.exp %435 : vector<8x32xf32>
    %cst_134 = arith.constant 1.000000e+00 : f32
    %437 = vector.broadcast %cst_134 : f32 to vector<8x32xf32>
    %438 = arith.addf %437, %436 : vector<8x32xf32>
    %439 = arith.divf %437, %438 : vector<8x32xf32>
    %440 = vector.extract_strided_slice %427 {offsets = [0, 32], sizes = [8, 32], strides = [1, 1]} : vector<8x96xf32> to vector<8x32xf32>
    %441 = vector.extract_strided_slice %431 {offsets = [0, 32], sizes = [8, 32], strides = [1, 1]} : vector<8x96xf32> to vector<8x32xf32>
    %442 = arith.addf %440, %441 : vector<8x32xf32>
    %443 = arith.negf %442 : vector<8x32xf32>
    %444 = math.exp %443 : vector<8x32xf32>
    %cst_135 = arith.constant 1.000000e+00 : f32
    %445 = vector.broadcast %cst_135 : f32 to vector<8x32xf32>
    %446 = arith.addf %445, %444 : vector<8x32xf32>
    %447 = arith.divf %445, %446 : vector<8x32xf32>
    %448 = vector.extract_strided_slice %427 {offsets = [0, 64], sizes = [8, 32], strides = [1, 1]} : vector<8x96xf32> to vector<8x32xf32>
    %449 = vector.extract_strided_slice %431 {offsets = [0, 64], sizes = [8, 32], strides = [1, 1]} : vector<8x96xf32> to vector<8x32xf32>
    %450 = arith.mulf %439, %449 : vector<8x32xf32>
    %451 = arith.addf %448, %450 : vector<8x32xf32>
    %452 = math.tanh %451 : vector<8x32xf32>
    %cst_136 = arith.constant 1.000000e+00 : f32
    %453 = vector.broadcast %cst_136 : f32 to vector<8x32xf32>
    %454 = arith.subf %453, %447 : vector<8x32xf32>
    %455 = arith.mulf %454, %452 : vector<8x32xf32>
    %456 = arith.mulf %447, %387 : vector<8x32xf32>
    %457 = arith.addf %455, %456 : vector<8x32xf32>
    %458 = vector.extract_strided_slice %0 {offsets = [2, 0, 0], sizes = [1, 8, 1], strides = [1, 1, 1]} : vector<8x8x1xf32> to vector<1x8x1xf32>
    %459 = vector.shape_cast %458 : vector<1x8x1xf32> to vector<8x1xf32>
    %460 = vector.broadcast %459 : vector<8x1xf32> to vector<8x32xf32>
    %461 = arith.mulf %457, %460 : vector<8x32xf32>
    %c5_137 = arith.constant 5 : index
    %c0_138 = arith.constant 0 : index
    %c0_139 = arith.constant 0 : index
    %462 = vector.load %arg27[%c5_137, %c0_138, %c0_139] : memref<8x8x32xf32, #tpu.memory_space<vmem>>, vector<1x8x32xf32>
    %463 = vector.shape_cast %462 : vector<1x8x32xf32> to vector<8x32xf32>
    %464 = vector.shape_cast %425 : vector<8x32xf32> to vector<1x8x32xf32>
    tpu.vector_store %arg27[%c5_137, %c0_138, %c0_139], %464 {strides = array<i32>} : memref<8x8x32xf32, #tpu.memory_space<vmem>>, vector<1x8x32xf32>,
    %c2_140 = arith.constant 2 : index
    %c0_141 = arith.constant 0 : index
    %c0_142 = arith.constant 0 : index
    %465 = vector.load %arg28[%c2_140, %c0_141, %c0_142] : memref<8x8x32xf32, #tpu.memory_space<vmem>>, vector<1x8x32xf32>
    %466 = vector.shape_cast %465 : vector<1x8x32xf32> to vector<8x32xf32>
    %467 = vector.shape_cast %461 : vector<8x32xf32> to vector<1x8x32xf32>
    tpu.vector_store %arg28[%c2_140, %c0_141, %c0_142], %467 {strides = array<i32>} : memref<8x8x32xf32, #tpu.memory_space<vmem>>, vector<1x8x32xf32>,
    %c6_143 = arith.constant 6 : index
    %c0_144 = arith.constant 0 : index
    %c0_145 = arith.constant 0 : index
    %468 = vector.load %arg29[%c6_143, %c0_144, %c0_145] : memref<8x8x96xf32, #tpu.memory_space<vmem>>, vector<1x8x96xf32>
    %469 = vector.shape_cast %468 : vector<1x8x96xf32> to vector<8x96xf32>
    %470 = arith.truncf %425 : vector<8x32xf32> to vector<8x32xbf16>
    %cst_146 = arith.constant dense<0.000000e+00> : vector<8x96xf32>
    %471 = tpu.matmul %470, %18, %cst_146 {dimension_numbers = #tpu.dot_dimension_numbers<[1], [0], [0], [1], [0, 0, 1, 1], [], []>} : vector<8x32xbf16>, vector<32x96xbf16>, vector<8x96xf32> -> vector<8x96xf32>
    %472 = vector.broadcast %19 : vector<1x96xf32> to vector<8x96xf32>
    %473 = arith.addf %471, %472 : vector<8x96xf32>
    %474 = vector.extract_strided_slice %469 {offsets = [0, 0], sizes = [8, 32], strides = [1, 1]} : vector<8x96xf32> to vector<8x32xf32>
    %475 = vector.extract_strided_slice %473 {offsets = [0, 0], sizes = [8, 32], strides = [1, 1]} : vector<8x96xf32> to vector<8x32xf32>
    %476 = arith.addf %474, %475 : vector<8x32xf32>
    %477 = arith.negf %476 : vector<8x32xf32>
    %478 = math.exp %477 : vector<8x32xf32>
    %cst_147 = arith.constant 1.000000e+00 : f32
    %479 = vector.broadcast %cst_147 : f32 to vector<8x32xf32>
    %480 = arith.addf %479, %478 : vector<8x32xf32>
    %481 = arith.divf %479, %480 : vector<8x32xf32>
    %482 = vector.extract_strided_slice %469 {offsets = [0, 32], sizes = [8, 32], strides = [1, 1]} : vector<8x96xf32> to vector<8x32xf32>
    %483 = vector.extract_strided_slice %473 {offsets = [0, 32], sizes = [8, 32], strides = [1, 1]} : vector<8x96xf32> to vector<8x32xf32>
    %484 = arith.addf %482, %483 : vector<8x32xf32>
    %485 = arith.negf %484 : vector<8x32xf32>
    %486 = math.exp %485 : vector<8x32xf32>
    %cst_148 = arith.constant 1.000000e+00 : f32
    %487 = vector.broadcast %cst_148 : f32 to vector<8x32xf32>
    %488 = arith.addf %487, %486 : vector<8x32xf32>
    %489 = arith.divf %487, %488 : vector<8x32xf32>
    %490 = vector.extract_strided_slice %469 {offsets = [0, 64], sizes = [8, 32], strides = [1, 1]} : vector<8x96xf32> to vector<8x32xf32>
    %491 = vector.extract_strided_slice %473 {offsets = [0, 64], sizes = [8, 32], strides = [1, 1]} : vector<8x96xf32> to vector<8x32xf32>
    %492 = arith.mulf %481, %491 : vector<8x32xf32>
    %493 = arith.addf %490, %492 : vector<8x32xf32>
    %494 = math.tanh %493 : vector<8x32xf32>
    %cst_149 = arith.constant 1.000000e+00 : f32
    %495 = vector.broadcast %cst_149 : f32 to vector<8x32xf32>
    %496 = arith.subf %495, %489 : vector<8x32xf32>
    %497 = arith.mulf %496, %494 : vector<8x32xf32>
    %498 = arith.mulf %489, %425 : vector<8x32xf32>
    %499 = arith.addf %497, %498 : vector<8x32xf32>
    %c1_150 = arith.constant 1 : index
    %c0_151 = arith.constant 0 : index
    %c0_152 = arith.constant 0 : index
    %500 = vector.load %arg30[%c1_150, %c0_151, %c0_152] : memref<8x8x96xf32, #tpu.memory_space<vmem>>, vector<1x8x96xf32>
    %501 = vector.shape_cast %500 : vector<1x8x96xf32> to vector<8x96xf32>
    %502 = arith.truncf %461 : vector<8x32xf32> to vector<8x32xbf16>
    %cst_153 = arith.constant dense<0.000000e+00> : vector<8x96xf32>
    %503 = tpu.matmul %502, %20, %cst_153 {dimension_numbers = #tpu.dot_dimension_numbers<[1], [0], [0], [1], [0, 0, 1, 1], [], []>} : vector<8x32xbf16>, vector<32x96xbf16>, vector<8x96xf32> -> vector<8x96xf32>
    %504 = vector.broadcast %21 : vector<1x96xf32> to vector<8x96xf32>
    %505 = arith.addf %503, %504 : vector<8x96xf32>
    %506 = vector.extract_strided_slice %501 {offsets = [0, 0], sizes = [8, 32], strides = [1, 1]} : vector<8x96xf32> to vector<8x32xf32>
    %507 = vector.extract_strided_slice %505 {offsets = [0, 0], sizes = [8, 32], strides = [1, 1]} : vector<8x96xf32> to vector<8x32xf32>
    %508 = arith.addf %506, %507 : vector<8x32xf32>
    %509 = arith.negf %508 : vector<8x32xf32>
    %510 = math.exp %509 : vector<8x32xf32>
    %cst_154 = arith.constant 1.000000e+00 : f32
    %511 = vector.broadcast %cst_154 : f32 to vector<8x32xf32>
    %512 = arith.addf %511, %510 : vector<8x32xf32>
    %513 = arith.divf %511, %512 : vector<8x32xf32>
    %514 = vector.extract_strided_slice %501 {offsets = [0, 32], sizes = [8, 32], strides = [1, 1]} : vector<8x96xf32> to vector<8x32xf32>
    %515 = vector.extract_strided_slice %505 {offsets = [0, 32], sizes = [8, 32], strides = [1, 1]} : vector<8x96xf32> to vector<8x32xf32>
    %516 = arith.addf %514, %515 : vector<8x32xf32>
    %517 = arith.negf %516 : vector<8x32xf32>
    %518 = math.exp %517 : vector<8x32xf32>
    %cst_155 = arith.constant 1.000000e+00 : f32
    %519 = vector.broadcast %cst_155 : f32 to vector<8x32xf32>
    %520 = arith.addf %519, %518 : vector<8x32xf32>
    %521 = arith.divf %519, %520 : vector<8x32xf32>
    %522 = vector.extract_strided_slice %501 {offsets = [0, 64], sizes = [8, 32], strides = [1, 1]} : vector<8x96xf32> to vector<8x32xf32>
    %523 = vector.extract_strided_slice %505 {offsets = [0, 64], sizes = [8, 32], strides = [1, 1]} : vector<8x96xf32> to vector<8x32xf32>
    %524 = arith.mulf %513, %523 : vector<8x32xf32>
    %525 = arith.addf %522, %524 : vector<8x32xf32>
    %526 = math.tanh %525 : vector<8x32xf32>
    %cst_156 = arith.constant 1.000000e+00 : f32
    %527 = vector.broadcast %cst_156 : f32 to vector<8x32xf32>
    %528 = arith.subf %527, %521 : vector<8x32xf32>
    %529 = arith.mulf %528, %526 : vector<8x32xf32>
    %530 = arith.mulf %521, %461 : vector<8x32xf32>
    %531 = arith.addf %529, %530 : vector<8x32xf32>
    %532 = vector.extract_strided_slice %0 {offsets = [1, 0, 0], sizes = [1, 8, 1], strides = [1, 1, 1]} : vector<8x8x1xf32> to vector<1x8x1xf32>
    %533 = vector.shape_cast %532 : vector<1x8x1xf32> to vector<8x1xf32>
    %534 = vector.broadcast %533 : vector<8x1xf32> to vector<8x32xf32>
    %535 = arith.mulf %531, %534 : vector<8x32xf32>
    %c6_157 = arith.constant 6 : index
    %c0_158 = arith.constant 0 : index
    %c0_159 = arith.constant 0 : index
    %536 = vector.load %arg27[%c6_157, %c0_158, %c0_159] : memref<8x8x32xf32, #tpu.memory_space<vmem>>, vector<1x8x32xf32>
    %537 = vector.shape_cast %536 : vector<1x8x32xf32> to vector<8x32xf32>
    %538 = vector.shape_cast %499 : vector<8x32xf32> to vector<1x8x32xf32>
    tpu.vector_store %arg27[%c6_157, %c0_158, %c0_159], %538 {strides = array<i32>} : memref<8x8x32xf32, #tpu.memory_space<vmem>>, vector<1x8x32xf32>,
    %c1_160 = arith.constant 1 : index
    %c0_161 = arith.constant 0 : index
    %c0_162 = arith.constant 0 : index
    %539 = vector.load %arg28[%c1_160, %c0_161, %c0_162] : memref<8x8x32xf32, #tpu.memory_space<vmem>>, vector<1x8x32xf32>
    %540 = vector.shape_cast %539 : vector<1x8x32xf32> to vector<8x32xf32>
    %541 = vector.shape_cast %535 : vector<8x32xf32> to vector<1x8x32xf32>
    tpu.vector_store %arg28[%c1_160, %c0_161, %c0_162], %541 {strides = array<i32>} : memref<8x8x32xf32, #tpu.memory_space<vmem>>, vector<1x8x32xf32>,
    %c7_163 = arith.constant 7 : index
    %c0_164 = arith.constant 0 : index
    %c0_165 = arith.constant 0 : index
    %542 = vector.load %arg29[%c7_163, %c0_164, %c0_165] : memref<8x8x96xf32, #tpu.memory_space<vmem>>, vector<1x8x96xf32>
    %543 = vector.shape_cast %542 : vector<1x8x96xf32> to vector<8x96xf32>
    %544 = arith.truncf %499 : vector<8x32xf32> to vector<8x32xbf16>
    %cst_166 = arith.constant dense<0.000000e+00> : vector<8x96xf32>
    %545 = tpu.matmul %544, %18, %cst_166 {dimension_numbers = #tpu.dot_dimension_numbers<[1], [0], [0], [1], [0, 0, 1, 1], [], []>} : vector<8x32xbf16>, vector<32x96xbf16>, vector<8x96xf32> -> vector<8x96xf32>
    %546 = vector.broadcast %19 : vector<1x96xf32> to vector<8x96xf32>
    %547 = arith.addf %545, %546 : vector<8x96xf32>
    %548 = vector.extract_strided_slice %543 {offsets = [0, 0], sizes = [8, 32], strides = [1, 1]} : vector<8x96xf32> to vector<8x32xf32>
    %549 = vector.extract_strided_slice %547 {offsets = [0, 0], sizes = [8, 32], strides = [1, 1]} : vector<8x96xf32> to vector<8x32xf32>
    %550 = arith.addf %548, %549 : vector<8x32xf32>
    %551 = arith.negf %550 : vector<8x32xf32>
    %552 = math.exp %551 : vector<8x32xf32>
    %cst_167 = arith.constant 1.000000e+00 : f32
    %553 = vector.broadcast %cst_167 : f32 to vector<8x32xf32>
    %554 = arith.addf %553, %552 : vector<8x32xf32>
    %555 = arith.divf %553, %554 : vector<8x32xf32>
    %556 = vector.extract_strided_slice %543 {offsets = [0, 32], sizes = [8, 32], strides = [1, 1]} : vector<8x96xf32> to vector<8x32xf32>
    %557 = vector.extract_strided_slice %547 {offsets = [0, 32], sizes = [8, 32], strides = [1, 1]} : vector<8x96xf32> to vector<8x32xf32>
    %558 = arith.addf %556, %557 : vector<8x32xf32>
    %559 = arith.negf %558 : vector<8x32xf32>
    %560 = math.exp %559 : vector<8x32xf32>
    %cst_168 = arith.constant 1.000000e+00 : f32
    %561 = vector.broadcast %cst_168 : f32 to vector<8x32xf32>
    %562 = arith.addf %561, %560 : vector<8x32xf32>
    %563 = arith.divf %561, %562 : vector<8x32xf32>
    %564 = vector.extract_strided_slice %543 {offsets = [0, 64], sizes = [8, 32], strides = [1, 1]} : vector<8x96xf32> to vector<8x32xf32>
    %565 = vector.extract_strided_slice %547 {offsets = [0, 64], sizes = [8, 32], strides = [1, 1]} : vector<8x96xf32> to vector<8x32xf32>
    %566 = arith.mulf %555, %565 : vector<8x32xf32>
    %567 = arith.addf %564, %566 : vector<8x32xf32>
    %568 = math.tanh %567 : vector<8x32xf32>
    %cst_169 = arith.constant 1.000000e+00 : f32
    %569 = vector.broadcast %cst_169 : f32 to vector<8x32xf32>
    %570 = arith.subf %569, %563 : vector<8x32xf32>
    %571 = arith.mulf %570, %568 : vector<8x32xf32>
    %572 = arith.mulf %563, %499 : vector<8x32xf32>
    %573 = arith.addf %571, %572 : vector<8x32xf32>
    %c0_170 = arith.constant 0 : index
    %c0_171 = arith.constant 0 : index
    %c0_172 = arith.constant 0 : index
    %574 = vector.load %arg30[%c0_170, %c0_171, %c0_172] : memref<8x8x96xf32, #tpu.memory_space<vmem>>, vector<1x8x96xf32>
    %575 = vector.shape_cast %574 : vector<1x8x96xf32> to vector<8x96xf32>
    %576 = arith.truncf %535 : vector<8x32xf32> to vector<8x32xbf16>
    %cst_173 = arith.constant dense<0.000000e+00> : vector<8x96xf32>
    %577 = tpu.matmul %576, %20, %cst_173 {dimension_numbers = #tpu.dot_dimension_numbers<[1], [0], [0], [1], [0, 0, 1, 1], [], []>} : vector<8x32xbf16>, vector<32x96xbf16>, vector<8x96xf32> -> vector<8x96xf32>
    %578 = vector.broadcast %21 : vector<1x96xf32> to vector<8x96xf32>
    %579 = arith.addf %577, %578 : vector<8x96xf32>
    %580 = vector.extract_strided_slice %575 {offsets = [0, 0], sizes = [8, 32], strides = [1, 1]} : vector<8x96xf32> to vector<8x32xf32>
    %581 = vector.extract_strided_slice %579 {offsets = [0, 0], sizes = [8, 32], strides = [1, 1]} : vector<8x96xf32> to vector<8x32xf32>
    %582 = arith.addf %580, %581 : vector<8x32xf32>
    %583 = arith.negf %582 : vector<8x32xf32>
    %584 = math.exp %583 : vector<8x32xf32>
    %cst_174 = arith.constant 1.000000e+00 : f32
    %585 = vector.broadcast %cst_174 : f32 to vector<8x32xf32>
    %586 = arith.addf %585, %584 : vector<8x32xf32>
    %587 = arith.divf %585, %586 : vector<8x32xf32>
    %588 = vector.extract_strided_slice %575 {offsets = [0, 32], sizes = [8, 32], strides = [1, 1]} : vector<8x96xf32> to vector<8x32xf32>
    %589 = vector.extract_strided_slice %579 {offsets = [0, 32], sizes = [8, 32], strides = [1, 1]} : vector<8x96xf32> to vector<8x32xf32>
    %590 = arith.addf %588, %589 : vector<8x32xf32>
    %591 = arith.negf %590 : vector<8x32xf32>
    %592 = math.exp %591 : vector<8x32xf32>
    %cst_175 = arith.constant 1.000000e+00 : f32
    %593 = vector.broadcast %cst_175 : f32 to vector<8x32xf32>
    %594 = arith.addf %593, %592 : vector<8x32xf32>
    %595 = arith.divf %593, %594 : vector<8x32xf32>
    %596 = vector.extract_strided_slice %575 {offsets = [0, 64], sizes = [8, 32], strides = [1, 1]} : vector<8x96xf32> to vector<8x32xf32>
    %597 = vector.extract_strided_slice %579 {offsets = [0, 64], sizes = [8, 32], strides = [1, 1]} : vector<8x96xf32> to vector<8x32xf32>
    %598 = arith.mulf %587, %597 : vector<8x32xf32>
    %599 = arith.addf %596, %598 : vector<8x32xf32>
    %600 = math.tanh %599 : vector<8x32xf32>
    %cst_176 = arith.constant 1.000000e+00 : f32
    %601 = vector.broadcast %cst_176 : f32 to vector<8x32xf32>
    %602 = arith.subf %601, %595 : vector<8x32xf32>
    %603 = arith.mulf %602, %600 : vector<8x32xf32>
    %604 = arith.mulf %595, %535 : vector<8x32xf32>
    %605 = arith.addf %603, %604 : vector<8x32xf32>
    %606 = vector.extract_strided_slice %0 {offsets = [0, 0, 0], sizes = [1, 8, 1], strides = [1, 1, 1]} : vector<8x8x1xf32> to vector<1x8x1xf32>
    %607 = vector.shape_cast %606 : vector<1x8x1xf32> to vector<8x1xf32>
    %608 = vector.broadcast %607 : vector<8x1xf32> to vector<8x32xf32>
    %609 = arith.mulf %605, %608 : vector<8x32xf32>
    %c7_177 = arith.constant 7 : index
    %c0_178 = arith.constant 0 : index
    %c0_179 = arith.constant 0 : index
    %610 = vector.load %arg27[%c7_177, %c0_178, %c0_179] : memref<8x8x32xf32, #tpu.memory_space<vmem>>, vector<1x8x32xf32>
    %611 = vector.shape_cast %610 : vector<1x8x32xf32> to vector<8x32xf32>
    %612 = vector.shape_cast %573 : vector<8x32xf32> to vector<1x8x32xf32>
    tpu.vector_store %arg27[%c7_177, %c0_178, %c0_179], %612 {strides = array<i32>} : memref<8x8x32xf32, #tpu.memory_space<vmem>>, vector<1x8x32xf32>,
    %c0_180 = arith.constant 0 : index
    %c0_181 = arith.constant 0 : index
    %c0_182 = arith.constant 0 : index
    %613 = vector.load %arg28[%c0_180, %c0_181, %c0_182] : memref<8x8x32xf32, #tpu.memory_space<vmem>>, vector<1x8x32xf32>
    %614 = vector.shape_cast %613 : vector<1x8x32xf32> to vector<8x32xf32>
    %615 = vector.shape_cast %609 : vector<8x32xf32> to vector<1x8x32xf32>
    tpu.vector_store %arg28[%c0_180, %c0_181, %c0_182], %615 {strides = array<i32>} : memref<8x8x32xf32, #tpu.memory_space<vmem>>, vector<1x8x32xf32>,
    %c0_183 = arith.constant 0 : index
    %c0_184 = arith.constant 0 : index
    %c0_185 = arith.constant 0 : index
    %616 = vector.load %arg27[%c0_183, %c0_184, %c0_185] : memref<8x8x32xf32, #tpu.memory_space<vmem>>, vector<8x8x32xf32>
    %617 = vector.broadcast %0 : vector<8x8x1xf32> to vector<8x8x32xf32>
    %618 = arith.mulf %616, %617 : vector<8x8x32xf32>
    %c0_186 = arith.constant 0 : index
    %c0_187 = arith.constant 0 : index
    %c0_188 = arith.constant 0 : index
    %619 = vector.load %arg27[%c0_186, %c0_187, %c0_188] : memref<8x8x32xf32, #tpu.memory_space<vmem>>, vector<8x8x32xf32>
    tpu.vector_store %arg27[%c0_186, %c0_187, %c0_188], %618 {strides = array<i32>} : memref<8x8x32xf32, #tpu.memory_space<vmem>>, vector<8x8x32xf32>,
    %c0_189 = arith.constant 0 : index
    %c0_190 = arith.constant 0 : index
    %c0_191 = arith.constant 0 : index
    %620 = vector.load %arg27[%c0_189, %c0_190, %c0_191] : memref<8x8x32xf32, #tpu.memory_space<vmem>>, vector<8x8x32xf32>
    %621 = arith.truncf %620 : vector<8x8x32xf32> to vector<8x8x32xbf16>
    %622 = vector.shape_cast %621 : vector<8x8x32xbf16> to vector<64x32xbf16>
    %c0_192 = arith.constant 0 : index
    %c0_193 = arith.constant 0 : index
    %c0_194 = arith.constant 0 : index
    %623 = vector.load %arg28[%c0_192, %c0_193, %c0_194] : memref<8x8x32xf32, #tpu.memory_space<vmem>>, vector<8x8x32xf32>
    %624 = arith.truncf %623 : vector<8x8x32xf32> to vector<8x8x32xbf16>
    %625 = vector.shape_cast %624 : vector<8x8x32xbf16> to vector<64x32xbf16>
    %c0_195 = arith.constant 0 : index
    %c0_196 = arith.constant 0 : index
    %626 = vector.load %arg11[%c0_195, %c0_196] : memref<64x96xbf16, #tpu.memory_space<vmem>>, vector<64x96xbf16>
    %c0_197 = arith.constant 0 : index
    %c0_198 = arith.constant 0 : index
    %627 = vector.load %arg12[%c0_197, %c0_198] : memref<64x96xbf16, #tpu.memory_space<vmem>>, vector<64x96xbf16>
    %628 = vector.extract_strided_slice %626 {offsets = [0, 0], sizes = [32, 96], strides = [1, 1]} : vector<64x96xbf16> to vector<32x96xbf16>
    %cst_199 = arith.constant dense<0.000000e+00> : vector<64x96xf32>
    %629 = tpu.matmul %622, %628, %cst_199 {dimension_numbers = #tpu.dot_dimension_numbers<[1], [0], [0], [1], [0, 0, 1, 1], [], []>} : vector<64x32xbf16>, vector<32x96xbf16>, vector<64x96xf32> -> vector<64x96xf32>
    %630 = vector.extract_strided_slice %626 {offsets = [32, 0], sizes = [32, 96], strides = [1, 1]} : vector<64x96xbf16> to vector<32x96xbf16>
    %cst_200 = arith.constant dense<0.000000e+00> : vector<64x96xf32>
    %631 = tpu.matmul %625, %630, %cst_200 {dimension_numbers = #tpu.dot_dimension_numbers<[1], [0], [0], [1], [0, 0, 1, 1], [], []>} : vector<64x32xbf16>, vector<32x96xbf16>, vector<64x96xf32> -> vector<64x96xf32>
    %632 = arith.addf %629, %631 : vector<64x96xf32>
    %633 = vector.extract_strided_slice %627 {offsets = [0, 0], sizes = [32, 96], strides = [1, 1]} : vector<64x96xbf16> to vector<32x96xbf16>
    %cst_201 = arith.constant dense<0.000000e+00> : vector<64x96xf32>
    %634 = tpu.matmul %622, %633, %cst_201 {dimension_numbers = #tpu.dot_dimension_numbers<[1], [0], [0], [1], [0, 0, 1, 1], [], []>} : vector<64x32xbf16>, vector<32x96xbf16>, vector<64x96xf32> -> vector<64x96xf32>
    %635 = vector.extract_strided_slice %627 {offsets = [32, 0], sizes = [32, 96], strides = [1, 1]} : vector<64x96xbf16> to vector<32x96xbf16>
    %cst_202 = arith.constant dense<0.000000e+00> : vector<64x96xf32>
    %636 = tpu.matmul %625, %635, %cst_202 {dimension_numbers = #tpu.dot_dimension_numbers<[1], [0], [0], [1], [0, 0, 1, 1], [], []>} : vector<64x32xbf16>, vector<32x96xbf16>, vector<64x96xf32> -> vector<64x96xf32>
    %637 = arith.addf %634, %636 : vector<64x96xf32>
    %c0_203 = arith.constant 0 : index
    %c0_204 = arith.constant 0 : index
    %638 = vector.load %arg13[%c0_203, %c0_204] : memref<1x96xf32, #tpu.memory_space<vmem>>, vector<1x96xf32>
    %639 = vector.broadcast %638 : vector<1x96xf32> to vector<64x96xf32>
    %640 = arith.addf %632, %639 : vector<64x96xf32>
    %641 = vector.shape_cast %640 : vector<64x96xf32> to vector<8x8x96xf32>
    %c0_205 = arith.constant 0 : index
    %c0_206 = arith.constant 0 : index
    %c0_207 = arith.constant 0 : index
    %642 = vector.load %arg29[%c0_205, %c0_206, %c0_207] : memref<8x8x96xf32, #tpu.memory_space<vmem>>, vector<8x8x96xf32>
    tpu.vector_store %arg29[%c0_205, %c0_206, %c0_207], %641 {strides = array<i32>} : memref<8x8x96xf32, #tpu.memory_space<vmem>>, vector<8x8x96xf32>,
    %c0_208 = arith.constant 0 : index
    %c0_209 = arith.constant 0 : index
    %643 = vector.load %arg14[%c0_208, %c0_209] : memref<1x96xf32, #tpu.memory_space<vmem>>, vector<1x96xf32>
    %644 = vector.broadcast %643 : vector<1x96xf32> to vector<64x96xf32>
    %645 = arith.addf %637, %644 : vector<64x96xf32>
    %646 = vector.shape_cast %645 : vector<64x96xf32> to vector<8x8x96xf32>
    %c0_210 = arith.constant 0 : index
    %c0_211 = arith.constant 0 : index
    %c0_212 = arith.constant 0 : index
    %647 = vector.load %arg30[%c0_210, %c0_211, %c0_212] : memref<8x8x96xf32, #tpu.memory_space<vmem>>, vector<8x8x96xf32>
    tpu.vector_store %arg30[%c0_210, %c0_211, %c0_212], %646 {strides = array<i32>} : memref<8x8x96xf32, #tpu.memory_space<vmem>>, vector<8x8x96xf32>,
    %c0_213 = arith.constant 0 : index
    %c0_214 = arith.constant 0 : index
    %648 = vector.load %arg15[%c0_213, %c0_214] : memref<32x96xbf16, #tpu.memory_space<vmem>>, vector<32x96xbf16>
    %c0_215 = arith.constant 0 : index
    %c0_216 = arith.constant 0 : index
    %649 = vector.load %arg17[%c0_215, %c0_216] : memref<1x96xf32, #tpu.memory_space<vmem>>, vector<1x96xf32>
    %c0_217 = arith.constant 0 : index
    %c0_218 = arith.constant 0 : index
    %650 = vector.load %arg16[%c0_217, %c0_218] : memref<32x96xbf16, #tpu.memory_space<vmem>>, vector<32x96xbf16>
    %c0_219 = arith.constant 0 : index
    %c0_220 = arith.constant 0 : index
    %651 = vector.load %arg18[%c0_219, %c0_220] : memref<1x96xf32, #tpu.memory_space<vmem>>, vector<1x96xf32>
    %cst_221 = arith.constant 0.000000e+00 : f32
    %652 = vector.broadcast %cst_221 : f32 to vector<8x32xf32>
    %cst_222 = arith.constant 0.000000e+00 : f32
    %653 = vector.broadcast %cst_222 : f32 to vector<8x32xf32>
    %c0_223 = arith.constant 0 : index
    %c0_224 = arith.constant 0 : index
    %c0_225 = arith.constant 0 : index
    %654 = vector.load %arg29[%c0_223, %c0_224, %c0_225] : memref<8x8x96xf32, #tpu.memory_space<vmem>>, vector<1x8x96xf32>
    %655 = vector.shape_cast %654 : vector<1x8x96xf32> to vector<8x96xf32>
    %656 = arith.truncf %652 : vector<8x32xf32> to vector<8x32xbf16>
    %cst_226 = arith.constant dense<0.000000e+00> : vector<8x96xf32>
    %657 = tpu.matmul %656, %648, %cst_226 {dimension_numbers = #tpu.dot_dimension_numbers<[1], [0], [0], [1], [0, 0, 1, 1], [], []>} : vector<8x32xbf16>, vector<32x96xbf16>, vector<8x96xf32> -> vector<8x96xf32>
    %658 = vector.broadcast %649 : vector<1x96xf32> to vector<8x96xf32>
    %659 = arith.addf %657, %658 : vector<8x96xf32>
    %660 = vector.extract_strided_slice %655 {offsets = [0, 0], sizes = [8, 32], strides = [1, 1]} : vector<8x96xf32> to vector<8x32xf32>
    %661 = vector.extract_strided_slice %659 {offsets = [0, 0], sizes = [8, 32], strides = [1, 1]} : vector<8x96xf32> to vector<8x32xf32>
    %662 = arith.addf %660, %661 : vector<8x32xf32>
    %663 = arith.negf %662 : vector<8x32xf32>
    %664 = math.exp %663 : vector<8x32xf32>
    %cst_227 = arith.constant 1.000000e+00 : f32
    %665 = vector.broadcast %cst_227 : f32 to vector<8x32xf32>
    %666 = arith.addf %665, %664 : vector<8x32xf32>
    %667 = arith.divf %665, %666 : vector<8x32xf32>
    %668 = vector.extract_strided_slice %655 {offsets = [0, 32], sizes = [8, 32], strides = [1, 1]} : vector<8x96xf32> to vector<8x32xf32>
    %669 = vector.extract_strided_slice %659 {offsets = [0, 32], sizes = [8, 32], strides = [1, 1]} : vector<8x96xf32> to vector<8x32xf32>
    %670 = arith.addf %668, %669 : vector<8x32xf32>
    %671 = arith.negf %670 : vector<8x32xf32>
    %672 = math.exp %671 : vector<8x32xf32>
    %cst_228 = arith.constant 1.000000e+00 : f32
    %673 = vector.broadcast %cst_228 : f32 to vector<8x32xf32>
    %674 = arith.addf %673, %672 : vector<8x32xf32>
    %675 = arith.divf %673, %674 : vector<8x32xf32>
    %676 = vector.extract_strided_slice %655 {offsets = [0, 64], sizes = [8, 32], strides = [1, 1]} : vector<8x96xf32> to vector<8x32xf32>
    %677 = vector.extract_strided_slice %659 {offsets = [0, 64], sizes = [8, 32], strides = [1, 1]} : vector<8x96xf32> to vector<8x32xf32>
    %678 = arith.mulf %667, %677 : vector<8x32xf32>
    %679 = arith.addf %676, %678 : vector<8x32xf32>
    %680 = math.tanh %679 : vector<8x32xf32>
    %cst_229 = arith.constant 1.000000e+00 : f32
    %681 = vector.broadcast %cst_229 : f32 to vector<8x32xf32>
    %682 = arith.subf %681, %675 : vector<8x32xf32>
    %683 = arith.mulf %682, %680 : vector<8x32xf32>
    %684 = arith.mulf %675, %652 : vector<8x32xf32>
    %685 = arith.addf %683, %684 : vector<8x32xf32>
    %c7_230 = arith.constant 7 : index
    %c0_231 = arith.constant 0 : index
    %c0_232 = arith.constant 0 : index
    %686 = vector.load %arg30[%c7_230, %c0_231, %c0_232] : memref<8x8x96xf32, #tpu.memory_space<vmem>>, vector<1x8x96xf32>
    %687 = vector.shape_cast %686 : vector<1x8x96xf32> to vector<8x96xf32>
    %688 = arith.truncf %653 : vector<8x32xf32> to vector<8x32xbf16>
    %cst_233 = arith.constant dense<0.000000e+00> : vector<8x96xf32>
    %689 = tpu.matmul %688, %650, %cst_233 {dimension_numbers = #tpu.dot_dimension_numbers<[1], [0], [0], [1], [0, 0, 1, 1], [], []>} : vector<8x32xbf16>, vector<32x96xbf16>, vector<8x96xf32> -> vector<8x96xf32>
    %690 = vector.broadcast %651 : vector<1x96xf32> to vector<8x96xf32>
    %691 = arith.addf %689, %690 : vector<8x96xf32>
    %692 = vector.extract_strided_slice %687 {offsets = [0, 0], sizes = [8, 32], strides = [1, 1]} : vector<8x96xf32> to vector<8x32xf32>
    %693 = vector.extract_strided_slice %691 {offsets = [0, 0], sizes = [8, 32], strides = [1, 1]} : vector<8x96xf32> to vector<8x32xf32>
    %694 = arith.addf %692, %693 : vector<8x32xf32>
    %695 = arith.negf %694 : vector<8x32xf32>
    %696 = math.exp %695 : vector<8x32xf32>
    %cst_234 = arith.constant 1.000000e+00 : f32
    %697 = vector.broadcast %cst_234 : f32 to vector<8x32xf32>
    %698 = arith.addf %697, %696 : vector<8x32xf32>
    %699 = arith.divf %697, %698 : vector<8x32xf32>
    %700 = vector.extract_strided_slice %687 {offsets = [0, 32], sizes = [8, 32], strides = [1, 1]} : vector<8x96xf32> to vector<8x32xf32>
    %701 = vector.extract_strided_slice %691 {offsets = [0, 32], sizes = [8, 32], strides = [1, 1]} : vector<8x96xf32> to vector<8x32xf32>
    %702 = arith.addf %700, %701 : vector<8x32xf32>
    %703 = arith.negf %702 : vector<8x32xf32>
    %704 = math.exp %703 : vector<8x32xf32>
    %cst_235 = arith.constant 1.000000e+00 : f32
    %705 = vector.broadcast %cst_235 : f32 to vector<8x32xf32>
    %706 = arith.addf %705, %704 : vector<8x32xf32>
    %707 = arith.divf %705, %706 : vector<8x32xf32>
    %708 = vector.extract_strided_slice %687 {offsets = [0, 64], sizes = [8, 32], strides = [1, 1]} : vector<8x96xf32> to vector<8x32xf32>
    %709 = vector.extract_strided_slice %691 {offsets = [0, 64], sizes = [8, 32], strides = [1, 1]} : vector<8x96xf32> to vector<8x32xf32>
    %710 = arith.mulf %699, %709 : vector<8x32xf32>
    %711 = arith.addf %708, %710 : vector<8x32xf32>
    %712 = math.tanh %711 : vector<8x32xf32>
    %cst_236 = arith.constant 1.000000e+00 : f32
    %713 = vector.broadcast %cst_236 : f32 to vector<8x32xf32>
    %714 = arith.subf %713, %707 : vector<8x32xf32>
    %715 = arith.mulf %714, %712 : vector<8x32xf32>
    %716 = arith.mulf %707, %653 : vector<8x32xf32>
    %717 = arith.addf %715, %716 : vector<8x32xf32>
    %718 = vector.extract_strided_slice %0 {offsets = [7, 0, 0], sizes = [1, 8, 1], strides = [1, 1, 1]} : vector<8x8x1xf32> to vector<1x8x1xf32>
    %719 = vector.shape_cast %718 : vector<1x8x1xf32> to vector<8x1xf32>
    %720 = vector.broadcast %719 : vector<8x1xf32> to vector<8x32xf32>
    %721 = arith.mulf %717, %720 : vector<8x32xf32>
    %c0_237 = arith.constant 0 : index
    %c0_238 = arith.constant 0 : index
    %c0_239 = arith.constant 0 : index
    %722 = vector.load %arg27[%c0_237, %c0_238, %c0_239] : memref<8x8x32xf32, #tpu.memory_space<vmem>>, vector<1x8x32xf32>
    %723 = vector.shape_cast %722 : vector<1x8x32xf32> to vector<8x32xf32>
    %724 = vector.shape_cast %685 : vector<8x32xf32> to vector<1x8x32xf32>
    tpu.vector_store %arg27[%c0_237, %c0_238, %c0_239], %724 {strides = array<i32>} : memref<8x8x32xf32, #tpu.memory_space<vmem>>, vector<1x8x32xf32>,
    %c7_240 = arith.constant 7 : index
    %c0_241 = arith.constant 0 : index
    %c0_242 = arith.constant 0 : index
    %725 = vector.load %arg28[%c7_240, %c0_241, %c0_242] : memref<8x8x32xf32, #tpu.memory_space<vmem>>, vector<1x8x32xf32>
    %726 = vector.shape_cast %725 : vector<1x8x32xf32> to vector<8x32xf32>
    %727 = vector.shape_cast %721 : vector<8x32xf32> to vector<1x8x32xf32>
    tpu.vector_store %arg28[%c7_240, %c0_241, %c0_242], %727 {strides = array<i32>} : memref<8x8x32xf32, #tpu.memory_space<vmem>>, vector<1x8x32xf32>,
    %c1_243 = arith.constant 1 : index
    %c0_244 = arith.constant 0 : index
    %c0_245 = arith.constant 0 : index
    %728 = vector.load %arg29[%c1_243, %c0_244, %c0_245] : memref<8x8x96xf32, #tpu.memory_space<vmem>>, vector<1x8x96xf32>
    %729 = vector.shape_cast %728 : vector<1x8x96xf32> to vector<8x96xf32>
    %730 = arith.truncf %685 : vector<8x32xf32> to vector<8x32xbf16>
    %cst_246 = arith.constant dense<0.000000e+00> : vector<8x96xf32>
    %731 = tpu.matmul %730, %648, %cst_246 {dimension_numbers = #tpu.dot_dimension_numbers<[1], [0], [0], [1], [0, 0, 1, 1], [], []>} : vector<8x32xbf16>, vector<32x96xbf16>, vector<8x96xf32> -> vector<8x96xf32>
    %732 = vector.broadcast %649 : vector<1x96xf32> to vector<8x96xf32>
    %733 = arith.addf %731, %732 : vector<8x96xf32>
    %734 = vector.extract_strided_slice %729 {offsets = [0, 0], sizes = [8, 32], strides = [1, 1]} : vector<8x96xf32> to vector<8x32xf32>
    %735 = vector.extract_strided_slice %733 {offsets = [0, 0], sizes = [8, 32], strides = [1, 1]} : vector<8x96xf32> to vector<8x32xf32>
    %736 = arith.addf %734, %735 : vector<8x32xf32>
    %737 = arith.negf %736 : vector<8x32xf32>
    %738 = math.exp %737 : vector<8x32xf32>
    %cst_247 = arith.constant 1.000000e+00 : f32
    %739 = vector.broadcast %cst_247 : f32 to vector<8x32xf32>
    %740 = arith.addf %739, %738 : vector<8x32xf32>
    %741 = arith.divf %739, %740 : vector<8x32xf32>
    %742 = vector.extract_strided_slice %729 {offsets = [0, 32], sizes = [8, 32], strides = [1, 1]} : vector<8x96xf32> to vector<8x32xf32>
    %743 = vector.extract_strided_slice %733 {offsets = [0, 32], sizes = [8, 32], strides = [1, 1]} : vector<8x96xf32> to vector<8x32xf32>
    %744 = arith.addf %742, %743 : vector<8x32xf32>
    %745 = arith.negf %744 : vector<8x32xf32>
    %746 = math.exp %745 : vector<8x32xf32>
    %cst_248 = arith.constant 1.000000e+00 : f32
    %747 = vector.broadcast %cst_248 : f32 to vector<8x32xf32>
    %748 = arith.addf %747, %746 : vector<8x32xf32>
    %749 = arith.divf %747, %748 : vector<8x32xf32>
    %750 = vector.extract_strided_slice %729 {offsets = [0, 64], sizes = [8, 32], strides = [1, 1]} : vector<8x96xf32> to vector<8x32xf32>
    %751 = vector.extract_strided_slice %733 {offsets = [0, 64], sizes = [8, 32], strides = [1, 1]} : vector<8x96xf32> to vector<8x32xf32>
    %752 = arith.mulf %741, %751 : vector<8x32xf32>
    %753 = arith.addf %750, %752 : vector<8x32xf32>
    %754 = math.tanh %753 : vector<8x32xf32>
    %cst_249 = arith.constant 1.000000e+00 : f32
    %755 = vector.broadcast %cst_249 : f32 to vector<8x32xf32>
    %756 = arith.subf %755, %749 : vector<8x32xf32>
    %757 = arith.mulf %756, %754 : vector<8x32xf32>
    %758 = arith.mulf %749, %685 : vector<8x32xf32>
    %759 = arith.addf %757, %758 : vector<8x32xf32>
    %c6_250 = arith.constant 6 : index
    %c0_251 = arith.constant 0 : index
    %c0_252 = arith.constant 0 : index
    %760 = vector.load %arg30[%c6_250, %c0_251, %c0_252] : memref<8x8x96xf32, #tpu.memory_space<vmem>>, vector<1x8x96xf32>
    %761 = vector.shape_cast %760 : vector<1x8x96xf32> to vector<8x96xf32>
    %762 = arith.truncf %721 : vector<8x32xf32> to vector<8x32xbf16>
    %cst_253 = arith.constant dense<0.000000e+00> : vector<8x96xf32>
    %763 = tpu.matmul %762, %650, %cst_253 {dimension_numbers = #tpu.dot_dimension_numbers<[1], [0], [0], [1], [0, 0, 1, 1], [], []>} : vector<8x32xbf16>, vector<32x96xbf16>, vector<8x96xf32> -> vector<8x96xf32>
    %764 = vector.broadcast %651 : vector<1x96xf32> to vector<8x96xf32>
    %765 = arith.addf %763, %764 : vector<8x96xf32>
    %766 = vector.extract_strided_slice %761 {offsets = [0, 0], sizes = [8, 32], strides = [1, 1]} : vector<8x96xf32> to vector<8x32xf32>
    %767 = vector.extract_strided_slice %765 {offsets = [0, 0], sizes = [8, 32], strides = [1, 1]} : vector<8x96xf32> to vector<8x32xf32>
    %768 = arith.addf %766, %767 : vector<8x32xf32>
    %769 = arith.negf %768 : vector<8x32xf32>
    %770 = math.exp %769 : vector<8x32xf32>
    %cst_254 = arith.constant 1.000000e+00 : f32
    %771 = vector.broadcast %cst_254 : f32 to vector<8x32xf32>
    %772 = arith.addf %771, %770 : vector<8x32xf32>
    %773 = arith.divf %771, %772 : vector<8x32xf32>
    %774 = vector.extract_strided_slice %761 {offsets = [0, 32], sizes = [8, 32], strides = [1, 1]} : vector<8x96xf32> to vector<8x32xf32>
    %775 = vector.extract_strided_slice %765 {offsets = [0, 32], sizes = [8, 32], strides = [1, 1]} : vector<8x96xf32> to vector<8x32xf32>
    %776 = arith.addf %774, %775 : vector<8x32xf32>
    %777 = arith.negf %776 : vector<8x32xf32>
    %778 = math.exp %777 : vector<8x32xf32>
    %cst_255 = arith.constant 1.000000e+00 : f32
    %779 = vector.broadcast %cst_255 : f32 to vector<8x32xf32>
    %780 = arith.addf %779, %778 : vector<8x32xf32>
    %781 = arith.divf %779, %780 : vector<8x32xf32>
    %782 = vector.extract_strided_slice %761 {offsets = [0, 64], sizes = [8, 32], strides = [1, 1]} : vector<8x96xf32> to vector<8x32xf32>
    %783 = vector.extract_strided_slice %765 {offsets = [0, 64], sizes = [8, 32], strides = [1, 1]} : vector<8x96xf32> to vector<8x32xf32>
    %784 = arith.mulf %773, %783 : vector<8x32xf32>
    %785 = arith.addf %782, %784 : vector<8x32xf32>
    %786 = math.tanh %785 : vector<8x32xf32>
    %cst_256 = arith.constant 1.000000e+00 : f32
    %787 = vector.broadcast %cst_256 : f32 to vector<8x32xf32>
    %788 = arith.subf %787, %781 : vector<8x32xf32>
    %789 = arith.mulf %788, %786 : vector<8x32xf32>
    %790 = arith.mulf %781, %721 : vector<8x32xf32>
    %791 = arith.addf %789, %790 : vector<8x32xf32>
    %792 = vector.extract_strided_slice %0 {offsets = [6, 0, 0], sizes = [1, 8, 1], strides = [1, 1, 1]} : vector<8x8x1xf32> to vector<1x8x1xf32>
    %793 = vector.shape_cast %792 : vector<1x8x1xf32> to vector<8x1xf32>
    %794 = vector.broadcast %793 : vector<8x1xf32> to vector<8x32xf32>
    %795 = arith.mulf %791, %794 : vector<8x32xf32>
    %c1_257 = arith.constant 1 : index
    %c0_258 = arith.constant 0 : index
    %c0_259 = arith.constant 0 : index
    %796 = vector.load %arg27[%c1_257, %c0_258, %c0_259] : memref<8x8x32xf32, #tpu.memory_space<vmem>>, vector<1x8x32xf32>
    %797 = vector.shape_cast %796 : vector<1x8x32xf32> to vector<8x32xf32>
    %798 = vector.shape_cast %759 : vector<8x32xf32> to vector<1x8x32xf32>
    tpu.vector_store %arg27[%c1_257, %c0_258, %c0_259], %798 {strides = array<i32>} : memref<8x8x32xf32, #tpu.memory_space<vmem>>, vector<1x8x32xf32>,
    %c6_260 = arith.constant 6 : index
    %c0_261 = arith.constant 0 : index
    %c0_262 = arith.constant 0 : index
    %799 = vector.load %arg28[%c6_260, %c0_261, %c0_262] : memref<8x8x32xf32, #tpu.memory_space<vmem>>, vector<1x8x32xf32>
    %800 = vector.shape_cast %799 : vector<1x8x32xf32> to vector<8x32xf32>
    %801 = vector.shape_cast %795 : vector<8x32xf32> to vector<1x8x32xf32>
    tpu.vector_store %arg28[%c6_260, %c0_261, %c0_262], %801 {strides = array<i32>} : memref<8x8x32xf32, #tpu.memory_space<vmem>>, vector<1x8x32xf32>,
    %c2_263 = arith.constant 2 : index
    %c0_264 = arith.constant 0 : index
    %c0_265 = arith.constant 0 : index
    %802 = vector.load %arg29[%c2_263, %c0_264, %c0_265] : memref<8x8x96xf32, #tpu.memory_space<vmem>>, vector<1x8x96xf32>
    %803 = vector.shape_cast %802 : vector<1x8x96xf32> to vector<8x96xf32>
    %804 = arith.truncf %759 : vector<8x32xf32> to vector<8x32xbf16>
    %cst_266 = arith.constant dense<0.000000e+00> : vector<8x96xf32>
    %805 = tpu.matmul %804, %648, %cst_266 {dimension_numbers = #tpu.dot_dimension_numbers<[1], [0], [0], [1], [0, 0, 1, 1], [], []>} : vector<8x32xbf16>, vector<32x96xbf16>, vector<8x96xf32> -> vector<8x96xf32>
    %806 = vector.broadcast %649 : vector<1x96xf32> to vector<8x96xf32>
    %807 = arith.addf %805, %806 : vector<8x96xf32>
    %808 = vector.extract_strided_slice %803 {offsets = [0, 0], sizes = [8, 32], strides = [1, 1]} : vector<8x96xf32> to vector<8x32xf32>
    %809 = vector.extract_strided_slice %807 {offsets = [0, 0], sizes = [8, 32], strides = [1, 1]} : vector<8x96xf32> to vector<8x32xf32>
    %810 = arith.addf %808, %809 : vector<8x32xf32>
    %811 = arith.negf %810 : vector<8x32xf32>
    %812 = math.exp %811 : vector<8x32xf32>
    %cst_267 = arith.constant 1.000000e+00 : f32
    %813 = vector.broadcast %cst_267 : f32 to vector<8x32xf32>
    %814 = arith.addf %813, %812 : vector<8x32xf32>
    %815 = arith.divf %813, %814 : vector<8x32xf32>
    %816 = vector.extract_strided_slice %803 {offsets = [0, 32], sizes = [8, 32], strides = [1, 1]} : vector<8x96xf32> to vector<8x32xf32>
    %817 = vector.extract_strided_slice %807 {offsets = [0, 32], sizes = [8, 32], strides = [1, 1]} : vector<8x96xf32> to vector<8x32xf32>
    %818 = arith.addf %816, %817 : vector<8x32xf32>
    %819 = arith.negf %818 : vector<8x32xf32>
    %820 = math.exp %819 : vector<8x32xf32>
    %cst_268 = arith.constant 1.000000e+00 : f32
    %821 = vector.broadcast %cst_268 : f32 to vector<8x32xf32>
    %822 = arith.addf %821, %820 : vector<8x32xf32>
    %823 = arith.divf %821, %822 : vector<8x32xf32>
    %824 = vector.extract_strided_slice %803 {offsets = [0, 64], sizes = [8, 32], strides = [1, 1]} : vector<8x96xf32> to vector<8x32xf32>
    %825 = vector.extract_strided_slice %807 {offsets = [0, 64], sizes = [8, 32], strides = [1, 1]} : vector<8x96xf32> to vector<8x32xf32>
    %826 = arith.mulf %815, %825 : vector<8x32xf32>
    %827 = arith.addf %824, %826 : vector<8x32xf32>
    %828 = math.tanh %827 : vector<8x32xf32>
    %cst_269 = arith.constant 1.000000e+00 : f32
    %829 = vector.broadcast %cst_269 : f32 to vector<8x32xf32>
    %830 = arith.subf %829, %823 : vector<8x32xf32>
    %831 = arith.mulf %830, %828 : vector<8x32xf32>
    %832 = arith.mulf %823, %759 : vector<8x32xf32>
    %833 = arith.addf %831, %832 : vector<8x32xf32>
    %c5_270 = arith.constant 5 : index
    %c0_271 = arith.constant 0 : index
    %c0_272 = arith.constant 0 : index
    %834 = vector.load %arg30[%c5_270, %c0_271, %c0_272] : memref<8x8x96xf32, #tpu.memory_space<vmem>>, vector<1x8x96xf32>
    %835 = vector.shape_cast %834 : vector<1x8x96xf32> to vector<8x96xf32>
    %836 = arith.truncf %795 : vector<8x32xf32> to vector<8x32xbf16>
    %cst_273 = arith.constant dense<0.000000e+00> : vector<8x96xf32>
    %837 = tpu.matmul %836, %650, %cst_273 {dimension_numbers = #tpu.dot_dimension_numbers<[1], [0], [0], [1], [0, 0, 1, 1], [], []>} : vector<8x32xbf16>, vector<32x96xbf16>, vector<8x96xf32> -> vector<8x96xf32>
    %838 = vector.broadcast %651 : vector<1x96xf32> to vector<8x96xf32>
    %839 = arith.addf %837, %838 : vector<8x96xf32>
    %840 = vector.extract_strided_slice %835 {offsets = [0, 0], sizes = [8, 32], strides = [1, 1]} : vector<8x96xf32> to vector<8x32xf32>
    %841 = vector.extract_strided_slice %839 {offsets = [0, 0], sizes = [8, 32], strides = [1, 1]} : vector<8x96xf32> to vector<8x32xf32>
    %842 = arith.addf %840, %841 : vector<8x32xf32>
    %843 = arith.negf %842 : vector<8x32xf32>
    %844 = math.exp %843 : vector<8x32xf32>
    %cst_274 = arith.constant 1.000000e+00 : f32
    %845 = vector.broadcast %cst_274 : f32 to vector<8x32xf32>
    %846 = arith.addf %845, %844 : vector<8x32xf32>
    %847 = arith.divf %845, %846 : vector<8x32xf32>
    %848 = vector.extract_strided_slice %835 {offsets = [0, 32], sizes = [8, 32], strides = [1, 1]} : vector<8x96xf32> to vector<8x32xf32>
    %849 = vector.extract_strided_slice %839 {offsets = [0, 32], sizes = [8, 32], strides = [1, 1]} : vector<8x96xf32> to vector<8x32xf32>
    %850 = arith.addf %848, %849 : vector<8x32xf32>
    %851 = arith.negf %850 : vector<8x32xf32>
    %852 = math.exp %851 : vector<8x32xf32>
    %cst_275 = arith.constant 1.000000e+00 : f32
    %853 = vector.broadcast %cst_275 : f32 to vector<8x32xf32>
    %854 = arith.addf %853, %852 : vector<8x32xf32>
    %855 = arith.divf %853, %854 : vector<8x32xf32>
    %856 = vector.extract_strided_slice %835 {offsets = [0, 64], sizes = [8, 32], strides = [1, 1]} : vector<8x96xf32> to vector<8x32xf32>
    %857 = vector.extract_strided_slice %839 {offsets = [0, 64], sizes = [8, 32], strides = [1, 1]} : vector<8x96xf32> to vector<8x32xf32>
    %858 = arith.mulf %847, %857 : vector<8x32xf32>
    %859 = arith.addf %856, %858 : vector<8x32xf32>
    %860 = math.tanh %859 : vector<8x32xf32>
    %cst_276 = arith.constant 1.000000e+00 : f32
    %861 = vector.broadcast %cst_276 : f32 to vector<8x32xf32>
    %862 = arith.subf %861, %855 : vector<8x32xf32>
    %863 = arith.mulf %862, %860 : vector<8x32xf32>
    %864 = arith.mulf %855, %795 : vector<8x32xf32>
    %865 = arith.addf %863, %864 : vector<8x32xf32>
    %866 = vector.extract_strided_slice %0 {offsets = [5, 0, 0], sizes = [1, 8, 1], strides = [1, 1, 1]} : vector<8x8x1xf32> to vector<1x8x1xf32>
    %867 = vector.shape_cast %866 : vector<1x8x1xf32> to vector<8x1xf32>
    %868 = vector.broadcast %867 : vector<8x1xf32> to vector<8x32xf32>
    %869 = arith.mulf %865, %868 : vector<8x32xf32>
    %c2_277 = arith.constant 2 : index
    %c0_278 = arith.constant 0 : index
    %c0_279 = arith.constant 0 : index
    %870 = vector.load %arg27[%c2_277, %c0_278, %c0_279] : memref<8x8x32xf32, #tpu.memory_space<vmem>>, vector<1x8x32xf32>
    %871 = vector.shape_cast %870 : vector<1x8x32xf32> to vector<8x32xf32>
    %872 = vector.shape_cast %833 : vector<8x32xf32> to vector<1x8x32xf32>
    tpu.vector_store %arg27[%c2_277, %c0_278, %c0_279], %872 {strides = array<i32>} : memref<8x8x32xf32, #tpu.memory_space<vmem>>, vector<1x8x32xf32>,
    %c5_280 = arith.constant 5 : index
    %c0_281 = arith.constant 0 : index
    %c0_282 = arith.constant 0 : index
    %873 = vector.load %arg28[%c5_280, %c0_281, %c0_282] : memref<8x8x32xf32, #tpu.memory_space<vmem>>, vector<1x8x32xf32>
    %874 = vector.shape_cast %873 : vector<1x8x32xf32> to vector<8x32xf32>
    %875 = vector.shape_cast %869 : vector<8x32xf32> to vector<1x8x32xf32>
    tpu.vector_store %arg28[%c5_280, %c0_281, %c0_282], %875 {strides = array<i32>} : memref<8x8x32xf32, #tpu.memory_space<vmem>>, vector<1x8x32xf32>,
    %c3_283 = arith.constant 3 : index
    %c0_284 = arith.constant 0 : index
    %c0_285 = arith.constant 0 : index
    %876 = vector.load %arg29[%c3_283, %c0_284, %c0_285] : memref<8x8x96xf32, #tpu.memory_space<vmem>>, vector<1x8x96xf32>
    %877 = vector.shape_cast %876 : vector<1x8x96xf32> to vector<8x96xf32>
    %878 = arith.truncf %833 : vector<8x32xf32> to vector<8x32xbf16>
    %cst_286 = arith.constant dense<0.000000e+00> : vector<8x96xf32>
    %879 = tpu.matmul %878, %648, %cst_286 {dimension_numbers = #tpu.dot_dimension_numbers<[1], [0], [0], [1], [0, 0, 1, 1], [], []>} : vector<8x32xbf16>, vector<32x96xbf16>, vector<8x96xf32> -> vector<8x96xf32>
    %880 = vector.broadcast %649 : vector<1x96xf32> to vector<8x96xf32>
    %881 = arith.addf %879, %880 : vector<8x96xf32>
    %882 = vector.extract_strided_slice %877 {offsets = [0, 0], sizes = [8, 32], strides = [1, 1]} : vector<8x96xf32> to vector<8x32xf32>
    %883 = vector.extract_strided_slice %881 {offsets = [0, 0], sizes = [8, 32], strides = [1, 1]} : vector<8x96xf32> to vector<8x32xf32>
    %884 = arith.addf %882, %883 : vector<8x32xf32>
    %885 = arith.negf %884 : vector<8x32xf32>
    %886 = math.exp %885 : vector<8x32xf32>
    %cst_287 = arith.constant 1.000000e+00 : f32
    %887 = vector.broadcast %cst_287 : f32 to vector<8x32xf32>
    %888 = arith.addf %887, %886 : vector<8x32xf32>
    %889 = arith.divf %887, %888 : vector<8x32xf32>
    %890 = vector.extract_strided_slice %877 {offsets = [0, 32], sizes = [8, 32], strides = [1, 1]} : vector<8x96xf32> to vector<8x32xf32>
    %891 = vector.extract_strided_slice %881 {offsets = [0, 32], sizes = [8, 32], strides = [1, 1]} : vector<8x96xf32> to vector<8x32xf32>
    %892 = arith.addf %890, %891 : vector<8x32xf32>
    %893 = arith.negf %892 : vector<8x32xf32>
    %894 = math.exp %893 : vector<8x32xf32>
    %cst_288 = arith.constant 1.000000e+00 : f32
    %895 = vector.broadcast %cst_288 : f32 to vector<8x32xf32>
    %896 = arith.addf %895, %894 : vector<8x32xf32>
    %897 = arith.divf %895, %896 : vector<8x32xf32>
    %898 = vector.extract_strided_slice %877 {offsets = [0, 64], sizes = [8, 32], strides = [1, 1]} : vector<8x96xf32> to vector<8x32xf32>
    %899 = vector.extract_strided_slice %881 {offsets = [0, 64], sizes = [8, 32], strides = [1, 1]} : vector<8x96xf32> to vector<8x32xf32>
    %900 = arith.mulf %889, %899 : vector<8x32xf32>
    %901 = arith.addf %898, %900 : vector<8x32xf32>
    %902 = math.tanh %901 : vector<8x32xf32>
    %cst_289 = arith.constant 1.000000e+00 : f32
    %903 = vector.broadcast %cst_289 : f32 to vector<8x32xf32>
    %904 = arith.subf %903, %897 : vector<8x32xf32>
    %905 = arith.mulf %904, %902 : vector<8x32xf32>
    %906 = arith.mulf %897, %833 : vector<8x32xf32>
    %907 = arith.addf %905, %906 : vector<8x32xf32>
    %c4_290 = arith.constant 4 : index
    %c0_291 = arith.constant 0 : index
    %c0_292 = arith.constant 0 : index
    %908 = vector.load %arg30[%c4_290, %c0_291, %c0_292] : memref<8x8x96xf32, #tpu.memory_space<vmem>>, vector<1x8x96xf32>
    %909 = vector.shape_cast %908 : vector<1x8x96xf32> to vector<8x96xf32>
    %910 = arith.truncf %869 : vector<8x32xf32> to vector<8x32xbf16>
    %cst_293 = arith.constant dense<0.000000e+00> : vector<8x96xf32>
    %911 = tpu.matmul %910, %650, %cst_293 {dimension_numbers = #tpu.dot_dimension_numbers<[1], [0], [0], [1], [0, 0, 1, 1], [], []>} : vector<8x32xbf16>, vector<32x96xbf16>, vector<8x96xf32> -> vector<8x96xf32>
    %912 = vector.broadcast %651 : vector<1x96xf32> to vector<8x96xf32>
    %913 = arith.addf %911, %912 : vector<8x96xf32>
    %914 = vector.extract_strided_slice %909 {offsets = [0, 0], sizes = [8, 32], strides = [1, 1]} : vector<8x96xf32> to vector<8x32xf32>
    %915 = vector.extract_strided_slice %913 {offsets = [0, 0], sizes = [8, 32], strides = [1, 1]} : vector<8x96xf32> to vector<8x32xf32>
    %916 = arith.addf %914, %915 : vector<8x32xf32>
    %917 = arith.negf %916 : vector<8x32xf32>
    %918 = math.exp %917 : vector<8x32xf32>
    %cst_294 = arith.constant 1.000000e+00 : f32
    %919 = vector.broadcast %cst_294 : f32 to vector<8x32xf32>
    %920 = arith.addf %919, %918 : vector<8x32xf32>
    %921 = arith.divf %919, %920 : vector<8x32xf32>
    %922 = vector.extract_strided_slice %909 {offsets = [0, 32], sizes = [8, 32], strides = [1, 1]} : vector<8x96xf32> to vector<8x32xf32>
    %923 = vector.extract_strided_slice %913 {offsets = [0, 32], sizes = [8, 32], strides = [1, 1]} : vector<8x96xf32> to vector<8x32xf32>
    %924 = arith.addf %922, %923 : vector<8x32xf32>
    %925 = arith.negf %924 : vector<8x32xf32>
    %926 = math.exp %925 : vector<8x32xf32>
    %cst_295 = arith.constant 1.000000e+00 : f32
    %927 = vector.broadcast %cst_295 : f32 to vector<8x32xf32>
    %928 = arith.addf %927, %926 : vector<8x32xf32>
    %929 = arith.divf %927, %928 : vector<8x32xf32>
    %930 = vector.extract_strided_slice %909 {offsets = [0, 64], sizes = [8, 32], strides = [1, 1]} : vector<8x96xf32> to vector<8x32xf32>
    %931 = vector.extract_strided_slice %913 {offsets = [0, 64], sizes = [8, 32], strides = [1, 1]} : vector<8x96xf32> to vector<8x32xf32>
    %932 = arith.mulf %921, %931 : vector<8x32xf32>
    %933 = arith.addf %930, %932 : vector<8x32xf32>
    %934 = math.tanh %933 : vector<8x32xf32>
    %cst_296 = arith.constant 1.000000e+00 : f32
    %935 = vector.broadcast %cst_296 : f32 to vector<8x32xf32>
    %936 = arith.subf %935, %929 : vector<8x32xf32>
    %937 = arith.mulf %936, %934 : vector<8x32xf32>
    %938 = arith.mulf %929, %869 : vector<8x32xf32>
    %939 = arith.addf %937, %938 : vector<8x32xf32>
    %940 = vector.extract_strided_slice %0 {offsets = [4, 0, 0], sizes = [1, 8, 1], strides = [1, 1, 1]} : vector<8x8x1xf32> to vector<1x8x1xf32>
    %941 = vector.shape_cast %940 : vector<1x8x1xf32> to vector<8x1xf32>
    %942 = vector.broadcast %941 : vector<8x1xf32> to vector<8x32xf32>
    %943 = arith.mulf %939, %942 : vector<8x32xf32>
    %c3_297 = arith.constant 3 : index
    %c0_298 = arith.constant 0 : index
    %c0_299 = arith.constant 0 : index
    %944 = vector.load %arg27[%c3_297, %c0_298, %c0_299] : memref<8x8x32xf32, #tpu.memory_space<vmem>>, vector<1x8x32xf32>
    %945 = vector.shape_cast %944 : vector<1x8x32xf32> to vector<8x32xf32>
    %946 = vector.shape_cast %907 : vector<8x32xf32> to vector<1x8x32xf32>
    tpu.vector_store %arg27[%c3_297, %c0_298, %c0_299], %946 {strides = array<i32>} : memref<8x8x32xf32, #tpu.memory_space<vmem>>, vector<1x8x32xf32>,
    %c4_300 = arith.constant 4 : index
    %c0_301 = arith.constant 0 : index
    %c0_302 = arith.constant 0 : index
    %947 = vector.load %arg28[%c4_300, %c0_301, %c0_302] : memref<8x8x32xf32, #tpu.memory_space<vmem>>, vector<1x8x32xf32>
    %948 = vector.shape_cast %947 : vector<1x8x32xf32> to vector<8x32xf32>
    %949 = vector.shape_cast %943 : vector<8x32xf32> to vector<1x8x32xf32>
    tpu.vector_store %arg28[%c4_300, %c0_301, %c0_302], %949 {strides = array<i32>} : memref<8x8x32xf32, #tpu.memory_space<vmem>>, vector<1x8x32xf32>,
    %c4_303 = arith.constant 4 : index
    %c0_304 = arith.constant 0 : index
    %c0_305 = arith.constant 0 : index
    %950 = vector.load %arg29[%c4_303, %c0_304, %c0_305] : memref<8x8x96xf32, #tpu.memory_space<vmem>>, vector<1x8x96xf32>
    %951 = vector.shape_cast %950 : vector<1x8x96xf32> to vector<8x96xf32>
    %952 = arith.truncf %907 : vector<8x32xf32> to vector<8x32xbf16>
    %cst_306 = arith.constant dense<0.000000e+00> : vector<8x96xf32>
    %953 = tpu.matmul %952, %648, %cst_306 {dimension_numbers = #tpu.dot_dimension_numbers<[1], [0], [0], [1], [0, 0, 1, 1], [], []>} : vector<8x32xbf16>, vector<32x96xbf16>, vector<8x96xf32> -> vector<8x96xf32>
    %954 = vector.broadcast %649 : vector<1x96xf32> to vector<8x96xf32>
    %955 = arith.addf %953, %954 : vector<8x96xf32>
    %956 = vector.extract_strided_slice %951 {offsets = [0, 0], sizes = [8, 32], strides = [1, 1]} : vector<8x96xf32> to vector<8x32xf32>
    %957 = vector.extract_strided_slice %955 {offsets = [0, 0], sizes = [8, 32], strides = [1, 1]} : vector<8x96xf32> to vector<8x32xf32>
    %958 = arith.addf %956, %957 : vector<8x32xf32>
    %959 = arith.negf %958 : vector<8x32xf32>
    %960 = math.exp %959 : vector<8x32xf32>
    %cst_307 = arith.constant 1.000000e+00 : f32
    %961 = vector.broadcast %cst_307 : f32 to vector<8x32xf32>
    %962 = arith.addf %961, %960 : vector<8x32xf32>
    %963 = arith.divf %961, %962 : vector<8x32xf32>
    %964 = vector.extract_strided_slice %951 {offsets = [0, 32], sizes = [8, 32], strides = [1, 1]} : vector<8x96xf32> to vector<8x32xf32>
    %965 = vector.extract_strided_slice %955 {offsets = [0, 32], sizes = [8, 32], strides = [1, 1]} : vector<8x96xf32> to vector<8x32xf32>
    %966 = arith.addf %964, %965 : vector<8x32xf32>
    %967 = arith.negf %966 : vector<8x32xf32>
    %968 = math.exp %967 : vector<8x32xf32>
    %cst_308 = arith.constant 1.000000e+00 : f32
    %969 = vector.broadcast %cst_308 : f32 to vector<8x32xf32>
    %970 = arith.addf %969, %968 : vector<8x32xf32>
    %971 = arith.divf %969, %970 : vector<8x32xf32>
    %972 = vector.extract_strided_slice %951 {offsets = [0, 64], sizes = [8, 32], strides = [1, 1]} : vector<8x96xf32> to vector<8x32xf32>
    %973 = vector.extract_strided_slice %955 {offsets = [0, 64], sizes = [8, 32], strides = [1, 1]} : vector<8x96xf32> to vector<8x32xf32>
    %974 = arith.mulf %963, %973 : vector<8x32xf32>
    %975 = arith.addf %972, %974 : vector<8x32xf32>
    %976 = math.tanh %975 : vector<8x32xf32>
    %cst_309 = arith.constant 1.000000e+00 : f32
    %977 = vector.broadcast %cst_309 : f32 to vector<8x32xf32>
    %978 = arith.subf %977, %971 : vector<8x32xf32>
    %979 = arith.mulf %978, %976 : vector<8x32xf32>
    %980 = arith.mulf %971, %907 : vector<8x32xf32>
    %981 = arith.addf %979, %980 : vector<8x32xf32>
    %c3_310 = arith.constant 3 : index
    %c0_311 = arith.constant 0 : index
    %c0_312 = arith.constant 0 : index
    %982 = vector.load %arg30[%c3_310, %c0_311, %c0_312] : memref<8x8x96xf32, #tpu.memory_space<vmem>>, vector<1x8x96xf32>
    %983 = vector.shape_cast %982 : vector<1x8x96xf32> to vector<8x96xf32>
    %984 = arith.truncf %943 : vector<8x32xf32> to vector<8x32xbf16>
    %cst_313 = arith.constant dense<0.000000e+00> : vector<8x96xf32>
    %985 = tpu.matmul %984, %650, %cst_313 {dimension_numbers = #tpu.dot_dimension_numbers<[1], [0], [0], [1], [0, 0, 1, 1], [], []>} : vector<8x32xbf16>, vector<32x96xbf16>, vector<8x96xf32> -> vector<8x96xf32>
    %986 = vector.broadcast %651 : vector<1x96xf32> to vector<8x96xf32>
    %987 = arith.addf %985, %986 : vector<8x96xf32>
    %988 = vector.extract_strided_slice %983 {offsets = [0, 0], sizes = [8, 32], strides = [1, 1]} : vector<8x96xf32> to vector<8x32xf32>
    %989 = vector.extract_strided_slice %987 {offsets = [0, 0], sizes = [8, 32], strides = [1, 1]} : vector<8x96xf32> to vector<8x32xf32>
    %990 = arith.addf %988, %989 : vector<8x32xf32>
    %991 = arith.negf %990 : vector<8x32xf32>
    %992 = math.exp %991 : vector<8x32xf32>
    %cst_314 = arith.constant 1.000000e+00 : f32
    %993 = vector.broadcast %cst_314 : f32 to vector<8x32xf32>
    %994 = arith.addf %993, %992 : vector<8x32xf32>
    %995 = arith.divf %993, %994 : vector<8x32xf32>
    %996 = vector.extract_strided_slice %983 {offsets = [0, 32], sizes = [8, 32], strides = [1, 1]} : vector<8x96xf32> to vector<8x32xf32>
    %997 = vector.extract_strided_slice %987 {offsets = [0, 32], sizes = [8, 32], strides = [1, 1]} : vector<8x96xf32> to vector<8x32xf32>
    %998 = arith.addf %996, %997 : vector<8x32xf32>
    %999 = arith.negf %998 : vector<8x32xf32>
    %1000 = math.exp %999 : vector<8x32xf32>
    %cst_315 = arith.constant 1.000000e+00 : f32
    %1001 = vector.broadcast %cst_315 : f32 to vector<8x32xf32>
    %1002 = arith.addf %1001, %1000 : vector<8x32xf32>
    %1003 = arith.divf %1001, %1002 : vector<8x32xf32>
    %1004 = vector.extract_strided_slice %983 {offsets = [0, 64], sizes = [8, 32], strides = [1, 1]} : vector<8x96xf32> to vector<8x32xf32>
    %1005 = vector.extract_strided_slice %987 {offsets = [0, 64], sizes = [8, 32], strides = [1, 1]} : vector<8x96xf32> to vector<8x32xf32>
    %1006 = arith.mulf %995, %1005 : vector<8x32xf32>
    %1007 = arith.addf %1004, %1006 : vector<8x32xf32>
    %1008 = math.tanh %1007 : vector<8x32xf32>
    %cst_316 = arith.constant 1.000000e+00 : f32
    %1009 = vector.broadcast %cst_316 : f32 to vector<8x32xf32>
    %1010 = arith.subf %1009, %1003 : vector<8x32xf32>
    %1011 = arith.mulf %1010, %1008 : vector<8x32xf32>
    %1012 = arith.mulf %1003, %943 : vector<8x32xf32>
    %1013 = arith.addf %1011, %1012 : vector<8x32xf32>
    %1014 = vector.extract_strided_slice %0 {offsets = [3, 0, 0], sizes = [1, 8, 1], strides = [1, 1, 1]} : vector<8x8x1xf32> to vector<1x8x1xf32>
    %1015 = vector.shape_cast %1014 : vector<1x8x1xf32> to vector<8x1xf32>
    %1016 = vector.broadcast %1015 : vector<8x1xf32> to vector<8x32xf32>
    %1017 = arith.mulf %1013, %1016 : vector<8x32xf32>
    %c4_317 = arith.constant 4 : index
    %c0_318 = arith.constant 0 : index
    %c0_319 = arith.constant 0 : index
    %1018 = vector.load %arg27[%c4_317, %c0_318, %c0_319] : memref<8x8x32xf32, #tpu.memory_space<vmem>>, vector<1x8x32xf32>
    %1019 = vector.shape_cast %1018 : vector<1x8x32xf32> to vector<8x32xf32>
    %1020 = vector.shape_cast %981 : vector<8x32xf32> to vector<1x8x32xf32>
    tpu.vector_store %arg27[%c4_317, %c0_318, %c0_319], %1020 {strides = array<i32>} : memref<8x8x32xf32, #tpu.memory_space<vmem>>, vector<1x8x32xf32>,
    %c3_320 = arith.constant 3 : index
    %c0_321 = arith.constant 0 : index
    %c0_322 = arith.constant 0 : index
    %1021 = vector.load %arg28[%c3_320, %c0_321, %c0_322] : memref<8x8x32xf32, #tpu.memory_space<vmem>>, vector<1x8x32xf32>
    %1022 = vector.shape_cast %1021 : vector<1x8x32xf32> to vector<8x32xf32>
    %1023 = vector.shape_cast %1017 : vector<8x32xf32> to vector<1x8x32xf32>
    tpu.vector_store %arg28[%c3_320, %c0_321, %c0_322], %1023 {strides = array<i32>} : memref<8x8x32xf32, #tpu.memory_space<vmem>>, vector<1x8x32xf32>,
    %c5_323 = arith.constant 5 : index
    %c0_324 = arith.constant 0 : index
    %c0_325 = arith.constant 0 : index
    %1024 = vector.load %arg29[%c5_323, %c0_324, %c0_325] : memref<8x8x96xf32, #tpu.memory_space<vmem>>, vector<1x8x96xf32>
    %1025 = vector.shape_cast %1024 : vector<1x8x96xf32> to vector<8x96xf32>
    %1026 = arith.truncf %981 : vector<8x32xf32> to vector<8x32xbf16>
    %cst_326 = arith.constant dense<0.000000e+00> : vector<8x96xf32>
    %1027 = tpu.matmul %1026, %648, %cst_326 {dimension_numbers = #tpu.dot_dimension_numbers<[1], [0], [0], [1], [0, 0, 1, 1], [], []>} : vector<8x32xbf16>, vector<32x96xbf16>, vector<8x96xf32> -> vector<8x96xf32>
    %1028 = vector.broadcast %649 : vector<1x96xf32> to vector<8x96xf32>
    %1029 = arith.addf %1027, %1028 : vector<8x96xf32>
    %1030 = vector.extract_strided_slice %1025 {offsets = [0, 0], sizes = [8, 32], strides = [1, 1]} : vector<8x96xf32> to vector<8x32xf32>
    %1031 = vector.extract_strided_slice %1029 {offsets = [0, 0], sizes = [8, 32], strides = [1, 1]} : vector<8x96xf32> to vector<8x32xf32>
    %1032 = arith.addf %1030, %1031 : vector<8x32xf32>
    %1033 = arith.negf %1032 : vector<8x32xf32>
    %1034 = math.exp %1033 : vector<8x32xf32>
    %cst_327 = arith.constant 1.000000e+00 : f32
    %1035 = vector.broadcast %cst_327 : f32 to vector<8x32xf32>
    %1036 = arith.addf %1035, %1034 : vector<8x32xf32>
    %1037 = arith.divf %1035, %1036 : vector<8x32xf32>
    %1038 = vector.extract_strided_slice %1025 {offsets = [0, 32], sizes = [8, 32], strides = [1, 1]} : vector<8x96xf32> to vector<8x32xf32>
    %1039 = vector.extract_strided_slice %1029 {offsets = [0, 32], sizes = [8, 32], strides = [1, 1]} : vector<8x96xf32> to vector<8x32xf32>
    %1040 = arith.addf %1038, %1039 : vector<8x32xf32>
    %1041 = arith.negf %1040 : vector<8x32xf32>
    %1042 = math.exp %1041 : vector<8x32xf32>
    %cst_328 = arith.constant 1.000000e+00 : f32
    %1043 = vector.broadcast %cst_328 : f32 to vector<8x32xf32>
    %1044 = arith.addf %1043, %1042 : vector<8x32xf32>
    %1045 = arith.divf %1043, %1044 : vector<8x32xf32>
    %1046 = vector.extract_strided_slice %1025 {offsets = [0, 64], sizes = [8, 32], strides = [1, 1]} : vector<8x96xf32> to vector<8x32xf32>
    %1047 = vector.extract_strided_slice %1029 {offsets = [0, 64], sizes = [8, 32], strides = [1, 1]} : vector<8x96xf32> to vector<8x32xf32>
    %1048 = arith.mulf %1037, %1047 : vector<8x32xf32>
    %1049 = arith.addf %1046, %1048 : vector<8x32xf32>
    %1050 = math.tanh %1049 : vector<8x32xf32>
    %cst_329 = arith.constant 1.000000e+00 : f32
    %1051 = vector.broadcast %cst_329 : f32 to vector<8x32xf32>
    %1052 = arith.subf %1051, %1045 : vector<8x32xf32>
    %1053 = arith.mulf %1052, %1050 : vector<8x32xf32>
    %1054 = arith.mulf %1045, %981 : vector<8x32xf32>
    %1055 = arith.addf %1053, %1054 : vector<8x32xf32>
    %c2_330 = arith.constant 2 : index
    %c0_331 = arith.constant 0 : index
    %c0_332 = arith.constant 0 : index
    %1056 = vector.load %arg30[%c2_330, %c0_331, %c0_332] : memref<8x8x96xf32, #tpu.memory_space<vmem>>, vector<1x8x96xf32>
    %1057 = vector.shape_cast %1056 : vector<1x8x96xf32> to vector<8x96xf32>
    %1058 = arith.truncf %1017 : vector<8x32xf32> to vector<8x32xbf16>
    %cst_333 = arith.constant dense<0.000000e+00> : vector<8x96xf32>
    %1059 = tpu.matmul %1058, %650, %cst_333 {dimension_numbers = #tpu.dot_dimension_numbers<[1], [0], [0], [1], [0, 0, 1, 1], [], []>} : vector<8x32xbf16>, vector<32x96xbf16>, vector<8x96xf32> -> vector<8x96xf32>
    %1060 = vector.broadcast %651 : vector<1x96xf32> to vector<8x96xf32>
    %1061 = arith.addf %1059, %1060 : vector<8x96xf32>
    %1062 = vector.extract_strided_slice %1057 {offsets = [0, 0], sizes = [8, 32], strides = [1, 1]} : vector<8x96xf32> to vector<8x32xf32>
    %1063 = vector.extract_strided_slice %1061 {offsets = [0, 0], sizes = [8, 32], strides = [1, 1]} : vector<8x96xf32> to vector<8x32xf32>
    %1064 = arith.addf %1062, %1063 : vector<8x32xf32>
    %1065 = arith.negf %1064 : vector<8x32xf32>
    %1066 = math.exp %1065 : vector<8x32xf32>
    %cst_334 = arith.constant 1.000000e+00 : f32
    %1067 = vector.broadcast %cst_334 : f32 to vector<8x32xf32>
    %1068 = arith.addf %1067, %1066 : vector<8x32xf32>
    %1069 = arith.divf %1067, %1068 : vector<8x32xf32>
    %1070 = vector.extract_strided_slice %1057 {offsets = [0, 32], sizes = [8, 32], strides = [1, 1]} : vector<8x96xf32> to vector<8x32xf32>
    %1071 = vector.extract_strided_slice %1061 {offsets = [0, 32], sizes = [8, 32], strides = [1, 1]} : vector<8x96xf32> to vector<8x32xf32>
    %1072 = arith.addf %1070, %1071 : vector<8x32xf32>
    %1073 = arith.negf %1072 : vector<8x32xf32>
    %1074 = math.exp %1073 : vector<8x32xf32>
    %cst_335 = arith.constant 1.000000e+00 : f32
    %1075 = vector.broadcast %cst_335 : f32 to vector<8x32xf32>
    %1076 = arith.addf %1075, %1074 : vector<8x32xf32>
    %1077 = arith.divf %1075, %1076 : vector<8x32xf32>
    %1078 = vector.extract_strided_slice %1057 {offsets = [0, 64], sizes = [8, 32], strides = [1, 1]} : vector<8x96xf32> to vector<8x32xf32>
    %1079 = vector.extract_strided_slice %1061 {offsets = [0, 64], sizes = [8, 32], strides = [1, 1]} : vector<8x96xf32> to vector<8x32xf32>
    %1080 = arith.mulf %1069, %1079 : vector<8x32xf32>
    %1081 = arith.addf %1078, %1080 : vector<8x32xf32>
    %1082 = math.tanh %1081 : vector<8x32xf32>
    %cst_336 = arith.constant 1.000000e+00 : f32
    %1083 = vector.broadcast %cst_336 : f32 to vector<8x32xf32>
    %1084 = arith.subf %1083, %1077 : vector<8x32xf32>
    %1085 = arith.mulf %1084, %1082 : vector<8x32xf32>
    %1086 = arith.mulf %1077, %1017 : vector<8x32xf32>
    %1087 = arith.addf %1085, %1086 : vector<8x32xf32>
    %1088 = vector.extract_strided_slice %0 {offsets = [2, 0, 0], sizes = [1, 8, 1], strides = [1, 1, 1]} : vector<8x8x1xf32> to vector<1x8x1xf32>
    %1089 = vector.shape_cast %1088 : vector<1x8x1xf32> to vector<8x1xf32>
    %1090 = vector.broadcast %1089 : vector<8x1xf32> to vector<8x32xf32>
    %1091 = arith.mulf %1087, %1090 : vector<8x32xf32>
    %c5_337 = arith.constant 5 : index
    %c0_338 = arith.constant 0 : index
    %c0_339 = arith.constant 0 : index
    %1092 = vector.load %arg27[%c5_337, %c0_338, %c0_339] : memref<8x8x32xf32, #tpu.memory_space<vmem>>, vector<1x8x32xf32>
    %1093 = vector.shape_cast %1092 : vector<1x8x32xf32> to vector<8x32xf32>
    %1094 = vector.shape_cast %1055 : vector<8x32xf32> to vector<1x8x32xf32>
    tpu.vector_store %arg27[%c5_337, %c0_338, %c0_339], %1094 {strides = array<i32>} : memref<8x8x32xf32, #tpu.memory_space<vmem>>, vector<1x8x32xf32>,
    %c2_340 = arith.constant 2 : index
    %c0_341 = arith.constant 0 : index
    %c0_342 = arith.constant 0 : index
    %1095 = vector.load %arg28[%c2_340, %c0_341, %c0_342] : memref<8x8x32xf32, #tpu.memory_space<vmem>>, vector<1x8x32xf32>
    %1096 = vector.shape_cast %1095 : vector<1x8x32xf32> to vector<8x32xf32>
    %1097 = vector.shape_cast %1091 : vector<8x32xf32> to vector<1x8x32xf32>
    tpu.vector_store %arg28[%c2_340, %c0_341, %c0_342], %1097 {strides = array<i32>} : memref<8x8x32xf32, #tpu.memory_space<vmem>>, vector<1x8x32xf32>,
    %c6_343 = arith.constant 6 : index
    %c0_344 = arith.constant 0 : index
    %c0_345 = arith.constant 0 : index
    %1098 = vector.load %arg29[%c6_343, %c0_344, %c0_345] : memref<8x8x96xf32, #tpu.memory_space<vmem>>, vector<1x8x96xf32>
    %1099 = vector.shape_cast %1098 : vector<1x8x96xf32> to vector<8x96xf32>
    %1100 = arith.truncf %1055 : vector<8x32xf32> to vector<8x32xbf16>
    %cst_346 = arith.constant dense<0.000000e+00> : vector<8x96xf32>
    %1101 = tpu.matmul %1100, %648, %cst_346 {dimension_numbers = #tpu.dot_dimension_numbers<[1], [0], [0], [1], [0, 0, 1, 1], [], []>} : vector<8x32xbf16>, vector<32x96xbf16>, vector<8x96xf32> -> vector<8x96xf32>
    %1102 = vector.broadcast %649 : vector<1x96xf32> to vector<8x96xf32>
    %1103 = arith.addf %1101, %1102 : vector<8x96xf32>
    %1104 = vector.extract_strided_slice %1099 {offsets = [0, 0], sizes = [8, 32], strides = [1, 1]} : vector<8x96xf32> to vector<8x32xf32>
    %1105 = vector.extract_strided_slice %1103 {offsets = [0, 0], sizes = [8, 32], strides = [1, 1]} : vector<8x96xf32> to vector<8x32xf32>
    %1106 = arith.addf %1104, %1105 : vector<8x32xf32>
    %1107 = arith.negf %1106 : vector<8x32xf32>
    %1108 = math.exp %1107 : vector<8x32xf32>
    %cst_347 = arith.constant 1.000000e+00 : f32
    %1109 = vector.broadcast %cst_347 : f32 to vector<8x32xf32>
    %1110 = arith.addf %1109, %1108 : vector<8x32xf32>
    %1111 = arith.divf %1109, %1110 : vector<8x32xf32>
    %1112 = vector.extract_strided_slice %1099 {offsets = [0, 32], sizes = [8, 32], strides = [1, 1]} : vector<8x96xf32> to vector<8x32xf32>
    %1113 = vector.extract_strided_slice %1103 {offsets = [0, 32], sizes = [8, 32], strides = [1, 1]} : vector<8x96xf32> to vector<8x32xf32>
    %1114 = arith.addf %1112, %1113 : vector<8x32xf32>
    %1115 = arith.negf %1114 : vector<8x32xf32>
    %1116 = math.exp %1115 : vector<8x32xf32>
    %cst_348 = arith.constant 1.000000e+00 : f32
    %1117 = vector.broadcast %cst_348 : f32 to vector<8x32xf32>
    %1118 = arith.addf %1117, %1116 : vector<8x32xf32>
    %1119 = arith.divf %1117, %1118 : vector<8x32xf32>
    %1120 = vector.extract_strided_slice %1099 {offsets = [0, 64], sizes = [8, 32], strides = [1, 1]} : vector<8x96xf32> to vector<8x32xf32>
    %1121 = vector.extract_strided_slice %1103 {offsets = [0, 64], sizes = [8, 32], strides = [1, 1]} : vector<8x96xf32> to vector<8x32xf32>
    %1122 = arith.mulf %1111, %1121 : vector<8x32xf32>
    %1123 = arith.addf %1120, %1122 : vector<8x32xf32>
    %1124 = math.tanh %1123 : vector<8x32xf32>
    %cst_349 = arith.constant 1.000000e+00 : f32
    %1125 = vector.broadcast %cst_349 : f32 to vector<8x32xf32>
    %1126 = arith.subf %1125, %1119 : vector<8x32xf32>
    %1127 = arith.mulf %1126, %1124 : vector<8x32xf32>
    %1128 = arith.mulf %1119, %1055 : vector<8x32xf32>
    %1129 = arith.addf %1127, %1128 : vector<8x32xf32>
    %c1_350 = arith.constant 1 : index
    %c0_351 = arith.constant 0 : index
    %c0_352 = arith.constant 0 : index
    %1130 = vector.load %arg30[%c1_350, %c0_351, %c0_352] : memref<8x8x96xf32, #tpu.memory_space<vmem>>, vector<1x8x96xf32>
    %1131 = vector.shape_cast %1130 : vector<1x8x96xf32> to vector<8x96xf32>
    %1132 = arith.truncf %1091 : vector<8x32xf32> to vector<8x32xbf16>
    %cst_353 = arith.constant dense<0.000000e+00> : vector<8x96xf32>
    %1133 = tpu.matmul %1132, %650, %cst_353 {dimension_numbers = #tpu.dot_dimension_numbers<[1], [0], [0], [1], [0, 0, 1, 1], [], []>} : vector<8x32xbf16>, vector<32x96xbf16>, vector<8x96xf32> -> vector<8x96xf32>
    %1134 = vector.broadcast %651 : vector<1x96xf32> to vector<8x96xf32>
    %1135 = arith.addf %1133, %1134 : vector<8x96xf32>
    %1136 = vector.extract_strided_slice %1131 {offsets = [0, 0], sizes = [8, 32], strides = [1, 1]} : vector<8x96xf32> to vector<8x32xf32>
    %1137 = vector.extract_strided_slice %1135 {offsets = [0, 0], sizes = [8, 32], strides = [1, 1]} : vector<8x96xf32> to vector<8x32xf32>
    %1138 = arith.addf %1136, %1137 : vector<8x32xf32>
    %1139 = arith.negf %1138 : vector<8x32xf32>
    %1140 = math.exp %1139 : vector<8x32xf32>
    %cst_354 = arith.constant 1.000000e+00 : f32
    %1141 = vector.broadcast %cst_354 : f32 to vector<8x32xf32>
    %1142 = arith.addf %1141, %1140 : vector<8x32xf32>
    %1143 = arith.divf %1141, %1142 : vector<8x32xf32>
    %1144 = vector.extract_strided_slice %1131 {offsets = [0, 32], sizes = [8, 32], strides = [1, 1]} : vector<8x96xf32> to vector<8x32xf32>
    %1145 = vector.extract_strided_slice %1135 {offsets = [0, 32], sizes = [8, 32], strides = [1, 1]} : vector<8x96xf32> to vector<8x32xf32>
    %1146 = arith.addf %1144, %1145 : vector<8x32xf32>
    %1147 = arith.negf %1146 : vector<8x32xf32>
    %1148 = math.exp %1147 : vector<8x32xf32>
    %cst_355 = arith.constant 1.000000e+00 : f32
    %1149 = vector.broadcast %cst_355 : f32 to vector<8x32xf32>
    %1150 = arith.addf %1149, %1148 : vector<8x32xf32>
    %1151 = arith.divf %1149, %1150 : vector<8x32xf32>
    %1152 = vector.extract_strided_slice %1131 {offsets = [0, 64], sizes = [8, 32], strides = [1, 1]} : vector<8x96xf32> to vector<8x32xf32>
    %1153 = vector.extract_strided_slice %1135 {offsets = [0, 64], sizes = [8, 32], strides = [1, 1]} : vector<8x96xf32> to vector<8x32xf32>
    %1154 = arith.mulf %1143, %1153 : vector<8x32xf32>
    %1155 = arith.addf %1152, %1154 : vector<8x32xf32>
    %1156 = math.tanh %1155 : vector<8x32xf32>
    %cst_356 = arith.constant 1.000000e+00 : f32
    %1157 = vector.broadcast %cst_356 : f32 to vector<8x32xf32>
    %1158 = arith.subf %1157, %1151 : vector<8x32xf32>
    %1159 = arith.mulf %1158, %1156 : vector<8x32xf32>
    %1160 = arith.mulf %1151, %1091 : vector<8x32xf32>
    %1161 = arith.addf %1159, %1160 : vector<8x32xf32>
    %1162 = vector.extract_strided_slice %0 {offsets = [1, 0, 0], sizes = [1, 8, 1], strides = [1, 1, 1]} : vector<8x8x1xf32> to vector<1x8x1xf32>
    %1163 = vector.shape_cast %1162 : vector<1x8x1xf32> to vector<8x1xf32>
    %1164 = vector.broadcast %1163 : vector<8x1xf32> to vector<8x32xf32>
    %1165 = arith.mulf %1161, %1164 : vector<8x32xf32>
    %c6_357 = arith.constant 6 : index
    %c0_358 = arith.constant 0 : index
    %c0_359 = arith.constant 0 : index
    %1166 = vector.load %arg27[%c6_357, %c0_358, %c0_359] : memref<8x8x32xf32, #tpu.memory_space<vmem>>, vector<1x8x32xf32>
    %1167 = vector.shape_cast %1166 : vector<1x8x32xf32> to vector<8x32xf32>
    %1168 = vector.shape_cast %1129 : vector<8x32xf32> to vector<1x8x32xf32>
    tpu.vector_store %arg27[%c6_357, %c0_358, %c0_359], %1168 {strides = array<i32>} : memref<8x8x32xf32, #tpu.memory_space<vmem>>, vector<1x8x32xf32>,
    %c1_360 = arith.constant 1 : index
    %c0_361 = arith.constant 0 : index
    %c0_362 = arith.constant 0 : index
    %1169 = vector.load %arg28[%c1_360, %c0_361, %c0_362] : memref<8x8x32xf32, #tpu.memory_space<vmem>>, vector<1x8x32xf32>
    %1170 = vector.shape_cast %1169 : vector<1x8x32xf32> to vector<8x32xf32>
    %1171 = vector.shape_cast %1165 : vector<8x32xf32> to vector<1x8x32xf32>
    tpu.vector_store %arg28[%c1_360, %c0_361, %c0_362], %1171 {strides = array<i32>} : memref<8x8x32xf32, #tpu.memory_space<vmem>>, vector<1x8x32xf32>,
    %c7_363 = arith.constant 7 : index
    %c0_364 = arith.constant 0 : index
    %c0_365 = arith.constant 0 : index
    %1172 = vector.load %arg29[%c7_363, %c0_364, %c0_365] : memref<8x8x96xf32, #tpu.memory_space<vmem>>, vector<1x8x96xf32>
    %1173 = vector.shape_cast %1172 : vector<1x8x96xf32> to vector<8x96xf32>
    %1174 = arith.truncf %1129 : vector<8x32xf32> to vector<8x32xbf16>
    %cst_366 = arith.constant dense<0.000000e+00> : vector<8x96xf32>
    %1175 = tpu.matmul %1174, %648, %cst_366 {dimension_numbers = #tpu.dot_dimension_numbers<[1], [0], [0], [1], [0, 0, 1, 1], [], []>} : vector<8x32xbf16>, vector<32x96xbf16>, vector<8x96xf32> -> vector<8x96xf32>
    %1176 = vector.broadcast %649 : vector<1x96xf32> to vector<8x96xf32>
    %1177 = arith.addf %1175, %1176 : vector<8x96xf32>
    %1178 = vector.extract_strided_slice %1173 {offsets = [0, 0], sizes = [8, 32], strides = [1, 1]} : vector<8x96xf32> to vector<8x32xf32>
    %1179 = vector.extract_strided_slice %1177 {offsets = [0, 0], sizes = [8, 32], strides = [1, 1]} : vector<8x96xf32> to vector<8x32xf32>
    %1180 = arith.addf %1178, %1179 : vector<8x32xf32>
    %1181 = arith.negf %1180 : vector<8x32xf32>
    %1182 = math.exp %1181 : vector<8x32xf32>
    %cst_367 = arith.constant 1.000000e+00 : f32
    %1183 = vector.broadcast %cst_367 : f32 to vector<8x32xf32>
    %1184 = arith.addf %1183, %1182 : vector<8x32xf32>
    %1185 = arith.divf %1183, %1184 : vector<8x32xf32>
    %1186 = vector.extract_strided_slice %1173 {offsets = [0, 32], sizes = [8, 32], strides = [1, 1]} : vector<8x96xf32> to vector<8x32xf32>
    %1187 = vector.extract_strided_slice %1177 {offsets = [0, 32], sizes = [8, 32], strides = [1, 1]} : vector<8x96xf32> to vector<8x32xf32>
    %1188 = arith.addf %1186, %1187 : vector<8x32xf32>
    %1189 = arith.negf %1188 : vector<8x32xf32>
    %1190 = math.exp %1189 : vector<8x32xf32>
    %cst_368 = arith.constant 1.000000e+00 : f32
    %1191 = vector.broadcast %cst_368 : f32 to vector<8x32xf32>
    %1192 = arith.addf %1191, %1190 : vector<8x32xf32>
    %1193 = arith.divf %1191, %1192 : vector<8x32xf32>
    %1194 = vector.extract_strided_slice %1173 {offsets = [0, 64], sizes = [8, 32], strides = [1, 1]} : vector<8x96xf32> to vector<8x32xf32>
    %1195 = vector.extract_strided_slice %1177 {offsets = [0, 64], sizes = [8, 32], strides = [1, 1]} : vector<8x96xf32> to vector<8x32xf32>
    %1196 = arith.mulf %1185, %1195 : vector<8x32xf32>
    %1197 = arith.addf %1194, %1196 : vector<8x32xf32>
    %1198 = math.tanh %1197 : vector<8x32xf32>
    %cst_369 = arith.constant 1.000000e+00 : f32
    %1199 = vector.broadcast %cst_369 : f32 to vector<8x32xf32>
    %1200 = arith.subf %1199, %1193 : vector<8x32xf32>
    %1201 = arith.mulf %1200, %1198 : vector<8x32xf32>
    %1202 = arith.mulf %1193, %1129 : vector<8x32xf32>
    %1203 = arith.addf %1201, %1202 : vector<8x32xf32>
    %c0_370 = arith.constant 0 : index
    %c0_371 = arith.constant 0 : index
    %c0_372 = arith.constant 0 : index
    %1204 = vector.load %arg30[%c0_370, %c0_371, %c0_372] : memref<8x8x96xf32, #tpu.memory_space<vmem>>, vector<1x8x96xf32>
    %1205 = vector.shape_cast %1204 : vector<1x8x96xf32> to vector<8x96xf32>
    %1206 = arith.truncf %1165 : vector<8x32xf32> to vector<8x32xbf16>
    %cst_373 = arith.constant dense<0.000000e+00> : vector<8x96xf32>
    %1207 = tpu.matmul %1206, %650, %cst_373 {dimension_numbers = #tpu.dot_dimension_numbers<[1], [0], [0], [1], [0, 0, 1, 1], [], []>} : vector<8x32xbf16>, vector<32x96xbf16>, vector<8x96xf32> -> vector<8x96xf32>
    %1208 = vector.broadcast %651 : vector<1x96xf32> to vector<8x96xf32>
    %1209 = arith.addf %1207, %1208 : vector<8x96xf32>
    %1210 = vector.extract_strided_slice %1205 {offsets = [0, 0], sizes = [8, 32], strides = [1, 1]} : vector<8x96xf32> to vector<8x32xf32>
    %1211 = vector.extract_strided_slice %1209 {offsets = [0, 0], sizes = [8, 32], strides = [1, 1]} : vector<8x96xf32> to vector<8x32xf32>
    %1212 = arith.addf %1210, %1211 : vector<8x32xf32>
    %1213 = arith.negf %1212 : vector<8x32xf32>
    %1214 = math.exp %1213 : vector<8x32xf32>
    %cst_374 = arith.constant 1.000000e+00 : f32
    %1215 = vector.broadcast %cst_374 : f32 to vector<8x32xf32>
    %1216 = arith.addf %1215, %1214 : vector<8x32xf32>
    %1217 = arith.divf %1215, %1216 : vector<8x32xf32>
    %1218 = vector.extract_strided_slice %1205 {offsets = [0, 32], sizes = [8, 32], strides = [1, 1]} : vector<8x96xf32> to vector<8x32xf32>
    %1219 = vector.extract_strided_slice %1209 {offsets = [0, 32], sizes = [8, 32], strides = [1, 1]} : vector<8x96xf32> to vector<8x32xf32>
    %1220 = arith.addf %1218, %1219 : vector<8x32xf32>
    %1221 = arith.negf %1220 : vector<8x32xf32>
    %1222 = math.exp %1221 : vector<8x32xf32>
    %cst_375 = arith.constant 1.000000e+00 : f32
    %1223 = vector.broadcast %cst_375 : f32 to vector<8x32xf32>
    %1224 = arith.addf %1223, %1222 : vector<8x32xf32>
    %1225 = arith.divf %1223, %1224 : vector<8x32xf32>
    %1226 = vector.extract_strided_slice %1205 {offsets = [0, 64], sizes = [8, 32], strides = [1, 1]} : vector<8x96xf32> to vector<8x32xf32>
    %1227 = vector.extract_strided_slice %1209 {offsets = [0, 64], sizes = [8, 32], strides = [1, 1]} : vector<8x96xf32> to vector<8x32xf32>
    %1228 = arith.mulf %1217, %1227 : vector<8x32xf32>
    %1229 = arith.addf %1226, %1228 : vector<8x32xf32>
    %1230 = math.tanh %1229 : vector<8x32xf32>
    %cst_376 = arith.constant 1.000000e+00 : f32
    %1231 = vector.broadcast %cst_376 : f32 to vector<8x32xf32>
    %1232 = arith.subf %1231, %1225 : vector<8x32xf32>
    %1233 = arith.mulf %1232, %1230 : vector<8x32xf32>
    %1234 = arith.mulf %1225, %1165 : vector<8x32xf32>
    %1235 = arith.addf %1233, %1234 : vector<8x32xf32>
    %1236 = vector.extract_strided_slice %0 {offsets = [0, 0, 0], sizes = [1, 8, 1], strides = [1, 1, 1]} : vector<8x8x1xf32> to vector<1x8x1xf32>
    %1237 = vector.shape_cast %1236 : vector<1x8x1xf32> to vector<8x1xf32>
    %1238 = vector.broadcast %1237 : vector<8x1xf32> to vector<8x32xf32>
    %1239 = arith.mulf %1235, %1238 : vector<8x32xf32>
    %c7_377 = arith.constant 7 : index
    %c0_378 = arith.constant 0 : index
    %c0_379 = arith.constant 0 : index
    %1240 = vector.load %arg27[%c7_377, %c0_378, %c0_379] : memref<8x8x32xf32, #tpu.memory_space<vmem>>, vector<1x8x32xf32>
    %1241 = vector.shape_cast %1240 : vector<1x8x32xf32> to vector<8x32xf32>
    %1242 = vector.shape_cast %1203 : vector<8x32xf32> to vector<1x8x32xf32>
    tpu.vector_store %arg27[%c7_377, %c0_378, %c0_379], %1242 {strides = array<i32>} : memref<8x8x32xf32, #tpu.memory_space<vmem>>, vector<1x8x32xf32>,
    %c0_380 = arith.constant 0 : index
    %c0_381 = arith.constant 0 : index
    %c0_382 = arith.constant 0 : index
    %1243 = vector.load %arg28[%c0_380, %c0_381, %c0_382] : memref<8x8x32xf32, #tpu.memory_space<vmem>>, vector<1x8x32xf32>
    %1244 = vector.shape_cast %1243 : vector<1x8x32xf32> to vector<8x32xf32>
    %1245 = vector.shape_cast %1239 : vector<8x32xf32> to vector<1x8x32xf32>
    tpu.vector_store %arg28[%c0_380, %c0_381, %c0_382], %1245 {strides = array<i32>} : memref<8x8x32xf32, #tpu.memory_space<vmem>>, vector<1x8x32xf32>,
    %c0_383 = arith.constant 0 : index
    %c0_384 = arith.constant 0 : index
    %c0_385 = arith.constant 0 : index
    %1246 = vector.load %arg27[%c0_383, %c0_384, %c0_385] : memref<8x8x32xf32, #tpu.memory_space<vmem>>, vector<8x8x32xf32>
    %1247 = vector.broadcast %0 : vector<8x8x1xf32> to vector<8x8x32xf32>
    %1248 = arith.mulf %1246, %1247 : vector<8x8x32xf32>
    %c0_386 = arith.constant 0 : index
    %c0_387 = arith.constant 0 : index
    %c0_388 = arith.constant 0 : index
    %1249 = vector.load %arg27[%c0_386, %c0_387, %c0_388] : memref<8x8x32xf32, #tpu.memory_space<vmem>>, vector<8x8x32xf32>
    tpu.vector_store %arg27[%c0_386, %c0_387, %c0_388], %1248 {strides = array<i32>} : memref<8x8x32xf32, #tpu.memory_space<vmem>>, vector<8x8x32xf32>,
    %c0_389 = arith.constant 0 : index
    %c0_390 = arith.constant 0 : index
    %c0_391 = arith.constant 0 : index
    %1250 = vector.load %arg27[%c0_389, %c0_390, %c0_391] : memref<8x8x32xf32, #tpu.memory_space<vmem>>, vector<8x8x32xf32>
    %c0_392 = arith.constant 0 : index
    %c0_393 = arith.constant 0 : index
    %c0_394 = arith.constant 0 : index
    %1251 = vector.load %arg28[%c0_392, %c0_393, %c0_394] : memref<8x8x32xf32, #tpu.memory_space<vmem>>, vector<8x8x32xf32>
    %1252 = arith.truncf %1250 : vector<8x8x32xf32> to vector<8x8x32xbf16>
    %1253 = vector.shape_cast %1252 : vector<8x8x32xbf16> to vector<64x32xbf16>
    %1254 = arith.truncf %1251 : vector<8x8x32xf32> to vector<8x8x32xbf16>
    %1255 = vector.shape_cast %1254 : vector<8x8x32xbf16> to vector<64x32xbf16>
    %c0_395 = arith.constant 0 : index
    %c0_396 = arith.constant 0 : index
    %1256 = vector.load %arg19[%c0_395, %c0_396] : memref<32x3xbf16, #tpu.memory_space<vmem>>, vector<32x3xbf16>
    %cst_397 = arith.constant dense<0.000000e+00> : vector<64x3xf32>
    %1257 = tpu.matmul %1253, %1256, %cst_397 {dimension_numbers = #tpu.dot_dimension_numbers<[1], [0], [0], [1], [0, 0, 1, 1], [], []>} : vector<64x32xbf16>, vector<32x3xbf16>, vector<64x3xf32> -> vector<64x3xf32>
    %c0_398 = arith.constant 0 : index
    %c0_399 = arith.constant 0 : index
    %1258 = vector.load %arg20[%c0_398, %c0_399] : memref<32x3xbf16, #tpu.memory_space<vmem>>, vector<32x3xbf16>
    %cst_400 = arith.constant dense<0.000000e+00> : vector<64x3xf32>
    %1259 = tpu.matmul %1255, %1258, %cst_400 {dimension_numbers = #tpu.dot_dimension_numbers<[1], [0], [0], [1], [0, 0, 1, 1], [], []>} : vector<64x32xbf16>, vector<32x3xbf16>, vector<64x3xf32> -> vector<64x3xf32>
    %1260 = arith.addf %1257, %1259 : vector<64x3xf32>
    %1261 = vector.shape_cast %1260 : vector<64x3xf32> to vector<8x8x3xf32>
    %cst_401 = arith.constant 0.000000e+00 : f32
    %1262 = vector.broadcast %cst_401 : f32 to vector<1x8x1xf32>
    %1263 = vector.extract_strided_slice %1261 {offsets = [0, 0, 1], sizes = [8, 8, 1], strides = [1, 1, 1]} : vector<8x8x3xf32> to vector<8x8x1xf32>
    %1264 = vector.extract_strided_slice %1261 {offsets = [0, 0, 0], sizes = [7, 8, 1], strides = [1, 1, 1]} : vector<8x8x3xf32> to vector<7x8x1xf32>
    %1265 = tpu.concatenate %1262, %1264 in 0 : vector<1x8x1xf32>, vector<7x8x1xf32> -> vector<8x8x1xf32>
    %1266 = vector.extract_strided_slice %1261 {offsets = [1, 0, 2], sizes = [7, 8, 1], strides = [1, 1, 1]} : vector<8x8x3xf32> to vector<7x8x1xf32>
    %1267 = tpu.concatenate %1266, %1262 in 0 : vector<7x8x1xf32>, vector<1x8x1xf32> -> vector<8x8x1xf32>
    %1268 = arith.addf %1263, %1265 : vector<8x8x1xf32>
    %1269 = arith.addf %1268, %1267 : vector<8x8x1xf32>
    %c0_402 = arith.constant 0 : index
    %c0_403 = arith.constant 0 : index
    %1270 = vector.load %arg21[%c0_402, %c0_403] : memref<1x1xf32, #tpu.memory_space<vmem>>, vector<1x1xf32>
    %1271 = vector.shape_cast %1270 : vector<1x1xf32> to vector<1x1x1xf32>
    %1272 = vector.broadcast %1271 : vector<1x1x1xf32> to vector<8x8x1xf32>
    %1273 = arith.addf %1269, %1272 : vector<8x8x1xf32>
    %1274 = arith.negf %1273 : vector<8x8x1xf32>
    %1275 = math.exp %1274 : vector<8x8x1xf32>
    %cst_404 = arith.constant 1.000000e+00 : f32
    %1276 = vector.broadcast %cst_404 : f32 to vector<8x8x1xf32>
    %1277 = arith.addf %1276, %1275 : vector<8x8x1xf32>
    %1278 = arith.divf %1276, %1277 : vector<8x8x1xf32>
    %1279 = math.tanh %1250 : vector<8x8x32xf32>
    %1280 = vector.broadcast %1278 : vector<8x8x1xf32> to vector<8x8x32xf32>
    %1281 = arith.mulf %1279, %1280 : vector<8x8x32xf32>
    %1282 = arith.truncf %1281 : vector<8x8x32xf32> to vector<8x8x32xbf16>
    %1283 = vector.shape_cast %1282 : vector<8x8x32xbf16> to vector<64x32xbf16>
    %1284 = math.tanh %1251 : vector<8x8x32xf32>
    %1285 = vector.broadcast %1278 : vector<8x8x1xf32> to vector<8x8x32xf32>
    %1286 = arith.mulf %1284, %1285 : vector<8x8x32xf32>
    %1287 = arith.truncf %1286 : vector<8x8x32xf32> to vector<8x8x32xbf16>
    %1288 = vector.shape_cast %1287 : vector<8x8x32xbf16> to vector<64x32xbf16>
    %c0_405 = arith.constant 0 : index
    %c0_406 = arith.constant 0 : index
    %c0_407 = arith.constant 0 : index
    %1289 = vector.load %arg1[%c0_405, %c0_406, %c0_407] : memref<8x8x32xf32, #tpu.memory_space<vmem>>, vector<8x8x32xf32>
    %1290 = arith.truncf %1289 : vector<8x8x32xf32> to vector<8x8x32xbf16>
    %1291 = vector.shape_cast %1290 : vector<8x8x32xbf16> to vector<64x32xbf16>
    %c0_408 = arith.constant 0 : index
    %c0_409 = arith.constant 0 : index
    %1292 = vector.load %arg22[%c0_408, %c0_409] : memref<32x32xbf16, #tpu.memory_space<vmem>>, vector<32x32xbf16>
    %cst_410 = arith.constant dense<0.000000e+00> : vector<64x32xf32>
    %1293 = tpu.matmul %1291, %1292, %cst_410 {dimension_numbers = #tpu.dot_dimension_numbers<[1], [0], [0], [1], [0, 0, 1, 1], [], []>} : vector<64x32xbf16>, vector<32x32xbf16>, vector<64x32xf32> -> vector<64x32xf32>
    %c0_411 = arith.constant 0 : index
    %c0_412 = arith.constant 0 : index
    %1294 = vector.load %arg23[%c0_411, %c0_412] : memref<32x32xbf16, #tpu.memory_space<vmem>>, vector<32x32xbf16>
    %cst_413 = arith.constant dense<0.000000e+00> : vector<64x32xf32>
    %1295 = tpu.matmul %1283, %1294, %cst_413 {dimension_numbers = #tpu.dot_dimension_numbers<[1], [0], [0], [1], [0, 0, 1, 1], [], []>} : vector<64x32xbf16>, vector<32x32xbf16>, vector<64x32xf32> -> vector<64x32xf32>
    %1296 = arith.addf %1293, %1295 : vector<64x32xf32>
    %c0_414 = arith.constant 0 : index
    %c0_415 = arith.constant 0 : index
    %1297 = vector.load %arg24[%c0_414, %c0_415] : memref<32x32xbf16, #tpu.memory_space<vmem>>, vector<32x32xbf16>
    %cst_416 = arith.constant dense<0.000000e+00> : vector<64x32xf32>
    %1298 = tpu.matmul %1288, %1297, %cst_416 {dimension_numbers = #tpu.dot_dimension_numbers<[1], [0], [0], [1], [0, 0, 1, 1], [], []>} : vector<64x32xbf16>, vector<32x32xbf16>, vector<64x32xf32> -> vector<64x32xf32>
    %1299 = arith.addf %1296, %1298 : vector<64x32xf32>
    %c0_417 = arith.constant 0 : index
    %c0_418 = arith.constant 0 : index
    %1300 = vector.load %arg25[%c0_417, %c0_418] : memref<1x32xf32, #tpu.memory_space<vmem>>, vector<1x32xf32>
    %1301 = vector.broadcast %1300 : vector<1x32xf32> to vector<64x32xf32>
    %1302 = arith.addf %1299, %1301 : vector<64x32xf32>
    %1303 = math.tanh %1302 : vector<64x32xf32>
    %1304 = vector.shape_cast %1303 : vector<64x32xf32> to vector<8x8x32xf32>
    %cst_419 = arith.constant dense<0xFF800000> : vector<8x32xf32>
    %1305 = vector.multi_reduction <maximumf>, %1304, %cst_419 [0] : vector<8x8x32xf32> to vector<8x32xf32>
    %c0_420 = arith.constant 0 : index
    %c0_421 = arith.constant 0 : index
    %1306 = vector.load %arg26[%c0_420, %c0_421] : memref<8x32xf32, #tpu.memory_space<vmem>>, vector<8x32xf32>
    tpu.vector_store %arg26[%c0_420, %c0_421], %1305 {strides = array<i32>} : memref<8x32xf32, #tpu.memory_space<vmem>>, vector<8x32xf32>,
    return
  }
  func.func @transform_0(%arg0: i32) -> (i32, i32, i32) {
    %c0_i32 = arith.constant 0 : i32
    %c0_i32_0 = arith.constant 0 : i32
    %c0_i32_1 = arith.constant 0 : i32
    return %c0_i32, %arg0, %c0_i32_0 : i32, i32, i32
  }
  func.func @transform_1(%arg0: i32) -> (i32, i32, i32) {
    %c0_i32 = arith.constant 0 : i32
    %c0_i32_0 = arith.constant 0 : i32
    %c0_i32_1 = arith.constant 0 : i32
    return %c0_i32, %arg0, %c0_i32_0 : i32, i32, i32
  }
  func.func @transform_2(%arg0: i32) -> (i32, i32) {
    %c0_i32 = arith.constant 0 : i32
    %c0_i32_0 = arith.constant 0 : i32
    %c0_i32_1 = arith.constant 0 : i32
    return %c0_i32, %c0_i32_0 : i32, i32
  }
  func.func @transform_3(%arg0: i32) -> (i32, i32) {
    %c0_i32 = arith.constant 0 : i32
    %c0_i32_0 = arith.constant 0 : i32
    %c0_i32_1 = arith.constant 0 : i32
    return %c0_i32, %c0_i32_0 : i32, i32
  }
  func.func @transform_4(%arg0: i32) -> (i32, i32) {
    %c0_i32 = arith.constant 0 : i32
    %c0_i32_0 = arith.constant 0 : i32
    %c0_i32_1 = arith.constant 0 : i32
    return %c0_i32, %c0_i32_0 : i32, i32
  }
  func.func @transform_5(%arg0: i32) -> (i32, i32) {
    %c0_i32 = arith.constant 0 : i32
    %c0_i32_0 = arith.constant 0 : i32
    %c0_i32_1 = arith.constant 0 : i32
    return %c0_i32, %c0_i32_0 : i32, i32
  }
  func.func @transform_6(%arg0: i32) -> (i32, i32) {
    %c0_i32 = arith.constant 0 : i32
    %c0_i32_0 = arith.constant 0 : i32
    %c0_i32_1 = arith.constant 0 : i32
    return %c0_i32, %c0_i32_0 : i32, i32
  }
  func.func @transform_7(%arg0: i32) -> (i32, i32) {
    %c0_i32 = arith.constant 0 : i32
    %c0_i32_0 = arith.constant 0 : i32
    %c0_i32_1 = arith.constant 0 : i32
    return %c0_i32, %c0_i32_0 : i32, i32
  }
  func.func @transform_8(%arg0: i32) -> (i32, i32) {
    %c0_i32 = arith.constant 0 : i32
    %c0_i32_0 = arith.constant 0 : i32
    %c0_i32_1 = arith.constant 0 : i32
    return %c0_i32, %c0_i32_0 : i32, i32
  }
  func.func @transform_9(%arg0: i32) -> (i32, i32) {
    %c0_i32 = arith.constant 0 : i32
    %c0_i32_0 = arith.constant 0 : i32
    %c0_i32_1 = arith.constant 0 : i32
    return %c0_i32, %c0_i32_0 : i32, i32
  }
  func.func @transform_10(%arg0: i32) -> (i32, i32) {
    %c0_i32 = arith.constant 0 : i32
    %c0_i32_0 = arith.constant 0 : i32
    %c0_i32_1 = arith.constant 0 : i32
    return %c0_i32, %c0_i32_0 : i32, i32
  }
  func.func @transform_11(%arg0: i32) -> (i32, i32) {
    %c0_i32 = arith.constant 0 : i32
    %c0_i32_0 = arith.constant 0 : i32
    %c0_i32_1 = arith.constant 0 : i32
    return %c0_i32, %c0_i32_0 : i32, i32
  }
  func.func @transform_12(%arg0: i32) -> (i32, i32) {
    %c0_i32 = arith.constant 0 : i32
    %c0_i32_0 = arith.constant 0 : i32
    %c0_i32_1 = arith.constant 0 : i32
    return %c0_i32, %c0_i32_0 : i32, i32
  }
  func.func @transform_13(%arg0: i32) -> (i32, i32) {
    %c0_i32 = arith.constant 0 : i32
    %c0_i32_0 = arith.constant 0 : i32
    %c0_i32_1 = arith.constant 0 : i32
    return %c0_i32, %c0_i32_0 : i32, i32
  }
  func.func @transform_14(%arg0: i32) -> (i32, i32) {
    %c0_i32 = arith.constant 0 : i32
    %c0_i32_0 = arith.constant 0 : i32
    %c0_i32_1 = arith.constant 0 : i32
    return %c0_i32, %c0_i32_0 : i32, i32
  }
  func.func @transform_15(%arg0: i32) -> (i32, i32) {
    %c0_i32 = arith.constant 0 : i32
    %c0_i32_0 = arith.constant 0 : i32
    %c0_i32_1 = arith.constant 0 : i32
    return %c0_i32, %c0_i32_0 : i32, i32
  }
  func.func @transform_16(%arg0: i32) -> (i32, i32) {
    %c0_i32 = arith.constant 0 : i32
    %c0_i32_0 = arith.constant 0 : i32
    %c0_i32_1 = arith.constant 0 : i32
    return %c0_i32, %c0_i32_0 : i32, i32
  }
  func.func @transform_17(%arg0: i32) -> (i32, i32) {
    %c0_i32 = arith.constant 0 : i32
    %c0_i32_0 = arith.constant 0 : i32
    %c0_i32_1 = arith.constant 0 : i32
    return %c0_i32, %c0_i32_0 : i32, i32
  }
  func.func @transform_18(%arg0: i32) -> (i32, i32) {
    %c0_i32 = arith.constant 0 : i32
    %c0_i32_0 = arith.constant 0 : i32
    %c0_i32_1 = arith.constant 0 : i32
    return %c0_i32, %c0_i32_0 : i32, i32
  }
  func.func @transform_19(%arg0: i32) -> (i32, i32) {
    %c0_i32 = arith.constant 0 : i32
    %c0_i32_0 = arith.constant 0 : i32
    %c0_i32_1 = arith.constant 0 : i32
    return %c0_i32, %c0_i32_0 : i32, i32
  }
  func.func @transform_20(%arg0: i32) -> (i32, i32) {
    %c0_i32 = arith.constant 0 : i32
    %c0_i32_0 = arith.constant 0 : i32
    %c0_i32_1 = arith.constant 0 : i32
    return %c0_i32, %c0_i32_0 : i32, i32
  }
  func.func @transform_21(%arg0: i32) -> (i32, i32) {
    %c0_i32 = arith.constant 0 : i32
    %c0_i32_0 = arith.constant 0 : i32
    %c0_i32_1 = arith.constant 0 : i32
    return %c0_i32, %c0_i32_0 : i32, i32
  }
  func.func @transform_22(%arg0: i32) -> (i32, i32) {
    %c0_i32 = arith.constant 0 : i32
    %c0_i32_0 = arith.constant 0 : i32
    %c0_i32_1 = arith.constant 0 : i32
    return %c0_i32, %c0_i32_0 : i32, i32
  }
  func.func @transform_23(%arg0: i32) -> (i32, i32) {
    %c0_i32 = arith.constant 0 : i32
    %c0_i32_0 = arith.constant 0 : i32
    %c0_i32_1 = arith.constant 0 : i32
    return %c0_i32, %c0_i32_0 : i32, i32
  }
  func.func @transform_24(%arg0: i32) -> (i32, i32) {
    %c0_i32 = arith.constant 0 : i32
    %c0_i32_0 = arith.constant 0 : i32
    %c0_i32_1 = arith.constant 0 : i32
    return %c0_i32, %c0_i32_0 : i32, i32
  }
  func.func @transform_25(%arg0: i32) -> (i32, i32) {
    %c0_i32 = arith.constant 0 : i32
    %c0_i32_0 = arith.constant 0 : i32
    return %arg0, %c0_i32 : i32, i32
  }
}

</mosaic_0001>

<bundles_post_ra>
// kernel: tpu_custom_call.1
= control target key start
LH: loop header
LB: loop body
LE: loop exit
PB: predicated region body
PF: predicated region fallthrough
CT: control target
= control target key end

     0   :  { %s7347_s0 = inlined_call_operand.vmem [shape: f32[8,8,32], index: 0, kind: input, shape index: {}]   ;;  %s7348_s1 = inlined_call_operand.vmem [shape: f32[8,8,1], index: 1, kind: input, shape index: {}]   ;;  %s7349_s2 = inlined_call_operand.hbm [shape: bf16[32,96], index: 2, kind: input, shape index: {}]   ;;  %s7350_s3 = inlined_call_operand.hbm [shape: bf16[32,96], index: 3, kind: input, shape index: {}]   ;;  %s7351_s4 = inlined_call_operand.hbm [shape: f32[1,96], index: 4, kind: input, shape index: {}]   ;;  %s7352_s5 = inlined_call_operand.hbm [shape: f32[1,96], index: 5, kind: input, shape index: {}]   ;;  %s7353_s6 = inlined_call_operand.hbm [shape: bf16[32,96], index: 6, kind: input, shape index: {}]   ;;  %s7354_s7 = inlined_call_operand.hbm [shape: bf16[32,96], index: 7, kind: input, shape index: {}]   ;;  %s7355_s8 = inlined_call_operand.hbm [shape: f32[1,96], index: 8, kind: input, shape index: {}]   ;;  %s7356_s9 = inlined_call_operand.hbm [shape: f32[1,96], index: 9, kind: input, shape index: {}]   ;;  %s7357_s10 = inlined_call_operand.vmem [shape: bf16[64,96], index: 10, kind: input, shape index: {}]   ;;  %s7358_s11 = inlined_call_operand.vmem [shape: bf16[64,96], index: 11, kind: input, shape index: {}]   ;;  %s7359_s12 = inlined_call_operand.hbm [shape: f32[1,96], index: 12, kind: input, shape index: {}]   ;;  %s7360_s13 = inlined_call_operand.hbm [shape: f32[1,96], index: 13, kind: input, shape index: {}]   ;;  %s7361_s14 = inlined_call_operand.hbm [shape: bf16[32,96], index: 14, kind: input, shape index: {}]   ;;  %s7362_s15 = inlined_call_operand.hbm [shape: bf16[32,96], index: 15, kind: input, shape index: {}]   ;;  %s7363_s16 = inlined_call_operand.hbm [shape: f32[1,96], index: 16, kind: input, shape index: {}]   ;;  %s7364_s17 = inlined_call_operand.hbm [shape: f32[1,96], index: 17, kind: input, shape index: {}]   ;;  %s7365_s18 = inlined_call_operand.vmem [shape: bf16[32,3], index: 18, kind: input, shape index: {}]   ;;  %s7366_s19 = inlined_call_operand.vmem [shape: bf16[32,3], index: 19, kind: input, shape index: {}]   ;;  %s7367_s20 = inlined_call_operand.<no memory space> [shape: f32[1,1], index: 20, kind: input, shape index: {}]   ;;  %s7368_s21 = inlined_call_operand.vmem [shape: bf16[32,32], index: 21, kind: input, shape index: {}]   ;;  %s7369_s22 = inlined_call_operand.hbm [shape: bf16[32,32], index: 22, kind: input, shape index: {}]   ;;  %s7370_s23 = inlined_call_operand.hbm [shape: bf16[32,32], index: 23, kind: input, shape index: {}]   ;;  %s7371_s24 = inlined_call_operand.vmem [shape: f32[1,32], index: 24, kind: input, shape index: {}]   ;;  %s7372_s25 = inlined_call_operand.hbm [shape: f32[8,32], index: 25, kind: output, shape index: {}]  }
   0x1   :  { %7375 = sst [smem:[#allocation44_spill]] %s7347_s0  ;;  %v30_v0 = vstv %s7367_s20 }
   0x2   :  { %7376 = sst [smem:[#allocation45_spill]] %s7348_s1  ;;  %31 = vst [vmem:[#allocation6] sm:$0x1] %v30_v0 }
   0x3   :  { %7377 = sst [smem:[#allocation46_spill]] %s7349_s2 }
   0x4   :  { %7378 = sst [smem:[#allocation47_spill]] %s7350_s3 }
   0x5   :  { %7379 = sst [smem:[#allocation48_spill]] %s7351_s4 }
   0x6   :  { %7380 = sst [smem:[#allocation49_spill]] %s7352_s5 }
   0x7   :  { %7381 = sst [smem:[#allocation50_spill]] %s7353_s6 }
   0x8   :  { %7382 = sst [smem:[#allocation51_spill]] %s7354_s7 }
   0x9   :  { %7383 = sst [smem:[#allocation52_spill]] %s7355_s8 }
   0xa   :  { %7384 = sst [smem:[#allocation53_spill]] %s7356_s9 }
   0xb   :  { %32 = vsyncpa [#allocation8], 0 }
   0xc   :  { %33 = vsyncpa [#allocation11], 0 }
   0xd   :  { %34 = vsyncpa [#allocation14], 0 }
   0xe   :  { %35 = vsyncpa [#allocation17], 0 }
   0xf   :  { %36 = vsyncpa [#allocation20], 0 }
  0x10   :  { %37 = vsyncpa [#allocation23], 0 }
  0x11   :  { %38 = vsyncpa [#allocation26], 0 }
  0x12   :  { %39 = vsyncpa [#allocation29], 0 }
  0x13   :  { %40 = vsyncpa [#allocation32], 0 }
  0x14   :  { %41 = vsyncpa [#allocation9], 0  ;;  %s6110_s6 = smov [#allocation10]   ;;  %s6111_s7 = smov [#allocation13]  }
  0x15   :  { %s63_s30 = sshll.u32 %s6110_s6, 4  ;;  %s86_s3 = sshll.u32 %s6111_s7, 4  ;;  %s64_s30 = int_to_ptr.vmem [resolvable:$true] %s63_s30  ;;  %s87_s3 = int_to_ptr.vmem [resolvable:$true] %s86_s3 }
  0x16   :  { %s5758_s26 = scalar_lea.vmem %s64_s30, 256  ;;  %p5763_p1 = scmp.lt.s32.totalorder %s64_s30, %s64_s30 }
  0x17   :  { %p5759_p0 = scmp.ne.s32.totalorder %s64_s30, %s5758_s26  ;;  %p5764_p2 = scmp.lt.s32.totalorder %s5758_s26, %s5758_s26 }
  0x19   :  { %p5765_p3 = por %p5764_p2, %p5763_p1 }
  0x1b   :  { %p5766_p4 = pnand %p5765_p3, %p5759_p0 }
  0x1d   :  { %5769 = shalt.err (!%p5766_p4)
}
  0x1e   :  { %s6112_s20 = smov 64   ;;  %s6113_s1 = smov 4  }
  0x1f   :  { %s7385_s4 = sld [smem:[#allocation47_spill]]  ;;  %s5778_s28 = scalar_lea.vmem %s87_s3, 16 }
  0x20   :  { %p5779_p5 = scmp.ne.s32.totalorder %s87_s3, %s5778_s28  ;;  %s5782_s9 = scalar_lea.vmem %s87_s3, 32 }
  0x21   :  { %p5783_p6 = scmp.lt.s32.totalorder %s87_s3, %s87_s3  ;;  %p5784_p7 = scmp.lt.s32.totalorder %s5782_s9, %s5778_s28 }
  0x23   :  { %p5785_p8 = por %p5784_p7, %p5783_p6 }
  0x25   :  { %69 = dma.hbm_to_vmem [thread:$0]  %s7385_s4, 256, %s64_s30, [#allocation11], %s6112_s20, %s6112_s20, %s6113_s1  }
  0x26   :  { %p5786_p9 = pnand %p5785_p8, %p5779_p5 }
  0x28   :  { %5789 = shalt.err (!%p5786_p9)
}
  0x29   :  { %s7386_s29 = sld [smem:[#allocation49_spill]]  ;;  %s6114_s2 = smov [#allocation16]  }
  0x2a   :  { %s107_s6 = sshll.u32 %s6114_s2, 4  ;;  %s6115_s7 = smov [#allocation19]   ;;  %s108_s6 = int_to_ptr.vmem [resolvable:$true] %s107_s6 }
  0x2b   :  { %s130_s26 = sshll.u32 %s6115_s7, 4  ;;  %s5798_s8 = scalar_lea.vmem %s108_s6, 256  ;;  %s131_s26 = int_to_ptr.vmem [resolvable:$true] %s130_s26 }
  0x2c   :  { %p5799_p10 = scmp.ne.s32.totalorder %s108_s6, %s5798_s8  ;;  %p5803_p11 = scmp.lt.s32.totalorder %s108_s6, %s108_s6 }
  0x2d   :  { %p5804_p12 = scmp.lt.s32.totalorder %s5798_s8, %s5798_s8 }
  0x2f   :  { %89 = dma.hbm_to_vmem [thread:$0]  %s7386_s29, 16, %s87_s3, [#allocation14]  }
  0x30   :  { %p5805_p13 = por %p5804_p12, %p5803_p11 }
  0x32   :  { %p5806_p0 = pnand %p5805_p13, %p5799_p10 }
  0x34   :  { %5809 = shalt.err (!%p5806_p0)
}
  0x35   :  { %s7387_s4 = sld [smem:[#allocation51_spill]]  ;;  %s5818_s3 = scalar_lea.vmem %s131_s26, 16 }
  0x36   :  { %p5819_p1 = scmp.ne.s32.totalorder %s131_s26, %s5818_s3  ;;  %s5822_s28 = scalar_lea.vmem %s131_s26, 32 }
  0x37   :  { %p5823_p2 = scmp.lt.s32.totalorder %s131_s26, %s131_s26  ;;  %p5824_p3 = scmp.lt.s32.totalorder %s5822_s28, %s5818_s3 }
  0x39   :  { %p5825_p4 = por %p5824_p3, %p5823_p2 }
  0x3b   :  { %113 = dma.hbm_to_vmem [thread:$0]  %s7387_s4, 256, %s108_s6, [#allocation17], %s6112_s20, %s6112_s20, %s6113_s1  }
  0x3c   :  { %p5826_p5 = pnand %p5825_p4, %p5819_p1 }
  0x3e   :  { %5829 = shalt.err (!%p5826_p5)
}
  0x3f   :  { %s7388_s0 = sld [smem:[#allocation53_spill]]  ;;  %s6116_s29 = smov [#allocation22]  }
  0x40   :  { %s154_s2 = sshll.u32 %s6116_s29, 4  ;;  %s6117_s7 = smov [#allocation25]   ;;  %s155_s2 = int_to_ptr.vmem [resolvable:$true] %s154_s2 }
  0x41   :  { %s175_s8 = sshll.u32 %s6117_s7, 4  ;;  %s5838_s30 = scalar_lea.vmem %s155_s2, 16  ;;  %s176_s8 = int_to_ptr.vmem [resolvable:$true] %s175_s8 }
  0x42   :  { %p5839_p6 = scmp.ne.s32.totalorder %s155_s2, %s5838_s30  ;;  %s5842_s6 = scalar_lea.vmem %s155_s2, 32 }
  0x43   :  { %p5843_p7 = scmp.lt.s32.totalorder %s155_s2, %s155_s2  ;;  %p5844_p8 = scmp.lt.s32.totalorder %s5842_s6, %s5838_s30 }
  0x45   :  { %133 = dma.hbm_to_vmem [thread:$0]  %s7388_s0, 16, %s131_s26, [#allocation20]  }
  0x46   :  { %p5845_p9 = por %p5844_p8, %p5843_p7 }
  0x48   :  { %p5846_p10 = pnand %p5845_p9, %p5839_p6 }
  0x4a   :  { %5849 = shalt.err (!%p5846_p10)
}
  0x4b   :  { %157 = dma.hbm_to_vmem [thread:$0]  %s7360_s13, 16, %s155_s2, [#allocation23]  }
  0x4c   :  { %s5858_s3 = scalar_lea.vmem %s176_s8, 256  ;;  %p5863_p12 = scmp.lt.s32.totalorder %s176_s8, %s176_s8 }
  0x4d   :  { %p5859_p11 = scmp.ne.s32.totalorder %s176_s8, %s5858_s3  ;;  %p5864_p13 = scmp.lt.s32.totalorder %s5858_s3, %s5858_s3 }
  0x4f   :  { %p5865_p0 = por %p5864_p13, %p5863_p12 }
  0x51   :  { %p5866_p1 = pnand %p5865_p0, %p5859_p11 }
  0x53   :  { %5869 = shalt.err (!%p5866_p1)
}
  0x54   :  { %181 = dma.hbm_to_vmem [thread:$0]  %s7362_s15, 256, %s176_s8, [#allocation26], %s6112_s20, %s6112_s20, %s6113_s1  }
  0x55   :  { %s6118_s9 = smov [#allocation28]   ;;  %s6119_s0 = smov [#allocation7]  }
  0x56   :  { %s198_s5 = sshll.u32 %s6118_s9, 4  ;;  %s51_s29 = sshll.u32 %s6119_s0, 4  ;;  %s199_s5 = int_to_ptr.vmem [resolvable:$true] %s198_s5  ;;  %s52_s29 = int_to_ptr.vmem [resolvable:$true] %s51_s29 }
  0x57   :  { %s5878_s13 = scalar_lea.vmem %s199_s5, 16  ;;  %s5882_s2 = scalar_lea.vmem %s199_s5, 32 }
  0x58   :  { %p5879_p2 = scmp.ne.s32.totalorder %s199_s5, %s5878_s13  ;;  %p5883_p3 = scmp.lt.s32.totalorder %s199_s5, %s199_s5 }
  0x59   :  { %p5884_p4 = scmp.lt.s32.totalorder %s5882_s2, %s5878_s13 }
  0x5b   :  { %p5885_p5 = por %p5884_p4, %p5883_p3 }
  0x5d   :  { %p5886_p6 = pnand %p5885_p5, %p5879_p2 }
  0x5f   :  { %5889 = shalt.err (!%p5886_p6)
}
  0x60   :  { %201 = dma.hbm_to_vmem [thread:$0]  %s7364_s17, 16, %s199_s5, [#allocation29]  }
  0x61   :  { %s5898_s6 = scalar_lea.vmem %s52_s29, 256  ;;  %p5903_p8 = scmp.lt.s32.totalorder %s52_s29, %s52_s29 }
  0x62   :  { %p5899_p7 = scmp.ne.s32.totalorder %s52_s29, %s5898_s6  ;;  %p5904_p9 = scmp.lt.s32.totalorder %s5898_s6, %s5898_s6 }
  0x64   :  { %p5905_p10 = por %p5904_p9, %p5903_p8 }
  0x66   :  { %p5906_p11 = pnand %p5905_p10, %p5899_p7 }
  0x68   :  { %5909 = shalt.err (!%p5906_p11)
}
  0x69   :  { %s7389_s27 = sld [smem:[#allocation46_spill]]  ;;  %s6120_s4 = smov [#allocation12]  }
  0x6a   :  { %s76_s3 = sshll.u32 %s6120_s4, 4  ;;  %s6121_s26 = smov [#allocation15]   ;;  %s77_s3 = int_to_ptr.vmem [resolvable:$true] %s76_s3 }
  0x6b   :  { %s95_s28 = sshll.u32 %s6121_s26, 4  ;;  %s5918_s17 = scalar_lea.vmem %s77_s3, 16  ;;  %s96_s28 = int_to_ptr.vmem [resolvable:$true] %s95_s28 }
  0x6c   :  { %p5919_p12 = scmp.ne.s32.totalorder %s77_s3, %s5918_s17  ;;  %s5922_s9 = scalar_lea.vmem %s77_s3, 32 }
  0x6d   :  { %p5923_p13 = scmp.lt.s32.totalorder %s77_s3, %s77_s3  ;;  %p5924_p0 = scmp.lt.s32.totalorder %s5922_s9, %s5918_s17 }
  0x6f   :  { %57 = dma.hbm_to_vmem [thread:$0]  %s7389_s27, 256, %s52_s29, [#allocation8], %s6112_s20, %s6112_s20, %s6113_s1  }
  0x70   :  { %p5925_p1 = por %p5924_p0, %p5923_p13 }
  0x72   :  { %p5926_p2 = pnand %p5925_p1, %p5919_p12 }
  0x74   :  { %5929 = shalt.err (!%p5926_p2)
}
  0x75   :  { %s7390_s13 = sld [smem:[#allocation48_spill]]  ;;  %s5938_s2 = scalar_lea.vmem %s96_s28, 256 }
  0x76   :  { %p5939_p3 = scmp.ne.s32.totalorder %s96_s28, %s5938_s2  ;;  %p5943_p4 = scmp.lt.s32.totalorder %s96_s28, %s96_s28 }
  0x77   :  { %p5944_p5 = scmp.lt.s32.totalorder %s5938_s2, %s5938_s2 }
  0x79   :  { %p5945_p6 = por %p5944_p5, %p5943_p4 }
  0x7b   :  { %79 = dma.hbm_to_vmem [thread:$0]  %s7390_s13, 16, %s77_s3, [#allocation11]  }
  0x7c   :  { %p5946_p7 = pnand %p5945_p6, %p5939_p3 }
  0x7e   :  { %5949 = shalt.err (!%p5946_p7)
}
  0x7f   :  { %s7391_s30 = sld [smem:[#allocation50_spill]]  ;;  %s6122_s6 = smov [#allocation18]  }
  0x80   :  { %s120_s15 = sshll.u32 %s6122_s6, 4  ;;  %s6123_s8 = smov [#allocation21]   ;;  %s121_s15 = int_to_ptr.vmem [resolvable:$true] %s120_s15 }
  0x81   :  { %s144_s27 = sshll.u32 %s6123_s8, 4  ;;  %s5958_s4 = scalar_lea.vmem %s121_s15, 16  ;;  %s145_s27 = int_to_ptr.vmem [resolvable:$true] %s144_s27 }
  0x82   :  { %p5959_p8 = scmp.ne.s32.totalorder %s121_s15, %s5958_s4  ;;  %s5962_s3 = scalar_lea.vmem %s121_s15, 32 }
  0x83   :  { %p5963_p9 = scmp.lt.s32.totalorder %s121_s15, %s121_s15  ;;  %p5964_p10 = scmp.lt.s32.totalorder %s5962_s3, %s5958_s4 }
  0x85   :  { %101 = dma.hbm_to_vmem [thread:$0]  %s7391_s30, 256, %s96_s28, [#allocation14], %s6112_s20, %s6112_s20, %s6113_s1  }
  0x86   :  { %p5965_p11 = por %p5964_p10, %p5963_p9 }
  0x88   :  { %p5966_p12 = pnand %p5965_p11, %p5959_p8 }
  0x8a   :  { %5969 = shalt.err (!%p5966_p12)
}
  0x8b   :  { %s7392_s9 = sld [smem:[#allocation52_spill]]  ;;  %s5978_s5 = scalar_lea.vmem %s145_s27, 16 }
  0x8c   :  { %p5979_p13 = scmp.ne.s32.totalorder %s145_s27, %s5978_s5  ;;  %s5982_s28 = scalar_lea.vmem %s145_s27, 32 }
  0x8d   :  { %p5983_p0 = scmp.lt.s32.totalorder %s145_s27, %s145_s27  ;;  %p5984_p1 = scmp.lt.s32.totalorder %s5982_s28, %s5978_s5 }
  0x8f   :  { %p5985_p2 = por %p5984_p1, %p5983_p0 }
  0x91   :  { %123 = dma.hbm_to_vmem [thread:$0]  %s7392_s9, 16, %s121_s15, [#allocation17]  }
  0x92   :  { %p5986_p3 = pnand %p5985_p2, %p5979_p13 }
  0x94   :  { %5989 = shalt.err (!%p5986_p3)
}
  0x95   :  { %147 = dma.hbm_to_vmem [thread:$0]  %s7359_s12, 16, %s145_s27, [#allocation20]  }
  0x96   :  { %s6124_s2 = smov [#allocation24]   ;;  %s6125_s7 = smov [#allocation27]  }
  0x97   :  { %s163_s29 = sshll.u32 %s6124_s2, 4  ;;  %s188_s30 = sshll.u32 %s6125_s7, 4  ;;  %s164_s29 = int_to_ptr.vmem [resolvable:$true] %s163_s29  ;;  %s189_s30 = int_to_ptr.vmem [resolvable:$true] %s188_s30 }
  0x98   :  { %s5998_s6 = scalar_lea.vmem %s164_s29, 256  ;;  %p6003_p5 = scmp.lt.s32.totalorder %s164_s29, %s164_s29 }
  0x99   :  { %p5999_p4 = scmp.ne.s32.totalorder %s164_s29, %s5998_s6  ;;  %p6004_p6 = scmp.lt.s32.totalorder %s5998_s6, %s5998_s6 }
  0x9b   :  { %p6005_p7 = por %p6004_p6, %p6003_p5 }
  0x9d   :  { %p6006_p8 = pnand %p6005_p7, %p5999_p4 }
  0x9f   :  { %6009 = shalt.err (!%p6006_p8)
}
  0xa0   :  { %169 = dma.hbm_to_vmem [thread:$0]  %s7361_s14, 256, %s164_s29, [#allocation23], %s6112_s20, %s6112_s20, %s6113_s1  }
  0xa1   :  { %s6018_s12 = scalar_lea.vmem %s189_s30, 16  ;;  %s6022_s27 = scalar_lea.vmem %s189_s30, 32 }
  0xa2   :  { %p6019_p9 = scmp.ne.s32.totalorder %s189_s30, %s6018_s12  ;;  %p6023_p10 = scmp.lt.s32.totalorder %s189_s30, %s189_s30 }
  0xa3   :  { %p6024_p11 = scmp.lt.s32.totalorder %s6022_s27, %s6018_s12 }
  0xa5   :  { %p6025_p12 = por %p6024_p11, %p6023_p10 }
  0xa7   :  { %p6026_p13 = pnand %p6025_p12, %p6019_p9 }
  0xa9   :  { %6029 = shalt.err (!%p6026_p13)
}
  0xaa   :  { %191 = dma.hbm_to_vmem [thread:$0]  %s7363_s16, 16, %s189_s30, [#allocation26]  }
  0xab   :  { %s6126_s26 = smov [#allocation30]   ;;  %s6127_s9 = smov [#allocation31]  }
  0xac   :  { %s215_s17 = sshll.u32 %s6126_s26, 4  ;;  %s227_s5 = sshll.u32 %s6127_s9, 4  ;;  %s216_s17 = int_to_ptr.vmem [resolvable:$true] %s215_s17  ;;  %s228_s5 = int_to_ptr.vmem [resolvable:$true] %s227_s5 }
  0xad   :  { %s6038_s28 = scalar_lea.vmem %s216_s17, 256  ;;  %p6043_p1 = scmp.lt.s32.totalorder %s216_s17, %s216_s17 }
  0xae   :  { %p6039_p0 = scmp.ne.s32.totalorder %s216_s17, %s6038_s28  ;;  %p6044_p2 = scmp.lt.s32.totalorder %s6038_s28, %s6038_s28 }
  0xb0   :  { %p6045_p3 = por %p6044_p2, %p6043_p1 }
  0xb2   :  { %p6046_p4 = pnand %p6045_p3, %p6039_p0 }
  0xb4   :  { %6049 = shalt.err (!%p6046_p4)
}
  0xb5   :  { %221 = dma.hbm_to_vmem [thread:$0]  %s7369_s22, 256, %s216_s17, [#allocation29], %s6112_s20, %s6112_s20, %s6113_s1  }
  0xb6   :  { %s6058_s16 = scalar_lea.vmem %s228_s5, 256  ;;  %p6063_p6 = scmp.lt.s32.totalorder %s228_s5, %s228_s5 }
  0xb7   :  { %p6059_p5 = scmp.ne.s32.totalorder %s228_s5, %s6058_s16  ;;  %p6064_p7 = scmp.lt.s32.totalorder %s6058_s16, %s6058_s16 }
  0xb9   :  { %p6065_p8 = por %p6064_p7, %p6063_p6 }
  0xbb   :  { %p6066_p9 = pnand %p6065_p8, %p6059_p5 }
  0xbd   :  { %6069 = shalt.err (!%p6066_p9)
}
  0xbe   :  { %233 = dma.hbm_to_vmem [thread:$0]  %s7370_s23, 256, %s228_s5, [#allocation32], %s6112_s20, %s6112_s20, %s6113_s1  }
  0xbf   :  { %6090 = dma.done.wait [#allocation8], 256  }
  0xc0   :  { %6091 = vsyncadd [#allocation8], 4294967040 }
  0xc1   :  { %6092 = dma.done.wait [#allocation11], 272  }
  0xc2   :  { %6093 = vsyncadd [#allocation11], 4294967024 }
  0xc3   :  { %6094 = dma.done.wait [#allocation14], 272  }
  0xc4   :  { %6095 = vsyncadd [#allocation14], 4294967024 }
  0xc5   :  { %6096 = dma.done.wait [#allocation17], 272  }
  0xc6   :  { %6097 = vsyncadd [#allocation17], 4294967024 }
  0xc7   :  { %6098 = dma.done.wait [#allocation20], 32  }
  0xc8   :  { %6099 = vsyncadd [#allocation20], 4294967264 }
  0xc9   :  { %6100 = dma.done.wait [#allocation23], 272  }
  0xca   :  { %6101 = vsyncadd [#allocation23], 4294967024 }
  0xcb   :  { %6102 = dma.done.wait [#allocation26], 272  }
  0xcc   :  { %6103 = vsyncadd [#allocation26], 4294967024 }
  0xcd   :  { %6104 = dma.done.wait [#allocation29], 272  }
  0xce   :  { %6105 = vsyncadd [#allocation29], 4294967024 }
  0xcf   :  { %6106 = dma.done.wait [#allocation32], 256  }
  0xd0   :  { %6107 = vsyncadd [#allocation32], 4294967040  ;;  %v6128_v1 = vmov 0   ;;  %v5437_v2 = vld [vmem:[#allocation7 + $0x8] sm:$0xff]   ;;  %v5438_v3 = vld [vmem:[#allocation7] sm:$0xff]   ;;  %s7393_s1 = sld [smem:[#allocation44_spill]] }
  0xd1   :  { %5433 = vset.pattern.permute.xlu0 %v6128_v1  ;;  %5434 = vset.pattern.permute.xlu1 %v6128_v1  ;;  %vm356_vm0 = vcmask 261120   ;;  %v5439_v14 = vld [vmem:[#allocation10 + $0x8] sm:$0xff]   ;;  %v6369_v17 = vld [vmem:[#allocation15 + $0x8] sm:$0xff]   ;;  %v6129_v18 = vmov 0.0   ;;  %v6374_v20 = vld [vmem:[#allocation15] sm:$0xff]   ;;  %vm6130_vm1 = vmmov 0  }
  0xd2   :  { %5015 = vmatprep.subr.bf16.mxu0 %v5437_v2  ;;  %5403 = vmatprep.subr.bf16.mxu1 %v5437_v2  ;;  %v5441_v19 = vld [vmem:[#allocation10] sm:$0xff]   ;;  %v6381_v21 = vld [vmem:[#allocation16 + $0x8] sm:$0xff]   ;;  %vm434_vm2 = vcmask 785408   ;;  %v6415_v39 = vld [vmem:[#allocation18] ss:$0 sm:$0xff]  ;;  %s7394_s0 = sld [smem:[#allocation45_spill]] }
  0xd3   :  { %5016 = vmatpush3.bf16.msra.mxu0 %v5437_v2  ;;  %5405 = vmatpush3.bf16.msra.mxu1 %v5437_v2  ;;  %v6386_v22 = vld [vmem:[#allocation16] sm:$0xff]   ;;  %v4637_v23 = vld [vmem:[#allocation12] ss:$0 sm:$0xff]  ;;  %v4648_v38 = vld [vmem:[#allocation13] ss:$0 sm:$0xff]  ;;  %s6131_s16 = smov 96  }
  0xd4   :  { %5017 = vmatprep.subr.bf16.mxu0 %v5438_v3  ;;  %5404 = vmatprep.subr.bf16.mxu1 %v5438_v3  ;;  %v6429_v62 = vld [vmem:[#allocation19] ss:$0 sm:$0xff] }
  0xd6   :  { %v293_v4 = vld [vmem:[%s7393_s1] sm:$0xff]  ;;  %v294_v5 = vld [vmem:[%s7393_s1 + $0x8] sm:$0xff]  ;;  %v295_v9 = vld [vmem:[%s7393_s1 + $0x10] sm:$0xff] }
  0xd7   :  { %v297_v6 = vld [vmem:[%s7393_s1 + $0x20] sm:$0xff]  ;;  %v4821_v7 = vpack.c.bf16 %v294_v5, %v293_v4  ;;  %v298_v8 = vld [vmem:[%s7393_s1 + $0x28] sm:$0xff]  ;;  %v296_v10 = vld [vmem:[%s7393_s1 + $0x18] sm:$0xff]  ;;  %5018 = vmatpush3.bf16.msra.mxu0 %v5438_v3  ;;  %5406 = vmatpush3.bf16.msra.mxu1 %v5438_v3 }
  0xd8   :  { %v4823_v11 = vpack.c.bf16 %v298_v8, %v297_v6  ;;  %v299_v12 = vld [vmem:[%s7393_s1 + $0x30] sm:$0xff]  ;;  %v300_v13 = vld [vmem:[%s7393_s1 + $0x38] sm:$0xff]  ;;  %v4822_v15 = vpack.c.bf16 %v296_v10, %v295_v9  ;;  %5027 = vmatprep.subr.bf16.mxu1 %v5439_v14  ;;  %5039 = vmatprep.subr.bf16.mxu0 %v6129_v18 }
  0xd9   :  { %5019 = vmatprep.mubr.msk.bf16.mxu0 %vm356_vm0, %v4821_v7  ;;  %v4824_v16 = vpack.c.bf16 %v300_v13, %v299_v12 }
  0xda   :  { %5023 = vmatprep.mubr.msk.bf16.mxu1 %vm356_vm0, %v4823_v11  ;;  %5020 = vmatmul.mubr.msk.bf16.vlgmr.msra.gmra.mxu0 %vm356_vm0, %v4822_v15 }
  0xdb   :  { %5024 = vmatmul.mubr.msk.bf16.vlgmr.msra.gmra.mxu1 %vm356_vm0, %v4824_v16  ;;  %5040 = vmatpush3.bf16.msra.mxu0 %v6369_v17 }
  0xdc   :  { %5028 = vmatpush3.bf16.msra.mxu1 %v5439_v14  ;;  %5041 = vmatprep.subr.bf16.mxu0 %v6129_v18 }
  0xdd   :  { %5029 = vmatprep.subr.bf16.mxu1 %v5441_v19  ;;  %5031 = vmatprep.mubr.msk.bf16.mxu1 %vm356_vm0, %v4821_v7 }
  0xde   :  { %5043 = vmatprep.mubr.msk.bf16.mxu0 %vm6130_vm1, %v6129_v18 }
  0xdf   :  { %5042 = vmatpush3.bf16.msra.mxu0 %v6374_v20 }
  0xe0   :  { %5030 = vmatpush3.bf16.msra.mxu1 %v5441_v19  ;;  %5055 = vmatprep.subr.bf16.mxu0 %v6129_v18 }
  0xe1   :  { %5047 = vmatprep.subr.bf16.mxu1 %v6129_v18 }
  0xe2   :  { %5044 = vmatmul.mubr.bf16.vlgmr.msra.gmra.mxu0 %v6128_v1 }
  0xe3   :  { %5032 = vmatmul.mubr.msk.bf16.vlgmr.msra.gmra.mxu1 %vm356_vm0, %v4822_v15  ;;  %5056 = vmatpush3.bf16.msra.mxu0 %v6369_v17 }
  0xe4   :  { %5048 = vmatpush3.bf16.msra.mxu1 %v6381_v21  ;;  %5035 = vmatprep.mubr.msk.bf16.mxu1 %vm356_vm0, %v4823_v11 }
  0xe5   :  { %5049 = vmatprep.subr.bf16.mxu1 %v6129_v18  ;;  %5057 = vmatprep.subr.bf16.mxu0 %v6129_v18 }
  0xe6   :  { %5059 = vmatprep.mubr.msk.bf16.mxu0 %vm6130_vm1, %v6129_v18 }
  0xe7   :  { %5058 = vmatpush3.bf16.msra.mxu0 %v6374_v20 }
  0xe8   :  { %5050 = vmatpush3.bf16.msra.mxu1 %v6386_v22  ;;  %5071 = vmatprep.subr.bf16.mxu0 %v6129_v18 }
  0xe9   :  { %5063 = vmatprep.subr.bf16.mxu1 %v6129_v18 }
  0xeb   :  { %5036 = vmatmul.mubr.msk.bf16.gmra.mxu1 %vm356_vm0, %v4824_v16 }
  0xec   :  { %5051 = vmatprep.mubr.msk.bf16.mxu1 %vm6130_vm1, %v6129_v18 }
  0xf3   :  { %5052 = vmatmul.mubr.bf16.vlgmr.msra.gmra.mxu1 %v6128_v1 }
  0xf4   :  { %5064 = vmatpush3.bf16.msra.mxu1 %v6381_v21  ;;  %5067 = vmatprep.mubr.msk.bf16.mxu1 %vm6130_vm1, %v6129_v18 }
  0xf5   :  { %5065 = vmatprep.subr.bf16.mxu1 %v6129_v18 }
  0xf8   :  { %5066 = vmatpush3.bf16.msra.mxu1 %v6386_v22 }
  0xf9   :  { %5079 = vmatprep.subr.bf16.mxu1 %v6129_v18 }
 0x19a   :  { %v5021_v24 = vpop.f32.mrf.mxu0 }
 0x19b   :  { %v5025_v25 = vpop.f32.mrf.mxu1  ;;  %v412_v26 = vadd.f32 %v5021_v24, %v4637_v23  ;;  %v292_v24 = vld [vmem:[%s7394_s0 + $0x38] sm:$0xff] }
 0x19c   :  { %v428_v27 = vadd.f32 %v5025_v25, %v4637_v23  ;;  %v403_v28 = vpop.f32.mrf.mxu0 }
 0x19d   :  { %v419_v29 = vpop.f32.mrf.mxu1  ;;  %437 = vst.msk [vmem:[#allocation4 + $0x10] sm:$0xff] %vm434_vm2, %v412_v26  ;;  %v404_v30 = vadd.f32 %v4637_v23, %v403_v28 }
 0x19e   :  { %441 = vst.msk [vmem:[#allocation4 + $0x30] sm:$0xff] %vm434_vm2, %v428_v27  ;;  %v420_v31 = vadd.f32 %v4637_v23, %v419_v29  ;;  %v5022_v32 = vpop.f32.mrf.mxu0 }
 0x19f   :  { %v5026_v33 = vpop.f32.mrf.mxu1  ;;  %435 = vst.msk [vmem:[#allocation4] sm:$0xff] %vm434_vm2, %v404_v30  ;;  %v415_v34 = vadd.f32 %v5022_v32, %v4637_v23 }
 0x1a0   :  { %439 = vst.msk [vmem:[#allocation4 + $0x20] sm:$0xff] %vm434_vm2, %v420_v31  ;;  %v431_v35 = vadd.f32 %v5026_v33, %v4637_v23  ;;  %v406_v36 = vpop.f32.mrf.mxu0 }
 0x1a1   :  { %v422_v37 = vpop.f32.mrf.mxu1  ;;  %438 = vst.msk [vmem:[#allocation4 + $0x18] sm:$0xff] %vm434_vm2, %v415_v34  ;;  %v407_v40 = vadd.f32 %v4637_v23, %v406_v36 }
 0x1a2   :  { %442 = vst.msk [vmem:[#allocation4 + $0x38] sm:$0xff] %vm434_vm2, %v431_v35  ;;  %v423_v41 = vadd.f32 %v4637_v23, %v422_v37  ;;  %v601_v43 = vpop.f32.mrf.mxu0 }
 0x1a3   :  { %v5033_v42 = vpop.f32.mrf.mxu1  ;;  %436 = vst.msk [vmem:[#allocation4 + $0x8] sm:$0xff] %vm434_vm2, %v407_v40  ;;  %v602_v45 = vadd.f32 %v6415_v39, %v601_v43 }
 0x1a4   :  { %440 = vst.msk [vmem:[#allocation4 + $0x28] sm:$0xff] %vm434_vm2, %v423_v41  ;;  %v505_v44 = vadd.f32 %v5033_v42, %v4648_v38  ;;  %v5045_v47 = vpop.f32.mrf.mxu0 }
 0x1a5   :  { %v496_v46 = vpop.f32.mrf.mxu1  ;;  %615 = vrot.lane.b32.xlu0 %v602_v45, %s6112_s20 }
 0x1a6   :  { %529 = vst.msk [vmem:[#allocation5 + $0x10] sm:$0xff] %vm434_vm2, %v505_v44  ;;  %v497_v48 = vadd.f32 %v4648_v38, %v496_v46  ;;  %v604_v50 = vpop.f32.mrf.mxu0  ;;  %v545_v6 = vld [vmem:[#allocation4] sm:$0xff] }
 0x1a7   :  { %v5034_v49 = vpop.f32.mrf.mxu1  ;;  %v607_v7 = vadd.f32 %v602_v45, %v545_v6 }
 0x1a8   :  { %527 = vst.msk [vmem:[#allocation5] sm:$0xff] %vm434_vm2, %v497_v48  ;;  %v508_v51 = vadd.f32 %v5034_v49, %v4648_v38  ;;  %v5046_v53 = vpop.f32.mrf.mxu0 }
 0x1a9   :  { %v499_v52 = vpop.f32.mrf.mxu1  ;;  %v4658_v8 = vmul.f32 -1.442695, %v607_v7 }
 0x1aa   :  { %530 = vst.msk [vmem:[#allocation5 + $0x18] sm:$0xff] %vm434_vm2, %v508_v51  ;;  %v500_v54 = vadd.f32 %v4648_v38, %v499_v52 }
 0x1ab   :  { %v5037_v55 = vpop.f32.mrf.mxu1  ;;  %5467 = vpow2.f32 %v4658_v8 }
 0x1ac   :  { %528 = vst.msk [vmem:[#allocation5 + $0x8] sm:$0xff] %vm434_vm2, %v500_v54  ;;  %v521_v56 = vadd.f32 %v5037_v55, %v4648_v38 }
 0x1ad   :  { %v512_v57 = vpop.f32.mrf.mxu1 }
 0x1ae   :  { %533 = vst.msk [vmem:[#allocation5 + $0x30] sm:$0xff] %vm434_vm2, %v521_v56  ;;  %v513_v58 = vadd.f32 %v4648_v38, %v512_v57 }
 0x1af   :  { %v5038_v59 = vpop.f32.mrf.mxu1 }
 0x1b0   :  { %531 = vst.msk [vmem:[#allocation5 + $0x20] sm:$0xff] %vm434_vm2, %v513_v58  ;;  %v524_v60 = vadd.f32 %v5038_v59, %v4648_v38 }
 0x1b1   :  { %v515_v61 = vpop.f32.mrf.mxu1 }
 0x1b2   :  { %534 = vst.msk [vmem:[#allocation5 + $0x38] sm:$0xff] %vm434_vm2, %v524_v60  ;;  %v516_v63 = vadd.f32 %v4648_v38, %v515_v61  ;;  %v737_v61 = vld [vmem:[#allocation4 + $0x8] sm:$0xff] }
 0x1b3   :  { %v687_v0 = vpop.f32.mrf.mxu1 }
 0x1b4   :  { %532 = vst.msk [vmem:[#allocation5 + $0x28] sm:$0xff] %vm434_vm2, %v516_v63  ;;  %v688_v2 = vadd.f32 %v6429_v62, %v687_v0 }
 0x1b5   :  { %v5053_v3 = vpop.f32.mrf.mxu1 }
 0x1b6   :  { %701 = vrot.lane.b32.xlu0 %v688_v2, %s6112_s20 }
 0x1b7   :  { %v690_v4 = vpop.f32.mrf.mxu1 }
 0x1b8   :  { %v5468_v12 = vpop.eup %5467 }
 0x1b9   :  { %v5054_v5 = vpop.f32.mrf.mxu1  ;;  %v634_v9 = vld [vmem:[#allocation5 + $0x38] sm:$0xff]  ;;  %v611_v13 = vadd.f32 1.0, %v5468_v12 }
 0x1ba   :  { %v693_v10 = vadd.f32 %v688_v2, %v634_v9  ;;  %721 = vperm.xlu0 %5433, %v292_v24   ;;  %v812_v2 = vld [vmem:[#allocation5 + $0x30] sm:$0xff] }
 0x1bc   :  { %v4662_v11 = vmul.f32 -1.442695, %v693_v10 }
 0x1be   :  { %5469 = vpow2.f32 %v4662_v11 }
 0x1bf   :  { %5471 = vrcp.f32 %v611_v13 }
 0x1cb   :  { %v5470_v14 = vpop.eup %5469 }
 0x1cc   :  { %v697_v15 = vadd.f32 1.0, %v5470_v14  ;;  %v5472_v16 = vpop.eup %5471 }
 0x1cd   :  { %v625_v34 = vsub.f32 1.0, %v5472_v16  ;;  %v631_v36 = vmul.f32 0.0, %v5472_v16 }
 0x1ce   :  { %5473 = vrcp.f32 %v697_v15  ;;  %v291_v15 = vld [vmem:[%s7394_s0 + $0x30] sm:$0xff] }
 0x1db   :  { %v5474_v25 = vpop.eup %5473 }
 0x1dc   :  { %v711_v41 = vsub.f32 1.0, %v5474_v25  ;;  %v717_v43 = vmul.f32 0.0, %v5474_v25 }
 0x217   :  { %v616_v19 = vpop.permute.xlu0 %615 }
 0x218   :  { %v618_v23 = vmul.f32 %v5472_v16, %v616_v19 }
 0x21a   :  { %620 = vrot.lane.b32.xlu1 %v618_v23, %s6112_s20 }
 0x228   :  { %v702_v26 = vpop.permute.xlu0 %701 }
 0x229   :  { %v704_v27 = vmul.f32 %v5474_v25, %v702_v26 }
 0x22b   :  { %706 = vrot.lane.b32.xlu1 %v704_v27, %s6112_s20 }
 0x235   :  { %v6447_v45 = vpop.permute.xlu0 %721 }
 0x28c   :  { %v621_v28 = vpop.permute.xlu1 %620 }
 0x28d   :  { %v623_v29 = vadd.f32 %v621_v28, %v545_v6 }
 0x28f   :  { %5475 = vtanh.f32 %v623_v29 }
 0x29c   :  { %v5476_v30 = vpop.eup %5475 }
 0x29d   :  { %v707_v31 = vpop.permute.xlu1 %706  ;;  %627 = vrot.lane.b32.xlu1 %v5476_v30, %s6131_s16 }
 0x29e   :  { %v709_v32 = vadd.f32 %v707_v31, %v634_v9 }
 0x2a0   :  { %5477 = vtanh.f32 %v709_v32 }
 0x2ad   :  { %v5478_v33 = vpop.eup %5477 }
 0x2ae   :  { %713 = vrot.lane.b32.xlu1 %v5478_v33, %s6131_s16 }
 0x30f   :  { %v628_v35 = vpop.permute.xlu1 %627 }
 0x310   :  { %v630_v37 = vmul.f32 %v628_v35, %v625_v34 }
 0x312   :  { %v6442_v38 = vadd.f32 %v631_v36, %v630_v37 }
 0x314   :  { %v738_v40 = vpack.c.bf16 %v6442_v38, %v6442_v38 }
 0x316   :  { %740 = vrot.lane.b32.xlu0 %v738_v40, %s6131_s16 }
 0x320   :  { %v714_v42 = vpop.permute.xlu1 %713 }
 0x321   :  { %v716_v44 = vmul.f32 %v714_v42, %v711_v41 }
 0x323   :  { %v718_v46 = vadd.f32 %v717_v43, %v716_v44 }
 0x325   :  { %v6450_v47 = vmul.f32 %v6447_v45, %v718_v46 }
 0x327   :  { %v813_v48 = vpack.c.bf16 %v6450_v47, %v6450_v47 }
 0x329   :  { %815 = vrot.lane.b32.xlu1 %v813_v48, %s6131_s16 }
 0x388   :  { %v741_v49 = vpop.permute.xlu0 %740 }
 0x389   :  { %5060 = vmatmul.mubr.msk.bf16.vlgmr.msra.gmra.mxu0 %vm356_vm0, %v741_v49 }
 0x38a   :  { %5072 = vmatpush3.bf16.msra.mxu0 %v6369_v17  ;;  %5075 = vmatprep.mubr.msk.bf16.mxu0 %vm6130_vm1, %v6129_v18 }
 0x38b   :  { %5073 = vmatprep.subr.bf16.mxu0 %v6129_v18 }
 0x38e   :  { %5074 = vmatpush3.bf16.msra.mxu0 %v6374_v20 }
 0x38f   :  { %5087 = vmatprep.subr.bf16.mxu0 %v6129_v18 }
 0x39b   :  { %v816_v50 = vpop.permute.xlu1 %815 }
 0x39c   :  { %5068 = vmatmul.mubr.msk.bf16.vlgmr.msra.gmra.mxu1 %vm356_vm0, %v816_v50 }
 0x39d   :  { %5080 = vmatpush3.bf16.msra.mxu1 %v6381_v21  ;;  %5083 = vmatprep.mubr.msk.bf16.mxu1 %vm6130_vm1, %v6129_v18 }
 0x39e   :  { %5081 = vmatprep.subr.bf16.mxu1 %v6129_v18 }
 0x3a1   :  { %5082 = vmatpush3.bf16.msra.mxu1 %v6386_v22 }
 0x3a2   :  { %5095 = vmatprep.subr.bf16.mxu1 %v6129_v18 }
 0x449   :  { %v779_v51 = vpop.f32.mrf.mxu0 }
 0x44a   :  { %v780_v52 = vadd.f32 %v6415_v39, %v779_v51 }
 0x44b   :  { %v5061_v53 = vpop.f32.mrf.mxu0 }
 0x44c   :  { %793 = vrot.lane.b32.xlu0 %v780_v52, %s6112_s20  ;;  %v785_v63 = vadd.f32 %v780_v52, %v737_v61 }
 0x44d   :  { %v782_v54 = vpop.f32.mrf.mxu0 }
 0x44e   :  { %v4664_v0 = vmul.f32 -1.442695, %v785_v63 }
 0x44f   :  { %v5062_v55 = vpop.f32.mrf.mxu0 }
 0x450   :  { %5479 = vpow2.f32 %v4664_v0 }
 0x45c   :  { %v854_v56 = vpop.f32.mrf.mxu1 }
 0x45d   :  { %v855_v57 = vadd.f32 %v6429_v62, %v854_v56  ;;  %v5480_v4 = vpop.eup %5479 }
 0x45e   :  { %v5069_v58 = vpop.f32.mrf.mxu1  ;;  %v789_v6 = vadd.f32 1.0, %v5480_v4 }
 0x45f   :  { %868 = vrot.lane.b32.xlu1 %v855_v57, %s6112_s20  ;;  %v860_v3 = vadd.f32 %v855_v57, %v812_v2  ;;  %v905_v57 = vld [vmem:[#allocation4 + $0x10] sm:$0xff] }
 0x460   :  { %v857_v59 = vpop.f32.mrf.mxu1 }
 0x461   :  { %v4666_v5 = vmul.f32 -1.442695, %v860_v3 }
 0x462   :  { %v5070_v60 = vpop.f32.mrf.mxu1 }
 0x463   :  { %5481 = vpow2.f32 %v4666_v5  ;;  %v980_v60 = vld [vmem:[#allocation5 + $0x28] sm:$0xff] }
 0x464   :  { %5483 = vrcp.f32 %v789_v6 }
 0x470   :  { %v5482_v7 = vpop.eup %5481 }
 0x471   :  { %v5484_v8 = vpop.eup %5483  ;;  %v864_v10 = vadd.f32 1.0, %v5482_v7 }
 0x472   :  { %v803_v27 = vsub.f32 1.0, %v5484_v8  ;;  %v809_v29 = vmul.f32 %v5484_v8, %v6442_v38 }
 0x473   :  { %5485 = vrcp.f32 %v864_v10 }
 0x480   :  { %v5486_v12 = vpop.eup %5485 }
 0x481   :  { %v878_v33 = vsub.f32 1.0, %v5486_v12  ;;  %v884_v35 = vmul.f32 %v5486_v12, %v6450_v47 }
 0x4be   :  { %v794_v9 = vpop.permute.xlu0 %793 }
 0x4bf   :  { %v796_v11 = vmul.f32 %v5484_v8, %v794_v9 }
 0x4c1   :  { %798 = vrot.lane.b32.xlu0 %v796_v11, %s6112_s20  ;;  %v290_v11 = vld [vmem:[%s7394_s0 + $0x28] sm:$0xff] }
 0x4d1   :  { %v869_v13 = vpop.permute.xlu1 %868 }
 0x4d2   :  { %v871_v14 = vmul.f32 %v5486_v12, %v869_v13 }
 0x4d4   :  { %873 = vrot.lane.b32.xlu1 %v871_v14, %s6112_s20 }
 0x4d8   :  { %888 = vperm.xlu1 %5434, %v291_v15  }
 0x533   :  { %v799_v16 = vpop.permute.xlu0 %798 }
 0x534   :  { %v801_v19 = vadd.f32 %v799_v16, %v737_v61 }
 0x536   :  { %5487 = vtanh.f32 %v801_v19 }
 0x543   :  { %v5488_v23 = vpop.eup %5487 }
 0x544   :  { %805 = vrot.lane.b32.xlu0 %v5488_v23, %s6131_s16 }
 0x546   :  { %v874_v24 = vpop.permute.xlu1 %873 }
 0x547   :  { %v876_v25 = vadd.f32 %v874_v24, %v812_v2 }
 0x549   :  { %5489 = vtanh.f32 %v876_v25 }
 0x553   :  { %v6487_v37 = vpop.permute.xlu1 %888 }
 0x556   :  { %v5490_v26 = vpop.eup %5489 }
 0x557   :  { %880 = vrot.lane.b32.xlu0 %v5490_v26, %s6131_s16 }
 0x5b6   :  { %v806_v28 = vpop.permute.xlu0 %805 }
 0x5b7   :  { %v808_v30 = vmul.f32 %v806_v28, %v803_v27 }
 0x5b9   :  { %v6481_v31 = vadd.f32 %v809_v29, %v808_v30 }
 0x5bb   :  { %v906_v32 = vpack.c.bf16 %v6481_v31, %v6481_v31 }
 0x5bd   :  { %908 = vrot.lane.b32.xlu1 %v906_v32, %s6131_s16 }
 0x5c9   :  { %v881_v34 = vpop.permute.xlu0 %880 }
 0x5ca   :  { %v883_v36 = vmul.f32 %v881_v34, %v878_v33 }
 0x5cc   :  { %v885_v40 = vadd.f32 %v884_v35, %v883_v36 }
 0x5ce   :  { %v6490_v41 = vmul.f32 %v6487_v37, %v885_v40 }
 0x5d0   :  { %v981_v42 = vpack.c.bf16 %v6490_v41, %v6490_v41 }
 0x5d2   :  { %983 = vrot.lane.b32.xlu0 %v981_v42, %s6131_s16 }
 0x62f   :  { %v909_v43 = vpop.permute.xlu1 %908 }
 0x630   :  { %5076 = vmatmul.mubr.msk.bf16.vlgmr.msra.gmra.mxu0 %vm356_vm0, %v909_v43 }
 0x631   :  { %5088 = vmatpush3.bf16.msra.mxu0 %v6369_v17  ;;  %5091 = vmatprep.mubr.msk.bf16.mxu0 %vm6130_vm1, %v6129_v18 }
 0x632   :  { %5089 = vmatprep.subr.bf16.mxu0 %v6129_v18 }
 0x635   :  { %5090 = vmatpush3.bf16.msra.mxu0 %v6374_v20 }
 0x636   :  { %5103 = vmatprep.subr.bf16.mxu0 %v6129_v18 }
 0x644   :  { %v984_v44 = vpop.permute.xlu0 %983 }
 0x645   :  { %5084 = vmatmul.mubr.msk.bf16.vlgmr.msra.gmra.mxu1 %vm356_vm0, %v984_v44 }
 0x646   :  { %5096 = vmatpush3.bf16.msra.mxu1 %v6381_v21  ;;  %5099 = vmatprep.mubr.msk.bf16.mxu1 %vm6130_vm1, %v6129_v18 }
 0x647   :  { %5097 = vmatprep.subr.bf16.mxu1 %v6129_v18 }
 0x64a   :  { %5098 = vmatpush3.bf16.msra.mxu1 %v6386_v22 }
 0x64b   :  { %5111 = vmatprep.subr.bf16.mxu1 %v6129_v18 }
 0x6f0   :  { %v947_v46 = vpop.f32.mrf.mxu0 }
 0x6f1   :  { %v948_v48 = vadd.f32 %v6415_v39, %v947_v46 }
 0x6f2   :  { %v5077_v49 = vpop.f32.mrf.mxu0 }
 0x6f3   :  { %961 = vrot.lane.b32.xlu1 %v948_v48, %s6112_s20  ;;  %v953_v58 = vadd.f32 %v948_v48, %v905_v57 }
 0x6f4   :  { %v950_v50 = vpop.f32.mrf.mxu0 }
 0x6f5   :  { %v4668_v59 = vmul.f32 -1.442695, %v953_v58 }
 0x6f6   :  { %v5078_v51 = vpop.f32.mrf.mxu0 }
 0x6f7   :  { %5491 = vpow2.f32 %v4668_v59 }
 0x704   :  { %v5492_v61 = vpop.eup %5491 }
 0x705   :  { %v1022_v52 = vpop.f32.mrf.mxu1  ;;  %v957_v0 = vadd.f32 1.0, %v5492_v61 }
 0x706   :  { %v1023_v53 = vadd.f32 %v6429_v62, %v1022_v52 }
 0x707   :  { %v5085_v54 = vpop.f32.mrf.mxu1  ;;  %5493 = vrcp.f32 %v957_v0 }
 0x708   :  { %1036 = vrot.lane.b32.xlu0 %v1023_v53, %s6112_s20  ;;  %v1028_v63 = vadd.f32 %v1023_v53, %v980_v60 }
 0x709   :  { %v1025_v55 = vpop.f32.mrf.mxu1 }
 0x70a   :  { %v4670_v2 = vmul.f32 -1.442695, %v1028_v63 }
 0x70b   :  { %v5086_v56 = vpop.f32.mrf.mxu1 }
 0x70c   :  { %5495 = vpow2.f32 %v4670_v2  ;;  %v1073_v56 = vld [vmem:[#allocation4 + $0x18] sm:$0xff] }
 0x714   :  { %v5494_v3 = vpop.eup %5493 }
 0x715   :  { %v971_v23 = vsub.f32 1.0, %v5494_v3  ;;  %v977_v25 = vmul.f32 %v5494_v3, %v6481_v31 }
 0x719   :  { %v5496_v4 = vpop.eup %5495 }
 0x71a   :  { %v1032_v7 = vadd.f32 1.0, %v5496_v4 }
 0x71c   :  { %5497 = vrcp.f32 %v1032_v7 }
 0x729   :  { %v5498_v8 = vpop.eup %5497 }
 0x72a   :  { %v1046_v29 = vsub.f32 1.0, %v5498_v8  ;;  %v1052_v32 = vmul.f32 %v5498_v8, %v6490_v41 }
 0x765   :  { %v962_v5 = vpop.permute.xlu1 %961 }
 0x766   :  { %v964_v6 = vmul.f32 %v5494_v3, %v962_v5 }
 0x768   :  { %966 = vrot.lane.b32.xlu1 %v964_v6, %s6112_s20 }
 0x77a   :  { %v1037_v9 = vpop.permute.xlu0 %1036 }
 0x77b   :  { %v1039_v10 = vmul.f32 %v5498_v8, %v1037_v9 }
 0x77d   :  { %1041 = vrot.lane.b32.xlu0 %v1039_v10, %s6112_s20  ;;  %v289_v10 = vld [vmem:[%s7394_s0 + $0x20] sm:$0xff] }
 0x781   :  { %1056 = vperm.xlu0 %5433, %v290_v11  }
 0x7da   :  { %v967_v12 = vpop.permute.xlu1 %966 }
 0x7db   :  { %v969_v13 = vadd.f32 %v967_v12, %v905_v57 }
 0x7dd   :  { %5499 = vtanh.f32 %v969_v13 }
 0x7ea   :  { %v5500_v14 = vpop.eup %5499 }
 0x7eb   :  { %973 = vrot.lane.b32.xlu1 %v5500_v14, %s6131_s16 }
 0x7ef   :  { %v1042_v15 = vpop.permute.xlu0 %1041 }
 0x7f0   :  { %v1044_v16 = vadd.f32 %v1042_v15, %v980_v60  ;;  %v1148_v60 = vld [vmem:[#allocation5 + $0x20] sm:$0xff] }
 0x7f2   :  { %5501 = vtanh.f32 %v1044_v16 }
 0x7fc   :  { %v6527_v35 = vpop.permute.xlu0 %1056 }
 0x7ff   :  { %v5502_v19 = vpop.eup %5501 }
 0x800   :  { %1048 = vrot.lane.b32.xlu1 %v5502_v19, %s6131_s16 }
 0x85d   :  { %v974_v24 = vpop.permute.xlu1 %973 }
 0x85e   :  { %v976_v26 = vmul.f32 %v974_v24, %v971_v23 }
 0x860   :  { %v6521_v27 = vadd.f32 %v977_v25, %v976_v26 }
 0x862   :  { %v1074_v28 = vpack.c.bf16 %v6521_v27, %v6521_v27 }
 0x864   :  { %1076 = vrot.lane.b32.xlu0 %v1074_v28, %s6131_s16 }
 0x872   :  { %v1049_v30 = vpop.permute.xlu1 %1048 }
 0x873   :  { %v1051_v33 = vmul.f32 %v1049_v30, %v1046_v29 }
 0x875   :  { %v1053_v34 = vadd.f32 %v1052_v32, %v1051_v33 }
 0x877   :  { %v6530_v36 = vmul.f32 %v6527_v35, %v1053_v34 }
 0x879   :  { %v1149_v40 = vpack.c.bf16 %v6530_v36, %v6530_v36 }
 0x87b   :  { %1151 = vrot.lane.b32.xlu1 %v1149_v40, %s6131_s16 }
 0x8d6   :  { %v1077_v42 = vpop.permute.xlu0 %1076 }
 0x8d7   :  { %5092 = vmatmul.mubr.msk.bf16.vlgmr.msra.gmra.mxu0 %vm356_vm0, %v1077_v42 }
 0x8d8   :  { %5104 = vmatpush3.bf16.msra.mxu0 %v6369_v17  ;;  %5107 = vmatprep.mubr.msk.bf16.mxu0 %vm6130_vm1, %v6129_v18 }
 0x8d9   :  { %5105 = vmatprep.subr.bf16.mxu0 %v6129_v18 }
 0x8dc   :  { %5106 = vmatpush3.bf16.msra.mxu0 %v6374_v20 }
 0x8dd   :  { %5119 = vmatprep.subr.bf16.mxu0 %v6129_v18 }
 0x8ed   :  { %v1152_v43 = vpop.permute.xlu1 %1151 }
 0x8ee   :  { %5100 = vmatmul.mubr.msk.bf16.vlgmr.msra.gmra.mxu1 %vm356_vm0, %v1152_v43 }
 0x8ef   :  { %5112 = vmatpush3.bf16.msra.mxu1 %v6381_v21  ;;  %5115 = vmatprep.mubr.msk.bf16.mxu1 %vm6130_vm1, %v6129_v18 }
 0x8f0   :  { %5113 = vmatprep.subr.bf16.mxu1 %v6129_v18 }
 0x8f3   :  { %5114 = vmatpush3.bf16.msra.mxu1 %v6386_v22 }
 0x8f4   :  { %5127 = vmatprep.subr.bf16.mxu1 %v6129_v18 }
 0x997   :  { %v1115_v44 = vpop.f32.mrf.mxu0 }
 0x998   :  { %v1116_v46 = vadd.f32 %v6415_v39, %v1115_v44 }
 0x999   :  { %v5093_v48 = vpop.f32.mrf.mxu0 }
 0x99a   :  { %1129 = vrot.lane.b32.xlu0 %v1116_v46, %s6112_s20  ;;  %v1121_v57 = vadd.f32 %v1116_v46, %v1073_v56 }
 0x99b   :  { %v1118_v49 = vpop.f32.mrf.mxu0 }
 0x99c   :  { %v4672_v58 = vmul.f32 -1.442695, %v1121_v57  ;;  %v1241_v57 = vld [vmem:[#allocation4 + $0x20] sm:$0xff] }
 0x99d   :  { %v5094_v50 = vpop.f32.mrf.mxu0 }
 0x99e   :  { %5503 = vpow2.f32 %v4672_v58 }
 0x9ab   :  { %v5504_v59 = vpop.eup %5503 }
 0x9ac   :  { %v1125_v63 = vadd.f32 1.0, %v5504_v59 }
 0x9ae   :  { %v1190_v51 = vpop.f32.mrf.mxu1  ;;  %5505 = vrcp.f32 %v1125_v63 }
 0x9af   :  { %v1191_v52 = vadd.f32 %v6429_v62, %v1190_v51 }
 0x9b0   :  { %v5101_v53 = vpop.f32.mrf.mxu1 }
 0x9b1   :  { %1204 = vrot.lane.b32.xlu1 %v1191_v52, %s6112_s20  ;;  %v1196_v61 = vadd.f32 %v1191_v52, %v1148_v60 }
 0x9b2   :  { %v1193_v54 = vpop.f32.mrf.mxu1 }
 0x9b3   :  { %v4674_v0 = vmul.f32 -1.442695, %v1196_v61  ;;  %v1316_v61 = vld [vmem:[#allocation5 + $0x18] sm:$0xff] }
 0x9b4   :  { %v5102_v55 = vpop.f32.mrf.mxu1 }
 0x9b5   :  { %5507 = vpow2.f32 %v4674_v0 }
 0x9bb   :  { %v5506_v2 = vpop.eup %5505 }
 0x9bc   :  { %v1139_v19 = vsub.f32 1.0, %v5506_v2  ;;  %v1145_v24 = vmul.f32 %v5506_v2, %v6521_v27 }
 0x9c2   :  { %v5508_v5 = vpop.eup %5507 }
 0x9c3   :  { %v1200_v6 = vadd.f32 1.0, %v5508_v5 }
 0x9c5   :  { %5509 = vrcp.f32 %v1200_v6 }
 0x9d2   :  { %v5510_v7 = vpop.eup %5509 }
 0x9d3   :  { %v1214_v29 = vsub.f32 1.0, %v5510_v7  ;;  %v1220_v32 = vmul.f32 %v5510_v7, %v6530_v36 }
 0xa0c   :  { %v1130_v3 = vpop.permute.xlu0 %1129 }
 0xa0d   :  { %v1132_v4 = vmul.f32 %v5506_v2, %v1130_v3 }
 0xa0f   :  { %1134 = vrot.lane.b32.xlu0 %v1132_v4, %s6112_s20 }
 0xa23   :  { %v1205_v8 = vpop.permute.xlu1 %1204 }
 0xa24   :  { %v1207_v9 = vmul.f32 %v5510_v7, %v1205_v8 }
 0xa26   :  { %1209 = vrot.lane.b32.xlu1 %v1207_v9, %s6112_s20 }
 0xa2a   :  { %1224 = vperm.xlu1 %5434, %v289_v10  }
 0xa81   :  { %v1135_v11 = vpop.permute.xlu0 %1134 }
 0xa82   :  { %v1137_v12 = vadd.f32 %v1135_v11, %v1073_v56  ;;  %v288_v11 = vld [vmem:[%s7394_s0 + $0x18] sm:$0xff] }
 0xa84   :  { %5511 = vtanh.f32 %v1137_v12 }
 0xa91   :  { %v5512_v13 = vpop.eup %5511 }
 0xa92   :  { %1141 = vrot.lane.b32.xlu0 %v5512_v13, %s6131_s16 }
 0xa98   :  { %v1210_v14 = vpop.permute.xlu1 %1209 }
 0xa99   :  { %v1212_v15 = vadd.f32 %v1210_v14, %v1148_v60 }
 0xa9b   :  { %5513 = vtanh.f32 %v1212_v15 }
 0xaa5   :  { %v6567_v40 = vpop.permute.xlu1 %1224 }
 0xaa8   :  { %v5514_v16 = vpop.eup %5513 }
 0xaa9   :  { %1216 = vrot.lane.b32.xlu0 %v5514_v16, %s6131_s16 }
 0xb04   :  { %v1142_v23 = vpop.permute.xlu0 %1141 }
 0xb05   :  { %v1144_v25 = vmul.f32 %v1142_v23, %v1139_v19 }
 0xb07   :  { %v6561_v26 = vadd.f32 %v1145_v24, %v1144_v25 }
 0xb09   :  { %v1242_v28 = vpack.c.bf16 %v6561_v26, %v6561_v26 }
 0xb0b   :  { %1244 = vrot.lane.b32.xlu1 %v1242_v28, %s6131_s16 }
 0xb1b   :  { %v1217_v30 = vpop.permute.xlu0 %1216 }
 0xb1c   :  { %v1219_v33 = vmul.f32 %v1217_v30, %v1214_v29 }
 0xb1e   :  { %v1221_v34 = vadd.f32 %v1220_v32, %v1219_v33 }
 0xb20   :  { %v6570_v42 = vmul.f32 %v6567_v40, %v1221_v34 }
 0xb22   :  { %v1317_v43 = vpack.c.bf16 %v6570_v42, %v6570_v42 }
 0xb24   :  { %1319 = vrot.lane.b32.xlu0 %v1317_v43, %s6131_s16 }
 0xb7d   :  { %v1245_v44 = vpop.permute.xlu1 %1244 }
 0xb7e   :  { %5108 = vmatmul.mubr.msk.bf16.vlgmr.msra.gmra.mxu0 %vm356_vm0, %v1245_v44 }
 0xb7f   :  { %5120 = vmatpush3.bf16.msra.mxu0 %v6369_v17  ;;  %5123 = vmatprep.mubr.msk.bf16.mxu0 %vm6130_vm1, %v6129_v18 }
 0xb80   :  { %5121 = vmatprep.subr.bf16.mxu0 %v6129_v18 }
 0xb83   :  { %5122 = vmatpush3.bf16.msra.mxu0 %v6374_v20 }
 0xb84   :  { %5135 = vmatprep.subr.bf16.mxu0 %v6129_v18 }
 0xb96   :  { %v1320_v46 = vpop.permute.xlu0 %1319 }
 0xb97   :  { %5116 = vmatmul.mubr.msk.bf16.vlgmr.msra.gmra.mxu1 %vm356_vm0, %v1320_v46 }
 0xb98   :  { %5128 = vmatpush3.bf16.msra.mxu1 %v6381_v21  ;;  %5131 = vmatprep.mubr.msk.bf16.mxu1 %vm6130_vm1, %v6129_v18 }
 0xb99   :  { %5129 = vmatprep.subr.bf16.mxu1 %v6129_v18 }
 0xb9c   :  { %5130 = vmatpush3.bf16.msra.mxu1 %v6386_v22 }
 0xb9d   :  { %5143 = vmatprep.subr.bf16.mxu1 %v6129_v18 }
 0xc3e   :  { %v1283_v17 = vpop.f32.mrf.mxu0 }
 0xc3f   :  { %v1284_v48 = vadd.f32 %v6415_v39, %v1283_v17 }
 0xc40   :  { %v5109_v49 = vpop.f32.mrf.mxu0 }
 0xc41   :  { %1297 = vrot.lane.b32.xlu1 %v1284_v48, %s6112_s20  ;;  %v1289_v58 = vadd.f32 %v1284_v48, %v1241_v57 }
 0xc42   :  { %v1286_v50 = vpop.f32.mrf.mxu0 }
 0xc43   :  { %v4676_v59 = vmul.f32 -1.442695, %v1289_v58  ;;  %v6616_v50 = vld [vmem:[#allocation15 + $0x8] sm:$0xff]  }
 0xc44   :  { %v5110_v51 = vpop.f32.mrf.mxu0 }
 0xc45   :  { %5515 = vpow2.f32 %v4676_v59 }
 0xc52   :  { %v5516_v60 = vpop.eup %5515 }
 0xc53   :  { %v1293_v63 = vadd.f32 1.0, %v5516_v60  ;;  %v1409_v60 = vld [vmem:[#allocation4 + $0x28] sm:$0xff] }
 0xc55   :  { %5517 = vrcp.f32 %v1293_v63 }
 0xc57   :  { %v1358_v52 = vpop.f32.mrf.mxu1 }
 0xc58   :  { %v1359_v53 = vadd.f32 %v6429_v62, %v1358_v52 }
 0xc59   :  { %v5117_v54 = vpop.f32.mrf.mxu1 }
 0xc5a   :  { %1372 = vrot.lane.b32.xlu0 %v1359_v53, %s6112_s20  ;;  %v1364_v0 = vadd.f32 %v1359_v53, %v1316_v61 }
 0xc5b   :  { %v1361_v55 = vpop.f32.mrf.mxu1 }
 0xc5c   :  { %v4678_v2 = vmul.f32 -1.442695, %v1364_v0 }
 0xc5d   :  { %v5118_v56 = vpop.f32.mrf.mxu1 }
 0xc5e   :  { %5519 = vpow2.f32 %v4678_v2  ;;  %v1484_v2 = vld [vmem:[#allocation5 + $0x10] sm:$0xff] }
 0xc62   :  { %v5518_v3 = vpop.eup %5517 }
 0xc63   :  { %v1307_v23 = vsub.f32 1.0, %v5518_v3  ;;  %v1313_v25 = vmul.f32 %v5518_v3, %v6561_v26 }
 0xc6b   :  { %v5520_v6 = vpop.eup %5519 }
 0xc6c   :  { %v1368_v7 = vadd.f32 1.0, %v5520_v6 }
 0xc6e   :  { %5521 = vrcp.f32 %v1368_v7 }
 0xc7b   :  { %v5522_v8 = vpop.eup %5521 }
 0xc7c   :  { %v1382_v32 = vsub.f32 1.0, %v5522_v8  ;;  %v1388_v34 = vmul.f32 %v5522_v8, %v6570_v42 }
 0xcb3   :  { %v1298_v4 = vpop.permute.xlu1 %1297 }
 0xcb4   :  { %v1300_v5 = vmul.f32 %v5518_v3, %v1298_v4 }
 0xcb6   :  { %1302 = vrot.lane.b32.xlu1 %v1300_v5, %s6112_s20 }
 0xccc   :  { %v1373_v9 = vpop.permute.xlu0 %1372 }
 0xccd   :  { %v1375_v10 = vmul.f32 %v5522_v8, %v1373_v9 }
 0xccf   :  { %1377 = vrot.lane.b32.xlu0 %v1375_v10, %s6112_s20 }
 0xcd3   :  { %1392 = vperm.xlu0 %5433, %v288_v11  }
 0xd28   :  { %v1303_v12 = vpop.permute.xlu1 %1302 }
 0xd29   :  { %v1305_v13 = vadd.f32 %v1303_v12, %v1241_v57 }
 0xd2b   :  { %5523 = vtanh.f32 %v1305_v13  ;;  %v287_v13 = vld [vmem:[%s7394_s0 + $0x10] sm:$0xff] }
 0xd38   :  { %v5524_v14 = vpop.eup %5523 }
 0xd39   :  { %1309 = vrot.lane.b32.xlu1 %v5524_v14, %s6131_s16 }
 0xd41   :  { %v1378_v15 = vpop.permute.xlu0 %1377 }
 0xd42   :  { %v1380_v16 = vadd.f32 %v1378_v15, %v1316_v61 }
 0xd44   :  { %5525 = vtanh.f32 %v1380_v16 }
 0xd4e   :  { %v6607_v46 = vpop.permute.xlu0 %1392 }
 0xd51   :  { %v5526_v19 = vpop.eup %5525 }
 0xd52   :  { %1384 = vrot.lane.b32.xlu1 %v5526_v19, %s6131_s16 }
 0xdab   :  { %v1310_v24 = vpop.permute.xlu1 %1309 }
 0xdac   :  { %v1312_v28 = vmul.f32 %v1310_v24, %v1307_v23 }
 0xdae   :  { %v6601_v29 = vadd.f32 %v1313_v25, %v1312_v28 }
 0xdb0   :  { %v1410_v30 = vpack.c.bf16 %v6601_v29, %v6601_v29 }
 0xdb2   :  { %1412 = vrot.lane.b32.xlu0 %v1410_v30, %s6131_s16 }
 0xdc4   :  { %v1385_v33 = vpop.permute.xlu1 %1384 }
 0xdc5   :  { %v1387_v43 = vmul.f32 %v1385_v33, %v1382_v32 }
 0xdc7   :  { %v1389_v44 = vadd.f32 %v1388_v34, %v1387_v43 }
 0xdc9   :  { %v6610_v17 = vmul.f32 %v6607_v46, %v1389_v44 }
 0xdcb   :  { %v1485_v48 = vpack.c.bf16 %v6610_v17, %v6610_v17 }
 0xdcd   :  { %1487 = vrot.lane.b32.xlu1 %v1485_v48, %s6131_s16 }
 0xe24   :  { %v1413_v49 = vpop.permute.xlu0 %1412 }
 0xe25   :  { %5124 = vmatmul.mubr.msk.bf16.vlgmr.msra.gmra.mxu0 %vm356_vm0, %v1413_v49 }
 0xe26   :  { %5136 = vmatpush3.bf16.msra.mxu0 %v6616_v50  ;;  %5139 = vmatprep.mubr.msk.bf16.mxu0 %vm6130_vm1, %v6129_v18 }
 0xe27   :  { %5137 = vmatprep.subr.bf16.mxu0 %v6129_v18 }
 0xe2a   :  { %5138 = vmatpush3.bf16.msra.mxu0 %v6374_v20 }
 0xe2b   :  { %5151 = vmatprep.subr.bf16.mxu0 %v6129_v18 }
 0xe3f   :  { %v1488_v51 = vpop.permute.xlu1 %1487 }
 0xe40   :  { %5132 = vmatmul.mubr.msk.bf16.vlgmr.msra.gmra.mxu1 %vm356_vm0, %v1488_v51 }
 0xe41   :  { %5144 = vmatpush3.bf16.msra.mxu1 %v6381_v21  ;;  %5147 = vmatprep.mubr.msk.bf16.mxu1 %vm6130_vm1, %v6129_v18 }
 0xe42   :  { %5145 = vmatprep.subr.bf16.mxu1 %v6129_v18 }
 0xe45   :  { %5146 = vmatpush3.bf16.msra.mxu1 %v6386_v22 }
 0xe46   :  { %5159 = vmatprep.subr.bf16.mxu1 %v6129_v18 }
 0xee5   :  { %v1451_v52 = vpop.f32.mrf.mxu0 }
 0xee6   :  { %v1452_v53 = vadd.f32 %v6415_v39, %v1451_v52 }
 0xee7   :  { %v5125_v20 = vpop.f32.mrf.mxu0 }
 0xee8   :  { %1465 = vrot.lane.b32.xlu0 %v1452_v53, %s6112_s20  ;;  %v1457_v22 = vadd.f32 %v1452_v53, %v1409_v60 }
 0xee9   :  { %v1454_v54 = vpop.f32.mrf.mxu0 }
 0xeea   :  { %v4680_v61 = vmul.f32 -1.442695, %v1457_v22 }
 0xeeb   :  { %v5126_v55 = vpop.f32.mrf.mxu0 }
 0xeec   :  { %5527 = vpow2.f32 %v4680_v61  ;;  %v5740_v55 = vld [vmem:[#allocation15] sm:$0xff]  }
 0xef9   :  { %v5528_v63 = vpop.eup %5527 }
 0xefa   :  { %v1461_v0 = vadd.f32 1.0, %v5528_v63 }
 0xefc   :  { %5529 = vrcp.f32 %v1461_v0 }
 0xf00   :  { %v1526_v56 = vpop.f32.mrf.mxu1 }
 0xf01   :  { %v1527_v21 = vadd.f32 %v6429_v62, %v1526_v56 }
 0xf02   :  { %v5133_v57 = vpop.f32.mrf.mxu1 }
 0xf03   :  { %1540 = vrot.lane.b32.xlu1 %v1527_v21, %s6112_s20  ;;  %v1532_v3 = vadd.f32 %v1527_v21, %v1484_v2  ;;  %v5741_v21 = vld [vmem:[#allocation16 + $0x8] sm:$0xff]   ;;  %v5742_v57 = vld [vmem:[#allocation16] sm:$0xff]  }
 0xf04   :  { %v1529_v58 = vpop.f32.mrf.mxu1 }
 0xf05   :  { %v4682_v4 = vmul.f32 -1.442695, %v1532_v3 }
 0xf06   :  { %v5134_v59 = vpop.f32.mrf.mxu1 }
 0xf07   :  { %5531 = vpow2.f32 %v4682_v4  ;;  %v1577_v4 = vld [vmem:[#allocation4 + $0x30] sm:$0xff] }
 0xf09   :  { %v5530_v5 = vpop.eup %5529 }
 0xf0a   :  { %v1475_v25 = vsub.f32 1.0, %v5530_v5  ;;  %v1481_v30 = vmul.f32 %v5530_v5, %v6601_v29 }
 0xf14   :  { %v5532_v8 = vpop.eup %5531 }
 0xf15   :  { %v1536_v9 = vadd.f32 1.0, %v5532_v8 }
 0xf17   :  { %5533 = vrcp.f32 %v1536_v9 }
 0xf24   :  { %v5534_v10 = vpop.eup %5533 }
 0xf25   :  { %v1550_v43 = vsub.f32 1.0, %v5534_v10  ;;  %v1556_v48 = vmul.f32 %v5534_v10, %v6610_v17 }
 0xf5a   :  { %v1466_v6 = vpop.permute.xlu0 %1465 }
 0xf5b   :  { %v1468_v7 = vmul.f32 %v5530_v5, %v1466_v6 }
 0xf5d   :  { %1470 = vrot.lane.b32.xlu0 %v1468_v7, %s6112_s20 }
 0xf75   :  { %v1541_v11 = vpop.permute.xlu1 %1540 }
 0xf76   :  { %v1543_v12 = vmul.f32 %v5534_v10, %v1541_v11 }
 0xf78   :  { %1545 = vrot.lane.b32.xlu1 %v1543_v12, %s6112_s20 }
 0xf7c   :  { %1560 = vperm.xlu1 %5434, %v287_v13  }
 0xfcf   :  { %v1471_v14 = vpop.permute.xlu0 %1470 }
 0xfd0   :  { %v1473_v15 = vadd.f32 %v1471_v14, %v1409_v60 }
 0xfd2   :  { %5535 = vtanh.f32 %v1473_v15 }
 0xfdf   :  { %v5536_v16 = vpop.eup %5535 }
 0xfe0   :  { %1477 = vrot.lane.b32.xlu0 %v5536_v16, %s6131_s16 }
 0xfea   :  { %v1546_v19 = vpop.permute.xlu1 %1545 }
 0xfeb   :  { %v1548_v23 = vadd.f32 %v1546_v19, %v1484_v2 }
 0xfed   :  { %5537 = vtanh.f32 %v1548_v23  ;;  %v286_v23 = vld [vmem:[%s7394_s0 + $0x8] sm:$0xff] }
 0xff7   :  { %v6649_v52 = vpop.permute.xlu1 %1560 }
 0xffa   :  { %v5538_v24 = vpop.eup %5537 }
 0xffb   :  { %1552 = vrot.lane.b32.xlu0 %v5538_v24, %s6131_s16 }
0x1052   :  { %v1478_v28 = vpop.permute.xlu0 %1477 }
0x1053   :  { %v1480_v32 = vmul.f32 %v1478_v28, %v1475_v25 }
0x1055   :  { %v6643_v33 = vadd.f32 %v1481_v30, %v1480_v32 }
0x1057   :  { %v1578_v34 = vpack.c.bf16 %v6643_v33, %v6643_v33 }
0x1059   :  { %1580 = vrot.lane.b32.xlu1 %v1578_v34, %s6131_s16 }
0x106d   :  { %v1553_v44 = vpop.permute.xlu0 %1552 }
0x106e   :  { %v1555_v49 = vmul.f32 %v1553_v44, %v1550_v43 }
0x1070   :  { %v1557_v51 = vadd.f32 %v1556_v48, %v1555_v49 }
0x1072   :  { %v6652_v53 = vmul.f32 %v6649_v52, %v1557_v51 }
0x1074   :  { %v1653_v20 = vpack.c.bf16 %v6652_v53, %v6652_v53 }
0x1076   :  { %1655 = vrot.lane.b32.xlu0 %v1653_v20, %s6131_s16 }
0x10cb   :  { %v1581_v54 = vpop.permute.xlu1 %1580 }
0x10cc   :  { %5140 = vmatmul.mubr.msk.bf16.vlgmr.msra.gmra.mxu0 %vm356_vm0, %v1581_v54 }
0x10cd   :  { %5152 = vmatpush3.bf16.msra.mxu0 %v6616_v50  ;;  %5155 = vmatprep.mubr.msk.bf16.mxu0 %vm6130_vm1, %v6129_v18 }
0x10ce   :  { %5153 = vmatprep.subr.bf16.mxu0 %v6129_v18 }
0x10d1   :  { %5154 = vmatpush3.bf16.msra.mxu0 %v5740_v55 }
0x10e8   :  { %v1656_v56 = vpop.permute.xlu0 %1655 }
0x10e9   :  { %5148 = vmatmul.mubr.msk.bf16.vlgmr.msra.gmra.mxu1 %vm356_vm0, %v1656_v56 }
0x10ea   :  { %5160 = vmatpush3.bf16.msra.mxu1 %v5741_v21  ;;  %5163 = vmatprep.mubr.msk.bf16.mxu1 %vm6130_vm1, %v6129_v18 }
0x10eb   :  { %5161 = vmatprep.subr.bf16.mxu1 %v6129_v18 }
0x10ee   :  { %5162 = vmatpush3.bf16.msra.mxu1 %v5742_v57 }
0x118c   :  { %v1619_v50 = vpop.f32.mrf.mxu0 }
0x118d   :  { %v1620_v58 = vadd.f32 %v6415_v39, %v1619_v50  ;;  %v1652_v39 = vld [vmem:[#allocation5 + $0x8] sm:$0xff] }
0x118e   :  { %v5141_v59 = vpop.f32.mrf.mxu0 }
0x118f   :  { %1633 = vrot.lane.b32.xlu1 %v1620_v58, %s6112_s20  ;;  %v1625_v5 = vadd.f32 %v1620_v58, %v1577_v4 }
0x1190   :  { %v1622_v60 = vpop.f32.mrf.mxu0 }
0x1191   :  { %v4684_v6 = vmul.f32 -1.442695, %v1625_v5 }
0x1192   :  { %v5142_v22 = vpop.f32.mrf.mxu0 }
0x1193   :  { %5539 = vpow2.f32 %v4684_v6  ;;  %v5744_v6 = vld [vmem:[#allocation19] ss:$0 sm:$0xff] }
0x11a0   :  { %v5540_v7 = vpop.eup %5539 }
0x11a1   :  { %v1629_v8 = vadd.f32 1.0, %v5540_v7 }
0x11a3   :  { %5541 = vrcp.f32 %v1629_v8 }
0x11a9   :  { %v1694_v61 = vpop.f32.mrf.mxu1 }
0x11aa   :  { %v1695_v63 = vadd.f32 %v6429_v62, %v1694_v61 }
0x11ab   :  { %v5149_v0 = vpop.f32.mrf.mxu1 }
0x11ac   :  { %1708 = vrot.lane.b32.xlu0 %v1695_v63, %s6112_s20  ;;  %v1700_v9 = vadd.f32 %v1695_v63, %v1652_v39  ;;  %v5743_v63 = vld [vmem:[#allocation18] ss:$0 sm:$0xff] }
0x11ad   :  { %v1697_v2 = vpop.f32.mrf.mxu1 }
0x11ae   :  { %v4686_v10 = vmul.f32 -1.442695, %v1700_v9 }
0x11af   :  { %v5150_v3 = vpop.f32.mrf.mxu1 }
0x11b0   :  { %5543 = vpow2.f32 %v4686_v10  ;;  %v5542_v11 = vpop.eup %5541  ;;  %v1745_v10 = vld [vmem:[#allocation4 + $0x38] sm:$0xff] }
0x11b1   :  { %v1643_v43 = vsub.f32 1.0, %v5542_v11  ;;  %v1649_v48 = vmul.f32 %v5542_v11, %v6643_v33 }
0x11bd   :  { %v5544_v62 = vpop.eup %5543 }
0x11be   :  { %v1704_v14 = vadd.f32 1.0, %v5544_v62 }
0x11c0   :  { %5545 = vrcp.f32 %v1704_v14  ;;  %v1819_v14 = vld [vmem:[#allocation5] sm:$0xff] }
0x11cd   :  { %v5546_v15 = vpop.eup %5545 }
0x11ce   :  { %v1718_v54 = vsub.f32 1.0, %v5546_v15  ;;  %v1724_v56 = vmul.f32 %v5546_v15, %v6652_v53 }
0x1201   :  { %v1634_v12 = vpop.permute.xlu1 %1633 }
0x1202   :  { %v1636_v13 = vmul.f32 %v5542_v11, %v1634_v12 }
0x1204   :  { %1638 = vrot.lane.b32.xlu1 %v1636_v13, %s6112_s20 }
0x121e   :  { %v1709_v16 = vpop.permute.xlu0 %1708 }
0x121f   :  { %v1711_v19 = vmul.f32 %v5546_v15, %v1709_v16 }
0x1221   :  { %1713 = vrot.lane.b32.xlu0 %v1711_v19, %s6112_s20 }
0x1225   :  { %1728 = vperm.xlu0 %5433, %v286_v23  }
0x1276   :  { %v1639_v24 = vpop.permute.xlu1 %1638 }
0x1277   :  { %v1641_v25 = vadd.f32 %v1639_v24, %v1577_v4 }
0x1279   :  { %5547 = vtanh.f32 %v1641_v25 }
0x1286   :  { %v5548_v28 = vpop.eup %5547 }
0x1287   :  { %1645 = vrot.lane.b32.xlu1 %v5548_v28, %s6131_s16 }
0x1293   :  { %v1714_v30 = vpop.permute.xlu0 %1713 }
0x1294   :  { %v1716_v32 = vadd.f32 %v1714_v30, %v1652_v39 }
0x1296   :  { %5549 = vtanh.f32 %v1716_v32 }
0x12a0   :  { %v6684_v50 = vpop.permute.xlu0 %1728 }
0x12a3   :  { %v5550_v34 = vpop.eup %5549 }
0x12a4   :  { %1720 = vrot.lane.b32.xlu1 %v5550_v34, %s6131_s16 }
0x12f9   :  { %v1646_v44 = vpop.permute.xlu1 %1645 }
0x12fa   :  { %v1648_v49 = vmul.f32 %v1646_v44, %v1643_v43  ;;  %v285_v43 = vld [vmem:[%s7394_s0] sm:$0xff] }
0x12fc   :  { %v6678_v51 = vadd.f32 %v1649_v48, %v1648_v49 }
0x12fe   :  { %v1746_v20 = vpack.c.bf16 %v6678_v51, %v6678_v51 }
0x1300   :  { %1748 = vrot.lane.b32.xlu0 %v1746_v20, %s6131_s16 }
0x1316   :  { %v1721_v55 = vpop.permute.xlu1 %1720 }
0x1317   :  { %v1723_v21 = vmul.f32 %v1721_v55, %v1718_v54 }
0x1319   :  { %v1725_v57 = vadd.f32 %v1724_v56, %v1723_v21 }
0x131b   :  { %v6687_v58 = vmul.f32 %v6684_v50, %v1725_v57 }
0x131d   :  { %v1820_v59 = vpack.c.bf16 %v6687_v58, %v6687_v58 }
0x131f   :  { %1822 = vrot.lane.b32.xlu1 %v1820_v59, %s6131_s16 }
0x1372   :  { %v1749_v60 = vpop.permute.xlu0 %1748 }
0x1373   :  { %5156 = vmatmul.mubr.msk.bf16.vlgmr.msra.gmra.mxu0 %vm356_vm0, %v1749_v60 }
0x1391   :  { %v1823_v22 = vpop.permute.xlu1 %1822 }
0x1392   :  { %5164 = vmatmul.mubr.msk.bf16.vlgmr.msra.gmra.mxu1 %vm356_vm0, %v1823_v22 }
0x1433   :  { %v1787_v61 = vpop.f32.mrf.mxu0 }
0x1434   :  { %v1788_v0 = vadd.f32 %v5743_v63, %v1787_v61 }
0x1435   :  { %v5157_v2 = vpop.f32.mrf.mxu0 }
0x1436   :  { %1801 = vrot.lane.b32.xlu0 %v1788_v0, %s6112_s20  ;;  %v1793_v11 = vadd.f32 %v1788_v0, %v1745_v10 }
0x1437   :  { %v1790_v3 = vpop.f32.mrf.mxu0 }
0x1438   :  { %v4688_v12 = vmul.f32 -1.442695, %v1793_v11 }
0x1439   :  { %v5158_v4 = vpop.f32.mrf.mxu0 }
0x143a   :  { %5551 = vpow2.f32 %v4688_v12  ;;  %v5452_v12 = vld [vmem:[%s7357_s10 + $0x10] sm:$0xff]  }
0x1447   :  { %v5552_v13 = vpop.eup %5551 }
0x1448   :  { %v1797_v62 = vadd.f32 1.0, %v5552_v13 }
0x144a   :  { %5553 = vrcp.f32 %v1797_v62 }
0x1452   :  { %v1861_v5 = vpop.f32.mrf.mxu1 }
0x1453   :  { %v1862_v7 = vadd.f32 %v5744_v6, %v1861_v5 }
0x1454   :  { %v5165_v8 = vpop.f32.mrf.mxu1 }
0x1455   :  { %1875 = vrot.lane.b32.xlu1 %v1862_v7, %s6112_s20  ;;  %v1867_v15 = vadd.f32 %v1862_v7, %v1819_v14  ;;  %v5447_v8 = vld [vmem:[%s7358_s11 + $0x8] sm:$0xff]  }
0x1456   :  { %v1864_v39 = vpop.f32.mrf.mxu1 }
0x1457   :  { %v4690_v16 = vmul.f32 -1.442695, %v1867_v15  ;;  %v6696_v19 = vpop.eup %5553  ;;  %v5450_v39 = vld [vmem:[%s7357_s10 + $0x18] sm:$0xff]  }
0x1458   :  { %v5166_v9 = vpop.f32.mrf.mxu1  ;;  %v1811_v3 = vsub.f32 1.0, %v6696_v19  ;;  %v1817_v5 = vmul.f32 %v6696_v19, %v6678_v51  ;;  %5167 = vmatprep.subr.bf16.mxu0 %v5450_v39 }
0x1459   :  { %5555 = vpow2.f32 %v4690_v16  ;;  %5168 = vmatpush3.bf16.msra.mxu0 %v5450_v39  ;;  %v6845_v39 = vld [vmem:[#allocation24] sm:$0xff]  }
0x145a   :  { %5169 = vmatprep.subr.bf16.mxu0 %v5452_v12 }
0x145d   :  { %5170 = vmatpush3.bf16.msra.mxu0 %v5452_v12 }
0x1466   :  { %v5556_v25 = vpop.eup %5555 }
0x1467   :  { %v1871_v28 = vadd.f32 1.0, %v5556_v25 }
0x1469   :  { %5557 = vrcp.f32 %v1871_v28 }
0x1476   :  { %v6700_v30 = vpop.eup %5557 }
0x1477   :  { %v1885_v9 = vsub.f32 1.0, %v6700_v30 }
0x14a8   :  { %v1802_v23 = vpop.permute.xlu0 %1801 }
0x14a9   :  { %v1804_v24 = vmul.f32 %v6696_v19, %v1802_v23 }
0x14ab   :  { %1806 = vrot.lane.b32.xlu0 %v1804_v24, %s6112_s20 }
0x14c7   :  { %v1876_v32 = vpop.permute.xlu1 %1875 }
0x14c8   :  { %v1878_v34 = vmul.f32 %v6700_v30, %v1876_v32 }
0x14ca   :  { %1880 = vrot.lane.b32.xlu1 %v1878_v34, %s6112_s20 }
0x14ce   :  { %1895 = vperm.xlu1 %5434, %v285_v43  }
0x14d2   :  { %726 = vrot.lane.b32.xlu1 %v6442_v38, %s6131_s16 }
0x14d6   :  { %1061 = vrot.lane.b32.xlu1 %v6521_v27, %s6131_s16 }
0x14da   :  { %1397 = vrot.lane.b32.xlu1 %v6601_v29, %s6131_s16 }
0x14de   :  { %1733 = vrot.lane.b32.xlu1 %v6678_v51, %s6131_s16  ;;  %v1891_v51 = vmul.f32 %v6700_v30, %v6687_v58 }
0x14e2   :  { %1739 = vrot.lane.b32.xlu1 %v6687_v58, %s6131_s16  ;;  %v6777_v58 = vld [vmem:[%s7358_s11 + $0x18] sm:$0xff]  }
0x14e3   :  { %5191 = vmatprep.subr.bf16.mxu0 %v6777_v58 }
0x14e6   :  { %1403 = vrot.lane.b32.xlu1 %v6610_v17, %s6131_s16 }
0x14ea   :  { %1067 = vrot.lane.b32.xlu1 %v6530_v36, %s6131_s16  ;;  %v5445_v36 = vld [vmem:[%s7357_s10 + $0x8] sm:$0xff]  }
0x14eb   :  { %5179 = vmatprep.subr.bf16.mxu1 %v5445_v36 }
0x14ec   :  { %5180 = vmatpush3.bf16.msra.mxu1 %v5445_v36 }
0x14ee   :  { %731 = vrot.lane.b32.xlu1 %v6450_v47, %s6131_s16 }
0x151d   :  { %v1807_v38 = vpop.permute.xlu0 %1806 }
0x151e   :  { %v1809_v27 = vadd.f32 %v1807_v38, %v1745_v10 }
0x1520   :  { %5559 = vtanh.f32 %v1809_v27  ;;  %v5448_v27 = vld [vmem:[%s7358_s11] sm:$0xff]  }
0x152d   :  { %v5560_v44 = vpop.eup %5559 }
0x152e   :  { %1813 = vrot.lane.b32.xlu0 %v5560_v44, %s6131_s16 }
0x153c   :  { %v1881_v29 = vpop.permute.xlu1 %1880 }
0x153d   :  { %v1883_v48 = vadd.f32 %v1881_v29, %v1819_v14 }
0x153f   :  { %5561 = vtanh.f32 %v1883_v48 }
0x1549   :  { %v6724_v49 = vpop.permute.xlu1 %1895 }
0x154c   :  { %v5562_v20 = vpop.eup %5561 }
0x154d   :  { %1887 = vrot.lane.b32.xlu0 %v5562_v20, %s6131_s16  ;;  %v727_v17 = vpop.permute.xlu1 %726 }
0x154e   :  { %729 = vst.msk [vmem:[#allocation2] sm:$0xff] %vm356_vm0, %v727_v17 }
0x1551   :  { %893 = vrot.lane.b32.xlu0 %v6481_v31, %s6131_s16  ;;  %v1062_v47 = vpop.permute.xlu1 %1061  ;;  %v5446_v31 = vld [vmem:[%s7357_s10] sm:$0xff]  }
0x1552   :  { %1065 = vst.msk [vmem:[#allocation2 + $0x10] sm:$0xff] %vm356_vm0, %v1062_v47  ;;  %5181 = vmatprep.subr.bf16.mxu1 %v5446_v31 }
0x1553   :  { %5182 = vmatpush3.bf16.msra.mxu1 %v5446_v31 }
0x1554   :  { %5203 = vmatprep.subr.bf16.mxu1 %v5447_v8 }
0x1555   :  { %v1910_v54 = vld [vmem:[#allocation2] sm:$0xff]  ;;  %1229 = vrot.lane.b32.xlu0 %v6561_v26, %s6131_s16  ;;  %v1398_v55 = vpop.permute.xlu1 %1397 }
0x1556   :  { %v1918_v56 = vmul.f32 %v1910_v54, %v6724_v49  ;;  %1401 = vst.msk [vmem:[#allocation2 + $0x20] sm:$0xff] %vm356_vm0, %v1398_v55  ;;  %v6806_v55 = vld [vmem:[#allocation25 + $0x8] sm:$0xff]  }
0x1558   :  { %1926 = vst.msk [vmem:[#allocation2] sm:$0xff] %vm356_vm0, %v1918_v56  ;;  %v6811_v56 = vld [vmem:[#allocation25] sm:$0xff]  }
0x1559   :  { %v1912_v21 = vld [vmem:[#allocation2 + $0x10] sm:$0xff]  ;;  %1565 = vrot.lane.b32.xlu0 %v6643_v33, %s6131_s16  ;;  %v1734_v57 = vpop.permute.xlu1 %1733 }
0x155a   :  { %v1920_v26 = vmul.f32 %v1912_v21, %v6649_v52  ;;  %1737 = vst.msk [vmem:[#allocation2 + $0x30] sm:$0xff] %vm356_vm0, %v1734_v57 }
0x155c   :  { %1928 = vst.msk [vmem:[#allocation2 + $0x10] sm:$0xff] %vm356_vm0, %v1920_v26 }
0x155d   :  { %v1914_v59 = vld [vmem:[#allocation2 + $0x20] sm:$0xff]  ;;  %v1740_v60 = vpop.permute.xlu1 %1739 }
0x155e   :  { %v1922_v22 = vmul.f32 %v1914_v59, %v6567_v40  ;;  %1743 = vst.msk [vmem:[#allocation3 + $0x8] sm:$0xff] %vm356_vm0, %v1740_v60 }
0x155f   :  { %v1934_v30 = vld [vmem:[#allocation2] sm:$0xff] }
0x1560   :  { %1930 = vst.msk [vmem:[#allocation2 + $0x20] sm:$0xff] %vm356_vm0, %v1922_v22 }
0x1561   :  { %v1916_v61 = vld [vmem:[#allocation2 + $0x30] sm:$0xff]  ;;  %v1404_v63 = vpop.permute.xlu1 %1403 }
0x1562   :  { %v1924_v33 = vmul.f32 %v1916_v61, %v6487_v37  ;;  %1407 = vst.msk [vmem:[#allocation3 + $0x18] sm:$0xff] %vm356_vm0, %v1404_v63 }
0x1563   :  { %v1936_v43 = vld [vmem:[#allocation2 + $0x10] sm:$0xff] }
0x1564   :  { %1932 = vst.msk [vmem:[#allocation2 + $0x30] sm:$0xff] %vm356_vm0, %v1924_v33 }
0x1565   :  { %v1068_v0 = vpop.permute.xlu1 %1067  ;;  %v1951_v59 = vld [vmem:[#allocation3 + $0x8] sm:$0xff] }
0x1566   :  { %1071 = vst.msk [vmem:[#allocation3 + $0x28] sm:$0xff] %vm356_vm0, %v1068_v0  ;;  %v5454_v0 = vld [vmem:[%s7358_s11 + $0x10] sm:$0xff]  }
0x1569   :  { %v732_v2 = vpop.permute.xlu1 %731  ;;  %v1953_v63 = vld [vmem:[#allocation3 + $0x18] sm:$0xff] }
0x156a   :  { %735 = vst.msk [vmem:[#allocation3 + $0x38] sm:$0xff] %vm356_vm0, %v732_v2 }
0x156b   :  { %v1940_v47 = vld [vmem:[#allocation2 + $0x30] sm:$0xff] }
0x15a0   :  { %v1814_v4 = vpop.permute.xlu0 %1813 }
0x15a1   :  { %v1816_v6 = vmul.f32 %v1814_v4, %v1811_v3  ;;  %v1955_v3 = vld [vmem:[#allocation3 + $0x28] sm:$0xff] }
0x15a3   :  { %v1818_v7 = vadd.f32 %v1817_v5, %v1816_v6  ;;  %v1957_v6 = vld [vmem:[#allocation3 + $0x38] sm:$0xff] }
0x15a5   :  { %1900 = vrot.lane.b32.xlu0 %v1818_v7, %s6131_s16 }
0x15bf   :  { %v1888_v10 = vpop.permute.xlu0 %1887 }
0x15c0   :  { %v1890_v11 = vmul.f32 %v1888_v10, %v1885_v9 }
0x15c2   :  { %v1892_v13 = vadd.f32 %v1891_v51, %v1890_v11 }
0x15c3   :  { %v894_v62 = vpop.permute.xlu0 %893 }
0x15c4   :  { %897 = vst.msk [vmem:[#allocation2 + $0x8] sm:$0xff] %vm356_vm0, %v894_v62  ;;  %v1898_v14 = vmul.f32 %v6724_v49, %v1892_v13 }
0x15c6   :  { %1906 = vrot.lane.b32.xlu0 %v1898_v14, %s6131_s16 }
0x15c7   :  { %v1230_v15 = vpop.permute.xlu0 %1229 }
0x15c8   :  { %1233 = vst.msk [vmem:[#allocation2 + $0x18] sm:$0xff] %vm356_vm0, %v1230_v15 }
0x15ca   :  { %1571 = vrot.lane.b32.xlu0 %v6652_v53, %s6131_s16 }
0x15cb   :  { %v1911_v16 = vld [vmem:[#allocation2 + $0x8] sm:$0xff]  ;;  %v1566_v19 = vpop.permute.xlu0 %1565 }
0x15cc   :  { %v1919_v23 = vmul.f32 %v1911_v16, %v6684_v50  ;;  %1569 = vst.msk [vmem:[#allocation2 + $0x28] sm:$0xff] %vm356_vm0, %v1566_v19 }
0x15ce   :  { %1927 = vst.msk [vmem:[#allocation2 + $0x8] sm:$0xff] %vm356_vm0, %v1919_v23  ;;  %1235 = vrot.lane.b32.xlu0 %v6570_v42, %s6131_s16 }
0x15cf   :  { %v1913_v24 = vld [vmem:[#allocation2 + $0x18] sm:$0xff] }
0x15d0   :  { %v1921_v25 = vmul.f32 %v1913_v24, %v6607_v46 }
0x15d2   :  { %1929 = vst.msk [vmem:[#allocation2 + $0x18] sm:$0xff] %vm356_vm0, %v1921_v25  ;;  %899 = vrot.lane.b32.xlu0 %v6490_v41, %s6131_s16  ;;  %v1938_v41 = vld [vmem:[#allocation2 + $0x20] sm:$0xff] }
0x15d3   :  { %v1915_v53 = vld [vmem:[#allocation2 + $0x28] sm:$0xff] }
0x15d4   :  { %v1923_v28 = vmul.f32 %v1915_v53, %v6527_v35  ;;  %v6866_v53 = vld [vmem:[#allocation28] ss:$0 sm:$0xff] }
0x15d5   :  { %v1935_v32 = vld [vmem:[#allocation2 + $0x8] sm:$0xff] }
0x15d6   :  { %1931 = vst.msk [vmem:[#allocation2 + $0x28] sm:$0xff] %vm356_vm0, %v1923_v28  ;;  %v4829_v34 = vpack.c.bf16 %v1935_v32, %v1934_v30 }
0x15d8   :  { %5183 = vmatprep.mubr.msk.bf16.mxu1 %vm356_vm0, %v4829_v34 }
0x15d9   :  { %v1937_v42 = vld [vmem:[#allocation2 + $0x18] sm:$0xff] }
0x15da   :  { %v4830_v38 = vpack.c.bf16 %v1937_v42, %v1936_v43 }
0x15dc   :  { %5184 = vmatmul.mubr.msk.bf16.vlgmr.msra.gmra.mxu1 %vm356_vm0, %v4830_v38 }
0x15dd   :  { %v1939_v44 = vld [vmem:[#allocation2 + $0x28] sm:$0xff]  ;;  %5204 = vmatpush3.bf16.msra.mxu1 %v5447_v8  ;;  %v6840_v8 = vld [vmem:[#allocation24 + $0x8] sm:$0xff]  }
0x15de   :  { %v4831_v29 = vpack.c.bf16 %v1939_v44, %v1938_v41  ;;  %5205 = vmatprep.subr.bf16.mxu1 %v5448_v27 }
0x15e0   :  { %5187 = vmatprep.mubr.msk.bf16.mxu1 %vm356_vm0, %v4831_v29 }
0x15e1   :  { %5206 = vmatpush3.bf16.msra.mxu1 %v5448_v27 }
0x15e2   :  { %5223 = vmatprep.subr.bf16.mxu1 %v6129_v18 }
0x1617   :  { %v1901_v48 = vpop.permute.xlu0 %1900 }
0x1618   :  { %1904 = vst.msk [vmem:[#allocation2 + $0x38] sm:$0xff] %vm356_vm0, %v1901_v48 }
0x161f   :  { %v1917_v20 = vld [vmem:[#allocation2 + $0x38] sm:$0xff] }
0x1620   :  { %v1925_v17 = vmul.f32 %v1917_v20, %v6447_v45 }
0x1622   :  { %1933 = vst.msk [vmem:[#allocation2 + $0x38] sm:$0xff] %vm356_vm0, %v1925_v17 }
0x1629   :  { %v1941_v36 = vld [vmem:[#allocation2 + $0x38] sm:$0xff] }
0x162a   :  { %v4832_v54 = vpack.c.bf16 %v1941_v36, %v1940_v47 }
0x162c   :  { %5188 = vmatmul.mubr.msk.bf16.gmra.mxu1 %vm356_vm0, %v4832_v54 }
0x162d   :  { %5207 = vmatprep.mubr.msk.bf16.mxu1 %vm356_vm0, %v4829_v34  ;;  %v4723_v34 = vld [vmem:[#allocation21] ss:$0 sm:$0xff] }
0x1634   :  { %5208 = vmatmul.mubr.msk.bf16.vlgmr.msra.gmra.mxu1 %vm356_vm0, %v4830_v38 }
0x1635   :  { %5211 = vmatprep.mubr.msk.bf16.mxu1 %vm356_vm0, %v4831_v29  ;;  %5224 = vmatpush3.bf16.msra.mxu1 %v6806_v55 }
0x1636   :  { %5225 = vmatprep.subr.bf16.mxu1 %v6129_v18 }
0x1638   :  { %v1907_v31 = vpop.permute.xlu0 %1906 }
0x1639   :  { %1909 = vst.msk [vmem:[#allocation3] sm:$0xff] %vm356_vm0, %v1907_v31  ;;  %5226 = vmatpush3.bf16.msra.mxu1 %v6811_v56 }
0x163a   :  { %5239 = vmatprep.subr.bf16.mxu1 %v6129_v18 }
0x163c   :  { %v1572_v21 = vpop.permute.xlu0 %1571  ;;  %5212 = vmatmul.mubr.msk.bf16.gmra.mxu1 %vm356_vm0, %v4832_v54 }
0x163d   :  { %1575 = vst.msk [vmem:[#allocation3 + $0x10] sm:$0xff] %vm356_vm0, %v1572_v21  ;;  %5227 = vmatprep.mubr.msk.bf16.mxu1 %vm6130_vm1, %v6129_v18 }
0x1640   :  { %v1236_v57 = vpop.permute.xlu0 %1235  ;;  %v1950_v26 = vld [vmem:[#allocation3] sm:$0xff] }
0x1641   :  { %1239 = vst.msk [vmem:[#allocation3 + $0x20] sm:$0xff] %vm356_vm0, %v1236_v57  ;;  %v4825_v60 = vpack.c.bf16 %v1951_v59, %v1950_v26 }
0x1643   :  { %5171 = vmatprep.mubr.msk.bf16.mxu0 %vm356_vm0, %v4825_v60 }
0x1644   :  { %v900_v22 = vpop.permute.xlu0 %899  ;;  %v1952_v61 = vld [vmem:[#allocation3 + $0x10] sm:$0xff]  ;;  %5228 = vmatmul.mubr.bf16.vlgmr.msra.gmra.mxu1 %v6128_v1 }
0x1645   :  { %903 = vst.msk [vmem:[#allocation3 + $0x30] sm:$0xff] %vm356_vm0, %v900_v22  ;;  %v4826_v33 = vpack.c.bf16 %v1953_v63, %v1952_v61  ;;  %5240 = vmatpush3.bf16.msra.mxu1 %v6806_v55  ;;  %5243 = vmatprep.mubr.msk.bf16.mxu1 %vm6130_vm1, %v6129_v18 }
0x1646   :  { %5241 = vmatprep.subr.bf16.mxu1 %v6129_v18 }
0x1647   :  { %5172 = vmatmul.mubr.msk.bf16.vlgmr.msra.gmra.mxu0 %vm356_vm0, %v4826_v33 }
0x1648   :  { %5192 = vmatpush3.bf16.msra.mxu0 %v6777_v58  ;;  %v1954_v2 = vld [vmem:[#allocation3 + $0x20] sm:$0xff] }
0x1649   :  { %v4827_v4 = vpack.c.bf16 %v1955_v3, %v1954_v2  ;;  %5193 = vmatprep.subr.bf16.mxu0 %v5454_v0  ;;  %5242 = vmatpush3.bf16.msra.mxu1 %v6811_v56 }
0x164a   :  { %5255 = vmatprep.subr.bf16.mxu1 %v6129_v18 }
0x164b   :  { %5175 = vmatprep.mubr.msk.bf16.mxu0 %vm356_vm0, %v4827_v4 }
0x164c   :  { %v1956_v5 = vld [vmem:[#allocation3 + $0x30] sm:$0xff]  ;;  %5194 = vmatpush3.bf16.msra.mxu0 %v5454_v0 }
0x164d   :  { %v4828_v7 = vpack.c.bf16 %v1957_v6, %v1956_v5  ;;  %5215 = vmatprep.subr.bf16.mxu0 %v6129_v18 }
0x164f   :  { %5176 = vmatmul.mubr.msk.bf16.gmra.mxu0 %vm356_vm0, %v4828_v7 }
0x1650   :  { %5195 = vmatprep.mubr.msk.bf16.mxu0 %vm356_vm0, %v4825_v60 }
0x1657   :  { %5196 = vmatmul.mubr.msk.bf16.vlgmr.msra.gmra.mxu0 %vm356_vm0, %v4826_v33 }
0x1658   :  { %5199 = vmatprep.mubr.msk.bf16.mxu0 %vm356_vm0, %v4827_v4  ;;  %5216 = vmatpush3.bf16.msra.mxu0 %v6840_v8  ;;  %v4724_v4 = vld [vmem:[#allocation22] ss:$0 sm:$0xff] }
0x1659   :  { %5217 = vmatprep.subr.bf16.mxu0 %v6129_v18 }
0x165c   :  { %5218 = vmatpush3.bf16.msra.mxu0 %v6845_v39 }
0x165d   :  { %5231 = vmatprep.subr.bf16.mxu0 %v6129_v18 }
0x165f   :  { %5200 = vmatmul.mubr.msk.bf16.gmra.mxu0 %vm356_vm0, %v4828_v7 }
0x1660   :  { %5219 = vmatprep.mubr.msk.bf16.mxu0 %vm6130_vm1, %v6129_v18 }
0x1667   :  { %5220 = vmatmul.mubr.bf16.vlgmr.msra.gmra.mxu0 %v6128_v1 }
0x1668   :  { %5232 = vmatpush3.bf16.msra.mxu0 %v6840_v8  ;;  %5235 = vmatprep.mubr.msk.bf16.mxu0 %vm6130_vm1, %v6129_v18 }
0x1669   :  { %5233 = vmatprep.subr.bf16.mxu0 %v6129_v18 }
0x166c   :  { %5234 = vmatpush3.bf16.msra.mxu0 %v6845_v39 }
0x166d   :  { %5247 = vmatprep.subr.bf16.mxu0 %v6129_v18 }
0x169c   :  { %v5185_v9 = vpop.f32.mrf.mxu1 }
0x169e   :  { %v2169_v10 = vpop.f32.mrf.mxu1 }
0x16a0   :  { %v5186_v51 = vpop.f32.mrf.mxu1 }
0x16a2   :  { %v2172_v11 = vpop.f32.mrf.mxu1 }
0x16ec   :  { %v5189_v12 = vpop.f32.mrf.mxu1 }
0x16ee   :  { %v2185_v13 = vpop.f32.mrf.mxu1 }
0x16f0   :  { %v5190_v62 = vpop.f32.mrf.mxu1 }
0x16f2   :  { %v2188_v14 = vpop.f32.mrf.mxu1 }
0x16f4   :  { %v5209_v1 = vpop.f32.mrf.mxu1 }
0x16f6   :  { %v2323_v15 = vpop.f32.mrf.mxu1 }
0x16f8   :  { %v5210_v58 = vpop.f32.mrf.mxu1 }
0x16fa   :  { %v2326_v16 = vpop.f32.mrf.mxu1 }
0x16fc   :  { %v5213_v19 = vpop.f32.mrf.mxu1 }
0x16fe   :  { %v6860_v23 = vpop.f32.mrf.mxu1 }
0x1700   :  { %v6862_v24 = vpop.f32.mrf.mxu1 }
0x1702   :  { %v6864_v25 = vpop.f32.mrf.mxu1 }
0x1704   :  { %v2548_v28 = vpop.f32.mrf.mxu1 }
0x1705   :  { %v6869_v30 = vadd.f32 %v6866_v53, %v2548_v28 }
0x1706   :  { %v5229_v43 = vpop.f32.mrf.mxu1 }
0x1707   :  { %v5173_v32 = vpop.f32.mrf.mxu0  ;;  %2562 = vrot.lane.b32.xlu1 %v6869_v30, %s6112_s20 }
0x1708   :  { %v2178_v42 = vadd.f32 %v5185_v9, %v5173_v32  ;;  %v2551_v27 = vpop.f32.mrf.mxu1 }
0x1709   :  { %v2060_v38 = vpop.f32.mrf.mxu0 }
0x170a   :  { %v2363_v41 = vadd.f32 %v4723_v34, %v2178_v42  ;;  %v2170_v44 = vadd.f32 %v2169_v10, %v2060_v38  ;;  %v5230_v48 = vpop.f32.mrf.mxu1 }
0x170b   :  { %v5174_v29 = vpop.f32.mrf.mxu0 }
0x170c   :  { %2371 = vst.msk [vmem:[#allocation4 + $0x10] sm:$0xff] %vm434_vm2, %v2363_v41  ;;  %v2361_v20 = vadd.f32 %v4723_v34, %v2170_v44  ;;  %v2181_v17 = vadd.f32 %v5186_v51, %v5174_v29  ;;  %v6888_v41 = vld [vmem:[#allocation27] ss:$0 sm:$0xff] }
0x170d   :  { %v2063_v47 = vpop.f32.mrf.mxu0 }
0x170e   :  { %2369 = vst.msk [vmem:[#allocation4] sm:$0xff] %vm434_vm2, %v2361_v20  ;;  %v2364_v36 = vadd.f32 %v4723_v34, %v2181_v17  ;;  %v2173_v54 = vadd.f32 %v2172_v11, %v2063_v47 }
0x170f   :  { %v5177_v31 = vpop.f32.mrf.mxu0 }
0x1710   :  { %2372 = vst.msk [vmem:[#allocation4 + $0x18] sm:$0xff] %vm434_vm2, %v2364_v36  ;;  %v2362_v21 = vadd.f32 %v4723_v34, %v2173_v54  ;;  %v2194_v57 = vadd.f32 %v5189_v12, %v5177_v31 }
0x1711   :  { %v2076_v26 = vpop.f32.mrf.mxu0 }
0x1712   :  { %2370 = vst.msk [vmem:[#allocation4 + $0x8] sm:$0xff] %vm434_vm2, %v2362_v21  ;;  %v2367_v59 = vadd.f32 %v4723_v34, %v2194_v57  ;;  %v2186_v60 = vadd.f32 %v2185_v13, %v2076_v26 }
0x1713   :  { %v5178_v22 = vpop.f32.mrf.mxu0 }
0x1714   :  { %2375 = vst.msk [vmem:[#allocation4 + $0x30] sm:$0xff] %vm434_vm2, %v2367_v59  ;;  %v2365_v61 = vadd.f32 %v4723_v34, %v2186_v60  ;;  %v2197_v63 = vadd.f32 %v5190_v62, %v5178_v22 }
0x1715   :  { %v2079_v33 = vpop.f32.mrf.mxu0  ;;  %v2410_v31 = vld [vmem:[#allocation4] sm:$0xff] }
0x1716   :  { %2373 = vst.msk [vmem:[#allocation4 + $0x20] sm:$0xff] %vm434_vm2, %v2365_v61  ;;  %v2368_v0 = vadd.f32 %v4723_v34, %v2197_v63  ;;  %v2189_v2 = vadd.f32 %v2188_v14, %v2079_v33 }
0x1717   :  { %v5197_v3 = vpop.f32.mrf.mxu0 }
0x1718   :  { %2376 = vst.msk [vmem:[#allocation4 + $0x38] sm:$0xff] %vm434_vm2, %v2368_v0  ;;  %v2366_v5 = vadd.f32 %v4723_v34, %v2189_v2  ;;  %v2332_v6 = vadd.f32 %v5209_v1, %v5197_v3 }
0x1719   :  { %v2246_v7 = vpop.f32.mrf.mxu0 }
0x171a   :  { %2374 = vst.msk [vmem:[#allocation4 + $0x28] sm:$0xff] %vm434_vm2, %v2366_v5  ;;  %v2386_v9 = vadd.f32 %v4724_v4, %v2332_v6  ;;  %v2324_v10 = vadd.f32 %v2323_v15, %v2246_v7 }
0x171b   :  { %v5198_v51 = vpop.f32.mrf.mxu0 }
0x171c   :  { %2394 = vst.msk [vmem:[#allocation5 + $0x10] sm:$0xff] %vm434_vm2, %v2386_v9  ;;  %v2384_v11 = vadd.f32 %v4724_v4, %v2324_v10  ;;  %v2335_v12 = vadd.f32 %v5210_v58, %v5198_v51 }
0x171d   :  { %v2249_v13 = vpop.f32.mrf.mxu0 }
0x171e   :  { %2392 = vst.msk [vmem:[#allocation5] sm:$0xff] %vm434_vm2, %v2384_v11  ;;  %v2387_v62 = vadd.f32 %v4724_v4, %v2335_v12  ;;  %v2327_v14 = vadd.f32 %v2326_v16, %v2249_v13 }
0x171f   :  { %v5201_v28 = vpop.f32.mrf.mxu0 }
0x1720   :  { %2395 = vst.msk [vmem:[#allocation5 + $0x18] sm:$0xff] %vm434_vm2, %v2387_v62  ;;  %v2385_v32 = vadd.f32 %v4724_v4, %v2327_v14  ;;  %v2348_v1 = vadd.f32 %v5213_v19, %v5201_v28 }
0x1721   :  { %v2262_v34 = vpop.f32.mrf.mxu0 }
0x1722   :  { %2393 = vst.msk [vmem:[#allocation5 + $0x8] sm:$0xff] %vm434_vm2, %v2385_v32  ;;  %v2390_v43 = vadd.f32 %v4724_v4, %v2348_v1  ;;  %v2340_v15 = vadd.f32 %v6860_v23, %v2262_v34 }
0x1723   :  { %v5202_v42 = vpop.f32.mrf.mxu0 }
0x1724   :  { %2398 = vst.msk [vmem:[#allocation5 + $0x30] sm:$0xff] %vm434_vm2, %v2390_v43  ;;  %v2388_v58 = vadd.f32 %v4724_v4, %v2340_v15  ;;  %v2351_v38 = vadd.f32 %v6862_v24, %v5202_v42 }
0x1725   :  { %v2265_v27 = vpop.f32.mrf.mxu0 }
0x1726   :  { %2396 = vst.msk [vmem:[#allocation5 + $0x20] sm:$0xff] %vm434_vm2, %v2388_v58  ;;  %v2391_v16 = vadd.f32 %v4724_v4, %v2351_v38  ;;  %v2343_v19 = vadd.f32 %v6864_v25, %v2265_v27 }
0x1727   :  { %v2463_v44 = vpop.f32.mrf.mxu0 }
0x1728   :  { %2399 = vst.msk [vmem:[#allocation5 + $0x38] sm:$0xff] %vm434_vm2, %v2391_v16  ;;  %v2389_v29 = vadd.f32 %v4724_v4, %v2343_v19  ;;  %v2464_v23 = vadd.f32 %v6888_v41, %v2463_v44 }
0x1729   :  { %v5221_v48 = vpop.f32.mrf.mxu0 }
0x172a   :  { %2397 = vst.msk [vmem:[#allocation5 + $0x28] sm:$0xff] %vm434_vm2, %v2389_v29  ;;  %2477 = vrot.lane.b32.xlu0 %v2464_v23, %s6112_s20  ;;  %v2469_v21 = vadd.f32 %v2464_v23, %v2410_v31 }
0x172b   :  { %v2466_v24 = vpop.f32.mrf.mxu0 }
0x172c   :  { %v4728_v57 = vmul.f32 -1.442695, %v2469_v21  ;;  %v2665_v24 = vld [vmem:[#allocation5 + $0x30] sm:$0xff] }
0x172d   :  { %v5222_v20 = vpop.f32.mrf.mxu0 }
0x172f   :  { %v2495_v17 = vld [vmem:[#allocation5 + $0x38] sm:$0xff] }
0x1730   :  { %v2554_v47 = vadd.f32 %v6869_v30, %v2495_v17 }
0x1732   :  { %v4732_v36 = vmul.f32 -1.442695, %v2554_v47 }
0x1734   :  { %5563 = vpow2.f32 %v4732_v36 }
0x1741   :  { %v5564_v54 = vpop.eup %5563 }
0x1742   :  { %v2558_v25 = vadd.f32 1.0, %v5564_v54  ;;  %v2591_v54 = vld [vmem:[#allocation4 + $0x8] sm:$0xff] }
0x1744   :  { %5565 = vrcp.f32 %v2558_v25 }
0x1745   :  { %5567 = vpow2.f32 %v4728_v57 }
0x1751   :  { %v5566_v26 = vpop.eup %5565 }
0x1752   :  { %v5568_v22 = vpop.eup %5567  ;;  %v2572_v7 = vsub.f32 1.0, %v5566_v26  ;;  %v2578_v10 = vmul.f32 0.0, %v5566_v26 }
0x1753   :  { %v2473_v61 = vadd.f32 1.0, %v5568_v22 }
0x1755   :  { %5569 = vrcp.f32 %v2473_v61 }
0x1762   :  { %v5570_v63 = vpop.eup %5569 }
0x1763   :  { %v2487_v62 = vsub.f32 1.0, %v5570_v63  ;;  %v2493_v28 = vmul.f32 0.0, %v5570_v63 }
0x1779   :  { %v2563_v59 = vpop.permute.xlu1 %2562 }
0x177a   :  { %v2565_v60 = vmul.f32 %v5566_v26, %v2563_v59 }
0x177c   :  { %2567 = vrot.lane.b32.xlu1 %v2565_v60, %s6112_s20 }
0x179c   :  { %v2478_v33 = vpop.permute.xlu0 %2477 }
0x179d   :  { %v2480_v30 = vmul.f32 %v5570_v63, %v2478_v33 }
0x179f   :  { %2482 = vrot.lane.b32.xlu0 %v2480_v30, %s6112_s20 }
0x17ee   :  { %v2568_v0 = vpop.permute.xlu1 %2567 }
0x17ef   :  { %v2570_v2 = vadd.f32 %v2568_v0, %v2495_v17 }
0x17f1   :  { %5571 = vtanh.f32 %v2570_v2 }
0x17fe   :  { %v5572_v3 = vpop.eup %5571 }
0x17ff   :  { %2574 = vrot.lane.b32.xlu1 %v5572_v3, %s6131_s16 }
0x1811   :  { %v2483_v4 = vpop.permute.xlu0 %2482 }
0x1812   :  { %v2485_v5 = vadd.f32 %v2483_v4, %v2410_v31 }
0x1814   :  { %5573 = vtanh.f32 %v2485_v5 }
0x1821   :  { %v5574_v6 = vpop.eup %5573 }
0x1822   :  { %2489 = vrot.lane.b32.xlu0 %v5574_v6, %s6131_s16 }
0x1871   :  { %v2575_v9 = vpop.permute.xlu1 %2574 }
0x1872   :  { %v2577_v51 = vmul.f32 %v2575_v9, %v2572_v7 }
0x1874   :  { %v2579_v11 = vadd.f32 %v2578_v10, %v2577_v51 }
0x1876   :  { %v6902_v12 = vmul.f32 %v2579_v11, %v6447_v45 }
0x1878   :  { %v2666_v13 = vpack.c.bf16 %v6902_v12, %v6902_v12 }
0x187a   :  { %2668 = vrot.lane.b32.xlu1 %v2666_v13, %s6131_s16 }
0x1894   :  { %v2490_v14 = vpop.permute.xlu0 %2489 }
0x1895   :  { %v2492_v32 = vmul.f32 %v2490_v14, %v2487_v62 }
0x1897   :  { %v6907_v1 = vadd.f32 %v2493_v28, %v2492_v32 }
0x1899   :  { %v2592_v34 = vpack.c.bf16 %v6907_v1, %v6907_v1 }
0x189b   :  { %2594 = vrot.lane.b32.xlu0 %v2592_v34, %s6131_s16 }
0x18ec   :  { %v2669_v43 = vpop.permute.xlu1 %2668 }
0x18ed   :  { %5244 = vmatmul.mubr.msk.bf16.vlgmr.msra.gmra.mxu1 %vm356_vm0, %v2669_v43 }
0x18ee   :  { %5256 = vmatpush3.bf16.msra.mxu1 %v6806_v55  ;;  %5259 = vmatprep.mubr.msk.bf16.mxu1 %vm6130_vm1, %v6129_v18 }
0x18ef   :  { %5257 = vmatprep.subr.bf16.mxu1 %v6129_v18 }
0x18f2   :  { %5258 = vmatpush3.bf16.msra.mxu1 %v6811_v56 }
0x18f3   :  { %5271 = vmatprep.subr.bf16.mxu1 %v6129_v18 }
0x190d   :  { %v2595_v15 = vpop.permute.xlu0 %2594 }
0x190e   :  { %5236 = vmatmul.mubr.msk.bf16.vlgmr.msra.gmra.mxu0 %vm356_vm0, %v2595_v15 }
0x190f   :  { %5248 = vmatpush3.bf16.msra.mxu0 %v6840_v8  ;;  %5251 = vmatprep.mubr.msk.bf16.mxu0 %vm6130_vm1, %v6129_v18 }
0x1910   :  { %5249 = vmatprep.subr.bf16.mxu0 %v6129_v18 }
0x1913   :  { %5250 = vmatpush3.bf16.msra.mxu0 %v6845_v39 }
0x1914   :  { %5263 = vmatprep.subr.bf16.mxu0 %v6129_v18 }
0x19ad   :  { %v2707_v42 = vpop.f32.mrf.mxu1 }
0x19ae   :  { %v2708_v58 = vadd.f32 %v6866_v53, %v2707_v42 }
0x19af   :  { %v5245_v38 = vpop.f32.mrf.mxu1 }
0x19b0   :  { %2721 = vrot.lane.b32.xlu1 %v2708_v58, %s6112_s20  ;;  %v2713_v20 = vadd.f32 %v2708_v58, %v2665_v24 }
0x19b1   :  { %v2710_v27 = vpop.f32.mrf.mxu1 }
0x19b2   :  { %v4736_v17 = vmul.f32 -1.442695, %v2713_v20 }
0x19b3   :  { %v5246_v16 = vpop.f32.mrf.mxu1 }
0x19b4   :  { %5575 = vpow2.f32 %v4736_v17 }
0x19c1   :  { %v5576_v47 = vpop.eup %5575 }
0x19c2   :  { %v2717_v36 = vadd.f32 1.0, %v5576_v47 }
0x19c4   :  { %5577 = vrcp.f32 %v2717_v36 }
0x19ce   :  { %v2633_v19 = vpop.f32.mrf.mxu0 }
0x19cf   :  { %v2634_v44 = vadd.f32 %v6888_v41, %v2633_v19 }
0x19d0   :  { %v5237_v29 = vpop.f32.mrf.mxu0 }
0x19d1   :  { %2647 = vrot.lane.b32.xlu0 %v2634_v44, %s6112_s20  ;;  %v2639_v25 = vadd.f32 %v2634_v44, %v2591_v54  ;;  %v5578_v21 = vpop.eup %5577 }
0x19d2   :  { %v2636_v23 = vpop.f32.mrf.mxu0  ;;  %v2731_v5 = vsub.f32 1.0, %v5578_v21  ;;  %v2737_v7 = vmul.f32 %v5578_v21, %v6902_v12 }
0x19d3   :  { %v4734_v31 = vmul.f32 -1.442695, %v2639_v25 }
0x19d4   :  { %v5238_v48 = vpop.f32.mrf.mxu0 }
0x19d5   :  { %5579 = vpow2.f32 %v4734_v31 }
0x19e2   :  { %v5580_v59 = vpop.eup %5579 }
0x19e3   :  { %v2643_v60 = vadd.f32 1.0, %v5580_v59 }
0x19e5   :  { %5581 = vrcp.f32 %v2643_v60 }
0x19f2   :  { %v5582_v22 = vpop.eup %5581 }
0x19f3   :  { %v2657_v13 = vsub.f32 1.0, %v5582_v22  ;;  %v2663_v14 = vmul.f32 %v5582_v22, %v6907_v1 }
0x1a22   :  { %v2722_v57 = vpop.permute.xlu1 %2721 }
0x1a23   :  { %v2724_v26 = vmul.f32 %v5578_v21, %v2722_v57 }
0x1a25   :  { %2726 = vrot.lane.b32.xlu1 %v2724_v26, %s6112_s20 }
0x1a43   :  { %v2648_v61 = vpop.permute.xlu0 %2647 }
0x1a44   :  { %v2650_v63 = vmul.f32 %v5582_v22, %v2648_v61 }
0x1a46   :  { %2652 = vrot.lane.b32.xlu0 %v2650_v63, %s6112_s20 }
0x1a97   :  { %v2727_v33 = vpop.permute.xlu1 %2726 }
0x1a98   :  { %v2729_v30 = vadd.f32 %v2727_v33, %v2665_v24  ;;  %v2824_v24 = vld [vmem:[#allocation5 + $0x28] sm:$0xff] }
0x1a9a   :  { %5583 = vtanh.f32 %v2729_v30 }
0x1aa7   :  { %v5584_v0 = vpop.eup %5583 }
0x1aa8   :  { %2733 = vrot.lane.b32.xlu1 %v5584_v0, %s6131_s16 }
0x1ab8   :  { %v2653_v2 = vpop.permute.xlu0 %2652 }
0x1ab9   :  { %v2655_v3 = vadd.f32 %v2653_v2, %v2591_v54  ;;  %v2750_v54 = vld [vmem:[#allocation4 + $0x10] sm:$0xff] }
0x1abb   :  { %5585 = vtanh.f32 %v2655_v3 }
0x1ac8   :  { %v5586_v4 = vpop.eup %5585 }
0x1ac9   :  { %2659 = vrot.lane.b32.xlu0 %v5586_v4, %s6131_s16 }
0x1b1a   :  { %v2734_v6 = vpop.permute.xlu1 %2733 }
0x1b1b   :  { %v2736_v9 = vmul.f32 %v2734_v6, %v2731_v5 }
0x1b1d   :  { %v2738_v10 = vadd.f32 %v2737_v7, %v2736_v9 }
0x1b1f   :  { %v6936_v51 = vmul.f32 %v2738_v10, %v6487_v37 }
0x1b21   :  { %v2825_v11 = vpack.c.bf16 %v6936_v51, %v6936_v51 }
0x1b23   :  { %2827 = vrot.lane.b32.xlu1 %v2825_v11, %s6131_s16 }
0x1b3b   :  { %v2660_v62 = vpop.permute.xlu0 %2659 }
0x1b3c   :  { %v2662_v28 = vmul.f32 %v2660_v62, %v2657_v13 }
0x1b3e   :  { %v6942_v32 = vadd.f32 %v2663_v14, %v2662_v28 }
0x1b40   :  { %v2751_v34 = vpack.c.bf16 %v6942_v32, %v6942_v32 }
0x1b42   :  { %2753 = vrot.lane.b32.xlu0 %v2751_v34, %s6131_s16 }
0x1b95   :  { %v2828_v43 = vpop.permute.xlu1 %2827 }
0x1b96   :  { %5260 = vmatmul.mubr.msk.bf16.vlgmr.msra.gmra.mxu1 %vm356_vm0, %v2828_v43 }
0x1b97   :  { %5272 = vmatpush3.bf16.msra.mxu1 %v6806_v55  ;;  %5275 = vmatprep.mubr.msk.bf16.mxu1 %vm6130_vm1, %v6129_v18 }
0x1b98   :  { %5273 = vmatprep.subr.bf16.mxu1 %v6129_v18 }
0x1b9b   :  { %5274 = vmatpush3.bf16.msra.mxu1 %v6811_v56 }
0x1b9c   :  { %5287 = vmatprep.subr.bf16.mxu1 %v6129_v18 }
0x1bb4   :  { %v2754_v15 = vpop.permute.xlu0 %2753 }
0x1bb5   :  { %5252 = vmatmul.mubr.msk.bf16.vlgmr.msra.gmra.mxu0 %vm356_vm0, %v2754_v15 }
0x1bb6   :  { %5264 = vmatpush3.bf16.msra.mxu0 %v6840_v8  ;;  %5267 = vmatprep.mubr.msk.bf16.mxu0 %vm6130_vm1, %v6129_v18 }
0x1bb7   :  { %5265 = vmatprep.subr.bf16.mxu0 %v6129_v18 }
0x1bba   :  { %5266 = vmatpush3.bf16.msra.mxu0 %v6845_v39 }
0x1bbb   :  { %5279 = vmatprep.subr.bf16.mxu0 %v6129_v18 }
0x1c56   :  { %v2866_v42 = vpop.f32.mrf.mxu1 }
0x1c57   :  { %v2867_v58 = vadd.f32 %v6866_v53, %v2866_v42 }
0x1c58   :  { %v5261_v38 = vpop.f32.mrf.mxu1 }
0x1c59   :  { %2880 = vrot.lane.b32.xlu1 %v2867_v58, %s6112_s20  ;;  %v2872_v20 = vadd.f32 %v2867_v58, %v2824_v24 }
0x1c5a   :  { %v2869_v27 = vpop.f32.mrf.mxu1 }
0x1c5b   :  { %v4740_v17 = vmul.f32 -1.442695, %v2872_v20 }
0x1c5c   :  { %v5262_v16 = vpop.f32.mrf.mxu1 }
0x1c5d   :  { %5587 = vpow2.f32 %v4740_v17  ;;  %v2983_v17 = vld [vmem:[#allocation5 + $0x20] sm:$0xff] }
0x1c6a   :  { %v5588_v47 = vpop.eup %5587 }
0x1c6b   :  { %v2876_v36 = vadd.f32 1.0, %v5588_v47 }
0x1c6d   :  { %5589 = vrcp.f32 %v2876_v36 }
0x1c75   :  { %v2792_v19 = vpop.f32.mrf.mxu0 }
0x1c76   :  { %v2793_v44 = vadd.f32 %v6888_v41, %v2792_v19 }
0x1c77   :  { %v5253_v29 = vpop.f32.mrf.mxu0 }
0x1c78   :  { %2806 = vrot.lane.b32.xlu0 %v2793_v44, %s6112_s20  ;;  %v2798_v25 = vadd.f32 %v2793_v44, %v2750_v54 }
0x1c79   :  { %v2795_v23 = vpop.f32.mrf.mxu0 }
0x1c7a   :  { %v4738_v31 = vmul.f32 -1.442695, %v2798_v25  ;;  %v5590_v21 = vpop.eup %5589 }
0x1c7b   :  { %v5254_v48 = vpop.f32.mrf.mxu0  ;;  %v2890_v5 = vsub.f32 1.0, %v5590_v21  ;;  %v2896_v7 = vmul.f32 %v5590_v21, %v6936_v51 }
0x1c7c   :  { %5591 = vpow2.f32 %v4738_v31  ;;  %v2909_v31 = vld [vmem:[#allocation4 + $0x18] sm:$0xff] }
0x1c89   :  { %v5592_v59 = vpop.eup %5591 }
0x1c8a   :  { %v2802_v60 = vadd.f32 1.0, %v5592_v59 }
0x1c8c   :  { %5593 = vrcp.f32 %v2802_v60 }
0x1c99   :  { %v5594_v22 = vpop.eup %5593 }
0x1c9a   :  { %v2816_v62 = vsub.f32 1.0, %v5594_v22  ;;  %v2822_v28 = vmul.f32 %v5594_v22, %v6942_v32 }
0x1ccb   :  { %v2881_v57 = vpop.permute.xlu1 %2880 }
0x1ccc   :  { %v2883_v26 = vmul.f32 %v5590_v21, %v2881_v57 }
0x1cce   :  { %2885 = vrot.lane.b32.xlu1 %v2883_v26, %s6112_s20 }
0x1cea   :  { %v2807_v61 = vpop.permute.xlu0 %2806 }
0x1ceb   :  { %v2809_v63 = vmul.f32 %v5594_v22, %v2807_v61 }
0x1ced   :  { %2811 = vrot.lane.b32.xlu0 %v2809_v63, %s6112_s20 }
0x1d40   :  { %v2886_v33 = vpop.permute.xlu1 %2885 }
0x1d41   :  { %v2888_v30 = vadd.f32 %v2886_v33, %v2824_v24 }
0x1d43   :  { %5595 = vtanh.f32 %v2888_v30 }
0x1d50   :  { %v5596_v0 = vpop.eup %5595 }
0x1d51   :  { %2892 = vrot.lane.b32.xlu1 %v5596_v0, %s6131_s16 }
0x1d5f   :  { %v2812_v2 = vpop.permute.xlu0 %2811 }
0x1d60   :  { %v2814_v3 = vadd.f32 %v2812_v2, %v2750_v54 }
0x1d62   :  { %5597 = vtanh.f32 %v2814_v3 }
0x1d6f   :  { %v5598_v4 = vpop.eup %5597 }
0x1d70   :  { %2818 = vrot.lane.b32.xlu0 %v5598_v4, %s6131_s16 }
0x1dc3   :  { %v2893_v6 = vpop.permute.xlu1 %2892 }
0x1dc4   :  { %v2895_v9 = vmul.f32 %v2893_v6, %v2890_v5 }
0x1dc6   :  { %v2897_v10 = vadd.f32 %v2896_v7, %v2895_v9 }
0x1dc8   :  { %v6971_v11 = vmul.f32 %v2897_v10, %v6527_v35 }
0x1dca   :  { %v2984_v13 = vpack.c.bf16 %v6971_v11, %v6971_v11 }
0x1dcc   :  { %2986 = vrot.lane.b32.xlu1 %v2984_v13, %s6131_s16 }
0x1de2   :  { %v2819_v14 = vpop.permute.xlu0 %2818 }
0x1de3   :  { %v2821_v34 = vmul.f32 %v2819_v14, %v2816_v62 }
0x1de5   :  { %v6977_v43 = vadd.f32 %v2822_v28, %v2821_v34 }
0x1de7   :  { %v2910_v15 = vpack.c.bf16 %v6977_v43, %v6977_v43 }
0x1de9   :  { %2912 = vrot.lane.b32.xlu0 %v2910_v15, %s6131_s16 }
0x1e3e   :  { %v2987_v42 = vpop.permute.xlu1 %2986 }
0x1e3f   :  { %5276 = vmatmul.mubr.msk.bf16.vlgmr.msra.gmra.mxu1 %vm356_vm0, %v2987_v42 }
0x1e40   :  { %5288 = vmatpush3.bf16.msra.mxu1 %v6806_v55  ;;  %5291 = vmatprep.mubr.msk.bf16.mxu1 %vm6130_vm1, %v6129_v18 }
0x1e41   :  { %5289 = vmatprep.subr.bf16.mxu1 %v6129_v18 }
0x1e44   :  { %5290 = vmatpush3.bf16.msra.mxu1 %v6811_v56 }
0x1e45   :  { %5303 = vmatprep.subr.bf16.mxu1 %v6129_v18 }
0x1e5b   :  { %v2913_v58 = vpop.permute.xlu0 %2912 }
0x1e5c   :  { %5268 = vmatmul.mubr.msk.bf16.vlgmr.msra.gmra.mxu0 %vm356_vm0, %v2913_v58 }
0x1e5d   :  { %5280 = vmatpush3.bf16.msra.mxu0 %v6840_v8  ;;  %5283 = vmatprep.mubr.msk.bf16.mxu0 %vm6130_vm1, %v6129_v18 }
0x1e5e   :  { %5281 = vmatprep.subr.bf16.mxu0 %v6129_v18 }
0x1e61   :  { %5282 = vmatpush3.bf16.msra.mxu0 %v6845_v39 }
0x1e62   :  { %5295 = vmatprep.subr.bf16.mxu0 %v6129_v18 }
0x1eff   :  { %v3025_v38 = vpop.f32.mrf.mxu1 }
0x1f00   :  { %v3026_v27 = vadd.f32 %v6866_v53, %v3025_v38 }
0x1f01   :  { %v5277_v16 = vpop.f32.mrf.mxu1 }
0x1f02   :  { %3039 = vrot.lane.b32.xlu1 %v3026_v27, %s6112_s20  ;;  %v3031_v47 = vadd.f32 %v3026_v27, %v2983_v17 }
0x1f03   :  { %v3028_v19 = vpop.f32.mrf.mxu1 }
0x1f04   :  { %v4744_v36 = vmul.f32 -1.442695, %v3031_v47 }
0x1f05   :  { %v5278_v44 = vpop.f32.mrf.mxu1 }
0x1f06   :  { %5599 = vpow2.f32 %v4744_v36 }
0x1f13   :  { %v5600_v54 = vpop.eup %5599 }
0x1f14   :  { %v3035_v25 = vadd.f32 1.0, %v5600_v54 }
0x1f16   :  { %5601 = vrcp.f32 %v3035_v25  ;;  %v3142_v25 = vld [vmem:[#allocation5 + $0x18] sm:$0xff] }
0x1f1c   :  { %v2951_v29 = vpop.f32.mrf.mxu0 }
0x1f1d   :  { %v2952_v23 = vadd.f32 %v6888_v41, %v2951_v29 }
0x1f1e   :  { %v5269_v48 = vpop.f32.mrf.mxu0 }
0x1f1f   :  { %2965 = vrot.lane.b32.xlu0 %v2952_v23, %s6112_s20  ;;  %v2957_v21 = vadd.f32 %v2952_v23, %v2909_v31 }
0x1f20   :  { %v2954_v24 = vpop.f32.mrf.mxu0 }
0x1f21   :  { %v4742_v57 = vmul.f32 -1.442695, %v2957_v21 }
0x1f22   :  { %v5270_v20 = vpop.f32.mrf.mxu0 }
0x1f23   :  { %5603 = vpow2.f32 %v4742_v57  ;;  %v5602_v26 = vpop.eup %5601 }
0x1f24   :  { %v3049_v7 = vsub.f32 1.0, %v5602_v26  ;;  %v3055_v10 = vmul.f32 %v5602_v26, %v6971_v11 }
0x1f30   :  { %v5604_v22 = vpop.eup %5603 }
0x1f31   :  { %v2961_v61 = vadd.f32 1.0, %v5604_v22 }
0x1f33   :  { %5605 = vrcp.f32 %v2961_v61 }
0x1f40   :  { %v5606_v63 = vpop.eup %5605 }
0x1f41   :  { %v2975_v34 = vsub.f32 1.0, %v5606_v63  ;;  %v2981_v42 = vmul.f32 %v5606_v63, %v6977_v43 }
0x1f74   :  { %v3040_v59 = vpop.permute.xlu1 %3039 }
0x1f75   :  { %v3042_v60 = vmul.f32 %v5602_v26, %v3040_v59  ;;  %v3068_v59 = vld [vmem:[#allocation4 + $0x20] sm:$0xff] }
0x1f77   :  { %3044 = vrot.lane.b32.xlu1 %v3042_v60, %s6112_s20 }
0x1f91   :  { %v2966_v33 = vpop.permute.xlu0 %2965 }
0x1f92   :  { %v2968_v30 = vmul.f32 %v5606_v63, %v2966_v33 }
0x1f94   :  { %2970 = vrot.lane.b32.xlu0 %v2968_v30, %s6112_s20 }
0x1fe9   :  { %v3045_v0 = vpop.permute.xlu1 %3044 }
0x1fea   :  { %v3047_v2 = vadd.f32 %v3045_v0, %v2983_v17 }
0x1fec   :  { %5607 = vtanh.f32 %v3047_v2 }
0x1ff9   :  { %v5608_v3 = vpop.eup %5607 }
0x1ffa   :  { %3051 = vrot.lane.b32.xlu1 %v5608_v3, %s6131_s16 }
0x2006   :  { %v2971_v4 = vpop.permute.xlu0 %2970 }
0x2007   :  { %v2973_v5 = vadd.f32 %v2971_v4, %v2909_v31 }
0x2009   :  { %5609 = vtanh.f32 %v2973_v5 }
0x2016   :  { %v5610_v6 = vpop.eup %5609 }
0x2017   :  { %2977 = vrot.lane.b32.xlu0 %v5610_v6, %s6131_s16 }
0x206c   :  { %v3052_v9 = vpop.permute.xlu1 %3051 }
0x206d   :  { %v3054_v13 = vmul.f32 %v3052_v9, %v3049_v7 }
0x206f   :  { %v3056_v62 = vadd.f32 %v3055_v10, %v3054_v13 }
0x2071   :  { %v7006_v14 = vmul.f32 %v3056_v62, %v6567_v40 }
0x2073   :  { %v3143_v28 = vpack.c.bf16 %v7006_v14, %v7006_v14 }
0x2075   :  { %3145 = vrot.lane.b32.xlu1 %v3143_v28, %s6131_s16 }
0x2089   :  { %v2978_v15 = vpop.permute.xlu0 %2977 }
0x208a   :  { %v2980_v58 = vmul.f32 %v2978_v15, %v2975_v34 }
0x208c   :  { %v7012_v38 = vadd.f32 %v2981_v42, %v2980_v58 }
0x208e   :  { %v3069_v27 = vpack.c.bf16 %v7012_v38, %v7012_v38 }
0x2090   :  { %3071 = vrot.lane.b32.xlu0 %v3069_v27, %s6131_s16 }
0x20e7   :  { %v3146_v16 = vpop.permute.xlu1 %3145 }
0x20e8   :  { %5292 = vmatmul.mubr.msk.bf16.vlgmr.msra.gmra.mxu1 %vm356_vm0, %v3146_v16 }
0x20e9   :  { %5304 = vmatpush3.bf16.msra.mxu1 %v6806_v55  ;;  %5307 = vmatprep.mubr.msk.bf16.mxu1 %vm6130_vm1, %v6129_v18 }
0x20ea   :  { %5305 = vmatprep.subr.bf16.mxu1 %v6129_v18 }
0x20ed   :  { %5306 = vmatpush3.bf16.msra.mxu1 %v6811_v56 }
0x20ee   :  { %5319 = vmatprep.subr.bf16.mxu1 %v6129_v18 }
0x2102   :  { %v3072_v19 = vpop.permute.xlu0 %3071 }
0x2103   :  { %5284 = vmatmul.mubr.msk.bf16.vlgmr.msra.gmra.mxu0 %vm356_vm0, %v3072_v19 }
0x2104   :  { %5296 = vmatpush3.bf16.msra.mxu0 %v6840_v8  ;;  %5299 = vmatprep.mubr.msk.bf16.mxu0 %vm6130_vm1, %v6129_v18 }
0x2105   :  { %5297 = vmatprep.subr.bf16.mxu0 %v6129_v18 }
0x2108   :  { %5298 = vmatpush3.bf16.msra.mxu0 %v6845_v39 }
0x2109   :  { %5311 = vmatprep.subr.bf16.mxu0 %v6129_v18 }
0x21a8   :  { %v3184_v44 = vpop.f32.mrf.mxu1 }
0x21a9   :  { %v3185_v29 = vadd.f32 %v6866_v53, %v3184_v44 }
0x21aa   :  { %v5293_v23 = vpop.f32.mrf.mxu1 }
0x21ab   :  { %3198 = vrot.lane.b32.xlu1 %v3185_v29, %s6112_s20  ;;  %v3190_v31 = vadd.f32 %v3185_v29, %v3142_v25 }
0x21ac   :  { %v3187_v48 = vpop.f32.mrf.mxu1 }
0x21ad   :  { %v4748_v21 = vmul.f32 -1.442695, %v3190_v31 }
0x21ae   :  { %v5294_v24 = vpop.f32.mrf.mxu1 }
0x21af   :  { %5611 = vpow2.f32 %v4748_v21 }
0x21bc   :  { %v5612_v57 = vpop.eup %5611 }
0x21bd   :  { %v3194_v26 = vadd.f32 1.0, %v5612_v57  ;;  %v3301_v57 = vld [vmem:[#allocation5 + $0x10] sm:$0xff] }
0x21bf   :  { %5613 = vrcp.f32 %v3194_v26 }
0x21c3   :  { %v3110_v20 = vpop.f32.mrf.mxu0 }
0x21c4   :  { %v3111_v17 = vadd.f32 %v6888_v41, %v3110_v20 }
0x21c5   :  { %v5285_v47 = vpop.f32.mrf.mxu0 }
0x21c6   :  { %3124 = vrot.lane.b32.xlu0 %v3111_v17, %s6112_s20  ;;  %v3116_v60 = vadd.f32 %v3111_v17, %v3068_v59 }
0x21c7   :  { %v3113_v36 = vpop.f32.mrf.mxu0 }
0x21c8   :  { %v4746_v22 = vmul.f32 -1.442695, %v3116_v60  ;;  %v3227_v60 = vld [vmem:[#allocation4 + $0x28] sm:$0xff] }
0x21c9   :  { %v5286_v54 = vpop.f32.mrf.mxu0 }
0x21ca   :  { %5615 = vpow2.f32 %v4746_v22 }
0x21cc   :  { %v5614_v61 = vpop.eup %5613 }
0x21cd   :  { %v3208_v62 = vsub.f32 1.0, %v5614_v61  ;;  %v3214_v34 = vmul.f32 %v5614_v61, %v7006_v14 }
0x21d7   :  { %v5616_v30 = vpop.eup %5615 }
0x21d8   :  { %v3120_v0 = vadd.f32 1.0, %v5616_v30 }
0x21da   :  { %5617 = vrcp.f32 %v3120_v0 }
0x21e7   :  { %v5618_v2 = vpop.eup %5617 }
0x21e8   :  { %v3134_v16 = vsub.f32 1.0, %v5618_v2  ;;  %v3140_v44 = vmul.f32 %v5618_v2, %v7012_v38 }
0x221d   :  { %v3199_v63 = vpop.permute.xlu1 %3198 }
0x221e   :  { %v3201_v33 = vmul.f32 %v5614_v61, %v3199_v63 }
0x2220   :  { %3203 = vrot.lane.b32.xlu1 %v3201_v33, %s6112_s20 }
0x2238   :  { %v3125_v3 = vpop.permute.xlu0 %3124 }
0x2239   :  { %v3127_v4 = vmul.f32 %v5618_v2, %v3125_v3 }
0x223b   :  { %3129 = vrot.lane.b32.xlu0 %v3127_v4, %s6112_s20 }
0x2292   :  { %v3204_v5 = vpop.permute.xlu1 %3203 }
0x2293   :  { %v3206_v6 = vadd.f32 %v3204_v5, %v3142_v25 }
0x2295   :  { %5619 = vtanh.f32 %v3206_v6 }
0x22a2   :  { %v5620_v7 = vpop.eup %5619 }
0x22a3   :  { %3210 = vrot.lane.b32.xlu1 %v5620_v7, %s6131_s16 }
0x22ad   :  { %v3130_v9 = vpop.permute.xlu0 %3129 }
0x22ae   :  { %v3132_v10 = vadd.f32 %v3130_v9, %v3068_v59 }
0x22b0   :  { %5621 = vtanh.f32 %v3132_v10 }
0x22bd   :  { %v5622_v13 = vpop.eup %5621 }
0x22be   :  { %3136 = vrot.lane.b32.xlu0 %v5622_v13, %s6131_s16 }
0x2315   :  { %v3211_v28 = vpop.permute.xlu1 %3210 }
0x2316   :  { %v3213_v15 = vmul.f32 %v3211_v28, %v3208_v62 }
0x2318   :  { %v3215_v42 = vadd.f32 %v3214_v34, %v3213_v15 }
0x231a   :  { %v7041_v58 = vmul.f32 %v3215_v42, %v6607_v46 }
0x231c   :  { %v3302_v27 = vpack.c.bf16 %v7041_v58, %v7041_v58 }
0x231e   :  { %3304 = vrot.lane.b32.xlu1 %v3302_v27, %s6131_s16 }
0x2330   :  { %v3137_v19 = vpop.permute.xlu0 %3136 }
0x2331   :  { %v3139_v29 = vmul.f32 %v3137_v19, %v3134_v16 }
0x2333   :  { %v7047_v23 = vadd.f32 %v3140_v44, %v3139_v29 }
0x2335   :  { %v3228_v48 = vpack.c.bf16 %v7047_v23, %v7047_v23 }
0x2337   :  { %3230 = vrot.lane.b32.xlu0 %v3228_v48, %s6131_s16 }
0x2390   :  { %v3305_v24 = vpop.permute.xlu1 %3304 }
0x2391   :  { %5308 = vmatmul.mubr.msk.bf16.vlgmr.msra.gmra.mxu1 %vm356_vm0, %v3305_v24 }
0x2392   :  { %5320 = vmatpush3.bf16.msra.mxu1 %v6806_v55  ;;  %5323 = vmatprep.mubr.msk.bf16.mxu1 %vm6130_vm1, %v6129_v18 }
0x2393   :  { %5321 = vmatprep.subr.bf16.mxu1 %v6129_v18 }
0x2396   :  { %5322 = vmatpush3.bf16.msra.mxu1 %v6811_v56 }
0x2397   :  { %5335 = vmatprep.subr.bf16.mxu1 %v6129_v18 }
0x23a9   :  { %v3231_v20 = vpop.permute.xlu0 %3230 }
0x23aa   :  { %5300 = vmatmul.mubr.msk.bf16.vlgmr.msra.gmra.mxu0 %vm356_vm0, %v3231_v20 }
0x23ab   :  { %5312 = vmatpush3.bf16.msra.mxu0 %v6840_v8  ;;  %5315 = vmatprep.mubr.msk.bf16.mxu0 %vm6130_vm1, %v6129_v18 }
0x23ac   :  { %5313 = vmatprep.subr.bf16.mxu0 %v6129_v18 }
0x23af   :  { %5314 = vmatpush3.bf16.msra.mxu0 %v6845_v39 }
0x23b0   :  { %5327 = vmatprep.subr.bf16.mxu0 %v6129_v18 }
0x2451   :  { %v3343_v55 = vpop.f32.mrf.mxu1 }
0x2452   :  { %v3344_v17 = vadd.f32 %v6866_v53, %v3343_v55 }
0x2453   :  { %v5309_v56 = vpop.f32.mrf.mxu1 }
0x2454   :  { %3357 = vrot.lane.b32.xlu1 %v3344_v17, %s6112_s20  ;;  %v3349_v39 = vadd.f32 %v3344_v17, %v3301_v57 }
0x2455   :  { %v3346_v47 = vpop.f32.mrf.mxu1 }
0x2456   :  { %v4752_v26 = vmul.f32 -1.442695, %v3349_v39  ;;  %v5745_v47 = vld [vmem:[#allocation25 + $0x8] sm:$0xff]  }
0x2457   :  { %v5310_v36 = vpop.f32.mrf.mxu1 }
0x2458   :  { %5623 = vpow2.f32 %v4752_v26  ;;  %v5746_v36 = vld [vmem:[#allocation25] sm:$0xff]  }
0x2465   :  { %v5624_v59 = vpop.eup %5623 }
0x2466   :  { %v3353_v22 = vadd.f32 1.0, %v5624_v59 }
0x2468   :  { %5625 = vrcp.f32 %v3353_v22 }
0x246a   :  { %v3269_v54 = vpop.f32.mrf.mxu0 }
0x246b   :  { %v3270_v8 = vadd.f32 %v6888_v41, %v3269_v54 }
0x246c   :  { %v5301_v25 = vpop.f32.mrf.mxu0 }
0x246d   :  { %3283 = vrot.lane.b32.xlu0 %v3270_v8, %s6112_s20  ;;  %v3275_v61 = vadd.f32 %v3270_v8, %v3227_v60  ;;  %v5747_v8 = vld [vmem:[#allocation24 + $0x8] sm:$0xff]   ;;  %v5748_v25 = vld [vmem:[#allocation24] sm:$0xff]  }
0x246e   :  { %v3272_v31 = vpop.f32.mrf.mxu0 }
0x246f   :  { %v4750_v63 = vmul.f32 -1.442695, %v3275_v61 }
0x2470   :  { %v5302_v21 = vpop.f32.mrf.mxu0 }
0x2471   :  { %5627 = vpow2.f32 %v4750_v63 }
0x2475   :  { %v5626_v33 = vpop.eup %5625 }
0x2476   :  { %v3367_v34 = vsub.f32 1.0, %v5626_v33  ;;  %v3373_v42 = vmul.f32 %v5626_v33, %v7041_v58 }
0x247e   :  { %v5628_v2 = vpop.eup %5627 }
0x247f   :  { %v3279_v3 = vadd.f32 1.0, %v5628_v2 }
0x2481   :  { %5629 = vrcp.f32 %v3279_v3  ;;  %v3386_v3 = vld [vmem:[#allocation4 + $0x30] sm:$0xff] }
0x248e   :  { %v5630_v4 = vpop.eup %5629 }
0x248f   :  { %v3293_v29 = vsub.f32 1.0, %v5630_v4  ;;  %v3299_v24 = vmul.f32 %v5630_v4, %v7047_v23 }
0x24c6   :  { %v3358_v30 = vpop.permute.xlu1 %3357 }
0x24c7   :  { %v3360_v0 = vmul.f32 %v5626_v33, %v3358_v30  ;;  %v3460_v33 = vld [vmem:[#allocation5 + $0x8] sm:$0xff] }
0x24c9   :  { %3362 = vrot.lane.b32.xlu1 %v3360_v0, %s6112_s20 }
0x24df   :  { %v3284_v5 = vpop.permute.xlu0 %3283 }
0x24e0   :  { %v3286_v6 = vmul.f32 %v5630_v4, %v3284_v5 }
0x24e2   :  { %3288 = vrot.lane.b32.xlu0 %v3286_v6, %s6112_s20 }
0x253b   :  { %v3363_v7 = vpop.permute.xlu1 %3362 }
0x253c   :  { %v3365_v9 = vadd.f32 %v3363_v7, %v3301_v57 }
0x253e   :  { %5631 = vtanh.f32 %v3365_v9 }
0x254b   :  { %v5632_v10 = vpop.eup %5631 }
0x254c   :  { %3369 = vrot.lane.b32.xlu1 %v5632_v10, %s6131_s16 }
0x2554   :  { %v3289_v13 = vpop.permute.xlu0 %3288 }
0x2555   :  { %v3291_v62 = vadd.f32 %v3289_v13, %v3227_v60 }
0x2557   :  { %5633 = vtanh.f32 %v3291_v62 }
0x2564   :  { %v5634_v28 = vpop.eup %5633 }
0x2565   :  { %3295 = vrot.lane.b32.xlu0 %v5634_v28, %s6131_s16 }
0x25be   :  { %v3370_v15 = vpop.permute.xlu1 %3369 }
0x25bf   :  { %v3372_v27 = vmul.f32 %v3370_v15, %v3367_v34 }
0x25c1   :  { %v3374_v16 = vadd.f32 %v3373_v42, %v3372_v27 }
0x25c3   :  { %v7076_v19 = vmul.f32 %v3374_v16, %v6649_v52 }
0x25c5   :  { %v3461_v44 = vpack.c.bf16 %v7076_v19, %v7076_v19 }
0x25c7   :  { %3463 = vrot.lane.b32.xlu1 %v3461_v44, %s6131_s16 }
0x25d7   :  { %v3296_v48 = vpop.permute.xlu0 %3295 }
0x25d8   :  { %v3298_v20 = vmul.f32 %v3296_v48, %v3293_v29 }
0x25da   :  { %v7082_v55 = vadd.f32 %v3299_v24, %v3298_v20 }
0x25dc   :  { %v3387_v17 = vpack.c.bf16 %v7082_v55, %v7082_v55 }
0x25de   :  { %3389 = vrot.lane.b32.xlu0 %v3387_v17, %s6131_s16 }
0x2639   :  { %v3464_v56 = vpop.permute.xlu1 %3463 }
0x263a   :  { %5324 = vmatmul.mubr.msk.bf16.vlgmr.msra.gmra.mxu1 %vm356_vm0, %v3464_v56 }
0x263b   :  { %5336 = vmatpush3.bf16.msra.mxu1 %v5745_v47  ;;  %5339 = vmatprep.mubr.msk.bf16.mxu1 %vm6130_vm1, %v6129_v18 }
0x263c   :  { %5337 = vmatprep.subr.bf16.mxu1 %v6129_v18 }
0x263f   :  { %5338 = vmatpush3.bf16.msra.mxu1 %v5746_v36 }
0x2650   :  { %v3390_v54 = vpop.permute.xlu0 %3389 }
0x2651   :  { %5316 = vmatmul.mubr.msk.bf16.vlgmr.msra.gmra.mxu0 %vm356_vm0, %v3390_v54 }
0x2652   :  { %5328 = vmatpush3.bf16.msra.mxu0 %v5747_v8  ;;  %5331 = vmatprep.mubr.msk.bf16.mxu0 %vm6130_vm1, %v6129_v18 }
0x2653   :  { %5329 = vmatprep.subr.bf16.mxu0 %v6129_v18 }
0x2656   :  { %5330 = vmatpush3.bf16.msra.mxu0 %v5748_v25 }
0x26fa   :  { %v3502_v31 = vpop.f32.mrf.mxu1 }
0x26fb   :  { %v3503_v21 = vadd.f32 %v6866_v53, %v3502_v31 }
0x26fc   :  { %v5325_v57 = vpop.f32.mrf.mxu1 }
0x26fd   :  { %3516 = vrot.lane.b32.xlu1 %v3503_v21, %s6112_s20  ;;  %v3508_v30 = vadd.f32 %v3503_v21, %v3460_v33 }
0x26fe   :  { %v3505_v39 = vpop.f32.mrf.mxu1 }
0x26ff   :  { %v4756_v0 = vmul.f32 -1.442695, %v3508_v30 }
0x2700   :  { %v5326_v26 = vpop.f32.mrf.mxu1 }
0x2701   :  { %5635 = vpow2.f32 %v4756_v0 }
0x270e   :  { %v5636_v2 = vpop.eup %5635 }
0x270f   :  { %v3512_v4 = vadd.f32 1.0, %v5636_v2 }
0x2711   :  { %v3428_v59 = vpop.f32.mrf.mxu0  ;;  %5637 = vrcp.f32 %v3512_v4  ;;  %v3619_v4 = vld [vmem:[#allocation5] sm:$0xff] }
0x2712   :  { %v3429_v60 = vadd.f32 %v6888_v41, %v3428_v59 }
0x2713   :  { %v5317_v22 = vpop.f32.mrf.mxu0 }
0x2714   :  { %3442 = vrot.lane.b32.xlu0 %v3429_v60, %s6112_s20  ;;  %v3434_v53 = vadd.f32 %v3429_v60, %v3386_v3  ;;  %v5749_v60 = vld [vmem:[#allocation28] ss:$0 sm:$0xff] }
0x2715   :  { %v3431_v61 = vpop.f32.mrf.mxu0 }
0x2716   :  { %v4754_v5 = vmul.f32 -1.442695, %v3434_v53 }
0x2717   :  { %v5318_v63 = vpop.f32.mrf.mxu0 }
0x2718   :  { %5639 = vpow2.f32 %v4754_v5 }
0x271e   :  { %v5638_v6 = vpop.eup %5637 }
0x271f   :  { %v3526_v48 = vsub.f32 1.0, %v5638_v6  ;;  %v3532_v20 = vmul.f32 %v5638_v6, %v7076_v19 }
0x2725   :  { %v5640_v10 = vpop.eup %5639 }
0x2726   :  { %v3438_v13 = vadd.f32 1.0, %v5640_v10 }
0x2728   :  { %5641 = vrcp.f32 %v3438_v13 }
0x2735   :  { %v5642_v62 = vpop.eup %5641 }
0x2736   :  { %v3452_v54 = vsub.f32 1.0, %v5642_v62  ;;  %v3458_v25 = vmul.f32 %v5642_v62, %v7082_v55 }
0x276f   :  { %v3517_v7 = vpop.permute.xlu1 %3516 }
0x2770   :  { %v3519_v9 = vmul.f32 %v5638_v6, %v3517_v7  ;;  %v3545_v7 = vld [vmem:[#allocation4 + $0x38] sm:$0xff] }
0x2772   :  { %3521 = vrot.lane.b32.xlu1 %v3519_v9, %s6112_s20 }
0x2786   :  { %v3443_v28 = vpop.permute.xlu0 %3442 }
0x2787   :  { %v3445_v34 = vmul.f32 %v5642_v62, %v3443_v28 }
0x2789   :  { %3447 = vrot.lane.b32.xlu0 %v3445_v34, %s6112_s20 }
0x27e4   :  { %v3522_v15 = vpop.permute.xlu1 %3521 }
0x27e5   :  { %v3524_v42 = vadd.f32 %v3522_v15, %v3460_v33 }
0x27e7   :  { %5643 = vtanh.f32 %v3524_v42 }
0x27f4   :  { %v5644_v27 = vpop.eup %5643 }
0x27f5   :  { %3528 = vrot.lane.b32.xlu1 %v5644_v27, %s6131_s16 }
0x27fb   :  { %v3448_v16 = vpop.permute.xlu0 %3447 }
0x27fc   :  { %v3450_v44 = vadd.f32 %v3448_v16, %v3386_v3 }
0x27fe   :  { %5645 = vtanh.f32 %v3450_v44 }
0x280b   :  { %v5646_v29 = vpop.eup %5645 }
0x280c   :  { %3454 = vrot.lane.b32.xlu0 %v5646_v29, %s6131_s16 }
0x2867   :  { %v3529_v24 = vpop.permute.xlu1 %3528 }
0x2868   :  { %v3531_v17 = vmul.f32 %v3529_v24, %v3526_v48 }
0x286a   :  { %v3533_v56 = vadd.f32 %v3532_v20, %v3531_v17 }
0x286c   :  { %v7105_v47 = vmul.f32 %v3533_v56, %v6684_v50 }
0x286e   :  { %v3620_v36 = vpack.c.bf16 %v7105_v47, %v7105_v47 }
0x2870   :  { %3622 = vrot.lane.b32.xlu1 %v3620_v36, %s6131_s16 }
0x287e   :  { %v3455_v8 = vpop.permute.xlu0 %3454 }
0x287f   :  { %v3457_v31 = vmul.f32 %v3455_v8, %v3452_v54 }
0x2881   :  { %v7111_v21 = vadd.f32 %v3458_v25, %v3457_v31 }
0x2883   :  { %v3546_v57 = vpack.c.bf16 %v7111_v21, %v7111_v21 }
0x2885   :  { %3548 = vrot.lane.b32.xlu0 %v3546_v57, %s6131_s16  ;;  %v5459_v57 = vld [vmem:[%s7366_s19 + $0x8] sm:$0xff]  }
0x2886   :  { %5343 = vmatprep.subr.bf16.mxu0 %v5459_v57 }
0x28e2   :  { %v3623_v39 = vpop.permute.xlu1 %3622 }
0x28e3   :  { %5340 = vmatmul.mubr.msk.bf16.vlgmr.msra.gmra.mxu1 %vm356_vm0, %v3623_v39 }
0x28f7   :  { %v3549_v26 = vpop.permute.xlu0 %3548 }
0x28f8   :  { %5332 = vmatmul.mubr.msk.bf16.vlgmr.msra.gmra.mxu0 %vm356_vm0, %v3549_v26 }
0x28f9   :  { %5344 = vmatpush3.bf16.msra.mxu0 %v5459_v57 }
0x29a3   :  { %v3661_v59 = vpop.f32.mrf.mxu1 }
0x29a4   :  { %v3662_v22 = vadd.f32 %v5749_v60, %v3661_v59 }
0x29a5   :  { %v5341_v61 = vpop.f32.mrf.mxu1 }
0x29a6   :  { %3675 = vrot.lane.b32.xlu1 %v3662_v22, %s6112_s20  ;;  %v3667_v5 = vadd.f32 %v3662_v22, %v3619_v4  ;;  %v5460_v22 = vld [vmem:[%s7366_s19] sm:$0xff]   ;;  %s6132_s19 = smov 1  }
0x29a7   :  { %v3664_v63 = vpop.f32.mrf.mxu1  ;;  %5345 = vmatprep.subr.bf16.mxu0 %v5460_v22 }
0x29a8   :  { %v4760_v6 = vmul.f32 -1.442695, %v3667_v5  ;;  %5346 = vmatpush3.bf16.msra.mxu0 %v5460_v22 }
0x29a9   :  { %v5342_v33 = vpop.f32.mrf.mxu1 }
0x29aa   :  { %5647 = vpow2.f32 %v4760_v6 }
0x29b7   :  { %v5648_v9 = vpop.eup %5647 }
0x29b8   :  { %v3587_v30 = vpop.f32.mrf.mxu0  ;;  %v3671_v13 = vadd.f32 1.0, %v5648_v9 }
0x29b9   :  { %v3588_v0 = vadd.f32 %v6888_v41, %v3587_v30 }
0x29ba   :  { %v5333_v2 = vpop.f32.mrf.mxu0  ;;  %5649 = vrcp.f32 %v3671_v13 }
0x29bb   :  { %3601 = vrot.lane.b32.xlu0 %v3588_v0, %s6112_s20  ;;  %v3593_v10 = vadd.f32 %v3588_v0, %v3545_v7 }
0x29bc   :  { %v3590_v3 = vpop.f32.mrf.mxu0 }
0x29bd   :  { %v4758_v62 = vmul.f32 -1.442695, %v3593_v10 }
0x29be   :  { %v5334_v53 = vpop.f32.mrf.mxu0 }
0x29bf   :  { %5651 = vpow2.f32 %v4758_v62 }
0x29c7   :  { %v5650_v28 = vpop.eup %5649 }
0x29cc   :  { %v5652_v34 = vpop.eup %5651 }
0x29cd   :  { %v3597_v42 = vadd.f32 1.0, %v5652_v34 }
0x29cf   :  { %5653 = vrcp.f32 %v3597_v42 }
0x29dc   :  { %v7122_v27 = vpop.eup %5653 }
0x29dd   :  { %v3611_v26 = vsub.f32 1.0, %v7122_v27 }
0x2a18   :  { %v3676_v15 = vpop.permute.xlu1 %3675 }
0x2a19   :  { %v3678_v41 = vmul.f32 %v5650_v28, %v3676_v15 }
0x2a1b   :  { %3680 = vrot.lane.b32.xlu1 %v3678_v41, %s6112_s20 }
0x2a2d   :  { %v3602_v16 = vpop.permute.xlu0 %3601 }
0x2a2e   :  { %v3604_v44 = vmul.f32 %v7122_v27, %v3602_v16 }
0x2a30   :  { %3606 = vrot.lane.b32.xlu0 %v3604_v44, %s6112_s20 }
0x2a8d   :  { %v3681_v29 = vpop.permute.xlu1 %3680 }
0x2a8e   :  { %v3683_v48 = vadd.f32 %v3681_v29, %v3619_v4 }
0x2a90   :  { %5655 = vtanh.f32 %v3683_v48 }
0x2a9d   :  { %v5656_v24 = vpop.eup %5655 }
0x2a9e   :  { %3687 = vrot.lane.b32.xlu1 %v5656_v24, %s6131_s16 }
0x2aa2   :  { %v3607_v20 = vpop.permute.xlu0 %3606  ;;  %2582 = vrot.lane.b32.xlu1 %v6907_v1, %s6131_s16  ;;  %v5457_v1 = vld [vmem:[%s7365_s18 + $0x8] sm:$0xff]  }
0x2aa3   :  { %v3609_v17 = vadd.f32 %v3607_v20, %v3545_v7  ;;  %5355 = vmatprep.subr.bf16.mxu1 %v5457_v1 }
0x2aa4   :  { %5356 = vmatpush3.bf16.msra.mxu1 %v5457_v1 }
0x2aa5   :  { %5657 = vtanh.f32 %v3609_v17 }
0x2aa6   :  { %2900 = vrot.lane.b32.xlu1 %v6977_v43, %s6131_s16  ;;  %v5458_v43 = vld [vmem:[%s7365_s18] sm:$0xff]  }
0x2aa7   :  { %5357 = vmatprep.subr.bf16.mxu1 %v5458_v43 }
0x2aa8   :  { %5358 = vmatpush3.bf16.msra.mxu1 %v5458_v43 }
0x2aaa   :  { %3218 = vrot.lane.b32.xlu1 %v7047_v23, %s6131_s16 }
0x2aae   :  { %3536 = vrot.lane.b32.xlu1 %v7111_v21, %s6131_s16 }
0x2ab2   :  { %v5658_v56 = vpop.eup %5657  ;;  %3541 = vrot.lane.b32.xlu1 %v7105_v47, %s6131_s16 }
0x2ab3   :  { %3613 = vrot.lane.b32.xlu0 %v5658_v56, %s6131_s16 }
0x2ab6   :  { %3223 = vrot.lane.b32.xlu1 %v7041_v58, %s6131_s16 }
0x2ab7   :  { %2741 = vrot.lane.b32.xlu0 %v6942_v32, %s6131_s16  ;;  %v3685_v32 = vsub.f32 1.0, %v5650_v28 }
0x2aba   :  { %2905 = vrot.lane.b32.xlu1 %v6971_v11, %s6131_s16 }
0x2abb   :  { %3059 = vrot.lane.b32.xlu0 %v7012_v38, %s6131_s16  ;;  %v3691_v38 = vmul.f32 %v5650_v28, %v7105_v47 }
0x2abe   :  { %2587 = vrot.lane.b32.xlu1 %v6902_v12, %s6131_s16 }
0x2abf   :  { %3377 = vrot.lane.b32.xlu0 %v7082_v55, %s6131_s16 }
0x2ac2   :  { %3994 = vrot.lane.b32.xlu1 %v6129_v18, %s6132_s19 }
0x2b10   :  { %v3688_v58 = vpop.permute.xlu1 %3687 }
0x2b11   :  { %v3690_v23 = vmul.f32 %v3688_v58, %v3685_v32 }
0x2b13   :  { %v3692_v36 = vadd.f32 %v3691_v38, %v3690_v23 }
0x2b14   :  { %v2583_v11 = vpop.permute.xlu1 %2582 }
0x2b15   :  { %v3693_v54 = vmul.f32 %v3692_v36, %v6724_v49  ;;  %2585 = vst.msk [vmem:[#allocation2] sm:$0xff] %vm356_vm0, %v2583_v11 }
0x2b17   :  { %3700 = vrot.lane.b32.xlu0 %v3693_v54, %s6131_s16  ;;  %v4781_v54 = vld [vmem:[#allocation6] ss:$0 sm:$0xff] }
0x2b18   :  { %v2901_v8 = vpop.permute.xlu1 %2900  ;;  %4065 = vrot.lane.b32.xlu1 %v4781_v54, %s6132_s19 }
0x2b19   :  { %2903 = vst.msk [vmem:[#allocation2 + $0x10] sm:$0xff] %vm356_vm0, %v2901_v8 }
0x2b1c   :  { %v3704_v55 = vld [vmem:[#allocation2] sm:$0xff]  ;;  %v3219_v25 = vpop.permute.xlu1 %3218 }
0x2b1d   :  { %v3712_v12 = vmul.f32 %v3704_v55, %v6724_v49  ;;  %3221 = vst.msk [vmem:[#allocation2 + $0x20] sm:$0xff] %vm356_vm0, %v3219_v25 }
0x2b1f   :  { %3720 = vst.msk [vmem:[#allocation2] sm:$0xff] %vm356_vm0, %v3712_v12 }
0x2b20   :  { %v3706_v47 = vld [vmem:[#allocation2 + $0x10] sm:$0xff]  ;;  %v3537_v31 = vpop.permute.xlu1 %3536 }
0x2b21   :  { %v3714_v39 = vmul.f32 %v3706_v47, %v6649_v52  ;;  %3539 = vst.msk [vmem:[#allocation2 + $0x30] sm:$0xff] %vm356_vm0, %v3537_v31  ;;  %v3617_v52 = vmul.f32 %v7122_v27, %v7111_v21 }
0x2b23   :  { %3722 = vst.msk [vmem:[#allocation2 + $0x10] sm:$0xff] %vm356_vm0, %v3714_v39 }
0x2b24   :  { %v3708_v49 = vld [vmem:[#allocation2 + $0x20] sm:$0xff]  ;;  %v3542_v60 = vpop.permute.xlu1 %3541 }
0x2b25   :  { %v3614_v59 = vpop.permute.xlu0 %3613  ;;  %v3716_v61 = vmul.f32 %v3708_v49, %v6567_v40  ;;  %3544 = vst.msk [vmem:[#allocation3 + $0x8] sm:$0xff] %vm356_vm0, %v3542_v60 }
0x2b26   :  { %v3616_v63 = vmul.f32 %v3614_v59, %v3611_v26  ;;  %v7201_v9 = vld [vmem:[#allocation2] sm:$0xff] }
0x2b27   :  { %3724 = vst.msk [vmem:[#allocation2 + $0x20] sm:$0xff] %vm356_vm0, %v3716_v61 }
0x2b28   :  { %v3618_v33 = vadd.f32 %v3617_v52, %v3616_v63  ;;  %v3710_v30 = vld [vmem:[#allocation2 + $0x30] sm:$0xff]  ;;  %v3224_v2 = vpop.permute.xlu1 %3223 }
0x2b29   :  { %v2742_v0 = vpop.permute.xlu0 %2741  ;;  %v3718_v3 = vmul.f32 %v3710_v30, %v6487_v37  ;;  %3226 = vst.msk [vmem:[#allocation3 + $0x18] sm:$0xff] %vm356_vm0, %v3224_v2 }
0x2b2a   :  { %2744 = vst.msk [vmem:[#allocation2 + $0x8] sm:$0xff] %vm356_vm0, %v2742_v0  ;;  %3695 = vrot.lane.b32.xlu0 %v3618_v33, %s6131_s16 }
0x2b2b   :  { %3726 = vst.msk [vmem:[#allocation2 + $0x30] sm:$0xff] %vm356_vm0, %v3718_v3 }
0x2b2c   :  { %v2906_v21 = vpop.permute.xlu1 %2905  ;;  %v7226_v41 = vld [vmem:[#allocation3 + $0x8] sm:$0xff] }
0x2b2d   :  { %v3060_v40 = vpop.permute.xlu0 %3059  ;;  %2908 = vst.msk [vmem:[#allocation3 + $0x28] sm:$0xff] %vm356_vm0, %v2906_v21 }
0x2b2e   :  { %3062 = vst.msk [vmem:[#allocation2 + $0x18] sm:$0xff] %vm356_vm0, %v3060_v40  ;;  %3382 = vrot.lane.b32.xlu0 %v7076_v19, %s6131_s16 }
0x2b30   :  { %v2588_v37 = vpop.permute.xlu1 %2587  ;;  %v7238_v17 = vld [vmem:[#allocation3 + $0x18] sm:$0xff] }
0x2b31   :  { %v3705_v53 = vld [vmem:[#allocation2 + $0x8] sm:$0xff]  ;;  %v3378_v4 = vpop.permute.xlu0 %3377  ;;  %2590 = vst.msk [vmem:[#allocation3 + $0x38] sm:$0xff] %vm356_vm0, %v2588_v37 }
0x2b32   :  { %v3713_v5 = vmul.f32 %v3705_v53, %v6684_v50  ;;  %3380 = vst.msk [vmem:[#allocation2 + $0x28] sm:$0xff] %vm356_vm0, %v3378_v4  ;;  %3064 = vrot.lane.b32.xlu0 %v7006_v14, %s6131_s16  ;;  %v7250_v32 = vld [vmem:[#allocation2 + $0x30] sm:$0xff]  ;;  %v6134_v4 = vmov 1  }
0x2b33   :  { %5435 = vset.pattern.permute.xlu1 %v6134_v4  ;;  %5436 = vset.pattern.permute.xlu0 %v6134_v4 }
0x2b34   :  { %3721 = vst.msk [vmem:[#allocation2 + $0x8] sm:$0xff] %vm356_vm0, %v3713_v5  ;;  %v7246_v43 = vld [vmem:[#allocation3 + $0x28] sm:$0xff]  ;;  %v3995_v37 = vpop.permute.xlu1 %3994 }
0x2b35   :  { %v3707_v6 = vld [vmem:[#allocation2 + $0x18] sm:$0xff] }
0x2b36   :  { %v3715_v19 = vmul.f32 %v3707_v6, %v6607_v46  ;;  %2746 = vrot.lane.b32.xlu0 %v6936_v51, %s6131_s16  ;;  %v7209_v46 = vld [vmem:[#allocation2 + $0x10] sm:$0xff]  ;;  %s6133_s16 = smov 127  }
0x2b38   :  { %3723 = vst.msk [vmem:[#allocation2 + $0x18] sm:$0xff] %vm356_vm0, %v3715_v19  ;;  %v7259_v36 = vld [vmem:[#allocation3 + $0x38] sm:$0xff] }
0x2b39   :  { %v3709_v50 = vld [vmem:[#allocation2 + $0x28] sm:$0xff] }
0x2b3a   :  { %v3717_v7 = vmul.f32 %v3709_v50, %v6527_v35  ;;  %v7216_v35 = vld [vmem:[#allocation2 + $0x20] sm:$0xff] }
0x2b3b   :  { %v7203_v14 = vld [vmem:[#allocation2 + $0x8] sm:$0xff] }
0x2b3c   :  { %3725 = vst.msk [vmem:[#allocation2 + $0x28] sm:$0xff] %vm356_vm0, %v3717_v7  ;;  %v4837_v10 = vpack.c.bf16 %v7203_v14, %v7201_v9 }
0x2b3e   :  { %5359 = vmatprep.mubr.msk.bf16.mxu1 %vm356_vm0, %v4837_v10 }
0x2b3f   :  { %v7211_v13 = vld [vmem:[#allocation2 + $0x18] sm:$0xff] }
0x2b40   :  { %v4838_v51 = vpack.c.bf16 %v7211_v13, %v7209_v46 }
0x2b42   :  { %5360 = vmatmul.mubr.msk.bf16.vlgmr.msra.gmra.mxu1 %vm356_vm0, %v4838_v51 }
0x2b43   :  { %v7218_v62 = vld [vmem:[#allocation2 + $0x28] sm:$0xff] }
0x2b44   :  { %v4839_v28 = vpack.c.bf16 %v7218_v62, %v7216_v35 }
0x2b46   :  { %5363 = vmatprep.mubr.msk.bf16.mxu1 %vm356_vm0, %v4839_v28 }
0x2b89   :  { %v3701_v34 = vpop.permute.xlu0 %3700 }
0x2b8a   :  { %3703 = vst.msk [vmem:[#allocation3] sm:$0xff] %vm356_vm0, %v3701_v34  ;;  %v4066_v5 = vpop.permute.xlu1 %4065 }
0x2b91   :  { %v7224_v15 = vld [vmem:[#allocation3] sm:$0xff] }
0x2b92   :  { %v4833_v42 = vpack.c.bf16 %v7226_v41, %v7224_v15 }
0x2b94   :  { %5347 = vmatprep.mubr.msk.bf16.mxu0 %vm356_vm0, %v4833_v42 }
0x2b9c   :  { %v3696_v27 = vpop.permute.xlu0 %3695 }
0x2b9d   :  { %3698 = vst.msk [vmem:[#allocation2 + $0x38] sm:$0xff] %vm356_vm0, %v3696_v27 }
0x2ba0   :  { %v3383_v16 = vpop.permute.xlu0 %3382 }
0x2ba1   :  { %3385 = vst.msk [vmem:[#allocation3 + $0x10] sm:$0xff] %vm356_vm0, %v3383_v16 }
0x2ba4   :  { %v3711_v44 = vld [vmem:[#allocation2 + $0x38] sm:$0xff]  ;;  %v3065_v29 = vpop.permute.xlu0 %3064 }
0x2ba5   :  { %v3719_v48 = vmul.f32 %v3711_v44, %v6447_v45  ;;  %3067 = vst.msk [vmem:[#allocation3 + $0x20] sm:$0xff] %vm356_vm0, %v3065_v29 }
0x2ba7   :  { %3727 = vst.msk [vmem:[#allocation2 + $0x38] sm:$0xff] %vm356_vm0, %v3719_v48 }
0x2ba8   :  { %v2747_v24 = vpop.permute.xlu0 %2746  ;;  %v7236_v20 = vld [vmem:[#allocation3 + $0x10] sm:$0xff] }
0x2ba9   :  { %2749 = vst.msk [vmem:[#allocation3 + $0x30] sm:$0xff] %vm356_vm0, %v2747_v24  ;;  %v4834_v56 = vpack.c.bf16 %v7238_v17, %v7236_v20 }
0x2bab   :  { %5348 = vmatmul.mubr.msk.bf16.vlgmr.msra.gmra.mxu0 %vm356_vm0, %v4834_v56 }
0x2bac   :  { %v7244_v1 = vld [vmem:[#allocation3 + $0x20] sm:$0xff] }
0x2bad   :  { %v4835_v45 = vpack.c.bf16 %v7246_v43, %v7244_v1 }
0x2bae   :  { %v7252_v58 = vld [vmem:[#allocation2 + $0x38] sm:$0xff] }
0x2baf   :  { %5351 = vmatprep.mubr.msk.bf16.mxu0 %vm356_vm0, %v4835_v45  ;;  %v4840_v38 = vpack.c.bf16 %v7252_v58, %v7250_v32 }
0x2bb0   :  { %v7257_v23 = vld [vmem:[#allocation3 + $0x30] sm:$0xff] }
0x2bb1   :  { %5364 = vmatmul.mubr.msk.bf16.gmra.mxu1 %vm356_vm0, %v4840_v38  ;;  %v4836_v11 = vpack.c.bf16 %v7259_v36, %v7257_v23 }
0x2bb3   :  { %5352 = vmatmul.mubr.msk.bf16.gmra.mxu0 %vm356_vm0, %v4836_v11 }
0x2c02   :  { %v5361_v8 = vpop.f32.mrf.mxu1 }
0x2c04   :  { %v3955_v55 = vpop.f32.mrf.mxu1 }
0x2c06   :  { %v5362_v47 = vpop.f32.mrf.mxu1 }
0x2c08   :  { %v3958_v26 = vpop.f32.mrf.mxu1 }
0x2c6b   :  { %v5349_v25 = vpop.f32.mrf.mxu0 }
0x2c6c   :  { %v3964_v12 = vadd.f32 %v5361_v8, %v5349_v25 }
0x2c6d   :  { %v3846_v31 = vpop.f32.mrf.mxu0 }
0x2c6e   :  { %4000 = vrot.lane.b32.xlu0 %v3964_v12, %s6132_s19  ;;  %v3956_v22 = vadd.f32 %v3955_v55, %v3846_v31 }
0x2c6f   :  { %v5350_v57 = vpop.f32.mrf.mxu0 }
0x2c70   :  { %v3967_v39 = vadd.f32 %v5362_v47, %v5350_v57  ;;  %v4018_v34 = vadd.f32 %v3995_v37, %v3956_v22 }
0x2c71   :  { %v3849_v49 = vpop.f32.mrf.mxu0  ;;  %v5365_v59 = vpop.f32.mrf.mxu1 }
0x2c72   :  { %4029 = vrot.lane.b32.xlu0 %v3964_v12, %s6133_s16  ;;  %4031 = vrot.lane.b32.xlu1 %v3967_v39, %s6133_s16  ;;  %v3959_v61 = vadd.f32 %v3958_v26, %v3849_v49 }
0x2c73   :  { %v5353_v60 = vpop.f32.mrf.mxu0  ;;  %v3971_v63 = vpop.f32.mrf.mxu1 }
0x2c74   :  { %v3980_v0 = vadd.f32 %v5365_v59, %v5353_v60 }
0x2c75   :  { %v3862_v52 = vpop.f32.mrf.mxu0  ;;  %v5366_v30 = vpop.f32.mrf.mxu1 }
0x2c76   :  { %3998 = vrot.lane.b32.xlu1 %v3959_v61, %s6132_s19  ;;  %3996 = vrot.lane.b32.xlu0 %v3956_v22, %s6132_s19  ;;  %v3972_v2 = vadd.f32 %v3971_v63, %v3862_v52 }
0x2c77   :  { %v5354_v33 = vpop.f32.mrf.mxu0  ;;  %v3974_v40 = vpop.f32.mrf.mxu1 }
0x2c78   :  { %v3983_v53 = vadd.f32 %v5366_v30, %v5354_v33 }
0x2c79   :  { %v3865_v3 = vpop.f32.mrf.mxu0 }
0x2c7a   :  { %4027 = vrot.lane.b32.xlu1 %v3959_v61, %s6133_s16  ;;  %4002 = vrot.lane.b32.xlu0 %v3967_v39, %s6132_s19  ;;  %v3975_v21 = vadd.f32 %v3974_v40, %v3865_v3 }
0x2c7e   :  { %4008 = vrot.lane.b32.xlu1 %v3980_v0, %s6132_s19  ;;  %4033 = vrot.lane.b32.xlu0 %v3972_v2, %s6133_s16 }
0x2c82   :  { %4037 = vrot.lane.b32.xlu1 %v3980_v0, %s6133_s16  ;;  %4006 = vrot.lane.b32.xlu0 %v3975_v21, %s6132_s19 }
0x2c86   :  { %4004 = vrot.lane.b32.xlu1 %v3972_v2, %s6132_s19  ;;  %4035 = vrot.lane.b32.xlu0 %v3975_v21, %s6133_s16 }
0x2c8a   :  { %4041 = vrot.lane.b32.xlu1 %v6129_v18, %s6133_s16  ;;  %4039 = vrot.lane.b32.xlu0 %v3983_v53, %s6133_s16 }
0x2ce0   :  { %v4001_v6 = vpop.permute.xlu0 %4000 }
0x2ce1   :  { %v4021_v24 = vadd.f32 %v4001_v6, %v3967_v39 }
0x2ce4   :  { %v4030_v19 = vpop.permute.xlu0 %4029  ;;  %v4032_v50 = vpop.permute.xlu1 %4031 }
0x2ce8   :  { %v3999_v7 = vpop.permute.xlu1 %3998  ;;  %v3997_v10 = vpop.permute.xlu0 %3996 }
0x2ce9   :  { %v4020_v51 = vadd.f32 %v3999_v7, %v3964_v12  ;;  %v4019_v28 = vadd.f32 %v3997_v10, %v3959_v61 }
0x2ceb   :  { %v4053_v42 = vadd.f32 %v4032_v50, %v4020_v51  ;;  %v4052_v27 = vadd.f32 %v4030_v19, %v4019_v28 }
0x2cec   :  { %v4028_v16 = vpop.permute.xlu1 %4027  ;;  %v4003_v44 = vpop.permute.xlu0 %4002 }
0x2ced   :  { %v4070_v29 = vadd.f32 %v4066_v5, %v4053_v42  ;;  %v4069_v18 = vadd.f32 %v4066_v5, %v4052_v27  ;;  %v4051_v48 = vadd.f32 %v4028_v16, %v4018_v34  ;;  %v4022_v57 = vadd.f32 %v4003_v44, %v3972_v2  ;;  %v5461_v27 = vld [vmem:[#allocation30 + $0x8] sm:$0xff]  }
0x2cee   :  { %5367 = vmatprep.subr.bf16.mxu0 %v5461_v27 }
0x2cef   :  { %v4784_v56 = vmul.f32 -1.442695, %v4070_v29  ;;  %v4783_v45 = vmul.f32 -1.442695, %v4069_v18  ;;  %v4068_v38 = vadd.f32 %v4066_v5, %v4051_v48  ;;  %5368 = vmatpush3.bf16.msra.mxu0 %v5461_v27 }
0x2cf0   :  { %v4009_v11 = vpop.permute.xlu1 %4008  ;;  %v4034_v54 = vpop.permute.xlu0 %4033 }
0x2cf1   :  { %5659 = vpow2.f32 %v4784_v56  ;;  %v4782_v8 = vmul.f32 -1.442695, %v4068_v38  ;;  %v4054_v55 = vadd.f32 %v4034_v54, %v4021_v24  ;;  %v4025_v60 = vadd.f32 %v4009_v11, %v3983_v53  ;;  %v5464_v38 = vld [vmem:[%s7368_s21] sm:$0xff]  }
0x2cf2   :  { %5661 = vpow2.f32 %v4783_v45  ;;  %v5463_v45 = vld [vmem:[#allocation30] sm:$0xff]   ;;  %v4212_v54 = vld [vmem:[%s7393_s1] sm:$0xff] }
0x2cf3   :  { %5663 = vpow2.f32 %v4782_v8  ;;  %v4071_v25 = vadd.f32 %v4066_v5, %v4054_v55  ;;  %v4213_v8 = vld [vmem:[%s7393_s1 + $0x8] sm:$0xff]  ;;  %5369 = vmatprep.subr.bf16.mxu0 %v5463_v45 }
0x2cf4   :  { %v4038_v12 = vpop.permute.xlu1 %4037  ;;  %v4007_v47 = vpop.permute.xlu0 %4006  ;;  %5370 = vmatpush3.bf16.msra.mxu0 %v5463_v45 }
0x2cf5   :  { %v4785_v31 = vmul.f32 -1.442695, %v4071_v25  ;;  %v4024_v22 = vadd.f32 %v4007_v47, %v3980_v0  ;;  %v4845_v47 = vpack.c.bf16 %v4213_v8, %v4212_v54 }
0x2cf7   :  { %5665 = vpow2.f32 %v4785_v31  ;;  %v4214_v31 = vld [vmem:[%s7393_s1 + $0x10] sm:$0xff]  ;;  %5383 = vmatprep.mubr.msk.bf16.mxu1 %vm356_vm0, %v4845_v47 }
0x2cf8   :  { %v4005_v26 = vpop.permute.xlu1 %4004  ;;  %v4036_v49 = vpop.permute.xlu0 %4035 }
0x2cf9   :  { %v4023_v59 = vadd.f32 %v4005_v26, %v3975_v21  ;;  %v4055_v39 = vadd.f32 %v4036_v49, %v4022_v57  ;;  %v4215_v57 = vld [vmem:[%s7393_s1 + $0x18] sm:$0xff] }
0x2cfa   :  { %v4846_v26 = vpack.c.bf16 %v4215_v57, %v4214_v31 }
0x2cfb   :  { %v4056_v61 = vadd.f32 %v4038_v12, %v4023_v59  ;;  %v4072_v52 = vadd.f32 %v4066_v5, %v4055_v39  ;;  %v5465_v59 = vld [vmem:[#allocation31 + $0x8] sm:$0xff]  }
0x2cfc   :  { %v4042_v63 = vpop.permute.xlu1 %4041  ;;  %v4040_v33 = vpop.permute.xlu0 %4039  ;;  %5391 = vmatprep.subr.bf16.mxu0 %v5465_v59 }
0x2cfd   :  { %v4073_v30 = vadd.f32 %v4066_v5, %v4056_v61  ;;  %v4786_v3 = vmul.f32 -1.442695, %v4072_v52  ;;  %v4058_v40 = vadd.f32 %v4042_v63, %v4025_v60  ;;  %v4057_v4 = vadd.f32 %v4040_v33, %v4024_v22  ;;  %v4216_v60 = vld [vmem:[%s7393_s1 + $0x20] sm:$0xff]  ;;  %v4217_v22 = vld [vmem:[%s7393_s1 + $0x28] sm:$0xff]  ;;  %v4218_v63 = vld [vmem:[%s7393_s1 + $0x30] sm:$0xff] }
0x2cfe   :  { %v5660_v37 = vpop.eup %5659  ;;  %v4847_v52 = vpack.c.bf16 %v4217_v22, %v4216_v60  ;;  %v4219_v33 = vld [vmem:[%s7393_s1 + $0x38] sm:$0xff] }
0x2cff   :  { %v5662_v6 = vpop.eup %5661  ;;  %v4102_v19 = vadd.f32 1.0, %v5660_v37  ;;  %5667 = vpow2.f32 %v4786_v3  ;;  %v4075_v2 = vadd.f32 %v4066_v5, %v4058_v40  ;;  %v4787_v10 = vmul.f32 -1.442695, %v4073_v30 }
0x2d00   :  { %v5664_v50 = vpop.eup %5663  ;;  %v4101_v7 = vadd.f32 1.0, %v5662_v6  ;;  %v4074_v21 = vadd.f32 %v4066_v5, %v4057_v4  ;;  %v5462_v5 = vld [vmem:[%s7368_s21 + $0x8] sm:$0xff]   ;;  %v4848_v30 = vpack.c.bf16 %v4219_v33, %v4218_v63 }
0x2d01   :  { %5669 = vrcp.f32 %v4102_v19  ;;  %v4100_v53 = vadd.f32 1.0, %v5664_v50  ;;  %v4789_v0 = vmul.f32 -1.442695, %v4075_v2  ;;  %5379 = vmatprep.subr.bf16.mxu1 %v5462_v5 }
0x2d02   :  { %5671 = vrcp.f32 %v4101_v7  ;;  %v4788_v51 = vmul.f32 -1.442695, %v4074_v21  ;;  %5380 = vmatpush3.bf16.msra.mxu1 %v5462_v5 }
0x2d03   :  { %5673 = vrcp.f32 %v4100_v53  ;;  %5381 = vmatprep.subr.bf16.mxu1 %v5464_v38 }
0x2d04   :  { %v5666_v28 = vpop.eup %5665  ;;  %5675 = vpow2.f32 %v4787_v10 }
0x2d05   :  { %v4103_v34 = vadd.f32 1.0, %v5666_v28  ;;  %5677 = vpow2.f32 %v4789_v0 }
0x2d06   :  { %5679 = vpow2.f32 %v4788_v51  ;;  %5382 = vmatpush3.bf16.msra.mxu1 %v5464_v38 }
0x2d07   :  { %5681 = vrcp.f32 %v4103_v34 }
0x2d09   :  { %5384 = vmatmul.mubr.msk.bf16.vlgmr.msra.gmra.mxu1 %vm356_vm0, %v4846_v26 }
0x2d0a   :  { %5387 = vmatprep.mubr.msk.bf16.mxu1 %vm356_vm0, %v4847_v52 }
0x2d0c   :  { %v5668_v42 = vpop.eup %5667 }
0x2d0d   :  { %v4104_v16 = vadd.f32 1.0, %v5668_v42 }
0x2d0e   :  { %v5670_v44 = vpop.eup %5669 }
0x2d0f   :  { %v5672_v29 = vpop.eup %5671  ;;  %5683 = vrcp.f32 %v4104_v16 }
0x2d10   :  { %v5674_v18 = vpop.eup %5673  ;;  %4139 = vperm.xlu1 %5435, %v5672_v29  }
0x2d11   :  { %v5676_v48 = vpop.eup %5675  ;;  %4134 = vperm.xlu0 %5436, %v5674_v18   ;;  %5388 = vmatmul.mubr.msk.bf16.gmra.mxu1 %vm356_vm0, %v4848_v30 }
0x2d12   :  { %v5678_v24 = vpop.eup %5677  ;;  %v4105_v56 = vadd.f32 1.0, %v5676_v48 }
0x2d13   :  { %v5680_v11 = vpop.eup %5679  ;;  %v4107_v25 = vadd.f32 1.0, %v5678_v24 }
0x2d14   :  { %v5682_v55 = vpop.eup %5681  ;;  %5685 = vrcp.f32 %v4105_v56  ;;  %v4106_v12 = vadd.f32 1.0, %v5680_v11  ;;  %4144 = vperm.xlu1 %5435, %v5670_v44  }
0x2d15   :  { %4149 = vperm.xlu0 %5436, %v5682_v55  }
0x2d16   :  { %5687 = vrcp.f32 %v4106_v12 }
0x2d17   :  { %5689 = vrcp.f32 %v4107_v25 }
0x2d18   :  { %5691 = vtanh.f32 %v7201_v9 }
0x2d19   :  { %5693 = vtanh.f32 %v7203_v14 }
0x2d1a   :  { %5695 = vtanh.f32 %v7209_v46 }
0x2d1b   :  { %5697 = vtanh.f32 %v7211_v13  ;;  %v5466_v13 = vld [vmem:[#allocation31] sm:$0xff]  }
0x2d1c   :  { %v5684_v49 = vpop.eup %5683  ;;  %5699 = vtanh.f32 %v7216_v35 }
0x2d1d   :  { %4154 = vperm.xlu1 %5435, %v5684_v49   ;;  %5701 = vtanh.f32 %v7218_v62 }
0x2d1e   :  { %5703 = vtanh.f32 %v7250_v32 }
0x2d1f   :  { %5705 = vtanh.f32 %v7224_v15 }
0x2d20   :  { %5707 = vtanh.f32 %v7252_v58 }
0x2d21   :  { %v5686_v39 = vpop.eup %5685  ;;  %5709 = vtanh.f32 %v7226_v41 }
0x2d22   :  { %4159 = vperm.xlu0 %5436, %v5686_v39   ;;  %5711 = vtanh.f32 %v7238_v17 }
0x2d23   :  { %v5688_v61 = vpop.eup %5687  ;;  %5713 = vtanh.f32 %v7246_v43 }
0x2d24   :  { %4164 = vperm.xlu1 %5435, %v5688_v61   ;;  %v5690_v3 = vpop.eup %5689  ;;  %5715 = vtanh.f32 %v7236_v20 }
0x2d25   :  { %v5692_v40 = vpop.eup %5691  ;;  %5717 = vtanh.f32 %v7244_v1 }
0x2d26   :  { %4169 = vperm.xlu0 %5436, %v5690_v3   ;;  %v5694_v37 = vpop.eup %5693  ;;  %5719 = vtanh.f32 %v7259_v36 }
0x2d27   :  { %v5696_v50 = vpop.eup %5695  ;;  %5721 = vtanh.f32 %v7257_v23 }
0x2d28   :  { %v5698_v21 = vpop.eup %5697 }
0x2d29   :  { %v5700_v62 = vpop.eup %5699 }
0x2d2a   :  { %v5702_v15 = vpop.eup %5701 }
0x2d2b   :  { %v5704_v41 = vpop.eup %5703 }
0x2d2c   :  { %v5706_v28 = vpop.eup %5705 }
0x2d2d   :  { %v5708_v42 = vpop.eup %5707 }
0x2d2e   :  { %v5710_v17 = vpop.eup %5709 }
0x2d2f   :  { %v5712_v29 = vpop.eup %5711 }
0x2d30   :  { %v5714_v18 = vpop.eup %5713 }
0x2d31   :  { %v5716_v24 = vpop.eup %5715 }
0x2d32   :  { %v5718_v45 = vpop.eup %5717 }
0x2d33   :  { %v5720_v8 = vpop.eup %5719 }
0x2d34   :  { %v5722_v55 = vpop.eup %5721 }
0x2d8b   :  { %v4140_v4 = vpop.permute.xlu1 %4139 }
0x2d8c   :  { %v4135_v6 = vpop.permute.xlu0 %4134  ;;  %v4173_v19 = vmul.f32 %v5694_v37, %v4140_v4  ;;  %v4197_v20 = vmul.f32 %v5710_v17, %v4140_v4 }
0x2d8d   :  { %v4172_v2 = vmul.f32 %v5692_v40, %v4135_v6  ;;  %v4196_v27 = vmul.f32 %v5706_v28, %v4135_v6 }
0x2d8f   :  { %v4841_v7 = vpack.c.bf16 %v4173_v19, %v4172_v2  ;;  %v4145_v10 = vpop.permute.xlu1 %4144  ;;  %v4849_v5 = vpack.c.bf16 %v4197_v20, %v4196_v27  ;;  %v4820_v2 = vld [vmem:[%s7371_s24] ss:$0 sm:$0xff]  ;;  %s6135_s24 = smov [#allocation33]  }
0x2d90   :  { %v4150_v9 = vpop.permute.xlu0 %4149  ;;  %v4174_v14 = vmul.f32 %v5696_v50, %v4145_v10  ;;  %v4198_v36 = vmul.f32 %v5716_v24, %v4145_v10  ;;  %s4620_s8 = sshll.u32 %s6135_s24, 4  ;;  %s4621_s8 = int_to_ptr.vmem [resolvable:$true] %s4620_s8 }
0x2d91   :  { %v4175_v53 = vmul.f32 %v5698_v21, %v4150_v9  ;;  %5371 = vmatprep.mubr.msk.bf16.mxu0 %vm356_vm0, %v4841_v7  ;;  %v4199_v48 = vmul.f32 %v5712_v29, %v4150_v9  ;;  %s6070_s18 = scalar_lea.vmem %s4621_s8, 128  ;;  %p6075_p11 = scmp.lt.s32.totalorder %s4621_s8, %s4621_s8 }
0x2d92   :  { %p6071_p10 = scmp.ne.s32.totalorder %s4621_s8, %s6070_s18  ;;  %p6076_p12 = scmp.lt.s32.totalorder %s6070_s18, %s6070_s18 }
0x2d93   :  { %v4842_v46 = vpack.c.bf16 %v4175_v53, %v4174_v14  ;;  %v4850_v11 = vpack.c.bf16 %v4199_v48, %v4198_v36 }
0x2d94   :  { %p6077_p13 = por %p6076_p12, %p6075_p11 }
0x2d95   :  { %5372 = vmatmul.mubr.msk.bf16.vlgmr.msra.gmra.mxu0 %vm356_vm0, %v4842_v46 }
0x2d96   :  { %5392 = vmatpush3.bf16.msra.mxu0 %v5465_v59  ;;  %p6078_p0 = pnand %p6077_p13, %p6071_p10 }
0x2d97   :  { %5393 = vmatprep.subr.bf16.mxu0 %v5466_v13 }
0x2d98   :  { %v4155_v35 = vpop.permute.xlu1 %4154 }
0x2d99   :  { %v4176_v58 = vmul.f32 %v5700_v62, %v4155_v35  ;;  %v4200_v38 = vmul.f32 %v5718_v45, %v4155_v35 }
0x2d9a   :  { %5394 = vmatpush3.bf16.msra.mxu0 %v5466_v13 }
0x2d9d   :  { %v4160_v32 = vpop.permute.xlu0 %4159 }
0x2d9e   :  { %v4177_v0 = vmul.f32 %v5702_v15, %v4160_v32  ;;  %v4201_v56 = vmul.f32 %v5714_v18, %v4160_v32 }
0x2d9f   :  { %v4165_v51 = vpop.permute.xlu1 %4164 }
0x2da0   :  { %v4843_v34 = vpack.c.bf16 %v4177_v0, %v4176_v58  ;;  %v4178_v43 = vmul.f32 %v5704_v41, %v4165_v51  ;;  %v4851_v54 = vpack.c.bf16 %v4201_v56, %v4200_v38  ;;  %v4202_v25 = vmul.f32 %v5722_v55, %v4165_v51 }
0x2da1   :  { %v4170_v16 = vpop.permute.xlu0 %4169 }
0x2da2   :  { %v4179_v44 = vmul.f32 %v5708_v42, %v4170_v16  ;;  %5375 = vmatprep.mubr.msk.bf16.mxu0 %vm356_vm0, %v4843_v34  ;;  %v4203_v23 = vmul.f32 %v5720_v8, %v4170_v16 }
0x2da4   :  { %v4844_v1 = vpack.c.bf16 %v4179_v44, %v4178_v43  ;;  %v4852_v12 = vpack.c.bf16 %v4203_v23, %v4202_v25 }
0x2da6   :  { %5376 = vmatmul.mubr.msk.bf16.gmra.mxu0 %vm356_vm0, %v4844_v1 }
0x2da7   :  { %5395 = vmatprep.mubr.msk.bf16.mxu0 %vm356_vm0, %v4849_v5 }
0x2dae   :  { %5396 = vmatmul.mubr.msk.bf16.vlgmr.msra.gmra.mxu0 %vm356_vm0, %v4850_v11 }
0x2daf   :  { %5399 = vmatprep.mubr.msk.bf16.mxu0 %vm356_vm0, %v4851_v54 }
0x2db6   :  { %5400 = vmatmul.mubr.msk.bf16.gmra.mxu0 %vm356_vm0, %v4852_v12 }
0x2dc9   :  { %v5385_v57 = vpop.f32.mrf.mxu1 }
0x2dcb   :  { %v4423_v49 = vpop.f32.mrf.mxu1 }
0x2dcd   :  { %v5386_v39 = vpop.f32.mrf.mxu1 }
0x2dcf   :  { %v4426_v61 = vpop.f32.mrf.mxu1 }
0x2dd1   :  { %v5389_v63 = vpop.f32.mrf.mxu1 }
0x2dd3   :  { %v4439_v4 = vpop.f32.mrf.mxu1 }
0x2dd5   :  { %v5390_v9 = vpop.f32.mrf.mxu1 }
0x2dd7   :  { %v4442_v0 = vpop.f32.mrf.mxu1 }
0x2e55   :  { %v5373_v47 = vpop.f32.mrf.mxu0 }
0x2e56   :  { %v4432_v3 = vadd.f32 %v5385_v57, %v5373_v47 }
0x2e57   :  { %v4314_v31 = vpop.f32.mrf.mxu0 }
0x2e58   :  { %v4424_v40 = vadd.f32 %v4423_v49, %v4314_v31 }
0x2e59   :  { %v5374_v26 = vpop.f32.mrf.mxu0 }
0x2e5a   :  { %v4435_v6 = vadd.f32 %v5386_v39, %v5374_v26 }
0x2e5b   :  { %v4317_v59 = vpop.f32.mrf.mxu0 }
0x2e5c   :  { %v4427_v21 = vadd.f32 %v4426_v61, %v4317_v59 }
0x2e66   :  { %v5377_v60 = vpop.f32.mrf.mxu0 }
0x2e67   :  { %v4448_v53 = vadd.f32 %v5389_v63, %v5377_v60 }
0x2e68   :  { %v4330_v22 = vpop.f32.mrf.mxu0 }
0x2e69   :  { %v4440_v15 = vadd.f32 %v4439_v4, %v4330_v22 }
0x2e6a   :  { %v5378_v52 = vpop.f32.mrf.mxu0 }
0x2e6b   :  { %v4451_v51 = vadd.f32 %v5390_v9, %v5378_v52 }
0x2e6c   :  { %v4333_v33 = vpop.f32.mrf.mxu0 }
0x2e6d   :  { %v4443_v16 = vadd.f32 %v4442_v0, %v4333_v33 }
0x2e6e   :  { %v5397_v30 = vpop.f32.mrf.mxu0 }
0x2e6f   :  { %v4569_v19 = vadd.f32 %v5397_v30, %v4432_v3 }
0x2e70   :  { %v4536_v37 = vpop.f32.mrf.mxu0 }
0x2e71   :  { %v4567_v50 = vadd.f32 %v4536_v37, %v4424_v40  ;;  %v4584_v46 = vadd.f32 %v4820_v2, %v4569_v19 }
0x2e72   :  { %v5398_v7 = vpop.f32.mrf.mxu0 }
0x2e73   :  { %v4570_v10 = vadd.f32 %v5398_v7, %v4435_v6  ;;  %v4582_v13 = vadd.f32 %v4820_v2, %v4567_v50  ;;  %5723 = vtanh.f32 %v4584_v46 }
0x2e74   :  { %v4539_v14 = vpop.f32.mrf.mxu0 }
0x2e75   :  { %v4568_v35 = vadd.f32 %v4539_v14, %v4427_v21  ;;  %v4585_v32 = vadd.f32 %v4820_v2, %v4570_v10  ;;  %5725 = vtanh.f32 %v4582_v13 }
0x2e76   :  { %v5401_v62 = vpop.f32.mrf.mxu0 }
0x2e77   :  { %v4573_v58 = vadd.f32 %v5401_v62, %v4448_v53  ;;  %v4583_v42 = vadd.f32 %v4820_v2, %v4568_v35  ;;  %5727 = vtanh.f32 %v4585_v32 }
0x2e78   :  { %v4552_v41 = vpop.f32.mrf.mxu0 }
0x2e79   :  { %v4588_v28 = vadd.f32 %v4820_v2, %v4573_v58  ;;  %v4571_v34 = vadd.f32 %v4552_v41, %v4440_v15 }
0x2e7a   :  { %v5402_v27 = vpop.f32.mrf.mxu0 }
0x2e7b   :  { %v4586_v17 = vadd.f32 %v4820_v2, %v4571_v34  ;;  %v4574_v43 = vadd.f32 %v5402_v27, %v4451_v51  ;;  %5729 = vtanh.f32 %v4588_v28 }
0x2e7c   :  { %v4555_v44 = vpop.f32.mrf.mxu0 }
0x2e7d   :  { %5731 = vtanh.f32 %v4586_v17  ;;  %v4589_v20 = vadd.f32 %v4820_v2, %v4574_v43  ;;  %v4572_v1 = vadd.f32 %v4555_v44, %v4443_v16 }
0x2e7e   :  { %5733 = vtanh.f32 %v4583_v42 }
0x2e7f   :  { %5735 = vtanh.f32 %v4589_v20  ;;  %v4587_v5 = vadd.f32 %v4820_v2, %v4572_v1 }
0x2e80   :  { %v5724_v29 = vpop.eup %5723 }
0x2e81   :  { %5737 = vtanh.f32 %v4587_v5  ;;  %v4600_v47 = vsel %vm356_vm0, %v5724_v29, -inf }
0x2e82   :  { %v5726_v18 = vpop.eup %5725 }
0x2e83   :  { %v4598_v25 = vsel %vm356_vm0, %v5726_v18, -inf }
0x2e84   :  { %v5728_v48 = vpop.eup %5727 }
0x2e85   :  { %v4601_v38 = vsel %vm356_vm0, %v5728_v48, -inf }
0x2e88   :  { %v5730_v24 = vpop.eup %5729 }
0x2e89   :  { %v4606_v54 = vsel %vm356_vm0, %v5730_v24, -inf }
0x2e8a   :  { %v5732_v56 = vpop.eup %5731  ;;  %v4607_v49 = vmax.f32 %v4600_v47, %v4606_v54 }
0x2e8b   :  { %v5734_v45 = vpop.eup %5733  ;;  %v4602_v11 = vsel %vm356_vm0, %v5732_v56, -inf }
0x2e8c   :  { %v5736_v36 = vpop.eup %5735  ;;  %v4599_v12 = vsel %vm356_vm0, %v5734_v45, -inf  ;;  %v4603_v57 = vmax.f32 %v4598_v25, %v4602_v11 }
0x2e8d   :  { %v4608_v8 = vsel %vm356_vm0, %v5736_v36, -inf }
0x2e8e   :  { %v5738_v23 = vpop.eup %5737  ;;  %v4609_v55 = vmax.f32 %v4601_v38, %v4608_v8 }
0x2e8f   :  { %v4604_v31 = vsel %vm356_vm0, %v5738_v23, -inf }
0x2e90   :  { %v4605_v26 = vmax.f32 %v4599_v12, %v4604_v31  ;;  %v4611_v39 = vmax.f32 %v4607_v49, %v4609_v55 }
0x2e92   :  { %v4610_v59 = vmax.f32 %v4603_v57, %v4605_v26 }
0x2e94   :  { %v4612_v60 = vmax.f32 %v4610_v59, %v4611_v39 }
0x2e96   :  { %4613 = vst.msk [vmem:[#allocation33] sm:$0xff] %vm356_vm0, %v4612_v60 }
0x2e97   :  { %6081 = shalt.err (!%p6078_p0)
}
0x2e98   :  { %4623 = dma.vmem_to_hbm [thread:$0]  %s4621_s8, 128, %s7372_s25, [#allocation9]  }
0x2e99   :  { %6108 = dma.done.wait [#allocation9], 128  }
0x2e9a   :  { %6109 = vsyncadd [#allocation9], 4294967168 }
0x2e9b   :  { %4627 = vsyncpa [#allocation8], 1 }
0x2e9c   :  { %4628 = vsyncpa [#allocation11], 1 }
0x2e9d   :  { %4629 = vsyncpa [#allocation14], 1 }
0x2e9e   :  { %4630 = vsyncpa [#allocation17], 1 }
0x2e9f   :  { %4631 = vsyncpa [#allocation20], 1 }
0x2ea0   :  { %4632 = vsyncpa [#allocation23], 1 }
0x2ea1   :  { %4633 = vsyncpa [#allocation26], 1 }
0x2ea2   :  { %4634 = vsyncpa [#allocation29], 1 }
0x2ea3   :  { %4635 = vsyncpa [#allocation32], 1 }
0x2ea4   :  { %4636 = vsyncpa [#allocation9], 1 }

</bundles_post_ra>
